<compile_context>
chip_gen: v7x
topology: tpu7x:2x2x1
jax: 0.10.0
libtpu: 0.0.40
codegen_flags: <defaults>
</compile_context>

<pallas_src>
import functools

import jax
import jax.numpy as jnp
from jax import lax
from jax.experimental import pallas as pl
from jax.experimental.pallas import tpu as pltpu

# ----------------------------- model constants -----------------------------
H = W = 32              # CIFAR spatial size
C_IN = 3
C1, C2 = 6, 16          # conv channel counts
KH = KW = 5             # conv kernel size
FC1, FC2, FC3 = 120, 84, 10
HW = H * W              # 1024 flat positions per sample

CP = 16                 # padded channel count (= bf16 sublane packing)
TAPS = KH * KW          # 25 conv taps
K_COL = TAPS * CP       # 400: im2col contraction depth (zero-padded channels)

# Dependency reach of each stage on the flat (row-major, batch-concatenated) grid.
OFF1_MAX = (KH - 1) * W + (KW - 1)              # 132: deepest conv1 shift
POOL1_MAX = W + 1                               # 33 : deepest pool1 shift
OFF2_MAX = 2 * OFF1_MAX                         # 264: deepest conv2 shift (dilation 2)
POOL2_MAX = 2 * (W + 1)                         # 66 : deepest pool2 shift
GATHER_REACH = 4 * (KH - 1) * W + 4 * (KW - 1)  # 528: deepest gathered 5x5 position

# Per-stage lane shrink, rounded UP to 128 so every scratch width is lane-dense.
SHRINK1, SHRINKP1, SHRINK2, SHRINKP2 = 256, 128, 384, 128
PAD = 512               # zero-padded flat columns appended to the input


def _widths(batch):
    """Lane widths of every stage; static asserts guarantee no OOB / stale reads."""
    w0 = batch * HW + PAD          # padded input width
    w1 = w0 - SHRINK1              # conv1 output width
    w2 = w1 - SHRINKP1             # pool1 width
    w3 = w2 - SHRINK2              # conv2 output width
    w4 = w3 - SHRINKP2             # pool2 width
    assert batch >= 1
    assert SHRINK1 >= OFF1_MAX and SHRINKP1 >= POOL1_MAX
    assert SHRINK2 >= OFF2_MAX and SHRINKP2 >= POOL2_MAX
    for ww in (w0, w1, w2, w3, w4):
        assert ww > 0 and ww % 128 == 0          # unmasked, lane-dense stores
    # Deepest pool2 column read by the FC gather must exist ...
    assert (batch - 1) * HW + GATHER_REACH < w4
    # ... and its full dependency chain stays inside that sample's real pixels.
    assert GATHER_REACH + POOL2_MAX + OFF2_MAX + POOL1_MAX + OFF1_MAX <= HW - 1
    return w0, w1, w2, w3, w4


# ------------------------------- the kernel --------------------------------
def _lenet_kernel(x_ref, w1_ref, b1_ref, w2_ref, b2_ref,
                  wf1_ref, bf1_ref, wf2_ref, bf2_ref, wf3_ref, bf3_ref,
                  o_ref,
                  col1_ref, r1_ref, p1_ref, col2_ref, r2_ref, p2_ref, *, batch):
    n1 = r1_ref.shape[1]   # conv1 out width
    n2 = p1_ref.shape[1]   # pool1 width
    n3 = r2_ref.shape[1]   # conv2 out width
    n4 = p2_ref.shape[1]   # pool2 width

    # ---- conv1 (3->6, 5x5): build im2col slab, then ONE (16,400)@(400,n1) dot ----
    # Each tap store is a full 16-row (one bf16 sublane group), lane-dense block.
    for di in range(KH):
        for dj in range(KW):
            t = di * KW + dj
            off = di * W + dj
            col1_ref[CP * t:CP * (t + 1), :] = x_ref[:, off:off + n1]
    y1 = jnp.dot(w1_ref[...], col1_ref[...], preferred_element_type=jnp.float32)
    r1_ref[...] = jnp.maximum(y1 + b1_ref[...], 0.0).astype(jnp.bfloat16)

    # ---- max-pool 2x2/2: max of 4 shifted slices; result stays on the full grid ----
    p1_ref[...] = jnp.maximum(
        jnp.maximum(r1_ref[:, 0:n2], r1_ref[:, 1:1 + n2]),
        jnp.maximum(r1_ref[:, W:W + n2], r1_ref[:, W + 1:W + 1 + n2]))

    # ---- conv2 (6->16, 5x5) on the dilation-2 grid: im2col slab + ONE dot ----
    # (K=400; Mosaic tiles K > MXU depth internally — no manual split needed.)
    for di in range(KH):
        for dj in range(KW):
            t = di * KW + dj
            off = 2 * (di * W + dj)
            col2_ref[CP * t:CP * (t + 1), :] = p1_ref[:, off:off + n3]
    y2 = jnp.dot(w2_ref[...], col2_ref[...], preferred_element_type=jnp.float32)
    r2_ref[...] = jnp.maximum(y2 + b2_ref[...], 0.0).astype(jnp.bfloat16)

    # ---- max-pool 2x2/2 on the dilation-2 grid (shifts 0, 2, 2W, 2W+2) ----
    p2_ref[...] = jnp.maximum(
        jnp.maximum(r2_ref[:, 0:n4], r2_ref[:, 2:2 + n4]),
        jnp.maximum(r2_ref[:, 2 * W:2 * W + n4], r2_ref[:, 2 * W + 2:2 * W + 2 + n4]))

    # ---- FC flatten-gather: register-only assembly of the (400, B) input ----
    # Row order (h5, w5, c) matches the host-side permutation of fc1's weight.
    # 16-row bf16 column blocks stack on whole sublane groups -> no scratch stores.
    blocks = []
    for h5 in range(KH):
        for w5 in range(KW):
            base = 4 * (h5 * W + w5)
            cols = [p2_ref[:, base + b * HW: base + b * HW + 1] for b in range(batch)]
            blocks.append(cols[0] if batch == 1 else jnp.concatenate(cols, axis=1))
    fc_in = jnp.concatenate(blocks, axis=0)          # (400, batch) bf16, in registers

    # ---- fused FC head, transposed layout (features x batch) ----
    h1 = jnp.dot(wf1_ref[...], fc_in, preferred_element_type=jnp.float32)
    h1 = jnp.maximum(h1 + bf1_ref[...], 0.0)
    h2 = jnp.dot(wf2_ref[...], h1.astype(jnp.bfloat16),
                 preferred_element_type=jnp.float32)
    h2 = jnp.maximum(h2 + bf2_ref[...], 0.0)
    o_ref[...] = jnp.dot(wf3_ref[...], h2.astype(jnp.bfloat16),
                         preferred_element_type=jnp.float32) + bf3_ref[...]


# ------------------------------ host wrappers -------------------------------
@jax.jit
def forward(packed, x):
    """x: (B, 3, 32, 32) f32 NCHW -> (B, 10) f32 logits (single fused Pallas call)."""
    batch = x.shape[0]
    assert x.shape[1:] == (C_IN, H, W)
    w0, n1, n2, n3, n4 = _widths(batch)

    # (B, C, H, W) -> (Cpad=16, B*H*W + PAD) bf16: channel/lane zero-padded MXU operand.
    xf = jnp.transpose(x, (1, 0, 2, 3)).reshape(C_IN, batch * HW)
    xp = jnp.pad(xf, ((0, CP - C_IN), (0, PAD))).astype(jnp.bfloat16)

    out = pl.pallas_call(
        functools.partial(_lenet_kernel, batch=batch),
        out_shape=jax.ShapeDtypeStruct((FC3, batch), jnp.float32),
        scratch_shapes=[
            pltpu.VMEM((K_COL, n1), jnp.bfloat16),   # conv1 im2col slab (400, n1)
            pltpu.VMEM((CP, n1), jnp.bfloat16),      # conv1 + bias + ReLU
            pltpu.VMEM((CP, n2), jnp.bfloat16),      # pool1
            pltpu.VMEM((K_COL, n3), jnp.bfloat16),   # conv2 im2col slab (400, n3)
            pltpu.VMEM((C2, n3), jnp.bfloat16),      # conv2 + bias + ReLU
            pltpu.VMEM((C2, n4), jnp.bfloat16),      # pool2
        ],
    )(xp, packed["w1"], packed["b1"], packed["w2"], packed["b2"],
      packed["wf1"], packed["bf1"], packed["wf2"], packed["bf2"],
      packed["wf3"], packed["bf3"])
    return out.T                                     # (B, 10)


def pack_params(p):
    """One-time host-side repack: kernel layouts, zero channel padding, bf16 weights."""
    def conv_pack(w, cout_pad):
        # torch (Cout, Cin, KH, KW) -> (Cout_pad, 25*16) bf16; column order
        # (di, dj, cin_padded) matches the im2col slab rows (16 rows per tap).
        cout, cin = w.shape[0], w.shape[1]
        w = jnp.transpose(w, (0, 2, 3, 1))                                  # (Co,KH,KW,Ci)
        w = jnp.pad(w, ((0, cout_pad - cout), (0, 0), (0, 0), (0, CP - cin)))
        return w.reshape(cout_pad, K_COL).astype(jnp.bfloat16)

    return {
        "w1": conv_pack(p["conv1_w"], CP),
        "b1": jnp.pad(p["conv1_b"], (0, CP - C1)).reshape(CP, 1).astype(jnp.float32),
        "w2": conv_pack(p["conv2_w"], C2),
        "b2": p["conv2_b"].reshape(C2, 1).astype(jnp.float32),
        # fc1: permute input features from torch order (c, h, w) to kernel order (h, w, c)
        "wf1": p["fc1_w"].reshape(FC1, C2, KH, KW).transpose(0, 2, 3, 1)
                 .reshape(FC1, C2 * KH * KW).astype(jnp.bfloat16),
        "bf1": p["fc1_b"].reshape(FC1, 1).astype(jnp.float32),
        "wf2": p["fc2_w"].astype(jnp.bfloat16),
        "bf2": p["fc2_b"].reshape(FC2, 1).astype(jnp.float32),
        "wf3": p["fc3_w"].astype(jnp.bfloat16),
        "bf3": p["fc3_b"].reshape(FC3, 1).astype(jnp.float32),
    }


def init_params(key):
    """Deterministic torch-style (uniform +/- 1/sqrt(fan_in)) init, torch layouts."""
    ks = jax.random.split(key, 10)

    def u(k, shape, fan_in):
        bound = 1.0 / float(fan_in) ** 0.5
        return jax.random.uniform(k, shape, jnp.float32, -bound, bound)

    return {
        "conv1_w": u(ks[0], (C1, C_IN, KH, KW), C_IN * KH * KW),
        "conv1_b": u(ks[1], (C1,), C_IN * KH * KW),
        "conv2_w": u(ks[2], (C2, C1, KH, KW), C1 * KH * KW),
        "conv2_b": u(ks[3], (C2,), C1 * KH * KW),
        "fc1_w":   u(ks[4], (FC1, C2 * 25), C2 * 25),
        "fc1_b":   u(ks[5], (FC1,), C2 * 25),
        "fc2_w":   u(ks[6], (FC2, FC1), FC1),
        "fc2_b":   u(ks[7], (FC2,), FC1),
        "fc3_w":   u(ks[8], (FC3, FC2), FC2),
        "fc3_b":   u(ks[9], (FC3,), FC2),
    }


def reference_forward(params, x):
    """Pure-JAX f32 reference of the PyTorch module (for a sanity check)."""
    def conv(x, w, b):
        y = lax.conv_general_dilated(x, w, (1, 1), "VALID",
                                     dimension_numbers=("NCHW", "OIHW", "NCHW"))
        return jax.nn.relu(y + b.reshape(1, -1, 1, 1))

    def pool(x):
        return lax.reduce_window(x, -jnp.inf, lax.max,
                                 (1, 1, 2, 2), (1, 1, 2, 2), "VALID")

    x = pool(conv(x, params["conv1_w"], params["conv1_b"]))
    x = pool(conv(x, params["conv2_w"], params["conv2_b"]))
    x = x.reshape(x.shape[0], -1)
    x = jax.nn.relu(x @ params["fc1_w"].T + params["fc1_b"])
    x = jax.nn.relu(x @ params["fc2_w"].T + params["fc2_b"])
    return x @ params["fc3_w"].T + params["fc3_b"]


if __name__ == "__main__":
    key = jax.random.PRNGKey(0)
    k_params, k_x = jax.random.split(key)
    params = init_params(k_params)
    packed = pack_params(params)
    # 32x32 spatial / 3 channels are required by the module's fixed 16*5*5 flatten.
    x = jax.random.normal(k_x, (2, C_IN, H, W), jnp.float32)

    out = jax.block_until_ready(forward(packed, x))
    assert out.shape == (2, FC3) and out.dtype == jnp.float32

    # Sanity check vs the f32 reference (abs + relative; bf16 MXU operands).
    ref = reference_forward(params, x)
    max_err = float(jnp.max(jnp.abs(out - ref)))
    rel_l2 = float(jnp.linalg.norm(out - ref) / (jnp.linalg.norm(ref) + 1e-6))
    assert max_err < 0.1 and rel_l2 < 0.08, (max_err, rel_l2)

    print("KERNEL_OK")
</pallas_src>

<mosaic_0001>
module attributes {stable_mosaic.version = 11 : i64} {
  func.func @_lenet_kernel(%arg0: memref<16x2560xbf16, #tpu.memory_space<vmem>>, %arg1: memref<16x400xbf16, #tpu.memory_space<vmem>>, %arg2: memref<16x1xf32, #tpu.memory_space<vmem>>, %arg3: memref<16x400xbf16, #tpu.memory_space<vmem>>, %arg4: memref<16x1xf32, #tpu.memory_space<vmem>>, %arg5: memref<120x400xbf16, #tpu.memory_space<vmem>>, %arg6: memref<120x1xf32, #tpu.memory_space<vmem>>, %arg7: memref<84x120xbf16, #tpu.memory_space<vmem>>, %arg8: memref<84x1xf32, #tpu.memory_space<vmem>>, %arg9: memref<10x84xbf16, #tpu.memory_space<vmem>>, %arg10: memref<10x1xf32, #tpu.memory_space<vmem>>, %arg11: memref<10x2xf32, #tpu.memory_space<vmem>>, %arg12: memref<400x2304xbf16, #tpu.memory_space<vmem>>, %arg13: memref<16x2304xbf16, #tpu.memory_space<vmem>>, %arg14: memref<16x2176xbf16, #tpu.memory_space<vmem>>, %arg15: memref<400x1792xbf16, #tpu.memory_space<vmem>>, %arg16: memref<16x1792xbf16, #tpu.memory_space<vmem>>, %arg17: memref<16x1664xbf16, #tpu.memory_space<vmem>>) attributes {dimension_semantics = [], scalar_prefetch = 0 : i64, scratch_operands = 6 : i64, tpu.core_type = #tpu.core_type<tc>} {
    %c0 = arith.constant 0 : index
    %c0_0 = arith.constant 0 : index
    %0 = vector.load %arg0[%c0, %c0_0] : memref<16x2560xbf16, #tpu.memory_space<vmem>>, vector<16x2304xbf16>
    %c0_1 = arith.constant 0 : index
    %c0_2 = arith.constant 0 : index
    %1 = vector.load %arg12[%c0_1, %c0_2] : memref<400x2304xbf16, #tpu.memory_space<vmem>>, vector<16x2304xbf16>
    tpu.vector_store %arg12[%c0_1, %c0_2], %0 {strides = array<i32>} : memref<400x2304xbf16, #tpu.memory_space<vmem>>, vector<16x2304xbf16>,
    %c0_3 = arith.constant 0 : index
    %c1 = arith.constant 1 : index
    %2 = vector.load %arg0[%c0_3, %c1] : memref<16x2560xbf16, #tpu.memory_space<vmem>>, vector<16x2304xbf16>
    %c16 = arith.constant 16 : index
    %c0_4 = arith.constant 0 : index
    %3 = vector.load %arg12[%c16, %c0_4] : memref<400x2304xbf16, #tpu.memory_space<vmem>>, vector<16x2304xbf16>
    tpu.vector_store %arg12[%c16, %c0_4], %2 {strides = array<i32>} : memref<400x2304xbf16, #tpu.memory_space<vmem>>, vector<16x2304xbf16>,
    %c0_5 = arith.constant 0 : index
    %c2 = arith.constant 2 : index
    %4 = vector.load %arg0[%c0_5, %c2] : memref<16x2560xbf16, #tpu.memory_space<vmem>>, vector<16x2304xbf16>
    %c32 = arith.constant 32 : index
    %c0_6 = arith.constant 0 : index
    %5 = vector.load %arg12[%c32, %c0_6] : memref<400x2304xbf16, #tpu.memory_space<vmem>>, vector<16x2304xbf16>
    tpu.vector_store %arg12[%c32, %c0_6], %4 {strides = array<i32>} : memref<400x2304xbf16, #tpu.memory_space<vmem>>, vector<16x2304xbf16>,
    %c0_7 = arith.constant 0 : index
    %c3 = arith.constant 3 : index
    %6 = vector.load %arg0[%c0_7, %c3] : memref<16x2560xbf16, #tpu.memory_space<vmem>>, vector<16x2304xbf16>
    %c48 = arith.constant 48 : index
    %c0_8 = arith.constant 0 : index
    %7 = vector.load %arg12[%c48, %c0_8] : memref<400x2304xbf16, #tpu.memory_space<vmem>>, vector<16x2304xbf16>
    tpu.vector_store %arg12[%c48, %c0_8], %6 {strides = array<i32>} : memref<400x2304xbf16, #tpu.memory_space<vmem>>, vector<16x2304xbf16>,
    %c0_9 = arith.constant 0 : index
    %c4 = arith.constant 4 : index
    %8 = vector.load %arg0[%c0_9, %c4] : memref<16x2560xbf16, #tpu.memory_space<vmem>>, vector<16x2304xbf16>
    %c64 = arith.constant 64 : index
    %c0_10 = arith.constant 0 : index
    %9 = vector.load %arg12[%c64, %c0_10] : memref<400x2304xbf16, #tpu.memory_space<vmem>>, vector<16x2304xbf16>
    tpu.vector_store %arg12[%c64, %c0_10], %8 {strides = array<i32>} : memref<400x2304xbf16, #tpu.memory_space<vmem>>, vector<16x2304xbf16>,
    %c0_11 = arith.constant 0 : index
    %c32_12 = arith.constant 32 : index
    %10 = vector.load %arg0[%c0_11, %c32_12] : memref<16x2560xbf16, #tpu.memory_space<vmem>>, vector<16x2304xbf16>
    %c80 = arith.constant 80 : index
    %c0_13 = arith.constant 0 : index
    %11 = vector.load %arg12[%c80, %c0_13] : memref<400x2304xbf16, #tpu.memory_space<vmem>>, vector<16x2304xbf16>
    tpu.vector_store %arg12[%c80, %c0_13], %10 {strides = array<i32>} : memref<400x2304xbf16, #tpu.memory_space<vmem>>, vector<16x2304xbf16>,
    %c0_14 = arith.constant 0 : index
    %c33 = arith.constant 33 : index
    %12 = vector.load %arg0[%c0_14, %c33] : memref<16x2560xbf16, #tpu.memory_space<vmem>>, vector<16x2304xbf16>
    %c96 = arith.constant 96 : index
    %c0_15 = arith.constant 0 : index
    %13 = vector.load %arg12[%c96, %c0_15] : memref<400x2304xbf16, #tpu.memory_space<vmem>>, vector<16x2304xbf16>
    tpu.vector_store %arg12[%c96, %c0_15], %12 {strides = array<i32>} : memref<400x2304xbf16, #tpu.memory_space<vmem>>, vector<16x2304xbf16>,
    %c0_16 = arith.constant 0 : index
    %c34 = arith.constant 34 : index
    %14 = vector.load %arg0[%c0_16, %c34] : memref<16x2560xbf16, #tpu.memory_space<vmem>>, vector<16x2304xbf16>
    %c112 = arith.constant 112 : index
    %c0_17 = arith.constant 0 : index
    %15 = vector.load %arg12[%c112, %c0_17] : memref<400x2304xbf16, #tpu.memory_space<vmem>>, vector<16x2304xbf16>
    tpu.vector_store %arg12[%c112, %c0_17], %14 {strides = array<i32>} : memref<400x2304xbf16, #tpu.memory_space<vmem>>, vector<16x2304xbf16>,
    %c0_18 = arith.constant 0 : index
    %c35 = arith.constant 35 : index
    %16 = vector.load %arg0[%c0_18, %c35] : memref<16x2560xbf16, #tpu.memory_space<vmem>>, vector<16x2304xbf16>
    %c128 = arith.constant 128 : index
    %c0_19 = arith.constant 0 : index
    %17 = vector.load %arg12[%c128, %c0_19] : memref<400x2304xbf16, #tpu.memory_space<vmem>>, vector<16x2304xbf16>
    tpu.vector_store %arg12[%c128, %c0_19], %16 {strides = array<i32>} : memref<400x2304xbf16, #tpu.memory_space<vmem>>, vector<16x2304xbf16>,
    %c0_20 = arith.constant 0 : index
    %c36 = arith.constant 36 : index
    %18 = vector.load %arg0[%c0_20, %c36] : memref<16x2560xbf16, #tpu.memory_space<vmem>>, vector<16x2304xbf16>
    %c144 = arith.constant 144 : index
    %c0_21 = arith.constant 0 : index
    %19 = vector.load %arg12[%c144, %c0_21] : memref<400x2304xbf16, #tpu.memory_space<vmem>>, vector<16x2304xbf16>
    tpu.vector_store %arg12[%c144, %c0_21], %18 {strides = array<i32>} : memref<400x2304xbf16, #tpu.memory_space<vmem>>, vector<16x2304xbf16>,
    %c0_22 = arith.constant 0 : index
    %c64_23 = arith.constant 64 : index
    %20 = vector.load %arg0[%c0_22, %c64_23] : memref<16x2560xbf16, #tpu.memory_space<vmem>>, vector<16x2304xbf16>
    %c160 = arith.constant 160 : index
    %c0_24 = arith.constant 0 : index
    %21 = vector.load %arg12[%c160, %c0_24] : memref<400x2304xbf16, #tpu.memory_space<vmem>>, vector<16x2304xbf16>
    tpu.vector_store %arg12[%c160, %c0_24], %20 {strides = array<i32>} : memref<400x2304xbf16, #tpu.memory_space<vmem>>, vector<16x2304xbf16>,
    %c0_25 = arith.constant 0 : index
    %c65 = arith.constant 65 : index
    %22 = vector.load %arg0[%c0_25, %c65] : memref<16x2560xbf16, #tpu.memory_space<vmem>>, vector<16x2304xbf16>
    %c176 = arith.constant 176 : index
    %c0_26 = arith.constant 0 : index
    %23 = vector.load %arg12[%c176, %c0_26] : memref<400x2304xbf16, #tpu.memory_space<vmem>>, vector<16x2304xbf16>
    tpu.vector_store %arg12[%c176, %c0_26], %22 {strides = array<i32>} : memref<400x2304xbf16, #tpu.memory_space<vmem>>, vector<16x2304xbf16>,
    %c0_27 = arith.constant 0 : index
    %c66 = arith.constant 66 : index
    %24 = vector.load %arg0[%c0_27, %c66] : memref<16x2560xbf16, #tpu.memory_space<vmem>>, vector<16x2304xbf16>
    %c192 = arith.constant 192 : index
    %c0_28 = arith.constant 0 : index
    %25 = vector.load %arg12[%c192, %c0_28] : memref<400x2304xbf16, #tpu.memory_space<vmem>>, vector<16x2304xbf16>
    tpu.vector_store %arg12[%c192, %c0_28], %24 {strides = array<i32>} : memref<400x2304xbf16, #tpu.memory_space<vmem>>, vector<16x2304xbf16>,
    %c0_29 = arith.constant 0 : index
    %c67 = arith.constant 67 : index
    %26 = vector.load %arg0[%c0_29, %c67] : memref<16x2560xbf16, #tpu.memory_space<vmem>>, vector<16x2304xbf16>
    %c208 = arith.constant 208 : index
    %c0_30 = arith.constant 0 : index
    %27 = vector.load %arg12[%c208, %c0_30] : memref<400x2304xbf16, #tpu.memory_space<vmem>>, vector<16x2304xbf16>
    tpu.vector_store %arg12[%c208, %c0_30], %26 {strides = array<i32>} : memref<400x2304xbf16, #tpu.memory_space<vmem>>, vector<16x2304xbf16>,
    %c0_31 = arith.constant 0 : index
    %c68 = arith.constant 68 : index
    %28 = vector.load %arg0[%c0_31, %c68] : memref<16x2560xbf16, #tpu.memory_space<vmem>>, vector<16x2304xbf16>
    %c224 = arith.constant 224 : index
    %c0_32 = arith.constant 0 : index
    %29 = vector.load %arg12[%c224, %c0_32] : memref<400x2304xbf16, #tpu.memory_space<vmem>>, vector<16x2304xbf16>
    tpu.vector_store %arg12[%c224, %c0_32], %28 {strides = array<i32>} : memref<400x2304xbf16, #tpu.memory_space<vmem>>, vector<16x2304xbf16>,
    %c0_33 = arith.constant 0 : index
    %c96_34 = arith.constant 96 : index
    %30 = vector.load %arg0[%c0_33, %c96_34] : memref<16x2560xbf16, #tpu.memory_space<vmem>>, vector<16x2304xbf16>
    %c240 = arith.constant 240 : index
    %c0_35 = arith.constant 0 : index
    %31 = vector.load %arg12[%c240, %c0_35] : memref<400x2304xbf16, #tpu.memory_space<vmem>>, vector<16x2304xbf16>
    tpu.vector_store %arg12[%c240, %c0_35], %30 {strides = array<i32>} : memref<400x2304xbf16, #tpu.memory_space<vmem>>, vector<16x2304xbf16>,
    %c0_36 = arith.constant 0 : index
    %c97 = arith.constant 97 : index
    %32 = vector.load %arg0[%c0_36, %c97] : memref<16x2560xbf16, #tpu.memory_space<vmem>>, vector<16x2304xbf16>
    %c256 = arith.constant 256 : index
    %c0_37 = arith.constant 0 : index
    %33 = vector.load %arg12[%c256, %c0_37] : memref<400x2304xbf16, #tpu.memory_space<vmem>>, vector<16x2304xbf16>
    tpu.vector_store %arg12[%c256, %c0_37], %32 {strides = array<i32>} : memref<400x2304xbf16, #tpu.memory_space<vmem>>, vector<16x2304xbf16>,
    %c0_38 = arith.constant 0 : index
    %c98 = arith.constant 98 : index
    %34 = vector.load %arg0[%c0_38, %c98] : memref<16x2560xbf16, #tpu.memory_space<vmem>>, vector<16x2304xbf16>
    %c272 = arith.constant 272 : index
    %c0_39 = arith.constant 0 : index
    %35 = vector.load %arg12[%c272, %c0_39] : memref<400x2304xbf16, #tpu.memory_space<vmem>>, vector<16x2304xbf16>
    tpu.vector_store %arg12[%c272, %c0_39], %34 {strides = array<i32>} : memref<400x2304xbf16, #tpu.memory_space<vmem>>, vector<16x2304xbf16>,
    %c0_40 = arith.constant 0 : index
    %c99 = arith.constant 99 : index
    %36 = vector.load %arg0[%c0_40, %c99] : memref<16x2560xbf16, #tpu.memory_space<vmem>>, vector<16x2304xbf16>
    %c288 = arith.constant 288 : index
    %c0_41 = arith.constant 0 : index
    %37 = vector.load %arg12[%c288, %c0_41] : memref<400x2304xbf16, #tpu.memory_space<vmem>>, vector<16x2304xbf16>
    tpu.vector_store %arg12[%c288, %c0_41], %36 {strides = array<i32>} : memref<400x2304xbf16, #tpu.memory_space<vmem>>, vector<16x2304xbf16>,
    %c0_42 = arith.constant 0 : index
    %c100 = arith.constant 100 : index
    %38 = vector.load %arg0[%c0_42, %c100] : memref<16x2560xbf16, #tpu.memory_space<vmem>>, vector<16x2304xbf16>
    %c304 = arith.constant 304 : index
    %c0_43 = arith.constant 0 : index
    %39 = vector.load %arg12[%c304, %c0_43] : memref<400x2304xbf16, #tpu.memory_space<vmem>>, vector<16x2304xbf16>
    tpu.vector_store %arg12[%c304, %c0_43], %38 {strides = array<i32>} : memref<400x2304xbf16, #tpu.memory_space<vmem>>, vector<16x2304xbf16>,
    %c0_44 = arith.constant 0 : index
    %c128_45 = arith.constant 128 : index
    %40 = vector.load %arg0[%c0_44, %c128_45] : memref<16x2560xbf16, #tpu.memory_space<vmem>>, vector<16x2304xbf16>
    %c320 = arith.constant 320 : index
    %c0_46 = arith.constant 0 : index
    %41 = vector.load %arg12[%c320, %c0_46] : memref<400x2304xbf16, #tpu.memory_space<vmem>>, vector<16x2304xbf16>
    tpu.vector_store %arg12[%c320, %c0_46], %40 {strides = array<i32>} : memref<400x2304xbf16, #tpu.memory_space<vmem>>, vector<16x2304xbf16>,
    %c0_47 = arith.constant 0 : index
    %c129 = arith.constant 129 : index
    %42 = vector.load %arg0[%c0_47, %c129] : memref<16x2560xbf16, #tpu.memory_space<vmem>>, vector<16x2304xbf16>
    %c336 = arith.constant 336 : index
    %c0_48 = arith.constant 0 : index
    %43 = vector.load %arg12[%c336, %c0_48] : memref<400x2304xbf16, #tpu.memory_space<vmem>>, vector<16x2304xbf16>
    tpu.vector_store %arg12[%c336, %c0_48], %42 {strides = array<i32>} : memref<400x2304xbf16, #tpu.memory_space<vmem>>, vector<16x2304xbf16>,
    %c0_49 = arith.constant 0 : index
    %c130 = arith.constant 130 : index
    %44 = vector.load %arg0[%c0_49, %c130] : memref<16x2560xbf16, #tpu.memory_space<vmem>>, vector<16x2304xbf16>
    %c352 = arith.constant 352 : index
    %c0_50 = arith.constant 0 : index
    %45 = vector.load %arg12[%c352, %c0_50] : memref<400x2304xbf16, #tpu.memory_space<vmem>>, vector<16x2304xbf16>
    tpu.vector_store %arg12[%c352, %c0_50], %44 {strides = array<i32>} : memref<400x2304xbf16, #tpu.memory_space<vmem>>, vector<16x2304xbf16>,
    %c0_51 = arith.constant 0 : index
    %c131 = arith.constant 131 : index
    %46 = vector.load %arg0[%c0_51, %c131] : memref<16x2560xbf16, #tpu.memory_space<vmem>>, vector<16x2304xbf16>
    %c368 = arith.constant 368 : index
    %c0_52 = arith.constant 0 : index
    %47 = vector.load %arg12[%c368, %c0_52] : memref<400x2304xbf16, #tpu.memory_space<vmem>>, vector<16x2304xbf16>
    tpu.vector_store %arg12[%c368, %c0_52], %46 {strides = array<i32>} : memref<400x2304xbf16, #tpu.memory_space<vmem>>, vector<16x2304xbf16>,
    %c0_53 = arith.constant 0 : index
    %c132 = arith.constant 132 : index
    %48 = vector.load %arg0[%c0_53, %c132] : memref<16x2560xbf16, #tpu.memory_space<vmem>>, vector<16x2304xbf16>
    %c384 = arith.constant 384 : index
    %c0_54 = arith.constant 0 : index
    %49 = vector.load %arg12[%c384, %c0_54] : memref<400x2304xbf16, #tpu.memory_space<vmem>>, vector<16x2304xbf16>
    tpu.vector_store %arg12[%c384, %c0_54], %48 {strides = array<i32>} : memref<400x2304xbf16, #tpu.memory_space<vmem>>, vector<16x2304xbf16>,
    %c0_55 = arith.constant 0 : index
    %c0_56 = arith.constant 0 : index
    %50 = vector.load %arg1[%c0_55, %c0_56] : memref<16x400xbf16, #tpu.memory_space<vmem>>, vector<16x400xbf16>
    %c0_57 = arith.constant 0 : index
    %c0_58 = arith.constant 0 : index
    %51 = vector.load %arg12[%c0_57, %c0_58] : memref<400x2304xbf16, #tpu.memory_space<vmem>>, vector<400x2304xbf16>
    %cst = arith.constant dense<0.000000e+00> : vector<16x2304xf32>
    %52 = tpu.matmul %50, %51, %cst {dimension_numbers = #tpu.dot_dimension_numbers<[1], [0], [0], [1], [0, 0, 1, 1], [], []>} : vector<16x400xbf16>, vector<400x2304xbf16>, vector<16x2304xf32> -> vector<16x2304xf32>
    %c0_59 = arith.constant 0 : index
    %c0_60 = arith.constant 0 : index
    %53 = vector.load %arg2[%c0_59, %c0_60] : memref<16x1xf32, #tpu.memory_space<vmem>>, vector<16x1xf32>
    %54 = vector.broadcast %53 : vector<16x1xf32> to vector<16x2304xf32>
    %55 = arith.addf %52, %54 : vector<16x2304xf32>
    %cst_61 = arith.constant 0.000000e+00 : f32
    %56 = vector.broadcast %cst_61 : f32 to vector<16x2304xf32>
    %57 = arith.maximumf %55, %56 : vector<16x2304xf32>
    %58 = arith.truncf %57 : vector<16x2304xf32> to vector<16x2304xbf16>
    %c0_62 = arith.constant 0 : index
    %c0_63 = arith.constant 0 : index
    %59 = vector.load %arg13[%c0_62, %c0_63] : memref<16x2304xbf16, #tpu.memory_space<vmem>>, vector<16x2304xbf16>
    tpu.vector_store %arg13[%c0_62, %c0_63], %58 {strides = array<i32>} : memref<16x2304xbf16, #tpu.memory_space<vmem>>, vector<16x2304xbf16>,
    %c0_64 = arith.constant 0 : index
    %c0_65 = arith.constant 0 : index
    %60 = vector.load %arg13[%c0_64, %c0_65] : memref<16x2304xbf16, #tpu.memory_space<vmem>>, vector<16x2176xbf16>
    %c0_66 = arith.constant 0 : index
    %c1_67 = arith.constant 1 : index
    %61 = vector.load %arg13[%c0_66, %c1_67] : memref<16x2304xbf16, #tpu.memory_space<vmem>>, vector<16x2176xbf16>
    %62 = arith.maximumf %60, %61 : vector<16x2176xbf16>
    %c0_68 = arith.constant 0 : index
    %c32_69 = arith.constant 32 : index
    %63 = vector.load %arg13[%c0_68, %c32_69] : memref<16x2304xbf16, #tpu.memory_space<vmem>>, vector<16x2176xbf16>
    %c0_70 = arith.constant 0 : index
    %c33_71 = arith.constant 33 : index
    %64 = vector.load %arg13[%c0_70, %c33_71] : memref<16x2304xbf16, #tpu.memory_space<vmem>>, vector<16x2176xbf16>
    %65 = arith.maximumf %63, %64 : vector<16x2176xbf16>
    %66 = arith.maximumf %62, %65 : vector<16x2176xbf16>
    %c0_72 = arith.constant 0 : index
    %c0_73 = arith.constant 0 : index
    %67 = vector.load %arg14[%c0_72, %c0_73] : memref<16x2176xbf16, #tpu.memory_space<vmem>>, vector<16x2176xbf16>
    tpu.vector_store %arg14[%c0_72, %c0_73], %66 {strides = array<i32>} : memref<16x2176xbf16, #tpu.memory_space<vmem>>, vector<16x2176xbf16>,
    %c0_74 = arith.constant 0 : index
    %c0_75 = arith.constant 0 : index
    %68 = vector.load %arg14[%c0_74, %c0_75] : memref<16x2176xbf16, #tpu.memory_space<vmem>>, vector<16x1792xbf16>
    %c0_76 = arith.constant 0 : index
    %c0_77 = arith.constant 0 : index
    %69 = vector.load %arg15[%c0_76, %c0_77] : memref<400x1792xbf16, #tpu.memory_space<vmem>>, vector<16x1792xbf16>
    tpu.vector_store %arg15[%c0_76, %c0_77], %68 {strides = array<i32>} : memref<400x1792xbf16, #tpu.memory_space<vmem>>, vector<16x1792xbf16>,
    %c0_78 = arith.constant 0 : index
    %c2_79 = arith.constant 2 : index
    %70 = vector.load %arg14[%c0_78, %c2_79] : memref<16x2176xbf16, #tpu.memory_space<vmem>>, vector<16x1792xbf16>
    %c16_80 = arith.constant 16 : index
    %c0_81 = arith.constant 0 : index
    %71 = vector.load %arg15[%c16_80, %c0_81] : memref<400x1792xbf16, #tpu.memory_space<vmem>>, vector<16x1792xbf16>
    tpu.vector_store %arg15[%c16_80, %c0_81], %70 {strides = array<i32>} : memref<400x1792xbf16, #tpu.memory_space<vmem>>, vector<16x1792xbf16>,
    %c0_82 = arith.constant 0 : index
    %c4_83 = arith.constant 4 : index
    %72 = vector.load %arg14[%c0_82, %c4_83] : memref<16x2176xbf16, #tpu.memory_space<vmem>>, vector<16x1792xbf16>
    %c32_84 = arith.constant 32 : index
    %c0_85 = arith.constant 0 : index
    %73 = vector.load %arg15[%c32_84, %c0_85] : memref<400x1792xbf16, #tpu.memory_space<vmem>>, vector<16x1792xbf16>
    tpu.vector_store %arg15[%c32_84, %c0_85], %72 {strides = array<i32>} : memref<400x1792xbf16, #tpu.memory_space<vmem>>, vector<16x1792xbf16>,
    %c0_86 = arith.constant 0 : index
    %c6 = arith.constant 6 : index
    %74 = vector.load %arg14[%c0_86, %c6] : memref<16x2176xbf16, #tpu.memory_space<vmem>>, vector<16x1792xbf16>
    %c48_87 = arith.constant 48 : index
    %c0_88 = arith.constant 0 : index
    %75 = vector.load %arg15[%c48_87, %c0_88] : memref<400x1792xbf16, #tpu.memory_space<vmem>>, vector<16x1792xbf16>
    tpu.vector_store %arg15[%c48_87, %c0_88], %74 {strides = array<i32>} : memref<400x1792xbf16, #tpu.memory_space<vmem>>, vector<16x1792xbf16>,
    %c0_89 = arith.constant 0 : index
    %c8 = arith.constant 8 : index
    %76 = vector.load %arg14[%c0_89, %c8] : memref<16x2176xbf16, #tpu.memory_space<vmem>>, vector<16x1792xbf16>
    %c64_90 = arith.constant 64 : index
    %c0_91 = arith.constant 0 : index
    %77 = vector.load %arg15[%c64_90, %c0_91] : memref<400x1792xbf16, #tpu.memory_space<vmem>>, vector<16x1792xbf16>
    tpu.vector_store %arg15[%c64_90, %c0_91], %76 {strides = array<i32>} : memref<400x1792xbf16, #tpu.memory_space<vmem>>, vector<16x1792xbf16>,
    %c0_92 = arith.constant 0 : index
    %c64_93 = arith.constant 64 : index
    %78 = vector.load %arg14[%c0_92, %c64_93] : memref<16x2176xbf16, #tpu.memory_space<vmem>>, vector<16x1792xbf16>
    %c80_94 = arith.constant 80 : index
    %c0_95 = arith.constant 0 : index
    %79 = vector.load %arg15[%c80_94, %c0_95] : memref<400x1792xbf16, #tpu.memory_space<vmem>>, vector<16x1792xbf16>
    tpu.vector_store %arg15[%c80_94, %c0_95], %78 {strides = array<i32>} : memref<400x1792xbf16, #tpu.memory_space<vmem>>, vector<16x1792xbf16>,
    %c0_96 = arith.constant 0 : index
    %c66_97 = arith.constant 66 : index
    %80 = vector.load %arg14[%c0_96, %c66_97] : memref<16x2176xbf16, #tpu.memory_space<vmem>>, vector<16x1792xbf16>
    %c96_98 = arith.constant 96 : index
    %c0_99 = arith.constant 0 : index
    %81 = vector.load %arg15[%c96_98, %c0_99] : memref<400x1792xbf16, #tpu.memory_space<vmem>>, vector<16x1792xbf16>
    tpu.vector_store %arg15[%c96_98, %c0_99], %80 {strides = array<i32>} : memref<400x1792xbf16, #tpu.memory_space<vmem>>, vector<16x1792xbf16>,
    %c0_100 = arith.constant 0 : index
    %c68_101 = arith.constant 68 : index
    %82 = vector.load %arg14[%c0_100, %c68_101] : memref<16x2176xbf16, #tpu.memory_space<vmem>>, vector<16x1792xbf16>
    %c112_102 = arith.constant 112 : index
    %c0_103 = arith.constant 0 : index
    %83 = vector.load %arg15[%c112_102, %c0_103] : memref<400x1792xbf16, #tpu.memory_space<vmem>>, vector<16x1792xbf16>
    tpu.vector_store %arg15[%c112_102, %c0_103], %82 {strides = array<i32>} : memref<400x1792xbf16, #tpu.memory_space<vmem>>, vector<16x1792xbf16>,
    %c0_104 = arith.constant 0 : index
    %c70 = arith.constant 70 : index
    %84 = vector.load %arg14[%c0_104, %c70] : memref<16x2176xbf16, #tpu.memory_space<vmem>>, vector<16x1792xbf16>
    %c128_105 = arith.constant 128 : index
    %c0_106 = arith.constant 0 : index
    %85 = vector.load %arg15[%c128_105, %c0_106] : memref<400x1792xbf16, #tpu.memory_space<vmem>>, vector<16x1792xbf16>
    tpu.vector_store %arg15[%c128_105, %c0_106], %84 {strides = array<i32>} : memref<400x1792xbf16, #tpu.memory_space<vmem>>, vector<16x1792xbf16>,
    %c0_107 = arith.constant 0 : index
    %c72 = arith.constant 72 : index
    %86 = vector.load %arg14[%c0_107, %c72] : memref<16x2176xbf16, #tpu.memory_space<vmem>>, vector<16x1792xbf16>
    %c144_108 = arith.constant 144 : index
    %c0_109 = arith.constant 0 : index
    %87 = vector.load %arg15[%c144_108, %c0_109] : memref<400x1792xbf16, #tpu.memory_space<vmem>>, vector<16x1792xbf16>
    tpu.vector_store %arg15[%c144_108, %c0_109], %86 {strides = array<i32>} : memref<400x1792xbf16, #tpu.memory_space<vmem>>, vector<16x1792xbf16>,
    %c0_110 = arith.constant 0 : index
    %c128_111 = arith.constant 128 : index
    %88 = vector.load %arg14[%c0_110, %c128_111] : memref<16x2176xbf16, #tpu.memory_space<vmem>>, vector<16x1792xbf16>
    %c160_112 = arith.constant 160 : index
    %c0_113 = arith.constant 0 : index
    %89 = vector.load %arg15[%c160_112, %c0_113] : memref<400x1792xbf16, #tpu.memory_space<vmem>>, vector<16x1792xbf16>
    tpu.vector_store %arg15[%c160_112, %c0_113], %88 {strides = array<i32>} : memref<400x1792xbf16, #tpu.memory_space<vmem>>, vector<16x1792xbf16>,
    %c0_114 = arith.constant 0 : index
    %c130_115 = arith.constant 130 : index
    %90 = vector.load %arg14[%c0_114, %c130_115] : memref<16x2176xbf16, #tpu.memory_space<vmem>>, vector<16x1792xbf16>
    %c176_116 = arith.constant 176 : index
    %c0_117 = arith.constant 0 : index
    %91 = vector.load %arg15[%c176_116, %c0_117] : memref<400x1792xbf16, #tpu.memory_space<vmem>>, vector<16x1792xbf16>
    tpu.vector_store %arg15[%c176_116, %c0_117], %90 {strides = array<i32>} : memref<400x1792xbf16, #tpu.memory_space<vmem>>, vector<16x1792xbf16>,
    %c0_118 = arith.constant 0 : index
    %c132_119 = arith.constant 132 : index
    %92 = vector.load %arg14[%c0_118, %c132_119] : memref<16x2176xbf16, #tpu.memory_space<vmem>>, vector<16x1792xbf16>
    %c192_120 = arith.constant 192 : index
    %c0_121 = arith.constant 0 : index
    %93 = vector.load %arg15[%c192_120, %c0_121] : memref<400x1792xbf16, #tpu.memory_space<vmem>>, vector<16x1792xbf16>
    tpu.vector_store %arg15[%c192_120, %c0_121], %92 {strides = array<i32>} : memref<400x1792xbf16, #tpu.memory_space<vmem>>, vector<16x1792xbf16>,
    %c0_122 = arith.constant 0 : index
    %c134 = arith.constant 134 : index
    %94 = vector.load %arg14[%c0_122, %c134] : memref<16x2176xbf16, #tpu.memory_space<vmem>>, vector<16x1792xbf16>
    %c208_123 = arith.constant 208 : index
    %c0_124 = arith.constant 0 : index
    %95 = vector.load %arg15[%c208_123, %c0_124] : memref<400x1792xbf16, #tpu.memory_space<vmem>>, vector<16x1792xbf16>
    tpu.vector_store %arg15[%c208_123, %c0_124], %94 {strides = array<i32>} : memref<400x1792xbf16, #tpu.memory_space<vmem>>, vector<16x1792xbf16>,
    %c0_125 = arith.constant 0 : index
    %c136 = arith.constant 136 : index
    %96 = vector.load %arg14[%c0_125, %c136] : memref<16x2176xbf16, #tpu.memory_space<vmem>>, vector<16x1792xbf16>
    %c224_126 = arith.constant 224 : index
    %c0_127 = arith.constant 0 : index
    %97 = vector.load %arg15[%c224_126, %c0_127] : memref<400x1792xbf16, #tpu.memory_space<vmem>>, vector<16x1792xbf16>
    tpu.vector_store %arg15[%c224_126, %c0_127], %96 {strides = array<i32>} : memref<400x1792xbf16, #tpu.memory_space<vmem>>, vector<16x1792xbf16>,
    %c0_128 = arith.constant 0 : index
    %c192_129 = arith.constant 192 : index
    %98 = vector.load %arg14[%c0_128, %c192_129] : memref<16x2176xbf16, #tpu.memory_space<vmem>>, vector<16x1792xbf16>
    %c240_130 = arith.constant 240 : index
    %c0_131 = arith.constant 0 : index
    %99 = vector.load %arg15[%c240_130, %c0_131] : memref<400x1792xbf16, #tpu.memory_space<vmem>>, vector<16x1792xbf16>
    tpu.vector_store %arg15[%c240_130, %c0_131], %98 {strides = array<i32>} : memref<400x1792xbf16, #tpu.memory_space<vmem>>, vector<16x1792xbf16>,
    %c0_132 = arith.constant 0 : index
    %c194 = arith.constant 194 : index
    %100 = vector.load %arg14[%c0_132, %c194] : memref<16x2176xbf16, #tpu.memory_space<vmem>>, vector<16x1792xbf16>
    %c256_133 = arith.constant 256 : index
    %c0_134 = arith.constant 0 : index
    %101 = vector.load %arg15[%c256_133, %c0_134] : memref<400x1792xbf16, #tpu.memory_space<vmem>>, vector<16x1792xbf16>
    tpu.vector_store %arg15[%c256_133, %c0_134], %100 {strides = array<i32>} : memref<400x1792xbf16, #tpu.memory_space<vmem>>, vector<16x1792xbf16>,
    %c0_135 = arith.constant 0 : index
    %c196 = arith.constant 196 : index
    %102 = vector.load %arg14[%c0_135, %c196] : memref<16x2176xbf16, #tpu.memory_space<vmem>>, vector<16x1792xbf16>
    %c272_136 = arith.constant 272 : index
    %c0_137 = arith.constant 0 : index
    %103 = vector.load %arg15[%c272_136, %c0_137] : memref<400x1792xbf16, #tpu.memory_space<vmem>>, vector<16x1792xbf16>
    tpu.vector_store %arg15[%c272_136, %c0_137], %102 {strides = array<i32>} : memref<400x1792xbf16, #tpu.memory_space<vmem>>, vector<16x1792xbf16>,
    %c0_138 = arith.constant 0 : index
    %c198 = arith.constant 198 : index
    %104 = vector.load %arg14[%c0_138, %c198] : memref<16x2176xbf16, #tpu.memory_space<vmem>>, vector<16x1792xbf16>
    %c288_139 = arith.constant 288 : index
    %c0_140 = arith.constant 0 : index
    %105 = vector.load %arg15[%c288_139, %c0_140] : memref<400x1792xbf16, #tpu.memory_space<vmem>>, vector<16x1792xbf16>
    tpu.vector_store %arg15[%c288_139, %c0_140], %104 {strides = array<i32>} : memref<400x1792xbf16, #tpu.memory_space<vmem>>, vector<16x1792xbf16>,
    %c0_141 = arith.constant 0 : index
    %c200 = arith.constant 200 : index
    %106 = vector.load %arg14[%c0_141, %c200] : memref<16x2176xbf16, #tpu.memory_space<vmem>>, vector<16x1792xbf16>
    %c304_142 = arith.constant 304 : index
    %c0_143 = arith.constant 0 : index
    %107 = vector.load %arg15[%c304_142, %c0_143] : memref<400x1792xbf16, #tpu.memory_space<vmem>>, vector<16x1792xbf16>
    tpu.vector_store %arg15[%c304_142, %c0_143], %106 {strides = array<i32>} : memref<400x1792xbf16, #tpu.memory_space<vmem>>, vector<16x1792xbf16>,
    %c0_144 = arith.constant 0 : index
    %c256_145 = arith.constant 256 : index
    %108 = vector.load %arg14[%c0_144, %c256_145] : memref<16x2176xbf16, #tpu.memory_space<vmem>>, vector<16x1792xbf16>
    %c320_146 = arith.constant 320 : index
    %c0_147 = arith.constant 0 : index
    %109 = vector.load %arg15[%c320_146, %c0_147] : memref<400x1792xbf16, #tpu.memory_space<vmem>>, vector<16x1792xbf16>
    tpu.vector_store %arg15[%c320_146, %c0_147], %108 {strides = array<i32>} : memref<400x1792xbf16, #tpu.memory_space<vmem>>, vector<16x1792xbf16>,
    %c0_148 = arith.constant 0 : index
    %c258 = arith.constant 258 : index
    %110 = vector.load %arg14[%c0_148, %c258] : memref<16x2176xbf16, #tpu.memory_space<vmem>>, vector<16x1792xbf16>
    %c336_149 = arith.constant 336 : index
    %c0_150 = arith.constant 0 : index
    %111 = vector.load %arg15[%c336_149, %c0_150] : memref<400x1792xbf16, #tpu.memory_space<vmem>>, vector<16x1792xbf16>
    tpu.vector_store %arg15[%c336_149, %c0_150], %110 {strides = array<i32>} : memref<400x1792xbf16, #tpu.memory_space<vmem>>, vector<16x1792xbf16>,
    %c0_151 = arith.constant 0 : index
    %c260 = arith.constant 260 : index
    %112 = vector.load %arg14[%c0_151, %c260] : memref<16x2176xbf16, #tpu.memory_space<vmem>>, vector<16x1792xbf16>
    %c352_152 = arith.constant 352 : index
    %c0_153 = arith.constant 0 : index
    %113 = vector.load %arg15[%c352_152, %c0_153] : memref<400x1792xbf16, #tpu.memory_space<vmem>>, vector<16x1792xbf16>
    tpu.vector_store %arg15[%c352_152, %c0_153], %112 {strides = array<i32>} : memref<400x1792xbf16, #tpu.memory_space<vmem>>, vector<16x1792xbf16>,
    %c0_154 = arith.constant 0 : index
    %c262 = arith.constant 262 : index
    %114 = vector.load %arg14[%c0_154, %c262] : memref<16x2176xbf16, #tpu.memory_space<vmem>>, vector<16x1792xbf16>
    %c368_155 = arith.constant 368 : index
    %c0_156 = arith.constant 0 : index
    %115 = vector.load %arg15[%c368_155, %c0_156] : memref<400x1792xbf16, #tpu.memory_space<vmem>>, vector<16x1792xbf16>
    tpu.vector_store %arg15[%c368_155, %c0_156], %114 {strides = array<i32>} : memref<400x1792xbf16, #tpu.memory_space<vmem>>, vector<16x1792xbf16>,
    %c0_157 = arith.constant 0 : index
    %c264 = arith.constant 264 : index
    %116 = vector.load %arg14[%c0_157, %c264] : memref<16x2176xbf16, #tpu.memory_space<vmem>>, vector<16x1792xbf16>
    %c384_158 = arith.constant 384 : index
    %c0_159 = arith.constant 0 : index
    %117 = vector.load %arg15[%c384_158, %c0_159] : memref<400x1792xbf16, #tpu.memory_space<vmem>>, vector<16x1792xbf16>
    tpu.vector_store %arg15[%c384_158, %c0_159], %116 {strides = array<i32>} : memref<400x1792xbf16, #tpu.memory_space<vmem>>, vector<16x1792xbf16>,
    %c0_160 = arith.constant 0 : index
    %c0_161 = arith.constant 0 : index
    %118 = vector.load %arg3[%c0_160, %c0_161] : memref<16x400xbf16, #tpu.memory_space<vmem>>, vector<16x400xbf16>
    %c0_162 = arith.constant 0 : index
    %c0_163 = arith.constant 0 : index
    %119 = vector.load %arg15[%c0_162, %c0_163] : memref<400x1792xbf16, #tpu.memory_space<vmem>>, vector<400x1792xbf16>
    %cst_164 = arith.constant dense<0.000000e+00> : vector<16x1792xf32>
    %120 = tpu.matmul %118, %119, %cst_164 {dimension_numbers = #tpu.dot_dimension_numbers<[1], [0], [0], [1], [0, 0, 1, 1], [], []>} : vector<16x400xbf16>, vector<400x1792xbf16>, vector<16x1792xf32> -> vector<16x1792xf32>
    %c0_165 = arith.constant 0 : index
    %c0_166 = arith.constant 0 : index
    %121 = vector.load %arg4[%c0_165, %c0_166] : memref<16x1xf32, #tpu.memory_space<vmem>>, vector<16x1xf32>
    %122 = vector.broadcast %121 : vector<16x1xf32> to vector<16x1792xf32>
    %123 = arith.addf %120, %122 : vector<16x1792xf32>
    %cst_167 = arith.constant 0.000000e+00 : f32
    %124 = vector.broadcast %cst_167 : f32 to vector<16x1792xf32>
    %125 = arith.maximumf %123, %124 : vector<16x1792xf32>
    %126 = arith.truncf %125 : vector<16x1792xf32> to vector<16x1792xbf16>
    %c0_168 = arith.constant 0 : index
    %c0_169 = arith.constant 0 : index
    %127 = vector.load %arg16[%c0_168, %c0_169] : memref<16x1792xbf16, #tpu.memory_space<vmem>>, vector<16x1792xbf16>
    tpu.vector_store %arg16[%c0_168, %c0_169], %126 {strides = array<i32>} : memref<16x1792xbf16, #tpu.memory_space<vmem>>, vector<16x1792xbf16>,
    %c0_170 = arith.constant 0 : index
    %c0_171 = arith.constant 0 : index
    %128 = vector.load %arg16[%c0_170, %c0_171] : memref<16x1792xbf16, #tpu.memory_space<vmem>>, vector<16x1664xbf16>
    %c0_172 = arith.constant 0 : index
    %c2_173 = arith.constant 2 : index
    %129 = vector.load %arg16[%c0_172, %c2_173] : memref<16x1792xbf16, #tpu.memory_space<vmem>>, vector<16x1664xbf16>
    %130 = arith.maximumf %128, %129 : vector<16x1664xbf16>
    %c0_174 = arith.constant 0 : index
    %c64_175 = arith.constant 64 : index
    %131 = vector.load %arg16[%c0_174, %c64_175] : memref<16x1792xbf16, #tpu.memory_space<vmem>>, vector<16x1664xbf16>
    %c0_176 = arith.constant 0 : index
    %c66_177 = arith.constant 66 : index
    %132 = vector.load %arg16[%c0_176, %c66_177] : memref<16x1792xbf16, #tpu.memory_space<vmem>>, vector<16x1664xbf16>
    %133 = arith.maximumf %131, %132 : vector<16x1664xbf16>
    %134 = arith.maximumf %130, %133 : vector<16x1664xbf16>
    %c0_178 = arith.constant 0 : index
    %c0_179 = arith.constant 0 : index
    %135 = vector.load %arg17[%c0_178, %c0_179] : memref<16x1664xbf16, #tpu.memory_space<vmem>>, vector<16x1664xbf16>
    tpu.vector_store %arg17[%c0_178, %c0_179], %134 {strides = array<i32>} : memref<16x1664xbf16, #tpu.memory_space<vmem>>, vector<16x1664xbf16>,
    %c0_180 = arith.constant 0 : index
    %c0_181 = arith.constant 0 : index
    %136 = vector.load %arg17[%c0_180, %c0_181] : memref<16x1664xbf16, #tpu.memory_space<vmem>>, vector<16x1xbf16>
    %c0_182 = arith.constant 0 : index
    %c1024 = arith.constant 1024 : index
    %137 = vector.load %arg17[%c0_182, %c1024] : memref<16x1664xbf16, #tpu.memory_space<vmem>>, vector<16x1xbf16>
    %138 = tpu.concatenate %136, %137 in 1 : vector<16x1xbf16>, vector<16x1xbf16> -> vector<16x2xbf16>
    %c0_183 = arith.constant 0 : index
    %c4_184 = arith.constant 4 : index
    %139 = vector.load %arg17[%c0_183, %c4_184] : memref<16x1664xbf16, #tpu.memory_space<vmem>>, vector<16x1xbf16>
    %c0_185 = arith.constant 0 : index
    %c1028 = arith.constant 1028 : index
    %140 = vector.load %arg17[%c0_185, %c1028] : memref<16x1664xbf16, #tpu.memory_space<vmem>>, vector<16x1xbf16>
    %141 = tpu.concatenate %139, %140 in 1 : vector<16x1xbf16>, vector<16x1xbf16> -> vector<16x2xbf16>
    %c0_186 = arith.constant 0 : index
    %c8_187 = arith.constant 8 : index
    %142 = vector.load %arg17[%c0_186, %c8_187] : memref<16x1664xbf16, #tpu.memory_space<vmem>>, vector<16x1xbf16>
    %c0_188 = arith.constant 0 : index
    %c1032 = arith.constant 1032 : index
    %143 = vector.load %arg17[%c0_188, %c1032] : memref<16x1664xbf16, #tpu.memory_space<vmem>>, vector<16x1xbf16>
    %144 = tpu.concatenate %142, %143 in 1 : vector<16x1xbf16>, vector<16x1xbf16> -> vector<16x2xbf16>
    %c0_189 = arith.constant 0 : index
    %c12 = arith.constant 12 : index
    %145 = vector.load %arg17[%c0_189, %c12] : memref<16x1664xbf16, #tpu.memory_space<vmem>>, vector<16x1xbf16>
    %c0_190 = arith.constant 0 : index
    %c1036 = arith.constant 1036 : index
    %146 = vector.load %arg17[%c0_190, %c1036] : memref<16x1664xbf16, #tpu.memory_space<vmem>>, vector<16x1xbf16>
    %147 = tpu.concatenate %145, %146 in 1 : vector<16x1xbf16>, vector<16x1xbf16> -> vector<16x2xbf16>
    %c0_191 = arith.constant 0 : index
    %c16_192 = arith.constant 16 : index
    %148 = vector.load %arg17[%c0_191, %c16_192] : memref<16x1664xbf16, #tpu.memory_space<vmem>>, vector<16x1xbf16>
    %c0_193 = arith.constant 0 : index
    %c1040 = arith.constant 1040 : index
    %149 = vector.load %arg17[%c0_193, %c1040] : memref<16x1664xbf16, #tpu.memory_space<vmem>>, vector<16x1xbf16>
    %150 = tpu.concatenate %148, %149 in 1 : vector<16x1xbf16>, vector<16x1xbf16> -> vector<16x2xbf16>
    %c0_194 = arith.constant 0 : index
    %c128_195 = arith.constant 128 : index
    %151 = vector.load %arg17[%c0_194, %c128_195] : memref<16x1664xbf16, #tpu.memory_space<vmem>>, vector<16x1xbf16>
    %c0_196 = arith.constant 0 : index
    %c1152 = arith.constant 1152 : index
    %152 = vector.load %arg17[%c0_196, %c1152] : memref<16x1664xbf16, #tpu.memory_space<vmem>>, vector<16x1xbf16>
    %153 = tpu.concatenate %151, %152 in 1 : vector<16x1xbf16>, vector<16x1xbf16> -> vector<16x2xbf16>
    %c0_197 = arith.constant 0 : index
    %c132_198 = arith.constant 132 : index
    %154 = vector.load %arg17[%c0_197, %c132_198] : memref<16x1664xbf16, #tpu.memory_space<vmem>>, vector<16x1xbf16>
    %c0_199 = arith.constant 0 : index
    %c1156 = arith.constant 1156 : index
    %155 = vector.load %arg17[%c0_199, %c1156] : memref<16x1664xbf16, #tpu.memory_space<vmem>>, vector<16x1xbf16>
    %156 = tpu.concatenate %154, %155 in 1 : vector<16x1xbf16>, vector<16x1xbf16> -> vector<16x2xbf16>
    %c0_200 = arith.constant 0 : index
    %c136_201 = arith.constant 136 : index
    %157 = vector.load %arg17[%c0_200, %c136_201] : memref<16x1664xbf16, #tpu.memory_space<vmem>>, vector<16x1xbf16>
    %c0_202 = arith.constant 0 : index
    %c1160 = arith.constant 1160 : index
    %158 = vector.load %arg17[%c0_202, %c1160] : memref<16x1664xbf16, #tpu.memory_space<vmem>>, vector<16x1xbf16>
    %159 = tpu.concatenate %157, %158 in 1 : vector<16x1xbf16>, vector<16x1xbf16> -> vector<16x2xbf16>
    %c0_203 = arith.constant 0 : index
    %c140 = arith.constant 140 : index
    %160 = vector.load %arg17[%c0_203, %c140] : memref<16x1664xbf16, #tpu.memory_space<vmem>>, vector<16x1xbf16>
    %c0_204 = arith.constant 0 : index
    %c1164 = arith.constant 1164 : index
    %161 = vector.load %arg17[%c0_204, %c1164] : memref<16x1664xbf16, #tpu.memory_space<vmem>>, vector<16x1xbf16>
    %162 = tpu.concatenate %160, %161 in 1 : vector<16x1xbf16>, vector<16x1xbf16> -> vector<16x2xbf16>
    %c0_205 = arith.constant 0 : index
    %c144_206 = arith.constant 144 : index
    %163 = vector.load %arg17[%c0_205, %c144_206] : memref<16x1664xbf16, #tpu.memory_space<vmem>>, vector<16x1xbf16>
    %c0_207 = arith.constant 0 : index
    %c1168 = arith.constant 1168 : index
    %164 = vector.load %arg17[%c0_207, %c1168] : memref<16x1664xbf16, #tpu.memory_space<vmem>>, vector<16x1xbf16>
    %165 = tpu.concatenate %163, %164 in 1 : vector<16x1xbf16>, vector<16x1xbf16> -> vector<16x2xbf16>
    %c0_208 = arith.constant 0 : index
    %c256_209 = arith.constant 256 : index
    %166 = vector.load %arg17[%c0_208, %c256_209] : memref<16x1664xbf16, #tpu.memory_space<vmem>>, vector<16x1xbf16>
    %c0_210 = arith.constant 0 : index
    %c1280 = arith.constant 1280 : index
    %167 = vector.load %arg17[%c0_210, %c1280] : memref<16x1664xbf16, #tpu.memory_space<vmem>>, vector<16x1xbf16>
    %168 = tpu.concatenate %166, %167 in 1 : vector<16x1xbf16>, vector<16x1xbf16> -> vector<16x2xbf16>
    %c0_211 = arith.constant 0 : index
    %c260_212 = arith.constant 260 : index
    %169 = vector.load %arg17[%c0_211, %c260_212] : memref<16x1664xbf16, #tpu.memory_space<vmem>>, vector<16x1xbf16>
    %c0_213 = arith.constant 0 : index
    %c1284 = arith.constant 1284 : index
    %170 = vector.load %arg17[%c0_213, %c1284] : memref<16x1664xbf16, #tpu.memory_space<vmem>>, vector<16x1xbf16>
    %171 = tpu.concatenate %169, %170 in 1 : vector<16x1xbf16>, vector<16x1xbf16> -> vector<16x2xbf16>
    %c0_214 = arith.constant 0 : index
    %c264_215 = arith.constant 264 : index
    %172 = vector.load %arg17[%c0_214, %c264_215] : memref<16x1664xbf16, #tpu.memory_space<vmem>>, vector<16x1xbf16>
    %c0_216 = arith.constant 0 : index
    %c1288 = arith.constant 1288 : index
    %173 = vector.load %arg17[%c0_216, %c1288] : memref<16x1664xbf16, #tpu.memory_space<vmem>>, vector<16x1xbf16>
    %174 = tpu.concatenate %172, %173 in 1 : vector<16x1xbf16>, vector<16x1xbf16> -> vector<16x2xbf16>
    %c0_217 = arith.constant 0 : index
    %c268 = arith.constant 268 : index
    %175 = vector.load %arg17[%c0_217, %c268] : memref<16x1664xbf16, #tpu.memory_space<vmem>>, vector<16x1xbf16>
    %c0_218 = arith.constant 0 : index
    %c1292 = arith.constant 1292 : index
    %176 = vector.load %arg17[%c0_218, %c1292] : memref<16x1664xbf16, #tpu.memory_space<vmem>>, vector<16x1xbf16>
    %177 = tpu.concatenate %175, %176 in 1 : vector<16x1xbf16>, vector<16x1xbf16> -> vector<16x2xbf16>
    %c0_219 = arith.constant 0 : index
    %c272_220 = arith.constant 272 : index
    %178 = vector.load %arg17[%c0_219, %c272_220] : memref<16x1664xbf16, #tpu.memory_space<vmem>>, vector<16x1xbf16>
    %c0_221 = arith.constant 0 : index
    %c1296 = arith.constant 1296 : index
    %179 = vector.load %arg17[%c0_221, %c1296] : memref<16x1664xbf16, #tpu.memory_space<vmem>>, vector<16x1xbf16>
    %180 = tpu.concatenate %178, %179 in 1 : vector<16x1xbf16>, vector<16x1xbf16> -> vector<16x2xbf16>
    %c0_222 = arith.constant 0 : index
    %c384_223 = arith.constant 384 : index
    %181 = vector.load %arg17[%c0_222, %c384_223] : memref<16x1664xbf16, #tpu.memory_space<vmem>>, vector<16x1xbf16>
    %c0_224 = arith.constant 0 : index
    %c1408 = arith.constant 1408 : index
    %182 = vector.load %arg17[%c0_224, %c1408] : memref<16x1664xbf16, #tpu.memory_space<vmem>>, vector<16x1xbf16>
    %183 = tpu.concatenate %181, %182 in 1 : vector<16x1xbf16>, vector<16x1xbf16> -> vector<16x2xbf16>
    %c0_225 = arith.constant 0 : index
    %c388 = arith.constant 388 : index
    %184 = vector.load %arg17[%c0_225, %c388] : memref<16x1664xbf16, #tpu.memory_space<vmem>>, vector<16x1xbf16>
    %c0_226 = arith.constant 0 : index
    %c1412 = arith.constant 1412 : index
    %185 = vector.load %arg17[%c0_226, %c1412] : memref<16x1664xbf16, #tpu.memory_space<vmem>>, vector<16x1xbf16>
    %186 = tpu.concatenate %184, %185 in 1 : vector<16x1xbf16>, vector<16x1xbf16> -> vector<16x2xbf16>
    %c0_227 = arith.constant 0 : index
    %c392 = arith.constant 392 : index
    %187 = vector.load %arg17[%c0_227, %c392] : memref<16x1664xbf16, #tpu.memory_space<vmem>>, vector<16x1xbf16>
    %c0_228 = arith.constant 0 : index
    %c1416 = arith.constant 1416 : index
    %188 = vector.load %arg17[%c0_228, %c1416] : memref<16x1664xbf16, #tpu.memory_space<vmem>>, vector<16x1xbf16>
    %189 = tpu.concatenate %187, %188 in 1 : vector<16x1xbf16>, vector<16x1xbf16> -> vector<16x2xbf16>
    %c0_229 = arith.constant 0 : index
    %c396 = arith.constant 396 : index
    %190 = vector.load %arg17[%c0_229, %c396] : memref<16x1664xbf16, #tpu.memory_space<vmem>>, vector<16x1xbf16>
    %c0_230 = arith.constant 0 : index
    %c1420 = arith.constant 1420 : index
    %191 = vector.load %arg17[%c0_230, %c1420] : memref<16x1664xbf16, #tpu.memory_space<vmem>>, vector<16x1xbf16>
    %192 = tpu.concatenate %190, %191 in 1 : vector<16x1xbf16>, vector<16x1xbf16> -> vector<16x2xbf16>
    %c0_231 = arith.constant 0 : index
    %c400 = arith.constant 400 : index
    %193 = vector.load %arg17[%c0_231, %c400] : memref<16x1664xbf16, #tpu.memory_space<vmem>>, vector<16x1xbf16>
    %c0_232 = arith.constant 0 : index
    %c1424 = arith.constant 1424 : index
    %194 = vector.load %arg17[%c0_232, %c1424] : memref<16x1664xbf16, #tpu.memory_space<vmem>>, vector<16x1xbf16>
    %195 = tpu.concatenate %193, %194 in 1 : vector<16x1xbf16>, vector<16x1xbf16> -> vector<16x2xbf16>
    %c0_233 = arith.constant 0 : index
    %c512 = arith.constant 512 : index
    %196 = vector.load %arg17[%c0_233, %c512] : memref<16x1664xbf16, #tpu.memory_space<vmem>>, vector<16x1xbf16>
    %c0_234 = arith.constant 0 : index
    %c1536 = arith.constant 1536 : index
    %197 = vector.load %arg17[%c0_234, %c1536] : memref<16x1664xbf16, #tpu.memory_space<vmem>>, vector<16x1xbf16>
    %198 = tpu.concatenate %196, %197 in 1 : vector<16x1xbf16>, vector<16x1xbf16> -> vector<16x2xbf16>
    %c0_235 = arith.constant 0 : index
    %c516 = arith.constant 516 : index
    %199 = vector.load %arg17[%c0_235, %c516] : memref<16x1664xbf16, #tpu.memory_space<vmem>>, vector<16x1xbf16>
    %c0_236 = arith.constant 0 : index
    %c1540 = arith.constant 1540 : index
    %200 = vector.load %arg17[%c0_236, %c1540] : memref<16x1664xbf16, #tpu.memory_space<vmem>>, vector<16x1xbf16>
    %201 = tpu.concatenate %199, %200 in 1 : vector<16x1xbf16>, vector<16x1xbf16> -> vector<16x2xbf16>
    %c0_237 = arith.constant 0 : index
    %c520 = arith.constant 520 : index
    %202 = vector.load %arg17[%c0_237, %c520] : memref<16x1664xbf16, #tpu.memory_space<vmem>>, vector<16x1xbf16>
    %c0_238 = arith.constant 0 : index
    %c1544 = arith.constant 1544 : index
    %203 = vector.load %arg17[%c0_238, %c1544] : memref<16x1664xbf16, #tpu.memory_space<vmem>>, vector<16x1xbf16>
    %204 = tpu.concatenate %202, %203 in 1 : vector<16x1xbf16>, vector<16x1xbf16> -> vector<16x2xbf16>
    %c0_239 = arith.constant 0 : index
    %c524 = arith.constant 524 : index
    %205 = vector.load %arg17[%c0_239, %c524] : memref<16x1664xbf16, #tpu.memory_space<vmem>>, vector<16x1xbf16>
    %c0_240 = arith.constant 0 : index
    %c1548 = arith.constant 1548 : index
    %206 = vector.load %arg17[%c0_240, %c1548] : memref<16x1664xbf16, #tpu.memory_space<vmem>>, vector<16x1xbf16>
    %207 = tpu.concatenate %205, %206 in 1 : vector<16x1xbf16>, vector<16x1xbf16> -> vector<16x2xbf16>
    %c0_241 = arith.constant 0 : index
    %c528 = arith.constant 528 : index
    %208 = vector.load %arg17[%c0_241, %c528] : memref<16x1664xbf16, #tpu.memory_space<vmem>>, vector<16x1xbf16>
    %c0_242 = arith.constant 0 : index
    %c1552 = arith.constant 1552 : index
    %209 = vector.load %arg17[%c0_242, %c1552] : memref<16x1664xbf16, #tpu.memory_space<vmem>>, vector<16x1xbf16>
    %210 = tpu.concatenate %208, %209 in 1 : vector<16x1xbf16>, vector<16x1xbf16> -> vector<16x2xbf16>
    %211 = tpu.concatenate %138, %141, %144, %147, %150, %153, %156, %159, %162, %165, %168, %171, %174, %177, %180, %183 in 0 : vector<16x2xbf16>, vector<16x2xbf16>, vector<16x2xbf16>, vector<16x2xbf16>, vector<16x2xbf16>, vector<16x2xbf16>, vector<16x2xbf16>, vector<16x2xbf16>, vector<16x2xbf16>, vector<16x2xbf16>, vector<16x2xbf16>, vector<16x2xbf16>, vector<16x2xbf16>, vector<16x2xbf16>, vector<16x2xbf16>, vector<16x2xbf16> -> vector<256x2xbf16>
    %212 = tpu.concatenate %186, %189, %192, %195, %198, %201, %204, %207, %210 in 0 : vector<16x2xbf16>, vector<16x2xbf16>, vector<16x2xbf16>, vector<16x2xbf16>, vector<16x2xbf16>, vector<16x2xbf16>, vector<16x2xbf16>, vector<16x2xbf16>, vector<16x2xbf16> -> vector<144x2xbf16>
    %213 = tpu.concatenate %211, %212 in 0 : vector<256x2xbf16>, vector<144x2xbf16> -> vector<400x2xbf16>
    %c0_243 = arith.constant 0 : index
    %c0_244 = arith.constant 0 : index
    %214 = vector.load %arg5[%c0_243, %c0_244] : memref<120x400xbf16, #tpu.memory_space<vmem>>, vector<120x400xbf16>
    %cst_245 = arith.constant dense<0.000000e+00> : vector<120x2xf32>
    %215 = tpu.matmul %214, %213, %cst_245 {dimension_numbers = #tpu.dot_dimension_numbers<[1], [0], [0], [1], [0, 0, 1, 1], [], []>} : vector<120x400xbf16>, vector<400x2xbf16>, vector<120x2xf32> -> vector<120x2xf32>
    %c0_246 = arith.constant 0 : index
    %c0_247 = arith.constant 0 : index
    %216 = vector.load %arg6[%c0_246, %c0_247] : memref<120x1xf32, #tpu.memory_space<vmem>>, vector<120x1xf32>
    %217 = vector.broadcast %216 : vector<120x1xf32> to vector<120x2xf32>
    %218 = arith.addf %215, %217 : vector<120x2xf32>
    %cst_248 = arith.constant 0.000000e+00 : f32
    %219 = vector.broadcast %cst_248 : f32 to vector<120x2xf32>
    %220 = arith.maximumf %218, %219 : vector<120x2xf32>
    %c0_249 = arith.constant 0 : index
    %c0_250 = arith.constant 0 : index
    %221 = vector.load %arg7[%c0_249, %c0_250] : memref<84x120xbf16, #tpu.memory_space<vmem>>, vector<84x120xbf16>
    %222 = arith.truncf %220 : vector<120x2xf32> to vector<120x2xbf16>
    %cst_251 = arith.constant dense<0.000000e+00> : vector<84x2xf32>
    %223 = tpu.matmul %221, %222, %cst_251 {dimension_numbers = #tpu.dot_dimension_numbers<[1], [0], [0], [1], [0, 0, 1, 1], [], []>} : vector<84x120xbf16>, vector<120x2xbf16>, vector<84x2xf32> -> vector<84x2xf32>
    %c0_252 = arith.constant 0 : index
    %c0_253 = arith.constant 0 : index
    %224 = vector.load %arg8[%c0_252, %c0_253] : memref<84x1xf32, #tpu.memory_space<vmem>>, vector<84x1xf32>
    %225 = vector.broadcast %224 : vector<84x1xf32> to vector<84x2xf32>
    %226 = arith.addf %223, %225 : vector<84x2xf32>
    %cst_254 = arith.constant 0.000000e+00 : f32
    %227 = vector.broadcast %cst_254 : f32 to vector<84x2xf32>
    %228 = arith.maximumf %226, %227 : vector<84x2xf32>
    %c0_255 = arith.constant 0 : index
    %c0_256 = arith.constant 0 : index
    %229 = vector.load %arg9[%c0_255, %c0_256] : memref<10x84xbf16, #tpu.memory_space<vmem>>, vector<10x84xbf16>
    %230 = arith.truncf %228 : vector<84x2xf32> to vector<84x2xbf16>
    %cst_257 = arith.constant dense<0.000000e+00> : vector<10x2xf32>
    %231 = tpu.matmul %229, %230, %cst_257 {dimension_numbers = #tpu.dot_dimension_numbers<[1], [0], [0], [1], [0, 0, 1, 1], [], []>} : vector<10x84xbf16>, vector<84x2xbf16>, vector<10x2xf32> -> vector<10x2xf32>
    %c0_258 = arith.constant 0 : index
    %c0_259 = arith.constant 0 : index
    %232 = vector.load %arg10[%c0_258, %c0_259] : memref<10x1xf32, #tpu.memory_space<vmem>>, vector<10x1xf32>
    %233 = vector.broadcast %232 : vector<10x1xf32> to vector<10x2xf32>
    %234 = arith.addf %231, %233 : vector<10x2xf32>
    %c0_260 = arith.constant 0 : index
    %c0_261 = arith.constant 0 : index
    %235 = vector.load %arg11[%c0_260, %c0_261] : memref<10x2xf32, #tpu.memory_space<vmem>>, vector<10x2xf32>
    tpu.vector_store %arg11[%c0_260, %c0_261], %234 {strides = array<i32>} : memref<10x2xf32, #tpu.memory_space<vmem>>, vector<10x2xf32>,
    return
  }
}

</mosaic_0001>

<bundles_post_ra>
// kernel: forward.1
= control target key start
LH: loop header
LB: loop body
LE: loop exit
PB: predicated region body
PF: predicated region fallthrough
CT: control target
= control target key end

     0   :  { %s16640_s21 = smov 127   ;;  %s16636_s24 = smov 126   ;;  %vm300_vm0 = vcmask 1039360   ;;  %vm490_vm1 = vcmask 1031168   ;;  %vm680_vm2 = vcmask 1022976   ;;  %vm870_vm3 = vcmask 1014784   ;;  %s16588_s0 = inlined_call_operand.vmem [shape: bf16[16,2560], index: 0, kind: input, shape index: {}]   ;;  %s16589_s1 = inlined_call_operand.vmem [shape: bf16[16,400], index: 1, kind: input, shape index: {}]   ;;  %s16590_s2 = inlined_call_operand.vmem [shape: f32[16,1], index: 2, kind: input, shape index: {}]   ;;  %s16591_s3 = inlined_call_operand.vmem [shape: bf16[16,400], index: 3, kind: input, shape index: {}]   ;;  %s16592_s4 = inlined_call_operand.vmem [shape: f32[16,1], index: 4, kind: input, shape index: {}]   ;;  %s16593_s5 = inlined_call_operand.vmem [shape: bf16[120,400], index: 5, kind: input, shape index: {}]   ;;  %s16594_s6 = inlined_call_operand.vmem [shape: f32[120,1], index: 6, kind: input, shape index: {}]   ;;  %s16595_s8 = inlined_call_operand.vmem [shape: f32[84,1], index: 8, kind: input, shape index: {}]   ;;  %s16596_s10 = inlined_call_operand.vmem [shape: f32[10,1], index: 10, kind: input, shape index: {}]   ;;  %s16597_s7 = inlined_call_operand.vmem [shape: bf16[84,120], index: 7, kind: input, shape index: {}]   ;;  %s16598_s9 = inlined_call_operand.vmem [shape: bf16[10,84], index: 9, kind: input, shape index: {}]   ;;  %s16599_s11 = inlined_call_operand.vmem [shape: f32[10,2], index: 11, kind: output, shape index: {}]  }
   0x1   :  { %16647 = sst [smem:[#allocation8_spill]] %s16596_s10  ;;  %v11999_v0 = vld [vmem:[%s16588_s0 + $0x4] ss:$80 sps:$4 sm:$0xff]   ;;  %v12004_v1 = vld [vmem:[%s16588_s0] ss:$80 sps:$4 sm:$0xff]   ;;  %s16638_s25 = smov 125  }
   0x2   :  { %16648 = sst [smem:[#allocation9_spill]] %s16597_s7  ;;  %264 = vrot.lane.b32.xlu0 %v11999_v0, %s16640_s21  ;;  %v12011_v2 = vld [vmem:[%s16588_s0 + $0x8] ss:$80 sps:$4 sm:$0xff]   ;;  %5146 = vmatprep.subr.bf16.mxu0 %v11999_v0  ;;  %s16634_s26 = smov 124   ;;  %v12096_v3 = vld [vmem:[%s16589_s1 + $0x4] ss:$16 sps:$4 sm:$0xff]  }
   0x3   :  { %16649 = sst [smem:[#allocation10_spill]] %s16598_s9  ;;  %262 = vrot.lane.b32.xlu1 %v12004_v1, %s16640_s21  ;;  %5147 = vmatpush1.bf16.msra.mxu0 %v12004_v1  ;;  %s16626_s27 = smov 96   ;;  %v11746_v4 = vld [vmem:[%s16588_s0 + $0xc] ss:$80 sps:$4 sm:$0xff]   ;;  %v11748_v5 = vld [vmem:[%s16588_s0 + $0x8] ss:$80 sps:$4 sm:$0xff]  }
   0x4   :  { %16650 = sst [smem:[#allocation11_spill]] %s16599_s11  ;;  %s16642_s28 = smov 95   ;;  %5178 = vmatprep.mubr.bf16.mxu0 %v12096_v3  ;;  %5264 = vmatprep.mubr.bf16.mxu1 %v12096_v3  ;;  %v12139_v6 = vld [vmem:[%s16588_s0 + $0xc] ss:$80 sps:$4 sm:$0xff]   ;;  %v12148_v7 = vld [vmem:[%s16588_s0 + $0x10] ss:$80 sps:$4 sm:$0xff]  }
   0x5   :  { %s16632_s29 = smov 94   ;;  %s16630_s30 = smov 93   ;;  %5232 = vmatprep.subr.bf16.mxu1 %v11746_v4  ;;  %v12155_v8 = vld [vmem:[%s16588_s0 + $0x8] ss:$80 sps:$4 sm:$0xff]   ;;  %v12162_v11 = vld [vmem:[%s16588_s0 + $0xc] ss:$80 sps:$4 sm:$0xff]  }
   0x6   :  { %266 = vrot.lane.b32.xlu0 %v12011_v2, %s16640_s21  ;;  %s16628_s12 = smov 92   ;;  %s16622_s13 = smov 64   ;;  %5233 = vmatpush1.bf16.msra.mxu1 %v11748_v5  ;;  %v12169_v12 = vld [vmem:[%s16588_s0 + $0x4] ss:$80 sps:$4 sm:$0xff]   ;;  %vm1060_vm4 = vcmask 785408   ;;  %vm1250_vm5 = vcmask 777216  }
   0x7   :  { %454 = vrot.lane.b32.xlu1 %v11999_v0, %s16636_s24  ;;  %s16618_s14 = smov 63   ;;  %s16616_s15 = smov 62   ;;  %vm1440_vm6 = vcmask 769024   ;;  %v12244_v44 = vld [vmem:[%s16588_s0 + $0x14] ss:$80 sps:$4 sm:$0xff]   ;;  %v12249_v45 = vld [vmem:[%s16588_s0 + $0x18] sm:$0xff] }
   0x8   :  { %s16604_s16 = smov 61   ;;  %s16602_s17 = smov 60   ;;  %v12254_v46 = vld [vmem:[%s16588_s0 + $0x68] sm:$0xff]  ;;  %vm16624_vm7 = vcmask 760832   ;;  %vm16625_vm8 = vcmask 752640   ;;  %vm2010_vm9 = vcmask 523264  }
   0x9   :  { %s16600_s20 = smov 32   ;;  %s16610_s22 = smov 31   ;;  %v12261_v50 = vcombine.low %v12249_v45, %v12254_v46  ;;  %vm2200_vm10 = vcmask 515072   ;;  %vm2390_vm11 = vcmask 506880   ;;  %vm2580_vm12 = vcmask 498688  }
   0xa   :  { %456 = vrot.lane.b32.xlu0 %v12011_v2, %s16636_s24  ;;  %s16606_s23 = smov 30   ;;  %s16620_s18 = smov 28   ;;  %vm16613_vm13 = vcmask 490496   ;;  %vm16612_vm14 = vcmask 261120   ;;  %vm3150_vm15 = vcmask 252928  }
   0xb   :  { %452 = vrot.lane.b32.xlu1 %v12004_v1, %s16636_s24  ;;  %s16656_s19 = smov 29   ;;  %s16715_s11 = smov 95  }
   0xc   :  { %s11926_s7 = smov 58  }
   0xe   :  { %644 = vrot.lane.b32.xlu0 %v11999_v0, %s16638_s25 }
   0xf   :  { %646 = vrot.lane.b32.xlu1 %v12011_v2, %s16638_s25 }
  0x12   :  { %642 = vrot.lane.b32.xlu0 %v12004_v1, %s16638_s25 }
  0x13   :  { %834 = vrot.lane.b32.xlu1 %v11999_v0, %s16634_s26 }
  0x16   :  { %836 = vrot.lane.b32.xlu0 %v12011_v2, %s16634_s26 }
  0x17   :  { %832 = vrot.lane.b32.xlu1 %v12004_v1, %s16634_s26 }
  0x1a   :  { %1024 = vrot.lane.b32.xlu0 %v11999_v0, %s16626_s27 }
  0x1b   :  { %1026 = vrot.lane.b32.xlu1 %v12011_v2, %s16626_s27 }
  0x1e   :  { %1022 = vrot.lane.b32.xlu0 %v12004_v1, %s16626_s27 }
  0x1f   :  { %1214 = vrot.lane.b32.xlu1 %v11999_v0, %s16642_s28 }
  0x22   :  { %1216 = vrot.lane.b32.xlu0 %v12011_v2, %s16642_s28 }
  0x23   :  { %1212 = vrot.lane.b32.xlu1 %v12004_v1, %s16642_s28 }
  0x26   :  { %1404 = vrot.lane.b32.xlu0 %v11999_v0, %s16632_s29 }
  0x27   :  { %1406 = vrot.lane.b32.xlu1 %v12011_v2, %s16632_s29 }
  0x2a   :  { %1402 = vrot.lane.b32.xlu0 %v12004_v1, %s16632_s29 }
  0x2b   :  { %1594 = vrot.lane.b32.xlu1 %v11999_v0, %s16630_s30 }
  0x2e   :  { %1596 = vrot.lane.b32.xlu0 %v12011_v2, %s16630_s30 }
  0x2f   :  { %1592 = vrot.lane.b32.xlu1 %v12004_v1, %s16630_s30 }
  0x32   :  { %1784 = vrot.lane.b32.xlu0 %v11999_v0, %s16628_s12 }
  0x33   :  { %1786 = vrot.lane.b32.xlu1 %v12011_v2, %s16628_s12 }
  0x36   :  { %1782 = vrot.lane.b32.xlu0 %v12004_v1, %s16628_s12 }
  0x37   :  { %1974 = vrot.lane.b32.xlu1 %v11999_v0, %s16622_s13 }
  0x3a   :  { %1976 = vrot.lane.b32.xlu0 %v12011_v2, %s16622_s13 }
  0x3b   :  { %1972 = vrot.lane.b32.xlu1 %v12004_v1, %s16622_s13 }
  0x3e   :  { %2164 = vrot.lane.b32.xlu0 %v11999_v0, %s16618_s14 }
  0x3f   :  { %2166 = vrot.lane.b32.xlu1 %v12011_v2, %s16618_s14 }
  0x42   :  { %2162 = vrot.lane.b32.xlu0 %v12004_v1, %s16618_s14 }
  0x43   :  { %2354 = vrot.lane.b32.xlu1 %v11999_v0, %s16616_s15 }
  0x46   :  { %2356 = vrot.lane.b32.xlu0 %v12011_v2, %s16616_s15 }
  0x47   :  { %2352 = vrot.lane.b32.xlu1 %v12004_v1, %s16616_s15 }
  0x4a   :  { %2544 = vrot.lane.b32.xlu0 %v11999_v0, %s16604_s16 }
  0x4b   :  { %2546 = vrot.lane.b32.xlu1 %v12011_v2, %s16604_s16 }
  0x4e   :  { %2542 = vrot.lane.b32.xlu0 %v12004_v1, %s16604_s16  ;;  %s16608_s16 = smov 29  }
  0x4f   :  { %2734 = vrot.lane.b32.xlu1 %v11999_v0, %s16602_s17 }
  0x52   :  { %2736 = vrot.lane.b32.xlu0 %v12011_v2, %s16602_s17 }
  0x53   :  { %2732 = vrot.lane.b32.xlu1 %v12004_v1, %s16602_s17  ;;  %s16651_s17 = smov 61  }
  0x56   :  { %2924 = vrot.lane.b32.xlu0 %v11999_v0, %s16600_s20 }
  0x57   :  { %2926 = vrot.lane.b32.xlu1 %v12011_v2, %s16600_s20 }
  0x5a   :  { %2922 = vrot.lane.b32.xlu0 %v12004_v1, %s16600_s20  ;;  %s16652_s20 = smov 60  }
  0x5b   :  { %3114 = vrot.lane.b32.xlu1 %v11999_v0, %s16610_s22 }
  0x5e   :  { %3116 = vrot.lane.b32.xlu0 %v12011_v2, %s16610_s22 }
  0x5f   :  { %3112 = vrot.lane.b32.xlu1 %v12004_v1, %s16610_s22  ;;  %s16654_s22 = smov 31  }
  0x62   :  { %3304 = vrot.lane.b32.xlu0 %v11999_v0, %s16606_s23 }
  0x63   :  { %3306 = vrot.lane.b32.xlu1 %v12011_v2, %s16606_s23 }
  0x66   :  { %3302 = vrot.lane.b32.xlu0 %v12004_v1, %s16606_s23  ;;  %s16655_s23 = smov 30  }
  0x67   :  { %3494 = vrot.lane.b32.xlu1 %v11999_v0, %s16608_s16 }
  0x6a   :  { %3496 = vrot.lane.b32.xlu0 %v12011_v2, %s16608_s16 }
  0x6b   :  { %3492 = vrot.lane.b32.xlu1 %v12004_v1, %s16608_s16  ;;  %s16653_s16 = smov 32  }
  0x6e   :  { %3684 = vrot.lane.b32.xlu0 %v11999_v0, %s16620_s18 }
  0x6f   :  { %3686 = vrot.lane.b32.xlu1 %v12011_v2, %s16620_s18 }
  0x72   :  { %3682 = vrot.lane.b32.xlu0 %v12004_v1, %s16620_s18 }
  0x73   :  { %268 = vrot.lane.b32.xlu1 %v12139_v6, %s16640_s21 }
  0x74   :  { %v265_v9 = vpop.permute.xlu0 %264 }
  0x75   :  { %v263_v10 = vpop.permute.xlu1 %262 }
  0x76   :  { %270 = vrot.lane.b32.xlu0 %v12148_v7, %s16640_s21  ;;  %v301_v16 = vsel %vm300_vm0, %v263_v10, %v265_v9 }
  0x77   :  { %4000 = vrot.lane.b32.xlu1 %v12155_v8, %s16640_s21 }
  0x78   :  { %v12171_v13 = vpop.permute.xlu0 %266 }
  0x79   :  { %v455_v14 = vpop.permute.xlu1 %454  ;;  %v302_v15 = vsel %vm300_vm0, %v265_v9, %v12171_v13 }
  0x7a   :  { %4002 = vrot.lane.b32.xlu0 %v12162_v11, %s16640_s21  ;;  %5148 = vmatprep.subr.bf16.mxu0 %v302_v15 }
  0x7b   :  { %3998 = vrot.lane.b32.xlu1 %v12169_v12, %s16640_s21  ;;  %5149 = vmatpush1.bf16.msra.mxu0 %v301_v16 }
  0x7c   :  { %v12180_v17 = vpop.permute.xlu0 %456 }
  0x7d   :  { %v453_v18 = vpop.permute.xlu1 %452  ;;  %v492_v19 = vsel %vm490_vm1, %v455_v14, %v12180_v17 }
  0x7e   :  { %458 = vrot.lane.b32.xlu0 %v12139_v6, %s16636_s24  ;;  %5150 = vmatprep.subr.bf16.mxu0 %v492_v19  ;;  %v491_v20 = vsel %vm490_vm1, %v453_v18, %v455_v14 }
  0x7f   :  { %460 = vrot.lane.b32.xlu1 %v12148_v7, %s16636_s24  ;;  %5151 = vmatpush1.bf16.msra.mxu0 %v491_v20 }
  0x80   :  { %v645_v21 = vpop.permute.xlu0 %644 }
  0x81   :  { %v12189_v22 = vpop.permute.xlu1 %646 }
  0x82   :  { %4189 = vrot.lane.b32.xlu0 %v12155_v8, %s16636_s24  ;;  %v682_v23 = vsel %vm680_vm2, %v645_v21, %v12189_v22 }
  0x83   :  { %4191 = vrot.lane.b32.xlu1 %v12162_v11, %s16636_s24  ;;  %5152 = vmatprep.subr.bf16.mxu0 %v682_v23 }
  0x84   :  { %v643_v24 = vpop.permute.xlu0 %642 }
  0x85   :  { %v835_v25 = vpop.permute.xlu1 %834  ;;  %v681_v26 = vsel %vm680_vm2, %v643_v24, %v645_v21 }
  0x86   :  { %4187 = vrot.lane.b32.xlu0 %v12169_v12, %s16636_s24  ;;  %5153 = vmatpush1.bf16.msra.mxu0 %v681_v26 }
  0x87   :  { %648 = vrot.lane.b32.xlu1 %v12139_v6, %s16638_s25 }
  0x88   :  { %v12202_v27 = vpop.permute.xlu0 %836 }
  0x89   :  { %v833_v28 = vpop.permute.xlu1 %832  ;;  %v872_v29 = vsel %vm870_vm3, %v835_v25, %v12202_v27 }
  0x8a   :  { %650 = vrot.lane.b32.xlu0 %v12148_v7, %s16638_s25  ;;  %5154 = vmatprep.subr.bf16.mxu0 %v872_v29  ;;  %v871_v30 = vsel %vm870_vm3, %v833_v28, %v835_v25 }
  0x8b   :  { %4378 = vrot.lane.b32.xlu1 %v12155_v8, %s16638_s25  ;;  %5155 = vmatpush1.bf16.msra.mxu0 %v871_v30 }
  0x8c   :  { %v1025_v31 = vpop.permute.xlu0 %1024 }
  0x8d   :  { %v12211_v32 = vpop.permute.xlu1 %1026 }
  0x8e   :  { %4380 = vrot.lane.b32.xlu0 %v12162_v11, %s16638_s25  ;;  %v1062_v33 = vsel %vm1060_vm4, %v1025_v31, %v12211_v32 }
  0x8f   :  { %4376 = vrot.lane.b32.xlu1 %v12169_v12, %s16638_s25  ;;  %5156 = vmatprep.subr.bf16.mxu0 %v1062_v33 }
  0x90   :  { %v1023_v34 = vpop.permute.xlu0 %1022 }
  0x91   :  { %v1215_v35 = vpop.permute.xlu1 %1214  ;;  %v1061_v36 = vsel %vm1060_vm4, %v1023_v34, %v1025_v31 }
  0x92   :  { %838 = vrot.lane.b32.xlu0 %v12139_v6, %s16634_s26  ;;  %5157 = vmatpush1.bf16.msra.mxu0 %v1061_v36 }
  0x93   :  { %840 = vrot.lane.b32.xlu1 %v12148_v7, %s16634_s26 }
  0x94   :  { %v12224_v37 = vpop.permute.xlu0 %1216 }
  0x95   :  { %v1213_v38 = vpop.permute.xlu1 %1212  ;;  %v1252_v39 = vsel %vm1250_vm5, %v1215_v35, %v12224_v37 }
  0x96   :  { %4567 = vrot.lane.b32.xlu0 %v12155_v8, %s16634_s26  ;;  %5158 = vmatprep.subr.bf16.mxu0 %v1252_v39  ;;  %v1251_v40 = vsel %vm1250_vm5, %v1213_v38, %v1215_v35  ;;  %v12352_v38 = vld [vmem:[%s16589_s1] ss:$16 sps:$4 sm:$0xff]  }
  0x97   :  { %4569 = vrot.lane.b32.xlu1 %v12162_v11, %s16634_s26  ;;  %5159 = vmatpush1.bf16.msra.mxu0 %v1251_v40  ;;  %v12363_v40 = vld [vmem:[%s16589_s1 + $0xc] ss:$16 sps:$4 sm:$0xff]  }
  0x98   :  { %v1405_v41 = vpop.permute.xlu0 %1404 }
  0x99   :  { %v12233_v42 = vpop.permute.xlu1 %1406 }
  0x9a   :  { %4565 = vrot.lane.b32.xlu0 %v12169_v12, %s16634_s26  ;;  %v1442_v43 = vsel %vm1440_vm6, %v1405_v41, %v12233_v42 }
  0x9b   :  { %1028 = vrot.lane.b32.xlu1 %v12139_v6, %s16626_s27  ;;  %5160 = vmatprep.subr.bf16.mxu0 %v1442_v43 }
  0x9c   :  { %v1403_v47 = vpop.permute.xlu0 %1402 }
  0x9d   :  { %v1595_v48 = vpop.permute.xlu1 %1594  ;;  %v1441_v49 = vsel %vm1440_vm6, %v1403_v47, %v1405_v41 }
  0x9e   :  { %1030 = vrot.lane.b32.xlu0 %v12148_v7, %s16626_s27  ;;  %5161 = vmatpush1.bf16.msra.mxu0 %v1441_v49 }
  0x9f   :  { %272 = vrot.lane.b32.xlu1 %v12244_v44, %s16640_s21 }
  0xa0   :  { %v12265_v51 = vpop.permute.xlu0 %1596 }
  0xa1   :  { %v1593_v52 = vpop.permute.xlu1 %1592  ;;  %v1632_v53 = vsel %vm16624_vm7, %v1595_v48, %v12265_v51 }
  0xa2   :  { %274 = vrot.lane.b32.xlu0 %v12261_v50, %s16640_s21  ;;  %5162 = vmatprep.subr.bf16.mxu0 %v1632_v53  ;;  %v1631_v54 = vsel %vm16624_vm7, %v1593_v52, %v1595_v48 }
  0xa3   :  { %1218 = vrot.lane.b32.xlu1 %v12139_v6, %s16642_s28  ;;  %5163 = vmatpush1.bf16.msra.mxu0 %v1631_v54 }
  0xa4   :  { %v1785_v55 = vpop.permute.xlu0 %1784 }
  0xa5   :  { %v12274_v56 = vpop.permute.xlu1 %1786 }
  0xa6   :  { %1220 = vrot.lane.b32.xlu0 %v12148_v7, %s16642_s28  ;;  %v1822_v57 = vsel %vm16625_vm8, %v1785_v55, %v12274_v56 }
  0xa7   :  { %462 = vrot.lane.b32.xlu1 %v12244_v44, %s16636_s24  ;;  %5164 = vmatprep.subr.bf16.mxu0 %v1822_v57 }
  0xa8   :  { %v1783_v58 = vpop.permute.xlu0 %1782 }
  0xa9   :  { %v1975_v59 = vpop.permute.xlu1 %1974  ;;  %v1821_v60 = vsel %vm16625_vm8, %v1783_v58, %v1785_v55 }
  0xaa   :  { %464 = vrot.lane.b32.xlu0 %v12261_v50, %s16636_s24  ;;  %5165 = vmatpush1.bf16.msra.mxu0 %v1821_v60 }
  0xab   :  { %1408 = vrot.lane.b32.xlu1 %v12139_v6, %s16632_s29 }
  0xac   :  { %v12287_v61 = vpop.permute.xlu0 %1976 }
  0xad   :  { %v1973_v62 = vpop.permute.xlu1 %1972  ;;  %v2012_v63 = vsel %vm2010_vm9, %v1975_v59, %v12287_v61 }
  0xae   :  { %1410 = vrot.lane.b32.xlu0 %v12148_v7, %s16632_s29  ;;  %5166 = vmatprep.subr.bf16.mxu0 %v2012_v63  ;;  %v2011_v0 = vsel %vm2010_vm9, %v1973_v62, %v1975_v59 }
  0xaf   :  { %652 = vrot.lane.b32.xlu1 %v12244_v44, %s16638_s25  ;;  %5167 = vmatpush1.bf16.msra.mxu0 %v2011_v0 }
  0xb0   :  { %v2165_v1 = vpop.permute.xlu0 %2164 }
  0xb1   :  { %v12296_v2 = vpop.permute.xlu1 %2166 }
  0xb2   :  { %654 = vrot.lane.b32.xlu0 %v12261_v50, %s16638_s25  ;;  %v2202_v4 = vsel %vm2200_vm10, %v2165_v1, %v12296_v2 }
  0xb3   :  { %1598 = vrot.lane.b32.xlu1 %v12139_v6, %s16630_s30  ;;  %5168 = vmatprep.subr.bf16.mxu0 %v2202_v4 }
  0xb4   :  { %v2163_v5 = vpop.permute.xlu0 %2162 }
  0xb5   :  { %v2355_v9 = vpop.permute.xlu1 %2354  ;;  %v2201_v10 = vsel %vm2200_vm10, %v2163_v5, %v2165_v1 }
  0xb6   :  { %1600 = vrot.lane.b32.xlu0 %v12148_v7, %s16630_s30  ;;  %5169 = vmatpush1.bf16.msra.mxu0 %v2201_v10 }
  0xb7   :  { %842 = vrot.lane.b32.xlu1 %v12244_v44, %s16634_s26 }
  0xb8   :  { %v12309_v11 = vpop.permute.xlu0 %2356 }
  0xb9   :  { %v2353_v14 = vpop.permute.xlu1 %2352  ;;  %v2392_v15 = vsel %vm2390_vm11, %v2355_v9, %v12309_v11 }
  0xba   :  { %844 = vrot.lane.b32.xlu0 %v12261_v50, %s16634_s26  ;;  %5170 = vmatprep.subr.bf16.mxu0 %v2392_v15  ;;  %v2391_v16 = vsel %vm2390_vm11, %v2353_v14, %v2355_v9 }
  0xbb   :  { %1788 = vrot.lane.b32.xlu1 %v12139_v6, %s16628_s12  ;;  %5171 = vmatpush1.bf16.msra.mxu0 %v2391_v16 }
  0xbc   :  { %v2545_v18 = vpop.permute.xlu0 %2544 }
  0xbd   :  { %v12318_v19 = vpop.permute.xlu1 %2546 }
  0xbe   :  { %1790 = vrot.lane.b32.xlu0 %v12148_v7, %s16628_s12  ;;  %v2582_v20 = vsel %vm2580_vm12, %v2545_v18, %v12318_v19 }
  0xbf   :  { %1032 = vrot.lane.b32.xlu1 %v12244_v44, %s16626_s27  ;;  %5172 = vmatprep.subr.bf16.mxu0 %v2582_v20 }
  0xc0   :  { %v2543_v21 = vpop.permute.xlu0 %2542 }
  0xc1   :  { %v2735_v23 = vpop.permute.xlu1 %2734  ;;  %v2581_v24 = vsel %vm2580_vm12, %v2543_v21, %v2545_v18 }
  0xc2   :  { %1034 = vrot.lane.b32.xlu0 %v12261_v50, %s16626_s27  ;;  %5173 = vmatpush1.bf16.msra.mxu0 %v2581_v24 }
  0xc3   :  { %1978 = vrot.lane.b32.xlu1 %v12139_v6, %s16622_s13 }
  0xc4   :  { %v12331_v25 = vpop.permute.xlu0 %2736 }
  0xc5   :  { %v2733_v26 = vpop.permute.xlu1 %2732  ;;  %v2772_v28 = vsel %vm16613_vm13, %v2735_v23, %v12331_v25 }
  0xc6   :  { %1980 = vrot.lane.b32.xlu0 %v12148_v7, %s16622_s13  ;;  %5174 = vmatprep.subr.bf16.mxu0 %v2772_v28  ;;  %v2771_v29 = vsel %vm16613_vm13, %v2733_v26, %v2735_v23  ;;  %vm16615_vm13 = vcmask 244736  }
  0xc7   :  { %1222 = vrot.lane.b32.xlu1 %v12244_v44, %s16642_s28  ;;  %5175 = vmatpush1.bf16.msra.mxu0 %v2771_v29 }
  0xc8   :  { %v2925_v30 = vpop.permute.xlu0 %2924 }
  0xc9   :  { %v12340_v31 = vpop.permute.xlu1 %2926 }
  0xca   :  { %1224 = vrot.lane.b32.xlu0 %v12261_v50, %s16642_s28  ;;  %v2962_v33 = vsel %vm16612_vm14, %v2925_v30, %v12340_v31 }
  0xcb   :  { %2168 = vrot.lane.b32.xlu1 %v12139_v6, %s16618_s14  ;;  %5176 = vmatprep.subr.bf16.mxu0 %v2962_v33 }
  0xcc   :  { %v2923_v34 = vpop.permute.xlu0 %2922 }
  0xcd   :  { %v3115_v35 = vpop.permute.xlu1 %3114  ;;  %v2961_v36 = vsel %vm16612_vm14, %v2923_v34, %v2925_v30  ;;  %vm16614_vm14 = vcmask 130048  }
  0xce   :  { %2170 = vrot.lane.b32.xlu0 %v12148_v7, %s16618_s14  ;;  %5177 = vmatpush1.bf16.msra.mxu0 %v2961_v36 }
  0xcf   :  { %1412 = vrot.lane.b32.xlu1 %v12244_v44, %s16632_s29 }
  0xd0   :  { %v12358_v39 = vpop.permute.xlu0 %3116 }
  0xd1   :  { %v3113_v41 = vpop.permute.xlu1 %3112  ;;  %v3152_v43 = vsel %vm3150_vm15, %v3115_v35, %v12358_v39  ;;  %5179 = vmatmul.mubr.bf16.vlgmr.msra.gmra.mrb[0].mxu0 %v12352_v38 }
  0xd2   :  { %v3151_v47 = vsel %vm3150_vm15, %v3113_v41, %v3115_v35  ;;  %1414 = vrot.lane.b32.xlu0 %v12261_v50, %s16632_s29  ;;  %5189 = vmatprep.subr.bf16.mxu0 %v3152_v43 }
  0xd3   :  { %2358 = vrot.lane.b32.xlu1 %v12139_v6, %s16616_s15  ;;  %5190 = vmatpush1.bf16.msra.mxu0 %v3151_v47 }
  0xd4   :  { %v3305_v48 = vpop.permute.xlu0 %3304  ;;  %11362 = vmatprep.mubr.msk.bf16.mxu0 %vm16614_vm14, %v12363_v40  ;;  %vm3530_vm14 = vcmask 236544  }
  0xd5   :  { %v12375_v49 = vpop.permute.xlu1 %3306 }
  0xd6   :  { %2360 = vrot.lane.b32.xlu0 %v12148_v7, %s16616_s15  ;;  %v3342_v52 = vsel %vm16615_vm13, %v3305_v48, %v12375_v49 }
  0xd7   :  { %1602 = vrot.lane.b32.xlu1 %v12244_v44, %s16630_s30  ;;  %5191 = vmatprep.subr.bf16.mxu0 %v3342_v52 }
  0xd8   :  { %v3303_v53 = vpop.permute.xlu0 %3302 }
  0xd9   :  { %v3341_v54 = vsel %vm16615_vm13, %v3303_v53, %v3305_v48  ;;  %v3495_v55 = vpop.permute.xlu1 %3494  ;;  %vm3720_vm13 = vcmask 228352  }
  0xda   :  { %1604 = vrot.lane.b32.xlu0 %v12261_v50, %s16630_s30  ;;  %5192 = vmatpush1.bf16.msra.mxu0 %v3341_v54 }
  0xdb   :  { %2548 = vrot.lane.b32.xlu1 %v12139_v6, %s16651_s17 }
  0xdc   :  { %v12388_v57 = vpop.permute.xlu0 %3496 }
  0xdd   :  { %v3493_v58 = vpop.permute.xlu1 %3492  ;;  %v3532_v59 = vsel %vm3530_vm14, %v3495_v55, %v12388_v57 }
  0xde   :  { %v3531_v60 = vsel %vm3530_vm14, %v3493_v58, %v3495_v55  ;;  %2550 = vrot.lane.b32.xlu0 %v12148_v7, %s16651_s17  ;;  %5193 = vmatprep.subr.bf16.mxu0 %v3532_v59 }
  0xdf   :  { %1792 = vrot.lane.b32.xlu1 %v12244_v44, %s16628_s12  ;;  %5194 = vmatpush1.bf16.msra.mxu0 %v3531_v60 }
  0xe0   :  { %v3685_v62 = vpop.permute.xlu0 %3684 }
  0xe1   :  { %v12397_v63 = vpop.permute.xlu1 %3686 }
  0xe2   :  { %1794 = vrot.lane.b32.xlu0 %v12261_v50, %s16628_s12  ;;  %v3722_v0 = vsel %vm3720_vm13, %v3685_v62, %v12397_v63 }
  0xe3   :  { %2738 = vrot.lane.b32.xlu1 %v12139_v6, %s16652_s20  ;;  %5195 = vmatprep.subr.bf16.mxu0 %v3722_v0  ;;  %v12495_v0 = vld [vmem:[%s16589_s1 + $0x8] ss:$16 sps:$4 sm:$0xff]  }
  0xe4   :  { %v3683_v1 = vpop.permute.xlu0 %3682 }
  0xe5   :  { %v3721_v4 = vsel %vm3720_vm13, %v3683_v1, %v3685_v62  ;;  %v269_v5 = vpop.permute.xlu1 %268 }
  0xe6   :  { %2740 = vrot.lane.b32.xlu0 %v12148_v7, %s16652_s20  ;;  %5196 = vmatpush1.bf16.msra.mxu0 %v3721_v4  ;;  %v303_v15 = vsel %vm300_vm0, %v12171_v13, %v269_v5 }
  0xe7   :  { %1982 = vrot.lane.b32.xlu1 %v12244_v44, %s16622_s13  ;;  %5197 = vmatprep.subr.bf16.mxu0 %v12155_v8 }
  0xe8   :  { %v12411_v9 = vpop.permute.xlu0 %270 }
  0xe9   :  { %v4001_v10 = vpop.permute.xlu1 %4000  ;;  %v304_v14 = vsel %vm300_vm0, %v269_v5, %v12411_v9 }
  0xea   :  { %1984 = vrot.lane.b32.xlu0 %v12261_v50, %s16622_s13  ;;  %5234 = vmatprep.subr.bf16.mxu1 %v304_v14  ;;  %s16664_s13 = smov 64  }
  0xeb   :  { %2928 = vrot.lane.b32.xlu1 %v12139_v6, %s16653_s16  ;;  %5198 = vmatpush1.bf16.msra.mxu0 %v12169_v12 }
  0xec   :  { %5235 = vmatpush1.bf16.msra.mxu1 %v303_v15  ;;  %v12422_v8 = vpop.permute.xlu0 %4002 }
  0xed   :  { %v3999_v16 = vpop.permute.xlu1 %3998  ;;  %v4037_v18 = vsel %vm300_vm0, %v4001_v10, %v12422_v8 }
  0xee   :  { %v4036_v20 = vsel %vm300_vm0, %v3999_v16, %v4001_v10  ;;  %2930 = vrot.lane.b32.xlu0 %v12148_v7, %s16653_s16  ;;  %5199 = vmatprep.subr.bf16.mxu0 %v4037_v18  ;;  %v11738_v10 = vld [vmem:[%s16588_s0 + $0x10] ss:$80 sps:$4 sm:$0xff]  }
  0xef   :  { %2172 = vrot.lane.b32.xlu1 %v12244_v44, %s16618_s14  ;;  %5200 = vmatpush1.bf16.msra.mxu0 %v4036_v20 }
  0xf0   :  { %v459_v12 = vpop.permute.xlu0 %458 }
  0xf1   :  { %v12431_v21 = vpop.permute.xlu1 %460  ;;  %v493_v13 = vsel %vm490_vm1, %v12180_v17, %v459_v12 }
  0xf2   :  { %2174 = vrot.lane.b32.xlu0 %v12261_v50, %s16618_s14  ;;  %v494_v23 = vsel %vm490_vm1, %v459_v12, %v12431_v21  ;;  %s16674_s14 = smov 28  }
  0xf3   :  { %3118 = vrot.lane.b32.xlu1 %v12139_v6, %s16654_s22  ;;  %5236 = vmatprep.subr.bf16.mxu1 %v494_v23 }
  0xf4   :  { %5237 = vmatpush1.bf16.msra.mxu1 %v493_v13  ;;  %v4190_v24 = vpop.permute.xlu0 %4189 }
  0xf5   :  { %v12441_v26 = vpop.permute.xlu1 %4191 }
  0xf6   :  { %3120 = vrot.lane.b32.xlu0 %v12148_v7, %s16654_s22  ;;  %v4226_v17 = vsel %vm490_vm1, %v4190_v24, %v12441_v26 }
  0xf7   :  { %2362 = vrot.lane.b32.xlu1 %v12244_v44, %s16616_s15  ;;  %5201 = vmatprep.subr.bf16.mxu0 %v4226_v17 }
  0xf8   :  { %v4188_v28 = vpop.permute.xlu0 %4187 }
  0xf9   :  { %v4225_v29 = vsel %vm490_vm1, %v4188_v28, %v4190_v24  ;;  %v649_v30 = vpop.permute.xlu1 %648 }
  0xfa   :  { %2364 = vrot.lane.b32.xlu0 %v12261_v50, %s16616_s15  ;;  %5202 = vmatpush1.bf16.msra.mxu0 %v4225_v29  ;;  %v683_v36 = vsel %vm680_vm2, %v12189_v22, %v649_v30  ;;  %s16667_s15 = smov 63  }
  0xfb   :  { %3308 = vrot.lane.b32.xlu1 %v12139_v6, %s16655_s23 }
  0xfc   :  { %v12454_v33 = vpop.permute.xlu0 %650 }
  0xfd   :  { %v4379_v34 = vpop.permute.xlu1 %4378  ;;  %v684_v35 = vsel %vm680_vm2, %v649_v30, %v12454_v33 }
  0xfe   :  { %3310 = vrot.lane.b32.xlu0 %v12148_v7, %s16655_s23  ;;  %5238 = vmatprep.subr.bf16.mxu1 %v684_v35 }
  0xff   :  { %2552 = vrot.lane.b32.xlu1 %v12244_v44, %s16651_s17  ;;  %5239 = vmatpush1.bf16.msra.mxu1 %v683_v36 }
 0x100   :  { %v12464_v41 = vpop.permute.xlu0 %4380 }
 0x101   :  { %v4377_v43 = vpop.permute.xlu1 %4376  ;;  %v4415_v47 = vsel %vm680_vm2, %v4379_v34, %v12464_v41 }
 0x102   :  { %v4414_v48 = vsel %vm680_vm2, %v4377_v43, %v4379_v34  ;;  %2554 = vrot.lane.b32.xlu0 %v12261_v50, %s16651_s17  ;;  %5203 = vmatprep.subr.bf16.mxu0 %v4415_v47 }
 0x103   :  { %3498 = vrot.lane.b32.xlu1 %v12139_v6, %s16656_s19  ;;  %5204 = vmatpush1.bf16.msra.mxu0 %v4414_v48 }
 0x104   :  { %v839_v22 = vpop.permute.xlu0 %838 }
 0x105   :  { %v12473_v52 = vpop.permute.xlu1 %840  ;;  %v873_v53 = vsel %vm870_vm3, %v12202_v27, %v839_v22 }
 0x106   :  { %3500 = vrot.lane.b32.xlu0 %v12148_v7, %s16656_s19  ;;  %v874_v54 = vsel %vm870_vm3, %v839_v22, %v12473_v52 }
 0x107   :  { %2742 = vrot.lane.b32.xlu1 %v12244_v44, %s16652_s20  ;;  %5240 = vmatprep.subr.bf16.mxu1 %v874_v54 }
 0x108   :  { %5241 = vmatpush1.bf16.msra.mxu1 %v873_v53  ;;  %v4568_v55 = vpop.permute.xlu0 %4567 }
 0x109   :  { %v12483_v58 = vpop.permute.xlu1 %4569 }
 0x10a   :  { %2744 = vrot.lane.b32.xlu0 %v12261_v50, %s16652_s20  ;;  %v4604_v27 = vsel %vm870_vm3, %v4568_v55, %v12483_v58 }
 0x10b   :  { %3688 = vrot.lane.b32.xlu1 %v12139_v6, %s16620_s18  ;;  %5205 = vmatprep.subr.bf16.mxu0 %v4604_v27 }
 0x10c   :  { %v4566_v59 = vpop.permute.xlu0 %4565 }
 0x10d   :  { %v4603_v60 = vsel %vm870_vm3, %v4566_v59, %v4568_v55  ;;  %v1029_v62 = vpop.permute.xlu1 %1028 }
 0x10e   :  { %3690 = vrot.lane.b32.xlu0 %v12148_v7, %s16620_s18  ;;  %5206 = vmatpush1.bf16.msra.mxu0 %v4603_v60  ;;  %v1063_v5 = vsel %vm1060_vm4, %v12211_v32, %v1029_v62  ;;  %v12527_v32 = vld [vmem:[%s16588_s0 + $0x14] ss:$80 sps:$4 sm:$0xff]   ;;  %v11757_v60 = vld [vmem:[%s16588_s0 + $0x1c] ss:$80 sps:$4 sm:$0xff]  }
 0x10f   :  { %2932 = vrot.lane.b32.xlu1 %v12244_v44, %s16653_s16  ;;  %5318 = vmatprep.subr.bf16.mxu0 %v12244_v44 }
 0x110   :  { %v12502_v6 = vpop.permute.xlu0 %1030 }
 0x111   :  { %v273_v1 = vpop.permute.xlu1 %272  ;;  %v1064_v4 = vsel %vm1060_vm4, %v1029_v62, %v12502_v6  ;;  %5222 = vmatmul.mubr.bf16.vlgmr.msra.gmra.mrb[0].mxu0 %v12495_v0 }
 0x112   :  { %2934 = vrot.lane.b32.xlu0 %v12261_v50, %s16653_s16  ;;  %5242 = vmatprep.subr.bf16.mxu1 %v1064_v4 }
 0x113   :  { %3122 = vrot.lane.b32.xlu1 %v12244_v44, %s16654_s22  ;;  %5243 = vmatpush1.bf16.msra.mxu1 %v1063_v5 }
 0x114   :  { %5319 = vmatpush1.bf16.msra.mxu0 %v12148_v7  ;;  %v12517_v14 = vpop.permute.xlu0 %274  ;;  %5350 = vmatprep.mubr.bf16.mxu0 %v12096_v3  ;;  %v305_v7 = vsel %vm300_vm0, %v12411_v9, %v273_v1 }
 0x115   :  { %v1219_v15 = vpop.permute.xlu1 %1218  ;;  %v306_v16 = vsel %vm300_vm0, %v273_v1, %v12517_v14 }
 0x116   :  { %3124 = vrot.lane.b32.xlu0 %v12261_v50, %s16654_s22  ;;  %5320 = vmatprep.subr.bf16.mxu0 %v306_v16  ;;  %v1253_v12 = vsel %vm1250_vm5, %v12224_v37, %v1219_v15 }
 0x117   :  { %4004 = vrot.lane.b32.xlu1 %v11738_v10, %s16640_s21 }
 0x118   :  { %5321 = vmatpush1.bf16.msra.mxu0 %v305_v7  ;;  %v12532_v3 = vpop.permute.xlu0 %1220 }
 0x119   :  { %v463_v18 = vpop.permute.xlu1 %462  ;;  %v1254_v20 = vsel %vm1250_vm5, %v1219_v15, %v12532_v3 }
 0x11a   :  { %4006 = vrot.lane.b32.xlu0 %v12527_v32, %s16640_s21  ;;  %5244 = vmatprep.subr.bf16.mxu1 %v1254_v20  ;;  %v495_v24 = vsel %vm490_vm1, %v12431_v21, %v463_v18 }
 0x11b   :  { %3312 = vrot.lane.b32.xlu1 %v12244_v44, %s16655_s23  ;;  %5245 = vmatpush1.bf16.msra.mxu1 %v1253_v12 }
 0x11c   :  { %v12542_v13 = vpop.permute.xlu0 %464 }
 0x11d   :  { %v1409_v9 = vpop.permute.xlu1 %1408  ;;  %v496_v23 = vsel %vm490_vm1, %v463_v18, %v12542_v13 }
 0x11e   :  { %3314 = vrot.lane.b32.xlu0 %v12261_v50, %s16655_s23  ;;  %5322 = vmatprep.subr.bf16.mxu0 %v496_v23  ;;  %v1443_v29 = vsel %vm1440_vm6, %v12233_v42, %v1409_v9 }
 0x11f   :  { %4193 = vrot.lane.b32.xlu1 %v11738_v10, %s16636_s24  ;;  %5323 = vmatpush1.bf16.msra.mxu0 %v495_v24 }
 0x120   :  { %v12551_v37 = vpop.permute.xlu0 %1410 }
 0x121   :  { %v653_v17 = vpop.permute.xlu1 %652  ;;  %v1444_v28 = vsel %vm1440_vm6, %v1409_v9, %v12551_v37 }
 0x122   :  { %4195 = vrot.lane.b32.xlu0 %v12527_v32, %s16636_s24  ;;  %5246 = vmatprep.subr.bf16.mxu1 %v1444_v28  ;;  %v685_v35 = vsel %vm680_vm2, %v12454_v33, %v653_v17 }
 0x123   :  { %3502 = vrot.lane.b32.xlu1 %v12244_v44, %s16656_s19  ;;  %5247 = vmatpush1.bf16.msra.mxu1 %v1443_v29 }
 0x124   :  { %v12561_v21 = vpop.permute.xlu0 %654 }
 0x125   :  { %v1599_v30 = vpop.permute.xlu1 %1598  ;;  %v686_v34 = vsel %vm680_vm2, %v653_v17, %v12561_v21 }
 0x126   :  { %3504 = vrot.lane.b32.xlu0 %v12261_v50, %s16656_s19  ;;  %5324 = vmatprep.subr.bf16.mxu0 %v686_v34  ;;  %v1633_v47 = vsel %vm16624_vm7, %v12265_v51, %v1599_v30  ;;  %v12590_v51 = vcombine.high %v12249_v45, %v12254_v46  ;;  %v12604_v45 = vld [vmem:[%s16588_s0 + $0x20] ss:$80 sps:$4 sm:$0xff]   ;;  %v12611_v46 = vld [vmem:[%s16588_s0 + $0x18] ss:$80 sps:$4 sm:$0xff]  }
 0x127   :  { %4382 = vrot.lane.b32.xlu1 %v11738_v10, %s16638_s25  ;;  %5325 = vmatpush1.bf16.msra.mxu0 %v685_v35 }
 0x128   :  { %v12570_v42 = vpop.permute.xlu0 %1600 }
 0x129   :  { %v843_v36 = vpop.permute.xlu1 %842  ;;  %v1634_v43 = vsel %vm16624_vm7, %v1599_v30, %v12570_v42 }
 0x12a   :  { %4384 = vrot.lane.b32.xlu0 %v12527_v32, %s16638_s25  ;;  %5248 = vmatprep.subr.bf16.mxu1 %v1634_v43  ;;  %v875_v53 = vsel %vm870_vm3, %v12473_v52, %v843_v36 }
 0x12b   :  { %3692 = vrot.lane.b32.xlu1 %v12244_v44, %s16620_s18  ;;  %5249 = vmatpush1.bf16.msra.mxu1 %v1633_v47 }
 0x12c   :  { %v12580_v33 = vpop.permute.xlu0 %844 }
 0x12d   :  { %v1789_v48 = vpop.permute.xlu1 %1788  ;;  %v876_v22 = vsel %vm870_vm3, %v843_v36, %v12580_v33 }
 0x12e   :  { %3694 = vrot.lane.b32.xlu0 %v12261_v50, %s16620_s18  ;;  %5326 = vmatprep.subr.bf16.mxu0 %v876_v22  ;;  %v1823_v50 = vsel %vm16625_vm8, %v12274_v56, %v1789_v48  ;;  %s16690_s18 = smov 93  }
 0x12f   :  { %4571 = vrot.lane.b32.xlu1 %v11738_v10, %s16634_s26  ;;  %5327 = vmatpush1.bf16.msra.mxu0 %v875_v53  ;;  %v12708_v53 = vld [vmem:[%s16588_s0 + $0x28] ss:$80 sps:$4 sm:$0xff]  }
 0x130   :  { %v12593_v44 = vpop.permute.xlu0 %1790 }
 0x131   :  { %v1033_v54 = vpop.permute.xlu1 %1032  ;;  %v1824_v55 = vsel %vm16625_vm8, %v1789_v48, %v12593_v44 }
 0x132   :  { %4573 = vrot.lane.b32.xlu0 %v12527_v32, %s16634_s26  ;;  %5250 = vmatprep.subr.bf16.mxu1 %v1824_v55  ;;  %v1065_v59 = vsel %vm1060_vm4, %v12502_v6, %v1033_v54 }
 0x133   :  { %276 = vrot.lane.b32.xlu1 %v12590_v51, %s16640_s21  ;;  %5251 = vmatpush1.bf16.msra.mxu1 %v1823_v50 }
 0x134   :  { %v12613_v52 = vpop.permute.xlu0 %1034 }
 0x135   :  { %v1979_v27 = vpop.permute.xlu1 %1978  ;;  %v1066_v56 = vsel %vm1060_vm4, %v1033_v54, %v12613_v52 }
 0x136   :  { %278 = vrot.lane.b32.xlu0 %v12604_v45, %s16640_s21  ;;  %5328 = vmatprep.subr.bf16.mxu0 %v1066_v56  ;;  %v2013_v6 = vsel %vm2010_vm9, %v12287_v61, %v1979_v27 }
 0x137   :  { %4008 = vrot.lane.b32.xlu1 %v12611_v46, %s16640_s21  ;;  %5329 = vmatpush1.bf16.msra.mxu0 %v1065_v59 }
 0x138   :  { %v12626_v62 = vpop.permute.xlu0 %1980 }
 0x139   :  { %v1223_v1 = vpop.permute.xlu1 %1222  ;;  %v2014_v4 = vsel %vm2010_vm9, %v1979_v27, %v12626_v62 }
 0x13a   :  { %4010 = vrot.lane.b32.xlu0 %v11757_v60, %s16640_s21  ;;  %5252 = vmatprep.subr.bf16.mxu1 %v2014_v4  ;;  %v1255_v16 = vsel %vm1250_vm5, %v12532_v3, %v1223_v1 }
 0x13b   :  { %466 = vrot.lane.b32.xlu1 %v12590_v51, %s16636_s24  ;;  %5253 = vmatpush1.bf16.msra.mxu1 %v2013_v6 }
 0x13c   :  { %v12635_v5 = vpop.permute.xlu0 %1224 }
 0x13d   :  { %v2169_v10 = vpop.permute.xlu1 %2168  ;;  %v1256_v15 = vsel %vm1250_vm5, %v1223_v1, %v12635_v5 }
 0x13e   :  { %468 = vrot.lane.b32.xlu0 %v12604_v45, %s16636_s24  ;;  %5330 = vmatprep.subr.bf16.mxu0 %v1256_v15  ;;  %v2203_v20 = vsel %vm2200_vm10, %v12296_v2, %v2169_v10 }
 0x13f   :  { %4197 = vrot.lane.b32.xlu1 %v12611_v46, %s16636_s24  ;;  %5331 = vmatpush1.bf16.msra.mxu0 %v1255_v16 }
 0x140   :  { %v12645_v61 = vpop.permute.xlu0 %2170 }
 0x141   :  { %v1413_v7 = vpop.permute.xlu1 %1412  ;;  %v2204_v18 = vsel %vm2200_vm10, %v2169_v10, %v12645_v61 }
 0x142   :  { %4199 = vrot.lane.b32.xlu0 %v11757_v60, %s16636_s24  ;;  %5254 = vmatprep.subr.bf16.mxu1 %v2204_v18  ;;  %v1445_v23 = vsel %vm1440_vm6, %v12551_v37, %v1413_v7 }
 0x143   :  { %656 = vrot.lane.b32.xlu1 %v12590_v51, %s16638_s25  ;;  %5255 = vmatpush1.bf16.msra.mxu1 %v2203_v20 }
 0x144   :  { %v12654_v3 = vpop.permute.xlu0 %1414 }
 0x145   :  { %v2359_v12 = vpop.permute.xlu1 %2358  ;;  %v1446_v9 = vsel %vm1440_vm6, %v1413_v7, %v12654_v3 }
 0x146   :  { %658 = vrot.lane.b32.xlu0 %v12604_v45, %s16638_s25  ;;  %5332 = vmatprep.subr.bf16.mxu0 %v1446_v9  ;;  %v2393_v28 = vsel %vm2390_vm11, %v12309_v11, %v2359_v12 }
 0x147   :  { %4386 = vrot.lane.b32.xlu1 %v12611_v46, %s16638_s25  ;;  %5333 = vmatpush1.bf16.msra.mxu0 %v1445_v23 }
 0x148   :  { %v12664_v2 = vpop.permute.xlu0 %2360 }
 0x149   :  { %v1603_v24 = vpop.permute.xlu1 %1602  ;;  %v2394_v17 = vsel %vm2390_vm11, %v2359_v12, %v12664_v2 }
 0x14a   :  { %4388 = vrot.lane.b32.xlu0 %v11757_v60, %s16638_s25  ;;  %5256 = vmatprep.subr.bf16.mxu1 %v2394_v17  ;;  %v1635_v34 = vsel %vm16624_vm7, %v12570_v42, %v1603_v24  ;;  %v12695_v42 = vld [vmem:[%s16588_s0 + $0x24] ss:$80 sps:$4 sm:$0xff]  }
 0x14b   :  { %846 = vrot.lane.b32.xlu1 %v12590_v51, %s16634_s26  ;;  %5257 = vmatpush1.bf16.msra.mxu1 %v2393_v28 }
 0x14c   :  { %v12673_v37 = vpop.permute.xlu0 %1604 }
 0x14d   :  { %v2549_v29 = vpop.permute.xlu1 %2548  ;;  %v1636_v30 = vsel %vm16624_vm7, %v1603_v24, %v12673_v37  ;;  %vm16657_vm7 = vcmask 490496  }
 0x14e   :  { %848 = vrot.lane.b32.xlu0 %v12604_v45, %s16634_s26  ;;  %5334 = vmatprep.subr.bf16.mxu0 %v1636_v30  ;;  %v2583_v43 = vsel %vm2580_vm12, %v12318_v19, %v2549_v29 }
 0x14f   :  { %4575 = vrot.lane.b32.xlu1 %v12611_v46, %s16634_s26  ;;  %5335 = vmatpush1.bf16.msra.mxu0 %v1635_v34 }
 0x150   :  { %v12683_v11 = vpop.permute.xlu0 %2550 }
 0x151   :  { %v1793_v35 = vpop.permute.xlu1 %1792  ;;  %v2584_v36 = vsel %vm2580_vm12, %v2549_v29, %v12683_v11 }
 0x152   :  { %4577 = vrot.lane.b32.xlu0 %v11757_v60, %s16634_s26  ;;  %5258 = vmatprep.subr.bf16.mxu1 %v2584_v36  ;;  %v1825_v19 = vsel %vm16625_vm8, %v12593_v44, %v1793_v35 }
 0x153   :  { %1036 = vrot.lane.b32.xlu1 %v12590_v51, %s16626_s27  ;;  %5259 = vmatpush1.bf16.msra.mxu1 %v2583_v43 }
 0x154   :  { %v12697_v47 = vpop.permute.xlu0 %1794 }
 0x155   :  { %v2739_v48 = vpop.permute.xlu1 %2738  ;;  %v1826_v22 = vsel %vm16625_vm8, %v1793_v35, %v12697_v47  ;;  %vm16658_vm8 = vmmov %vm16657_vm7 }
 0x156   :  { %1038 = vrot.lane.b32.xlu0 %v12604_v45, %s16626_s27  ;;  %5336 = vmatprep.subr.bf16.mxu0 %v1826_v22  ;;  %v2773_v44 = vsel %vm16658_vm8, %v12331_v25, %v2739_v48 }
 0x157   :  { %280 = vrot.lane.b32.xlu1 %v12695_v42, %s16640_s21  ;;  %5337 = vmatpush1.bf16.msra.mxu0 %v1825_v19 }
 0x158   :  { %v12712_v54 = vpop.permute.xlu0 %2740 }
 0x159   :  { %v1983_v55 = vpop.permute.xlu1 %1982  ;;  %v2774_v50 = vsel %vm16657_vm7, %v2739_v48, %v12712_v54  ;;  %vm16659_vm7 = vcmask 261120  }
 0x15a   :  { %282 = vrot.lane.b32.xlu0 %v12708_v53, %s16640_s21  ;;  %5260 = vmatprep.subr.bf16.mxu1 %v2774_v50  ;;  %v2015_v60 = vsel %vm2010_vm9, %v12626_v62, %v1983_v55  ;;  %vm16660_vm8 = vmmov %vm16659_vm7 }
 0x15b   :  { %1226 = vrot.lane.b32.xlu1 %v12590_v51, %s16642_s28  ;;  %5261 = vmatpush1.bf16.msra.mxu1 %v2773_v44 }
 0x15c   :  { %v12722_v27 = vpop.permute.xlu0 %1984 }
 0x15d   :  { %v2929_v56 = vpop.permute.xlu1 %2928  ;;  %v2016_v59 = vsel %vm2010_vm9, %v1983_v55, %v12722_v27  ;;  %v11765_v55 = vld [vmem:[%s16588_s0 + $0x10] ss:$80 sps:$4 sm:$0xff]  }
 0x15e   :  { %1228 = vrot.lane.b32.xlu0 %v12604_v45, %s16642_s28  ;;  %5338 = vmatprep.subr.bf16.mxu0 %v2016_v59  ;;  %v2963_v6 = vsel %vm16660_vm8, %v12340_v31, %v2929_v56  ;;  %vm16662_vm8 = vcmask 244736   ;;  %v11763_v59 = vld [vmem:[%s16588_s0 + $0xc] ss:$80 sps:$4 sm:$0xff]  }
 0x15f   :  { %470 = vrot.lane.b32.xlu1 %v12695_v42, %s16636_s24  ;;  %5339 = vmatpush1.bf16.msra.mxu0 %v2015_v60 }
 0x160   :  { %v12732_v25 = vpop.permute.xlu0 %2930 }
 0x161   :  { %v2173_v1 = vpop.permute.xlu1 %2172  ;;  %v2964_v4 = vsel %vm16659_vm7, %v2929_v56, %v12732_v25  ;;  %vm16661_vm7 = vcmask 130048  }
 0x162   :  { %472 = vrot.lane.b32.xlu0 %v12708_v53, %s16636_s24  ;;  %5262 = vmatprep.subr.bf16.mxu1 %v2964_v4  ;;  %v2205_v16 = vsel %vm2200_vm10, %v12645_v61, %v2173_v1 }
 0x163   :  { %1416 = vrot.lane.b32.xlu1 %v12590_v51, %s16632_s29  ;;  %5263 = vmatpush1.bf16.msra.mxu1 %v2963_v6 }
 0x164   :  { %v12742_v62 = vpop.permute.xlu0 %2174 }
 0x165   :  { %v3119_v10 = vpop.permute.xlu1 %3118  ;;  %v2206_v15 = vsel %vm2200_vm10, %v2173_v1, %v12742_v62 }
 0x166   :  { %1418 = vrot.lane.b32.xlu0 %v12604_v45, %s16632_s29  ;;  %5340 = vmatprep.subr.bf16.mxu0 %v2206_v15  ;;  %v3153_v61 = vsel %vm3150_vm15, %v12358_v39, %v3119_v10 }
 0x167   :  { %660 = vrot.lane.b32.xlu1 %v12695_v42, %s16638_s25  ;;  %5341 = vmatpush1.bf16.msra.mxu0 %v2205_v16 }
 0x168   :  { %v12752_v31 = vpop.permute.xlu0 %3120  ;;  %5265 = vmatmul.mubr.bf16.vlgmr.msra.gmra.mrb[0].mxu1 %v12352_v38 }
 0x169   :  { %v2363_v7 = vpop.permute.xlu1 %2362  ;;  %v3154_v18 = vsel %vm3150_vm15, %v3119_v10, %v12752_v31  ;;  %11363 = vmatprep.mubr.msk.bf16.mxu1 %vm16661_vm7, %v12363_v40  ;;  %vm16663_vm7 = vmmov %vm16662_vm8 }
 0x16a   :  { %662 = vrot.lane.b32.xlu0 %v12708_v53, %s16638_s25  ;;  %5275 = vmatprep.subr.bf16.mxu1 %v3154_v18  ;;  %v2395_v23 = vsel %vm2390_vm11, %v12664_v2, %v2363_v7 }
 0x16b   :  { %1606 = vrot.lane.b32.xlu1 %v12590_v51, %s16630_s30  ;;  %5276 = vmatpush1.bf16.msra.mxu1 %v3153_v61 }
 0x16c   :  { %v12765_v20 = vpop.permute.xlu0 %2364 }
 0x16d   :  { %v3309_v12 = vpop.permute.xlu1 %3308  ;;  %v2396_v9 = vsel %vm2390_vm11, %v2363_v7, %v12765_v20 }
 0x16e   :  { %1608 = vrot.lane.b32.xlu0 %v12604_v45, %s16630_s30  ;;  %5342 = vmatprep.subr.bf16.mxu0 %v2396_v9  ;;  %v3343_v28 = vsel %vm16663_vm7, %v12375_v49, %v3309_v12 }
 0x16f   :  { %850 = vrot.lane.b32.xlu1 %v12695_v42, %s16634_s26  ;;  %5343 = vmatpush1.bf16.msra.mxu0 %v2395_v23 }
 0x170   :  { %v12775_v39 = vpop.permute.xlu0 %3310 }
 0x171   :  { %v2553_v24 = vpop.permute.xlu1 %2552  ;;  %v3344_v17 = vsel %vm16662_vm8, %v3309_v12, %v12775_v39  ;;  %vm16665_vm8 = vcmask 490496  }
 0x172   :  { %852 = vrot.lane.b32.xlu0 %v12708_v53, %s16634_s26  ;;  %5277 = vmatprep.subr.bf16.mxu1 %v3344_v17  ;;  %v2585_v34 = vsel %vm2580_vm12, %v12683_v11, %v2553_v24  ;;  %vm16666_vm7 = vmmov %vm16665_vm8 }
 0x173   :  { %1796 = vrot.lane.b32.xlu1 %v12590_v51, %s16628_s12  ;;  %5278 = vmatpush1.bf16.msra.mxu1 %v3343_v28 }
 0x174   :  { %v12785_v2 = vpop.permute.xlu0 %2554 }
 0x175   :  { %v3499_v29 = vpop.permute.xlu1 %3498  ;;  %v2586_v30 = vsel %vm2580_vm12, %v2553_v24, %v12785_v2 }
 0x176   :  { %1798 = vrot.lane.b32.xlu0 %v12604_v45, %s16628_s12  ;;  %5344 = vmatprep.subr.bf16.mxu0 %v2586_v30  ;;  %v3533_v43 = vsel %vm3530_vm14, %v12388_v57, %v3499_v29 }
 0x177   :  { %1040 = vrot.lane.b32.xlu1 %v12695_v42, %s16626_s27  ;;  %5345 = vmatpush1.bf16.msra.mxu0 %v2585_v34 }
 0x178   :  { %v12795_v49 = vpop.permute.xlu0 %3500 }
 0x179   :  { %v2743_v35 = vpop.permute.xlu1 %2742  ;;  %v3534_v36 = vsel %vm3530_vm14, %v3499_v29, %v12795_v49 }
 0x17a   :  { %1042 = vrot.lane.b32.xlu0 %v12708_v53, %s16626_s27  ;;  %5279 = vmatprep.subr.bf16.mxu1 %v3534_v36  ;;  %v2775_v19 = vsel %vm16666_vm7, %v12712_v54, %v2743_v35  ;;  %s16670_s27 = smov 62  }
 0x17b   :  { %1986 = vrot.lane.b32.xlu1 %v12590_v51, %s16664_s13  ;;  %5280 = vmatpush1.bf16.msra.mxu1 %v3533_v43 }
 0x17c   :  { %v12805_v11 = vpop.permute.xlu0 %2744 }
 0x17d   :  { %v3689_v48 = vpop.permute.xlu1 %3688  ;;  %v2776_v22 = vsel %vm16665_vm8, %v2743_v35, %v12805_v11  ;;  %vm16668_vm8 = vcmask 261120  }
 0x17e   :  { %1988 = vrot.lane.b32.xlu0 %v12604_v45, %s16664_s13  ;;  %5346 = vmatprep.subr.bf16.mxu0 %v2776_v22  ;;  %v3723_v54 = vsel %vm3720_vm13, %v12397_v63, %v3689_v48  ;;  %vm16669_vm7 = vmmov %vm16668_vm8 }
 0x17f   :  { %1230 = vrot.lane.b32.xlu1 %v12695_v42, %s16642_s28  ;;  %5347 = vmatpush1.bf16.msra.mxu0 %v2775_v19 }
 0x180   :  { %v12815_v57 = vpop.permute.xlu0 %3690 }
 0x181   :  { %v2933_v50 = vpop.permute.xlu1 %2932  ;;  %v3724_v44 = vsel %vm3720_vm13, %v3689_v48, %v12815_v57  ;;  %v11768_v48 = vld [vmem:[%s16588_s0 + $0x1c] ss:$80 sps:$4 sm:$0xff]  }
 0x182   :  { %1232 = vrot.lane.b32.xlu0 %v12708_v53, %s16642_s28  ;;  %5281 = vmatprep.subr.bf16.mxu1 %v3724_v44  ;;  %v2965_v63 = vsel %vm16669_vm7, %v12732_v25, %v2933_v50  ;;  %vm16672_vm7 = vcmask 244736  }
 0x183   :  { %2176 = vrot.lane.b32.xlu1 %v12590_v51, %s16667_s15  ;;  %5282 = vmatpush1.bf16.msra.mxu1 %v3723_v54 }
 0x184   :  { %v12828_v56 = vpop.permute.xlu0 %2934  ;;  %5283 = vmatprep.subr.bf16.mxu1 %v11765_v55 }
 0x185   :  { %v3123_v60 = vpop.permute.xlu1 %3122  ;;  %v2966_v1 = vsel %vm16668_vm8, %v2933_v50, %v12828_v56  ;;  %vm16671_vm8 = vcmask 130048  }
 0x186   :  { %2178 = vrot.lane.b32.xlu0 %v12604_v45, %s16667_s15  ;;  %5348 = vmatprep.subr.bf16.mxu0 %v2966_v1  ;;  %v3155_v25 = vsel %vm3150_vm15, %v12752_v31, %v3123_v60 }
 0x187   :  { %1420 = vrot.lane.b32.xlu1 %v12695_v42, %s16632_s29  ;;  %5349 = vmatpush1.bf16.msra.mxu0 %v2965_v63 }
 0x188   :  { %v12841_v4 = vpop.permute.xlu0 %3124  ;;  %5284 = vmatpush1.bf16.msra.mxu1 %v11763_v59 }
 0x189   :  { %v4005_v6 = vpop.permute.xlu1 %4004  ;;  %v3156_v10 = vsel %vm3150_vm15, %v3123_v60, %v12841_v4 }
 0x18a   :  { %1422 = vrot.lane.b32.xlu0 %v12708_v53, %s16632_s29  ;;  %5361 = vmatprep.subr.bf16.mxu0 %v3156_v10  ;;  %s16681_s29 = smov 96  }
 0x18b   :  { %2366 = vrot.lane.b32.xlu1 %v12590_v51, %s16670_s27  ;;  %5351 = vmatmul.mubr.bf16.vlgmr.msra.gmra.mrb[4].mxu0 %v12352_v38  ;;  %v4038_v38 = vsel %vm300_vm0, %v12422_v8, %v4005_v6 }
 0x18c   :  { %5362 = vmatpush1.bf16.msra.mxu0 %v3155_v25  ;;  %v12852_v15 = vpop.permute.xlu0 %4006  ;;  %11364 = vmatprep.mubr.msk.bf16.mxu0 %vm16671_vm8, %v12363_v40  ;;  %vm16673_vm8 = vmmov %vm16672_vm7 }
 0x18d   :  { %v3313_v16 = vpop.permute.xlu1 %3312  ;;  %v4039_v7 = vsel %vm300_vm0, %v4005_v6, %v12852_v15 }
 0x18e   :  { %2368 = vrot.lane.b32.xlu0 %v12604_v45, %s16670_s27  ;;  %5285 = vmatprep.subr.bf16.mxu1 %v4039_v7  ;;  %v3345_v61 = vsel %vm16673_vm8, %v12775_v39, %v3313_v16 }
 0x18f   :  { %1610 = vrot.lane.b32.xlu1 %v12695_v42, %s16630_s30  ;;  %5286 = vmatpush1.bf16.msra.mxu1 %v4038_v38 }
 0x190   :  { %v12864_v31 = vpop.permute.xlu0 %3314 }
 0x191   :  { %v4194_v18 = vpop.permute.xlu1 %4193  ;;  %v3346_v40 = vsel %vm16672_vm7, %v3313_v16, %v12864_v31  ;;  %vm16675_vm7 = vcmask 760832  }
 0x192   :  { %1612 = vrot.lane.b32.xlu0 %v12708_v53, %s16630_s30  ;;  %5363 = vmatprep.subr.bf16.mxu0 %v3346_v40  ;;  %v4227_v23 = vsel %vm490_vm1, %v12441_v26, %v4194_v18  ;;  %vm16676_vm8 = vmmov %vm16675_vm7  ;;  %s16694_s30 = smov 92  }
 0x193   :  { %2556 = vrot.lane.b32.xlu1 %v12590_v51, %s16651_s17  ;;  %5364 = vmatpush1.bf16.msra.mxu0 %v3345_v61 }
 0x194   :  { %v12874_v8 = vpop.permute.xlu0 %4195 }
 0x195   :  { %v3503_v12 = vpop.permute.xlu1 %3502  ;;  %v4228_v9 = vsel %vm490_vm1, %v4194_v18, %v12874_v8 }
 0x196   :  { %2558 = vrot.lane.b32.xlu0 %v12604_v45, %s16651_s17  ;;  %5287 = vmatprep.subr.bf16.mxu1 %v4228_v9  ;;  %v3535_v28 = vsel %vm3530_vm14, %v12795_v49, %v3503_v12 }
 0x197   :  { %1800 = vrot.lane.b32.xlu1 %v12695_v42, %s16628_s12  ;;  %5288 = vmatpush1.bf16.msra.mxu1 %v4227_v23 }
 0x198   :  { %v12884_v39 = vpop.permute.xlu0 %3504 }
 0x199   :  { %v4383_v24 = vpop.permute.xlu1 %4382  ;;  %v3536_v17 = vsel %vm3530_vm14, %v3503_v12, %v12884_v39 }
 0x19a   :  { %1802 = vrot.lane.b32.xlu0 %v12708_v53, %s16628_s12  ;;  %5365 = vmatprep.subr.bf16.mxu0 %v3536_v17  ;;  %v4416_v34 = vsel %vm680_vm2, %v12464_v41, %v4383_v24 }
 0x19b   :  { %2746 = vrot.lane.b32.xlu1 %v12590_v51, %s16652_s20  ;;  %5366 = vmatpush1.bf16.msra.mxu0 %v3535_v28 }
 0x19c   :  { %v12894_v26 = vpop.permute.xlu0 %4384 }
 0x19d   :  { %v3693_v29 = vpop.permute.xlu1 %3692  ;;  %v4417_v30 = vsel %vm680_vm2, %v4383_v24, %v12894_v26 }
 0x19e   :  { %2748 = vrot.lane.b32.xlu0 %v12604_v45, %s16652_s20  ;;  %5289 = vmatprep.subr.bf16.mxu1 %v4417_v30  ;;  %v3725_v43 = vsel %vm3720_vm13, %v12815_v57, %v3693_v29 }
 0x19f   :  { %1990 = vrot.lane.b32.xlu1 %v12695_v42, %s16664_s13  ;;  %5290 = vmatpush1.bf16.msra.mxu1 %v4416_v34 }
 0x1a0   :  { %v12904_v49 = vpop.permute.xlu0 %3694 }
 0x1a1   :  { %v4572_v35 = vpop.permute.xlu1 %4571  ;;  %v3726_v36 = vsel %vm3720_vm13, %v3693_v29, %v12904_v49 }
 0x1a2   :  { %1992 = vrot.lane.b32.xlu0 %v12708_v53, %s16664_s13  ;;  %5367 = vmatprep.subr.bf16.mxu0 %v3726_v36  ;;  %v4605_v57 = vsel %vm870_vm3, %v12483_v58, %v4572_v35  ;;  %v11769_v36 = vld [vmem:[%s16588_s0 + $0x20] ss:$80 sps:$4 sm:$0xff]  }
 0x1a3   :  { %2936 = vrot.lane.b32.xlu1 %v12590_v51, %s16653_s16  ;;  %5368 = vmatpush1.bf16.msra.mxu0 %v3725_v43 }
 0x1a4   :  { %v12914_v41 = vpop.permute.xlu0 %4573  ;;  %5369 = vmatprep.subr.bf16.mxu0 %v12611_v46  ;;  %v11766_v46 = vld [vmem:[%s16588_s0 + $0x18] ss:$80 sps:$4 sm:$0xff]  }
 0x1a5   :  { %v277_v22 = vpop.permute.xlu1 %276  ;;  %v4606_v19 = vsel %vm870_vm3, %v4572_v35, %v12914_v41 }
 0x1a6   :  { %2938 = vrot.lane.b32.xlu0 %v12604_v45, %s16653_s16  ;;  %5291 = vmatprep.subr.bf16.mxu1 %v4606_v19  ;;  %v307_v1 = vsel %vm300_vm0, %v12517_v14, %v277_v22 }
 0x1a7   :  { %2180 = vrot.lane.b32.xlu1 %v12695_v42, %s16667_s15  ;;  %5292 = vmatpush1.bf16.msra.mxu1 %v4605_v57 }
 0x1a8   :  { %v12931_v55 = vpop.permute.xlu0 %278  ;;  %5404 = vmatprep.subr.bf16.mxu1 %v11768_v48  ;;  %5370 = vmatpush1.bf16.msra.mxu0 %v12527_v32  ;;  %v12946_v32 = vld [vmem:[%s16589_s1 + $0x4] ss:$16 sps:$4 sm:$0xff]  }
 0x1a9   :  { %v4009_v50 = vpop.permute.xlu1 %4008  ;;  %v308_v58 = vsel %vm300_vm0, %v277_v22, %v12931_v55 }
 0x1aa   :  { %2182 = vrot.lane.b32.xlu0 %v12708_v53, %s16667_s15  ;;  %5308 = vmatmul.mubr.bf16.vlgmr.msra.gmra.mrb[0].mxu1 %v12495_v0  ;;  %v4040_v60 = vsel %vm300_vm0, %v12852_v15, %v4009_v50 }
 0x1ab   :  { %3126 = vrot.lane.b32.xlu1 %v12590_v51, %s16654_s22  ;;  %5405 = vmatpush1.bf16.msra.mxu1 %v11766_v46 }
 0x1ac   :  { %v12941_v44 = vpop.permute.xlu0 %4010  ;;  %5406 = vmatprep.subr.bf16.mxu1 %v308_v58  ;;  %5436 = vmatprep.mubr.bf16.mxu1 %v12946_v32 }
 0x1ad   :  { %v467_v54 = vpop.permute.xlu1 %466  ;;  %v4041_v59 = vsel %vm300_vm0, %v4009_v50, %v12941_v44 }
 0x1ae   :  { %3128 = vrot.lane.b32.xlu0 %v12604_v45, %s16654_s22  ;;  %5371 = vmatprep.subr.bf16.mxu0 %v4041_v59  ;;  %v497_v25 = vsel %vm490_vm1, %v12542_v13, %v467_v54 }
 0x1af   :  { %2370 = vrot.lane.b32.xlu1 %v12695_v42, %s16670_s27  ;;  %5372 = vmatpush1.bf16.msra.mxu0 %v4040_v60 }
 0x1b0   :  { %5407 = vmatpush1.bf16.msra.mxu1 %v307_v1  ;;  %v12959_v63 = vpop.permute.xlu0 %468 }
 0x1b1   :  { %v4198_v6 = vpop.permute.xlu1 %4197  ;;  %v498_v10 = vsel %vm490_vm1, %v467_v54, %v12959_v63 }
 0x1b2   :  { %2372 = vrot.lane.b32.xlu0 %v12708_v53, %s16670_s27  ;;  %5408 = vmatprep.subr.bf16.mxu1 %v498_v10  ;;  %v4229_v7 = vsel %vm490_vm1, %v12874_v8, %v4198_v6 }
 0x1b3   :  { %3316 = vrot.lane.b32.xlu1 %v12590_v51, %s16655_s23 }
 0x1b4   :  { %5409 = vmatpush1.bf16.msra.mxu1 %v497_v25  ;;  %v12969_v15 = vpop.permute.xlu0 %4199 }
 0x1b5   :  { %v657_v14 = vpop.permute.xlu1 %656  ;;  %v4230_v16 = vsel %vm490_vm1, %v4198_v6, %v12969_v15 }
 0x1b6   :  { %3318 = vrot.lane.b32.xlu0 %v12604_v45, %s16655_s23  ;;  %5373 = vmatprep.subr.bf16.mxu0 %v4230_v16  ;;  %v687_v40 = vsel %vm680_vm2, %v12561_v21, %v657_v14 }
 0x1b7   :  { %2560 = vrot.lane.b32.xlu1 %v12695_v42, %s16651_s17  ;;  %5374 = vmatpush1.bf16.msra.mxu0 %v4229_v7 }
 0x1b8   :  { %v12979_v38 = vpop.permute.xlu0 %658 }
 0x1b9   :  { %v4387_v13 = vpop.permute.xlu1 %4386  ;;  %v688_v18 = vsel %vm680_vm2, %v657_v14, %v12979_v38 }
 0x1ba   :  { %2562 = vrot.lane.b32.xlu0 %v12708_v53, %s16651_s17  ;;  %5410 = vmatprep.subr.bf16.mxu1 %v688_v18  ;;  %v4418_v9 = vsel %vm680_vm2, %v12894_v26, %v4387_v13 }
 0x1bb   :  { %3506 = vrot.lane.b32.xlu1 %v12590_v51, %s16656_s19  ;;  %5411 = vmatpush1.bf16.msra.mxu1 %v687_v40 }
 0x1bc   :  { %v12989_v61 = vpop.permute.xlu0 %4388 }
 0x1bd   :  { %v847_v8 = vpop.permute.xlu1 %846  ;;  %v4419_v12 = vsel %vm680_vm2, %v4387_v13, %v12989_v61 }
 0x1be   :  { %3508 = vrot.lane.b32.xlu0 %v12604_v45, %s16656_s19  ;;  %5375 = vmatprep.subr.bf16.mxu0 %v4419_v12  ;;  %v877_v17 = vsel %vm870_vm3, %v12580_v33, %v847_v8  ;;  %v13123_v12 = vld [vmem:[%s16588_s0 + $0x30] ss:$80 sps:$4 sm:$0xff]  }
 0x1bf   :  { %2750 = vrot.lane.b32.xlu1 %v12695_v42, %s16652_s20  ;;  %5376 = vmatpush1.bf16.msra.mxu0 %v4418_v9  ;;  %v13130_v9 = vld [vmem:[%s16588_s0 + $0x28] ss:$80 sps:$4 sm:$0xff]  }
 0x1c0   :  { %v12999_v21 = vpop.permute.xlu0 %848 }
 0x1c1   :  { %v4576_v23 = vpop.permute.xlu1 %4575  ;;  %v878_v24 = vsel %vm870_vm3, %v847_v8, %v12999_v21 }
 0x1c2   :  { %2752 = vrot.lane.b32.xlu0 %v12708_v53, %s16652_s20  ;;  %5412 = vmatprep.subr.bf16.mxu1 %v878_v24  ;;  %v4607_v30 = vsel %vm870_vm3, %v12914_v41, %v4576_v23 }
 0x1c3   :  { %3696 = vrot.lane.b32.xlu1 %v12590_v51, %s16674_s14  ;;  %5413 = vmatpush1.bf16.msra.mxu1 %v877_v17  ;;  %v11776_v17 = vld [vmem:[%s16588_s0 + $0x2c] ss:$80 sps:$4 sm:$0xff]  }
 0x1c4   :  { %v13009_v28 = vpop.permute.xlu0 %4577 }
 0x1c5   :  { %v1037_v26 = vpop.permute.xlu1 %1036  ;;  %v4608_v29 = vsel %vm870_vm3, %v4576_v23, %v13009_v28 }
 0x1c6   :  { %3698 = vrot.lane.b32.xlu0 %v12604_v45, %s16674_s14  ;;  %5377 = vmatprep.subr.bf16.mxu0 %v4608_v29  ;;  %v1067_v35 = vsel %vm1060_vm4, %v12613_v52, %v1037_v26 }
 0x1c7   :  { %2940 = vrot.lane.b32.xlu1 %v12695_v42, %s16653_s16  ;;  %5378 = vmatpush1.bf16.msra.mxu0 %v4607_v30 }
 0x1c8   :  { %v13019_v33 = vpop.permute.xlu0 %1038  ;;  %5490 = vmatprep.subr.bf16.mxu0 %v12695_v42 }
 0x1c9   :  { %v281_v51 = vpop.permute.xlu1 %280  ;;  %v1068_v34 = vsel %vm1060_vm4, %v1037_v26, %v13019_v33 }
 0x1ca   :  { %2942 = vrot.lane.b32.xlu0 %v12708_v53, %s16653_s16  ;;  %5414 = vmatprep.subr.bf16.mxu1 %v1068_v34 }
 0x1cb   :  { %3130 = vrot.lane.b32.xlu1 %v12695_v42, %s16654_s22  ;;  %5394 = vmatmul.mubr.bf16.vlgmr.msra.gmra.mrb[4].mxu0 %v12495_v0  ;;  %v13045_v0 = vld [vmem:[%s16588_s0 + $0x24] ss:$80 sps:$4 sm:$0xff]  }
 0x1cc   :  { %5415 = vmatpush1.bf16.msra.mxu1 %v1067_v35  ;;  %5491 = vmatpush1.bf16.msra.mxu0 %v12604_v45  ;;  %v13035_v43 = vpop.permute.xlu0 %282  ;;  %v309_v45 = vsel %vm300_vm0, %v12931_v55, %v281_v51 }
 0x1cd   :  { %v1227_v41 = vpop.permute.xlu1 %1226  ;;  %v310_v48 = vsel %vm300_vm0, %v281_v51, %v13035_v43  ;;  %5522 = vmatprep.mubr.bf16.mxu0 %v12946_v32 }
 0x1ce   :  { %3132 = vrot.lane.b32.xlu0 %v12708_v53, %s16654_s22  ;;  %5492 = vmatprep.subr.bf16.mxu0 %v310_v48  ;;  %v1257_v57 = vsel %vm1250_vm5, %v12635_v5, %v1227_v41 }
 0x1cf   :  { %4012 = vrot.lane.b32.xlu1 %v11769_v36, %s16640_s21 }
 0x1d0   :  { %5493 = vmatpush1.bf16.msra.mxu0 %v309_v45  ;;  %v13050_v52 = vpop.permute.xlu0 %1228 }
 0x1d1   :  { %v471_v22 = vpop.permute.xlu1 %470  ;;  %v1258_v19 = vsel %vm1250_vm5, %v1227_v41, %v13050_v52 }
 0x1d2   :  { %4014 = vrot.lane.b32.xlu0 %v13045_v0, %s16640_s21  ;;  %5416 = vmatprep.subr.bf16.mxu1 %v1258_v19  ;;  %v499_v58 = vsel %vm490_vm1, %v12959_v63, %v471_v22 }
 0x1d3   :  { %3320 = vrot.lane.b32.xlu1 %v12695_v42, %s16655_s23  ;;  %5417 = vmatpush1.bf16.msra.mxu1 %v1257_v57 }
 0x1d4   :  { %v13060_v46 = vpop.permute.xlu0 %472 }
 0x1d5   :  { %v1417_v55 = vpop.permute.xlu1 %1416  ;;  %v500_v50 = vsel %vm490_vm1, %v471_v22, %v13060_v46 }
 0x1d6   :  { %3322 = vrot.lane.b32.xlu0 %v12708_v53, %s16655_s23  ;;  %5494 = vmatprep.subr.bf16.mxu0 %v500_v50  ;;  %v1447_v60 = vsel %vm1440_vm6, %v12654_v3, %v1417_v55 }
 0x1d7   :  { %4201 = vrot.lane.b32.xlu1 %v11769_v36, %s16636_s24  ;;  %5495 = vmatpush1.bf16.msra.mxu0 %v499_v58 }
 0x1d8   :  { %v13069_v5 = vpop.permute.xlu0 %1418 }
 0x1d9   :  { %v661_v54 = vpop.permute.xlu1 %660  ;;  %v1448_v59 = vsel %vm1440_vm6, %v1417_v55, %v13069_v5 }
 0x1da   :  { %4203 = vrot.lane.b32.xlu0 %v13045_v0, %s16636_s24  ;;  %5418 = vmatprep.subr.bf16.mxu1 %v1448_v59  ;;  %v689_v10 = vsel %vm680_vm2, %v12979_v38, %v661_v54 }
 0x1db   :  { %3510 = vrot.lane.b32.xlu1 %v12695_v42, %s16656_s19  ;;  %5419 = vmatpush1.bf16.msra.mxu1 %v1447_v60 }
 0x1dc   :  { %v13079_v1 = vpop.permute.xlu0 %662 }
 0x1dd   :  { %v1607_v63 = vpop.permute.xlu1 %1606  ;;  %v690_v6 = vsel %vm680_vm2, %v661_v54, %v13079_v1 }
 0x1de   :  { %3512 = vrot.lane.b32.xlu0 %v12708_v53, %s16656_s19  ;;  %5496 = vmatprep.subr.bf16.mxu0 %v690_v6  ;;  %v1637_v16 = vsel %vm16676_vm8, %v12673_v37, %v1607_v63  ;;  %v13110_v37 = vld [vmem:[%s16588_s0 + $0x2c] ss:$80 sps:$4 sm:$0xff]  }
 0x1df   :  { %4390 = vrot.lane.b32.xlu1 %v11769_v36, %s16638_s25  ;;  %5497 = vmatpush1.bf16.msra.mxu0 %v689_v10 }
 0x1e0   :  { %v13088_v3 = vpop.permute.xlu0 %1608 }
 0x1e1   :  { %v851_v25 = vpop.permute.xlu1 %850  ;;  %v1638_v14 = vsel %vm16675_vm7, %v1607_v63, %v13088_v3  ;;  %vm16677_vm7 = vcmask 752640  }
 0x1e2   :  { %4392 = vrot.lane.b32.xlu0 %v13045_v0, %s16638_s25  ;;  %5420 = vmatprep.subr.bf16.mxu1 %v1638_v14  ;;  %v879_v18 = vsel %vm870_vm3, %v12999_v21, %v851_v25  ;;  %vm16678_vm8 = vmmov %vm16677_vm7 }
 0x1e3   :  { %3700 = vrot.lane.b32.xlu1 %v12695_v42, %s16674_s14  ;;  %5421 = vmatpush1.bf16.msra.mxu1 %v1637_v16 }
 0x1e4   :  { %v13098_v7 = vpop.permute.xlu0 %852 }
 0x1e5   :  { %v1797_v38 = vpop.permute.xlu1 %1796  ;;  %v880_v13 = vsel %vm870_vm3, %v851_v25, %v13098_v7 }
 0x1e6   :  { %3702 = vrot.lane.b32.xlu0 %v12708_v53, %s16674_s14  ;;  %5498 = vmatprep.subr.bf16.mxu0 %v880_v13  ;;  %v1827_v53 = vsel %vm16678_vm8, %v12697_v47, %v1797_v38 }
 0x1e7   :  { %4579 = vrot.lane.b32.xlu1 %v11769_v36, %s16634_s26  ;;  %5499 = vmatpush1.bf16.msra.mxu0 %v879_v18 }
 0x1e8   :  { %v13112_v42 = vpop.permute.xlu0 %1798 }
 0x1e9   :  { %v1041_v40 = vpop.permute.xlu1 %1040  ;;  %v1828_v8 = vsel %vm16677_vm7, %v1797_v38, %v13112_v42  ;;  %vm16679_vm7 = vcmask 760832   ;;  %v13227_v38 = vld [vmem:[%s16588_s0 + $0x38] ss:$80 sps:$4 sm:$0xff]  }
 0x1ea   :  { %4581 = vrot.lane.b32.xlu0 %v13045_v0, %s16634_s26  ;;  %5422 = vmatprep.subr.bf16.mxu1 %v1828_v8  ;;  %v1069_v24 = vsel %vm1060_vm4, %v13019_v33, %v1041_v40  ;;  %vm16680_vm8 = vmmov %vm16679_vm7 }
 0x1eb   :  { %284 = vrot.lane.b32.xlu1 %v13110_v37, %s16640_s21  ;;  %5423 = vmatpush1.bf16.msra.mxu1 %v1827_v53 }
 0x1ec   :  { %v13132_v21 = vpop.permute.xlu0 %1042 }
 0x1ed   :  { %v1987_v23 = vpop.permute.xlu1 %1986  ;;  %v1070_v47 = vsel %vm1060_vm4, %v1041_v40, %v13132_v21 }
 0x1ee   :  { %286 = vrot.lane.b32.xlu0 %v13123_v12, %s16640_s21  ;;  %5500 = vmatprep.subr.bf16.mxu0 %v1070_v47  ;;  %v2017_v33 = vsel %vm2010_vm9, %v12722_v27, %v1987_v23 }
 0x1ef   :  { %4016 = vrot.lane.b32.xlu1 %v13130_v9, %s16640_s21  ;;  %5501 = vmatpush1.bf16.msra.mxu0 %v1069_v24 }
 0x1f0   :  { %v13145_v26 = vpop.permute.xlu0 %1988 }
 0x1f1   :  { %v1231_v29 = vpop.permute.xlu1 %1230  ;;  %v2018_v30 = vsel %vm2010_vm9, %v1987_v23, %v13145_v26 }
 0x1f2   :  { %4018 = vrot.lane.b32.xlu0 %v11776_v17, %s16640_s21  ;;  %5424 = vmatprep.subr.bf16.mxu1 %v2018_v30  ;;  %v1259_v36 = vsel %vm1250_vm5, %v13050_v52, %v1231_v29 }
 0x1f3   :  { %474 = vrot.lane.b32.xlu1 %v13110_v37, %s16636_s24  ;;  %5425 = vmatpush1.bf16.msra.mxu1 %v2017_v33 }
 0x1f4   :  { %v13154_v51 = vpop.permute.xlu0 %1232 }
 0x1f5   :  { %v2177_v34 = vpop.permute.xlu1 %2176  ;;  %v1260_v35 = vsel %vm1250_vm5, %v1231_v29, %v13154_v51 }
 0x1f6   :  { %476 = vrot.lane.b32.xlu0 %v13123_v12, %s16636_s24  ;;  %5502 = vmatprep.subr.bf16.mxu0 %v1260_v35  ;;  %v2207_v45 = vsel %vm2200_vm10, %v12742_v62, %v2177_v34  ;;  %v13276_v35 = vld [vmem:[%s16589_s1] ss:$16 sps:$4 sm:$0xff]  }
 0x1f7   :  { %4205 = vrot.lane.b32.xlu1 %v13130_v9, %s16636_s24  ;;  %5503 = vmatpush1.bf16.msra.mxu0 %v1259_v36 }
 0x1f8   :  { %v13164_v27 = vpop.permute.xlu0 %2178 }
 0x1f9   :  { %v1421_v41 = vpop.permute.xlu1 %1420  ;;  %v2208_v48 = vsel %vm2200_vm10, %v2177_v34, %v13164_v27 }
 0x1fa   :  { %4207 = vrot.lane.b32.xlu0 %v11776_v17, %s16636_s24  ;;  %5426 = vmatprep.subr.bf16.mxu1 %v2208_v48  ;;  %v1449_v57 = vsel %vm1440_vm6, %v13069_v5, %v1421_v41 }
 0x1fb   :  { %664 = vrot.lane.b32.xlu1 %v13110_v37, %s16638_s25  ;;  %5427 = vmatpush1.bf16.msra.mxu1 %v2207_v45 }
 0x1fc   :  { %v13173_v52 = vpop.permute.xlu0 %1422 }
 0x1fd   :  { %v2367_v22 = vpop.permute.xlu1 %2366  ;;  %v1450_v19 = vsel %vm1440_vm6, %v1421_v41, %v13173_v52 }
 0x1fe   :  { %666 = vrot.lane.b32.xlu0 %v13123_v12, %s16638_s25  ;;  %5504 = vmatprep.subr.bf16.mxu0 %v1450_v19  ;;  %v2397_v58 = vsel %vm2390_vm11, %v12765_v20, %v2367_v22 }
 0x1ff   :  { %4394 = vrot.lane.b32.xlu1 %v13130_v9, %s16638_s25  ;;  %5505 = vmatpush1.bf16.msra.mxu0 %v1449_v57 }
 0x200   :  { %v13183_v62 = vpop.permute.xlu0 %2368 }
 0x201   :  { %v1611_v55 = vpop.permute.xlu1 %1610  ;;  %v2398_v50 = vsel %vm2390_vm11, %v2367_v22, %v13183_v62 }
 0x202   :  { %4396 = vrot.lane.b32.xlu0 %v11776_v17, %s16638_s25  ;;  %5428 = vmatprep.subr.bf16.mxu1 %v2398_v50  ;;  %v1639_v60 = vsel %vm16680_vm8, %v13088_v3, %v1611_v55  ;;  %v13214_v3 = vld [vmem:[%s16588_s0 + $0x34] ss:$80 sps:$4 sm:$0xff]  }
 0x203   :  { %854 = vrot.lane.b32.xlu1 %v13110_v37, %s16634_s26  ;;  %5429 = vmatpush1.bf16.msra.mxu1 %v2397_v58 }
 0x204   :  { %v13192_v5 = vpop.permute.xlu0 %1612 }
 0x205   :  { %v2557_v54 = vpop.permute.xlu1 %2556  ;;  %v1640_v59 = vsel %vm16679_vm7, %v1611_v55, %v13192_v5  ;;  %vm16682_vm7 = vcmask 752640  }
 0x206   :  { %856 = vrot.lane.b32.xlu0 %v13123_v12, %s16634_s26  ;;  %5506 = vmatprep.subr.bf16.mxu0 %v1640_v59  ;;  %v2587_v10 = vsel %vm2580_vm12, %v12785_v2, %v2557_v54  ;;  %vm16683_vm8 = vmmov %vm16682_vm7 }
 0x207   :  { %4583 = vrot.lane.b32.xlu1 %v13130_v9, %s16634_s26  ;;  %5507 = vmatpush1.bf16.msra.mxu0 %v1639_v60 }
 0x208   :  { %v13202_v20 = vpop.permute.xlu0 %2558 }
 0x209   :  { %v1801_v63 = vpop.permute.xlu1 %1800  ;;  %v2588_v6 = vsel %vm2580_vm12, %v2557_v54, %v13202_v20 }
 0x20a   :  { %4585 = vrot.lane.b32.xlu0 %v11776_v17, %s16634_s26  ;;  %5430 = vmatprep.subr.bf16.mxu1 %v2588_v6  ;;  %v1829_v2 = vsel %vm16683_vm8, %v13112_v42, %v1801_v63  ;;  %s16688_s26 = smov 94  }
 0x20b   :  { %1044 = vrot.lane.b32.xlu1 %v13110_v37, %s16681_s29  ;;  %5431 = vmatpush1.bf16.msra.mxu1 %v2587_v10 }
 0x20c   :  { %v13216_v25 = vpop.permute.xlu0 %1802 }
 0x20d   :  { %v2747_v14 = vpop.permute.xlu1 %2746  ;;  %v1830_v16 = vsel %vm16682_vm7, %v1801_v63, %v13216_v25  ;;  %vm16684_vm7 = vcmask 490496  }
 0x20e   :  { %1046 = vrot.lane.b32.xlu0 %v13123_v12, %s16681_s29  ;;  %5508 = vmatprep.subr.bf16.mxu0 %v1830_v16  ;;  %vm16685_vm8 = vmmov %vm16684_vm7 }
 0x20f   :  { %288 = vrot.lane.b32.xlu1 %v13214_v3, %s16640_s21  ;;  %5509 = vmatpush1.bf16.msra.mxu0 %v1829_v2  ;;  %v2777_v42 = vsel %vm16685_vm8, %v12805_v11, %v2747_v14 }
 0x210   :  { %v13231_v13 = vpop.permute.xlu0 %2748 }
 0x211   :  { %v1991_v18 = vpop.permute.xlu1 %1990  ;;  %v2778_v40 = vsel %vm16684_vm7, %v2747_v14, %v13231_v13  ;;  %vm16686_vm7 = vcmask 261120  }
 0x212   :  { %290 = vrot.lane.b32.xlu0 %v13227_v38, %s16640_s21  ;;  %5432 = vmatprep.subr.bf16.mxu1 %v2778_v40  ;;  %v2019_v47 = vsel %vm2010_vm9, %v13145_v26, %v1991_v18  ;;  %vm16687_vm8 = vmmov %vm16686_vm7  ;;  %s16704_s21 = smov 125  }
 0x213   :  { %1234 = vrot.lane.b32.xlu1 %v13110_v37, %s16642_s28  ;;  %5433 = vmatpush1.bf16.msra.mxu1 %v2777_v42 }
 0x214   :  { %v13241_v8 = vpop.permute.xlu0 %1992 }
 0x215   :  { %v2937_v53 = vpop.permute.xlu1 %2936  ;;  %v2020_v23 = vsel %vm2010_vm9, %v1991_v18, %v13241_v8  ;;  %v11783_v18 = vld [vmem:[%s16588_s0 + $0x20] ss:$80 sps:$4 sm:$0xff]  }
 0x216   :  { %1236 = vrot.lane.b32.xlu0 %v13123_v12, %s16642_s28  ;;  %5510 = vmatprep.subr.bf16.mxu0 %v2020_v23  ;;  %v2967_v29 = vsel %vm16687_vm8, %v12828_v56, %v2937_v53  ;;  %vm16692_vm8 = vcmask 244736   ;;  %v11781_v23 = vld [vmem:[%s16588_s0 + $0x1c] ss:$80 sps:$4 sm:$0xff]  }
 0x217   :  { %478 = vrot.lane.b32.xlu1 %v13214_v3, %s16636_s24  ;;  %5511 = vmatpush1.bf16.msra.mxu0 %v2019_v47 }
 0x218   :  { %v13251_v11 = vpop.permute.xlu0 %2938 }
 0x219   :  { %v2181_v24 = vpop.permute.xlu1 %2180  ;;  %v2968_v17 = vsel %vm16686_vm7, %v2937_v53, %v13251_v11  ;;  %vm16689_vm7 = vcmask 130048  }
 0x21a   :  { %480 = vrot.lane.b32.xlu0 %v13227_v38, %s16636_s24  ;;  %5434 = vmatprep.subr.bf16.mxu1 %v2968_v17  ;;  %v2209_v34 = vsel %vm2200_vm10, %v13164_v27, %v2181_v24  ;;  %v13284_v27 = vld [vmem:[%s16589_s1 + $0xc] ss:$16 sps:$4 sm:$0xff]   ;;  %s16691_s24 = smov 124  }
 0x21b   :  { %1424 = vrot.lane.b32.xlu1 %v13110_v37, %s16688_s26  ;;  %5435 = vmatpush1.bf16.msra.mxu1 %v2967_v29 }
 0x21c   :  { %v13261_v26 = vpop.permute.xlu0 %2182 }
 0x21d   :  { %v3127_v30 = vpop.permute.xlu1 %3126  ;;  %v2210_v33 = vsel %vm2200_vm10, %v2181_v24, %v13261_v26 }
 0x21e   :  { %1426 = vrot.lane.b32.xlu0 %v13123_v12, %s16688_s26  ;;  %5512 = vmatprep.subr.bf16.mxu0 %v2210_v33  ;;  %v3157_v48 = vsel %vm3150_vm15, %v12841_v4, %v3127_v30 }
 0x21f   :  { %668 = vrot.lane.b32.xlu1 %v13214_v3, %s16638_s25  ;;  %5513 = vmatpush1.bf16.msra.mxu0 %v2209_v34 }
 0x220   :  { %v13271_v56 = vpop.permute.xlu0 %3128  ;;  %5437 = vmatmul.mubr.bf16.vlgmr.msra.gmra.mrb[4].mxu1 %v13276_v35 }
 0x221   :  { %v2371_v36 = vpop.permute.xlu1 %2370  ;;  %v3158_v41 = vsel %vm3150_vm15, %v3127_v30, %v13271_v56  ;;  %11365 = vmatprep.mubr.msk.bf16.mxu1 %vm16689_vm7, %v13284_v27  ;;  %vm16693_vm7 = vmmov %vm16692_vm8 }
 0x222   :  { %670 = vrot.lane.b32.xlu0 %v13227_v38, %s16638_s25  ;;  %5447 = vmatprep.subr.bf16.mxu1 %v3158_v41  ;;  %v2399_v57 = vsel %vm2390_vm11, %v13183_v62, %v2371_v36  ;;  %s16703_s25 = smov 126  }
 0x223   :  { %1614 = vrot.lane.b32.xlu1 %v13110_v37, %s16690_s18  ;;  %5448 = vmatpush1.bf16.msra.mxu1 %v3157_v48 }
 0x224   :  { %v13294_v45 = vpop.permute.xlu0 %2372 }
 0x225   :  { %v3317_v22 = vpop.permute.xlu1 %3316  ;;  %v2400_v19 = vsel %vm2390_vm11, %v2371_v36, %v13294_v45 }
 0x226   :  { %1616 = vrot.lane.b32.xlu0 %v13123_v12, %s16690_s18  ;;  %5514 = vmatprep.subr.bf16.mxu0 %v2400_v19  ;;  %v3347_v58 = vsel %vm16693_vm7, %v12864_v31, %v3317_v22 }
 0x227   :  { %858 = vrot.lane.b32.xlu1 %v13214_v3, %s16691_s24  ;;  %5515 = vmatpush1.bf16.msra.mxu0 %v2399_v57 }
 0x228   :  { %v13304_v4 = vpop.permute.xlu0 %3318 }
 0x229   :  { %v2561_v55 = vpop.permute.xlu1 %2560  ;;  %v3348_v50 = vsel %vm16692_vm8, %v3317_v22, %v13304_v4  ;;  %vm16695_vm8 = vcmask 490496  }
 0x22a   :  { %860 = vrot.lane.b32.xlu0 %v13227_v38, %s16691_s24  ;;  %5449 = vmatprep.subr.bf16.mxu1 %v3348_v50  ;;  %v2589_v60 = vsel %vm2580_vm12, %v13202_v20, %v2561_v55  ;;  %vm16696_vm7 = vmmov %vm16695_vm8 }
 0x22b   :  { %1804 = vrot.lane.b32.xlu1 %v13110_v37, %s16694_s30  ;;  %5450 = vmatpush1.bf16.msra.mxu1 %v3347_v58 }
 0x22c   :  { %v13314_v62 = vpop.permute.xlu0 %2562 }
 0x22d   :  { %v3507_v54 = vpop.permute.xlu1 %3506  ;;  %v2590_v59 = vsel %vm2580_vm12, %v2561_v55, %v13314_v62 }
 0x22e   :  { %1806 = vrot.lane.b32.xlu0 %v13123_v12, %s16694_s30  ;;  %5516 = vmatprep.subr.bf16.mxu0 %v2590_v59  ;;  %v3537_v10 = vsel %vm3530_vm14, %v12884_v39, %v3507_v54 }
 0x22f   :  { %1048 = vrot.lane.b32.xlu1 %v13214_v3, %s16681_s29  ;;  %5517 = vmatpush1.bf16.msra.mxu0 %v2589_v60 }
 0x230   :  { %v13324_v31 = vpop.permute.xlu0 %3508 }
 0x231   :  { %v2751_v63 = vpop.permute.xlu1 %2750  ;;  %v3538_v6 = vsel %vm3530_vm14, %v3507_v54, %v13324_v31 }
 0x232   :  { %1050 = vrot.lane.b32.xlu0 %v13227_v38, %s16681_s29  ;;  %5451 = vmatprep.subr.bf16.mxu1 %v3538_v6  ;;  %v2779_v2 = vsel %vm16696_vm7, %v13231_v13, %v2751_v63 }
 0x233   :  { %1994 = vrot.lane.b32.xlu1 %v13110_v37, %s16664_s13  ;;  %5452 = vmatpush1.bf16.msra.mxu1 %v3537_v10  ;;  %v11923_v10 = vmov 0  }
 0x234   :  { %v13334_v20 = vpop.permute.xlu0 %2752  ;;  %11724 = vset.pattern.permute.xlu1 %v11923_v10  ;;  %11725 = vset.pattern.permute.xlu0 %v11923_v10 }
 0x235   :  { %v3697_v14 = vpop.permute.xlu1 %3696  ;;  %v2780_v16 = vsel %vm16695_vm8, %v2751_v63, %v13334_v20  ;;  %vm16697_vm8 = vcmask 261120  }
 0x236   :  { %1996 = vrot.lane.b32.xlu0 %v13123_v12, %s16664_s13  ;;  %5518 = vmatprep.subr.bf16.mxu0 %v2780_v16  ;;  %v3727_v13 = vsel %vm3720_vm13, %v12904_v49, %v3697_v14  ;;  %vm16698_vm7 = vmmov %vm16697_vm8 }
 0x237   :  { %1238 = vrot.lane.b32.xlu1 %v13214_v3, %s16642_s28  ;;  %5519 = vmatpush1.bf16.msra.mxu0 %v2779_v2 }
 0x238   :  { %v13344_v39 = vpop.permute.xlu0 %3698 }
 0x239   :  { %v2941_v40 = vpop.permute.xlu1 %2940  ;;  %v3728_v42 = vsel %vm3720_vm13, %v3697_v14, %v13344_v39 }
 0x23a   :  { %1240 = vrot.lane.b32.xlu0 %v13227_v38, %s16642_s28  ;;  %5453 = vmatprep.subr.bf16.mxu1 %v3728_v42  ;;  %v2969_v49 = vsel %vm16698_vm7, %v13251_v11, %v2941_v40  ;;  %vm16700_vm7 = vcmask 244736   ;;  %s16702_s28 = smov 127  }
 0x23b   :  { %2184 = vrot.lane.b32.xlu1 %v13110_v37, %s16667_s15  ;;  %5454 = vmatpush1.bf16.msra.mxu1 %v3727_v13 }
 0x23c   :  { %v13357_v53 = vpop.permute.xlu0 %2942  ;;  %5455 = vmatprep.subr.bf16.mxu1 %v11783_v18  ;;  %v11786_v18 = vld [vmem:[%s16588_s0 + $0x2c] ss:$80 sps:$4 sm:$0xff]  }
 0x23d   :  { %v3131_v47 = vpop.permute.xlu1 %3130  ;;  %v2970_v24 = vsel %vm16697_vm8, %v2941_v40, %v13357_v53  ;;  %vm16699_vm8 = vcmask 130048  }
 0x23e   :  { %2186 = vrot.lane.b32.xlu0 %v13123_v12, %s16667_s15  ;;  %5520 = vmatprep.subr.bf16.mxu0 %v2970_v24  ;;  %v3159_v11 = vsel %vm3150_vm15, %v13271_v56, %v3131_v47 }
 0x23f   :  { %1428 = vrot.lane.b32.xlu1 %v13214_v3, %s16688_s26  ;;  %5521 = vmatpush1.bf16.msra.mxu0 %v2969_v49 }
 0x240   :  { %v13370_v17 = vpop.permute.xlu0 %3132  ;;  %5456 = vmatpush1.bf16.msra.mxu1 %v11781_v23 }
 0x241   :  { %v4013_v29 = vpop.permute.xlu1 %4012  ;;  %v3160_v30 = vsel %vm3150_vm15, %v3131_v47, %v13370_v17  ;;  %v13465_v47 = vpop.f32.mrb[0].mxu0 }
 0x242   :  { %1430 = vrot.lane.b32.xlu0 %v13227_v38, %s16688_s26  ;;  %5533 = vmatprep.subr.bf16.mxu0 %v3160_v30  ;;  %v4042_v41 = vsel %vm300_vm0, %v12941_v44, %v4013_v29  ;;  %v13475_v24 = vpop.f32.mrb[1].mxu0 }
 0x243   :  { %2374 = vrot.lane.b32.xlu1 %v13110_v37, %s16670_s27  ;;  %5523 = vmatmul.mubr.bf16.vlgmr.msra.gmra.mrb[8].mxu0 %v13276_v35  ;;  %v13481_v49 = vpop.f32.mrb[2].mxu0 }
 0x244   :  { %5534 = vmatpush1.bf16.msra.mxu0 %v3159_v11  ;;  %v13381_v33 = vpop.permute.xlu0 %4014  ;;  %11366 = vmatprep.mubr.msk.bf16.mxu0 %vm16699_vm8, %v13284_v27  ;;  %vm16701_vm8 = vmmov %vm16700_vm7  ;;  %v13486_v30 = vpop.f32.mrb[3].mxu0 }
 0x245   :  { %v3321_v34 = vpop.permute.xlu1 %3320  ;;  %v4043_v36 = vsel %vm300_vm0, %v4013_v29, %v13381_v33 }
 0x246   :  { %2376 = vrot.lane.b32.xlu0 %v13123_v12, %s16670_s27  ;;  %5457 = vmatprep.subr.bf16.mxu1 %v4043_v36  ;;  %v3349_v19 = vsel %vm16701_vm8, %v13304_v4, %v3321_v34 }
 0x247   :  { %1618 = vrot.lane.b32.xlu1 %v13214_v3, %s16690_s18  ;;  %5458 = vmatpush1.bf16.msra.mxu1 %v4042_v41 }
 0x248   :  { %v13393_v56 = vpop.permute.xlu0 %3322 }
 0x249   :  { %v4202_v48 = vpop.permute.xlu1 %4201  ;;  %v3350_v22 = vsel %vm16700_vm7, %v3321_v34, %v13393_v56  ;;  %vm16705_vm7 = vcmask 760832  }
 0x24a   :  { %1620 = vrot.lane.b32.xlu0 %v13227_v38, %s16690_s18  ;;  %5535 = vmatprep.subr.bf16.mxu0 %v3350_v22  ;;  %v4231_v50 = vsel %vm490_vm1, %v12969_v15, %v4202_v48  ;;  %vm16706_vm8 = vmmov %vm16705_vm7 }
 0x24b   :  { %2564 = vrot.lane.b32.xlu1 %v13110_v37, %s16651_s17  ;;  %5536 = vmatpush1.bf16.msra.mxu0 %v3349_v19 }
 0x24c   :  { %v13403_v44 = vpop.permute.xlu0 %4203 }
 0x24d   :  { %v3511_v57 = vpop.permute.xlu1 %3510  ;;  %v4232_v55 = vsel %vm490_vm1, %v4202_v48, %v13403_v44 }
 0x24e   :  { %2566 = vrot.lane.b32.xlu0 %v13123_v12, %s16651_s17  ;;  %5459 = vmatprep.subr.bf16.mxu1 %v4232_v55  ;;  %v3539_v59 = vsel %vm3530_vm14, %v13324_v31, %v3511_v57 }
 0x24f   :  { %1808 = vrot.lane.b32.xlu1 %v13214_v3, %s16694_s30  ;;  %5460 = vmatpush1.bf16.msra.mxu1 %v4231_v50 }
 0x250   :  { %v13413_v4 = vpop.permute.xlu0 %3512 }
 0x251   :  { %v4391_v58 = vpop.permute.xlu1 %4390  ;;  %v3540_v54 = vsel %vm3530_vm14, %v3511_v57, %v13413_v4 }
 0x252   :  { %1810 = vrot.lane.b32.xlu0 %v13227_v38, %s16694_s30  ;;  %5537 = vmatprep.subr.bf16.mxu0 %v3540_v54  ;;  %v4420_v6 = vsel %vm680_vm2, %v12989_v61, %v4391_v58 }
 0x253   :  { %2754 = vrot.lane.b32.xlu1 %v13110_v37, %s16652_s20  ;;  %5538 = vmatpush1.bf16.msra.mxu0 %v3539_v59 }
 0x254   :  { %v13423_v15 = vpop.permute.xlu0 %4392 }
 0x255   :  { %v3701_v60 = vpop.permute.xlu1 %3700  ;;  %v4421_v63 = vsel %vm680_vm2, %v4391_v58, %v13423_v15 }
 0x256   :  { %2756 = vrot.lane.b32.xlu0 %v13123_v12, %s16652_s20  ;;  %5461 = vmatprep.subr.bf16.mxu1 %v4421_v63  ;;  %v3729_v61 = vsel %vm3720_vm13, %v13344_v39, %v3701_v60 }
 0x257   :  { %1998 = vrot.lane.b32.xlu1 %v13214_v3, %s16664_s13  ;;  %5462 = vmatpush1.bf16.msra.mxu1 %v4420_v6 }
 0x258   :  { %v13433_v31 = vpop.permute.xlu0 %3702 }
 0x259   :  { %v4580_v14 = vpop.permute.xlu1 %4579  ;;  %v3730_v16 = vsel %vm3720_vm13, %v3701_v60, %v13433_v31 }
 0x25a   :  { %2000 = vrot.lane.b32.xlu0 %v13227_v38, %s16664_s13  ;;  %5539 = vmatprep.subr.bf16.mxu0 %v3730_v16  ;;  %v4609_v39 = vsel %vm870_vm3, %v13009_v28, %v4580_v14  ;;  %v13472_v28 = vld [vmem:[%s16589_s1 + $0x8] ss:$16 sps:$4 sm:$0xff]  }
 0x25b   :  { %2944 = vrot.lane.b32.xlu1 %v13110_v37, %s16653_s16  ;;  %5540 = vmatpush1.bf16.msra.mxu0 %v3729_v61 }
 0x25c   :  { %v13445_v2 = vpop.permute.xlu0 %4581  ;;  %5541 = vmatprep.subr.bf16.mxu0 %v13130_v9  ;;  %v11784_v9 = vld [vmem:[%s16588_s0 + $0x28] ss:$80 sps:$4 sm:$0xff]  }
 0x25d   :  { %v285_v40 = vpop.permute.xlu1 %284  ;;  %v4610_v42 = vsel %vm870_vm3, %v4580_v14, %v13445_v2 }
 0x25e   :  { %2946 = vrot.lane.b32.xlu0 %v13123_v12, %s16653_s16  ;;  %5463 = vmatprep.subr.bf16.mxu1 %v4610_v42  ;;  %v311_v41 = vsel %vm300_vm0, %v13035_v43, %v285_v40 }
 0x25f   :  { %2188 = vrot.lane.b32.xlu1 %v13214_v3, %s16667_s15  ;;  %5464 = vmatpush1.bf16.msra.mxu1 %v4609_v39 }
 0x260   :  { %v13462_v13 = vpop.permute.xlu0 %286  ;;  %5576 = vmatprep.subr.bf16.mxu1 %v11786_v18  ;;  %5542 = vmatpush1.bf16.msra.mxu0 %v13045_v0 }
 0x261   :  { %v4017_v23 = vpop.permute.xlu1 %4016  ;;  %v312_v0 = vsel %vm300_vm0, %v285_v40, %v13462_v13 }
 0x262   :  { %2190 = vrot.lane.b32.xlu0 %v13227_v38, %s16667_s15  ;;  %5480 = vmatmul.mubr.bf16.vlgmr.msra.gmra.mrb[4].mxu1 %v13472_v28  ;;  %v4044_v36 = vsel %vm300_vm0, %v13381_v33, %v4017_v23 }
 0x263   :  { %3134 = vrot.lane.b32.xlu1 %v13110_v37, %s16654_s22  ;;  %5577 = vmatpush1.bf16.msra.mxu1 %v11784_v9  ;;  %v11787_v9 = vld [vmem:[%s16588_s0 + $0x30] ss:$80 sps:$4 sm:$0xff]  }
 0x264   :  { %v13483_v29 = vpop.permute.xlu0 %4018  ;;  %5578 = vmatprep.subr.bf16.mxu1 %v312_v0  ;;  %5608 = vmatprep.mubr.bf16.mxu1 %v12946_v32 }
 0x265   :  { %v475_v11 = vpop.permute.xlu1 %474  ;;  %v4045_v34 = vsel %vm300_vm0, %v4017_v23, %v13483_v29 }
 0x266   :  { %3136 = vrot.lane.b32.xlu0 %v13123_v12, %s16654_s22  ;;  %5543 = vmatprep.subr.bf16.mxu0 %v4045_v34  ;;  %v501_v33 = vsel %vm490_vm1, %v13060_v46, %v475_v11 }
 0x267   :  { %2378 = vrot.lane.b32.xlu1 %v13214_v3, %s16670_s27  ;;  %5544 = vmatpush1.bf16.msra.mxu0 %v4044_v36 }
 0x268   :  { %5579 = vmatpush1.bf16.msra.mxu1 %v311_v41  ;;  %v13498_v48 = vpop.permute.xlu0 %476 }
 0x269   :  { %v4206_v22 = vpop.permute.xlu1 %4205  ;;  %v502_v19 = vsel %vm490_vm1, %v475_v11, %v13498_v48 }
 0x26a   :  { %2380 = vrot.lane.b32.xlu0 %v13227_v38, %s16670_s27  ;;  %5580 = vmatprep.subr.bf16.mxu1 %v502_v19  ;;  %v4233_v50 = vsel %vm490_vm1, %v13403_v44, %v4206_v22 }
 0x26b   :  { %3324 = vrot.lane.b32.xlu1 %v13110_v37, %s16655_s23 }
 0x26c   :  { %5581 = vmatpush1.bf16.msra.mxu1 %v501_v33  ;;  %v13508_v57 = vpop.permute.xlu0 %4207 }
 0x26d   :  { %v665_v43 = vpop.permute.xlu1 %664  ;;  %v4234_v55 = vsel %vm490_vm1, %v4206_v22, %v13508_v57 }
 0x26e   :  { %3326 = vrot.lane.b32.xlu0 %v13123_v12, %s16655_s23  ;;  %5545 = vmatprep.subr.bf16.mxu0 %v4234_v55  ;;  %v691_v59 = vsel %vm680_vm2, %v13079_v1, %v665_v43 }
 0x26f   :  { %2568 = vrot.lane.b32.xlu1 %v13214_v3, %s16651_s17  ;;  %5546 = vmatpush1.bf16.msra.mxu0 %v4233_v50 }
 0x270   :  { %v13518_v58 = vpop.permute.xlu0 %666 }
 0x271   :  { %v4395_v46 = vpop.permute.xlu1 %4394  ;;  %v692_v54 = vsel %vm680_vm2, %v665_v43, %v13518_v58 }
 0x272   :  { %2570 = vrot.lane.b32.xlu0 %v13227_v38, %s16651_s17  ;;  %5582 = vmatprep.subr.bf16.mxu1 %v692_v54  ;;  %v4422_v6 = vsel %vm680_vm2, %v13423_v15, %v4395_v46 }
 0x273   :  { %3514 = vrot.lane.b32.xlu1 %v13110_v37, %s16656_s19  ;;  %5583 = vmatpush1.bf16.msra.mxu1 %v691_v59 }
 0x274   :  { %v13528_v44 = vpop.permute.xlu0 %4396 }
 0x275   :  { %v855_v60 = vpop.permute.xlu1 %854  ;;  %v4423_v63 = vsel %vm680_vm2, %v4395_v46, %v13528_v44 }
 0x276   :  { %3516 = vrot.lane.b32.xlu0 %v13123_v12, %s16656_s19  ;;  %5547 = vmatprep.subr.bf16.mxu0 %v4423_v63  ;;  %v881_v61 = vsel %vm870_vm3, %v13098_v7, %v855_v60 }
 0x277   :  { %2758 = vrot.lane.b32.xlu1 %v13214_v3, %s16652_s20  ;;  %5548 = vmatpush1.bf16.msra.mxu0 %v4422_v6 }
 0x278   :  { %v13538_v1 = vpop.permute.xlu0 %856 }
 0x279   :  { %v4584_v14 = vpop.permute.xlu1 %4583  ;;  %v882_v16 = vsel %vm870_vm3, %v855_v60, %v13538_v1 }
 0x27a   :  { %2760 = vrot.lane.b32.xlu0 %v13227_v38, %s16652_s20  ;;  %5584 = vmatprep.subr.bf16.mxu1 %v882_v16  ;;  %v4611_v42 = vsel %vm870_vm3, %v13445_v2, %v4584_v14 }
 0x27b   :  { %3704 = vrot.lane.b32.xlu1 %v13110_v37, %s16674_s14  ;;  %5585 = vmatpush1.bf16.msra.mxu1 %v881_v61 }
 0x27c   :  { %v13548_v15 = vpop.permute.xlu0 %4585 }
 0x27d   :  { %v1045_v18 = vpop.permute.xlu1 %1044  ;;  %v4612_v40 = vsel %vm870_vm3, %v4584_v14, %v13548_v15 }
 0x27e   :  { %3706 = vrot.lane.b32.xlu0 %v13123_v12, %s16674_s14  ;;  %5549 = vmatprep.subr.bf16.mxu0 %v4612_v40  ;;  %v1071_v2 = vsel %vm1060_vm4, %v13132_v21, %v1045_v18  ;;  %v13584_v21 = vld [vmem:[%s16588_s0 + $0x34] ss:$80 sps:$4 sm:$0xff]  }
 0x27f   :  { %2948 = vrot.lane.b32.xlu1 %v13214_v3, %s16653_s16  ;;  %5550 = vmatpush1.bf16.msra.mxu0 %v4611_v42  ;;  %v13669_v42 = vld [vmem:[%s16588_s0 + $0x38] ss:$80 sps:$4 sm:$0xff]  }
 0x280   :  { %v13558_v7 = vpop.permute.xlu0 %1046  ;;  %5662 = vmatprep.subr.bf16.mxu0 %v13214_v3 }
 0x281   :  { %v289_v37 = vpop.permute.xlu1 %288  ;;  %v1072_v39 = vsel %vm1060_vm4, %v1045_v18, %v13558_v7 }
 0x282   :  { %2950 = vrot.lane.b32.xlu0 %v13227_v38, %s16653_s16  ;;  %5566 = vmatmul.mubr.bf16.vlgmr.msra.gmra.mrb[8].mxu0 %v13472_v28 }
 0x283   :  { %3138 = vrot.lane.b32.xlu1 %v13214_v3, %s16654_s22  ;;  %5586 = vmatprep.subr.bf16.mxu1 %v1072_v39 }
 0x284   :  { %5587 = vmatpush1.bf16.msra.mxu1 %v1071_v2  ;;  %5663 = vmatpush1.bf16.msra.mxu0 %v13123_v12  ;;  %v13574_v23 = vpop.permute.xlu0 %290  ;;  %v313_v12 = vsel %vm300_vm0, %v13462_v13, %v289_v37 }
 0x285   :  { %v1235_v0 = vpop.permute.xlu1 %1234  ;;  %v314_v11 = vsel %vm300_vm0, %v289_v37, %v13574_v23  ;;  %5694 = vmatprep.mubr.bf16.mxu0 %v12946_v32 }
 0x286   :  { %3140 = vrot.lane.b32.xlu0 %v13227_v38, %s16654_s22  ;;  %5664 = vmatprep.subr.bf16.mxu0 %v314_v11  ;;  %v1261_v41 = vsel %vm1250_vm5, %v13154_v51, %v1235_v0 }
 0x287   :  { %4020 = vrot.lane.b32.xlu1 %v11787_v9, %s16702_s28 }
 0x288   :  { %5665 = vmatpush1.bf16.msra.mxu0 %v313_v12  ;;  %v13589_v34 = vpop.permute.xlu0 %1236 }
 0x289   :  { %v479_v36 = vpop.permute.xlu1 %478  ;;  %v1262_v32 = vsel %vm1250_vm5, %v1235_v0, %v13589_v34 }
 0x28a   :  { %4022 = vrot.lane.b32.xlu0 %v13584_v21, %s16702_s28  ;;  %5588 = vmatprep.subr.bf16.mxu1 %v1262_v32  ;;  %v503_v33 = vsel %vm490_vm1, %v13498_v48, %v479_v36 }
 0x28b   :  { %3328 = vrot.lane.b32.xlu1 %v13214_v3, %s16655_s23  ;;  %5589 = vmatpush1.bf16.msra.mxu1 %v1261_v41 }
 0x28c   :  { %v13599_v22 = vpop.permute.xlu0 %480 }
 0x28d   :  { %v1425_v13 = vpop.permute.xlu1 %1424  ;;  %v504_v19 = vsel %vm490_vm1, %v479_v36, %v13599_v22 }
 0x28e   :  { %3330 = vrot.lane.b32.xlu0 %v13227_v38, %s16655_s23  ;;  %5666 = vmatprep.subr.bf16.mxu0 %v504_v19  ;;  %v1451_v50 = vsel %vm1440_vm6, %v13173_v52, %v1425_v13 }
 0x28f   :  { %4209 = vrot.lane.b32.xlu1 %v11787_v9, %s16703_s25  ;;  %5667 = vmatpush1.bf16.msra.mxu0 %v503_v33 }
 0x290   :  { %v13608_v51 = vpop.permute.xlu0 %1426 }
 0x291   :  { %v669_v43 = vpop.permute.xlu1 %668  ;;  %v1452_v55 = vsel %vm1440_vm6, %v1425_v13, %v13608_v51 }
 0x292   :  { %4211 = vrot.lane.b32.xlu0 %v13584_v21, %s16703_s25  ;;  %5590 = vmatprep.subr.bf16.mxu1 %v1452_v55  ;;  %v693_v59 = vsel %vm680_vm2, %v13518_v58, %v669_v43 }
 0x293   :  { %3518 = vrot.lane.b32.xlu1 %v13214_v3, %s16656_s19  ;;  %5591 = vmatpush1.bf16.msra.mxu1 %v1451_v50 }
 0x294   :  { %v13618_v48 = vpop.permute.xlu0 %670 }
 0x295   :  { %v1615_v46 = vpop.permute.xlu1 %1614  ;;  %v694_v54 = vsel %vm680_vm2, %v669_v43, %v13618_v48 }
 0x296   :  { %3520 = vrot.lane.b32.xlu0 %v13227_v38, %s16656_s19  ;;  %5668 = vmatprep.subr.bf16.mxu0 %v694_v54  ;;  %v1641_v6 = vsel %vm16706_vm8, %v13192_v5, %v1615_v46  ;;  %v13649_v5 = vld [vmem:[%s16588_s0 + $0x3c] ss:$80 sps:$4 sm:$0xff]  }
 0x297   :  { %4398 = vrot.lane.b32.xlu1 %v11787_v9, %s16704_s21  ;;  %5669 = vmatpush1.bf16.msra.mxu0 %v693_v59 }
 0x298   :  { %v13627_v52 = vpop.permute.xlu0 %1616 }
 0x299   :  { %v859_v60 = vpop.permute.xlu1 %858  ;;  %v1642_v63 = vsel %vm16705_vm7, %v1615_v46, %v13627_v52  ;;  %vm16707_vm7 = vcmask 752640  }
 0x29a   :  { %4400 = vrot.lane.b32.xlu0 %v13584_v21, %s16704_s21  ;;  %5592 = vmatprep.subr.bf16.mxu1 %v1642_v63  ;;  %v883_v61 = vsel %vm870_vm3, %v13538_v1, %v859_v60  ;;  %vm16708_vm8 = vmmov %vm16707_vm7  ;;  %v13662_v1 = vld [vmem:[%s16588_s0 + $0x40] ss:$80 sps:$4 sm:$0xff]  }
 0x29b   :  { %3708 = vrot.lane.b32.xlu1 %v13214_v3, %s16674_s14  ;;  %5593 = vmatpush1.bf16.msra.mxu1 %v1641_v6 }
 0x29c   :  { %v13637_v58 = vpop.permute.xlu0 %860 }
 0x29d   :  { %v1805_v14 = vpop.permute.xlu1 %1804  ;;  %v884_v16 = vsel %vm870_vm3, %v859_v60, %v13637_v58 }
 0x29e   :  { %3710 = vrot.lane.b32.xlu0 %v13227_v38, %s16674_s14  ;;  %5670 = vmatprep.subr.bf16.mxu0 %v884_v16  ;;  %v1831_v38 = vsel %vm16708_vm8, %v13216_v25, %v1805_v14 }
 0x29f   :  { %4587 = vrot.lane.b32.xlu1 %v11787_v9, %s16691_s24  ;;  %5671 = vmatpush1.bf16.msra.mxu0 %v883_v61  ;;  %v11794_v9 = vld [vmem:[%s16588_s0 + $0x3c] ss:$80 sps:$4 sm:$0xff]  }
 0x2a0   :  { %v13651_v3 = vpop.permute.xlu0 %1806 }
 0x2a1   :  { %v1049_v18 = vpop.permute.xlu1 %1048  ;;  %v1832_v40 = vsel %vm16707_vm7, %v1805_v14, %v13651_v3  ;;  %vm16709_vm7 = vcmask 760832  }
 0x2a2   :  { %4589 = vrot.lane.b32.xlu0 %v13584_v21, %s16691_s24  ;;  %5594 = vmatprep.subr.bf16.mxu1 %v1832_v40  ;;  %v1073_v2 = vsel %vm1060_vm4, %v13558_v7, %v1049_v18  ;;  %vm16710_vm8 = vmmov %vm16709_vm7 }
 0x2a3   :  { %292 = vrot.lane.b32.xlu1 %v13649_v5, %s16702_s28  ;;  %5595 = vmatpush1.bf16.msra.mxu1 %v1831_v38 }
 0x2a4   :  { %v13671_v37 = vpop.permute.xlu0 %1050 }
 0x2a5   :  { %v1995_v39 = vpop.permute.xlu1 %1994  ;;  %v1074_v25 = vsel %vm1060_vm4, %v1049_v18, %v13671_v37  ;;  %v13745_v18 = vpop.f32.mrb[0].mxu1 }
 0x2a6   :  { %294 = vrot.lane.b32.xlu0 %v13662_v1, %s16702_s28  ;;  %5672 = vmatprep.subr.bf16.mxu0 %v1074_v25  ;;  %v2021_v7 = vsel %vm2010_vm9, %v13241_v8, %v1995_v39  ;;  %v13750_v38 = vpop.f32.mrb[1].mxu1 }
 0x2a7   :  { %4024 = vrot.lane.b32.xlu1 %v13669_v42, %s16702_s28  ;;  %5673 = vmatpush1.bf16.msra.mxu0 %v1073_v2 }
 0x2a8   :  { %v13684_v0 = vpop.permute.xlu0 %1996 }
 0x2a9   :  { %v1239_v11 = vpop.permute.xlu1 %1238  ;;  %v2022_v12 = vsel %vm2010_vm9, %v1995_v39, %v13684_v0  ;;  %v13759_v39 = vpop.f32.mrb[2].mxu1 }
 0x2aa   :  { %4026 = vrot.lane.b32.xlu0 %v11794_v9, %s16702_s28  ;;  %5596 = vmatprep.subr.bf16.mxu1 %v2022_v12  ;;  %v1263_v13 = vsel %vm1250_vm5, %v13589_v34, %v1239_v11  ;;  %v13763_v2 = vpop.f32.mrb[3].mxu1 }
 0x2ab   :  { %482 = vrot.lane.b32.xlu1 %v13649_v5, %s16703_s25  ;;  %5597 = vmatpush1.bf16.msra.mxu1 %v2021_v7  ;;  %v11797_v7 = vld [vmem:[%s16588_s0 + $0x48] ss:$80 sps:$4 sm:$0xff]  }
 0x2ac   :  { %v13693_v36 = vpop.permute.xlu0 %1240 }
 0x2ad   :  { %v2185_v32 = vpop.permute.xlu1 %2184  ;;  %v1264_v41 = vsel %vm1250_vm5, %v1239_v11, %v13693_v36  ;;  %v13767_v11 = vpop.f32.mrb[4].mxu0 }
 0x2ae   :  { %484 = vrot.lane.b32.xlu0 %v13662_v1, %s16703_s25  ;;  %5674 = vmatprep.subr.bf16.mxu0 %v1264_v41  ;;  %v2211_v43 = vsel %vm2200_vm10, %v13261_v26, %v2185_v32 }
 0x2af   :  { %4213 = vrot.lane.b32.xlu1 %v13669_v42, %s16703_s25  ;;  %5675 = vmatpush1.bf16.msra.mxu0 %v1263_v13 }
 0x2b0   :  { %v13703_v8 = vpop.permute.xlu0 %2186 }
 0x2b1   :  { %v1429_v19 = vpop.permute.xlu1 %1428  ;;  %v2212_v33 = vsel %vm2200_vm10, %v2185_v32, %v13703_v8  ;;  %v13776_v32 = vpop.f32.mrb[5].mxu0 }
 0x2b2   :  { %4215 = vrot.lane.b32.xlu0 %v11794_v9, %s16703_s25  ;;  %5598 = vmatprep.subr.bf16.mxu1 %v2212_v33  ;;  %v1453_v46 = vsel %vm1440_vm6, %v13608_v51, %v1429_v19  ;;  %v13780_v41 = vpop.f32.mrb[6].mxu0 }
 0x2b3   :  { %672 = vrot.lane.b32.xlu1 %v13649_v5, %s16704_s21  ;;  %5599 = vmatpush1.bf16.msra.mxu1 %v2211_v43 }
 0x2b4   :  { %v13712_v34 = vpop.permute.xlu0 %1430 }
 0x2b5   :  { %v2375_v55 = vpop.permute.xlu1 %2374  ;;  %v1454_v50 = vsel %vm1440_vm6, %v1429_v19, %v13712_v34  ;;  %v13784_v19 = vpop.f32.mrb[7].mxu0 }
 0x2b6   :  { %674 = vrot.lane.b32.xlu0 %v13662_v1, %s16704_s21  ;;  %5676 = vmatprep.subr.bf16.mxu0 %v1454_v50  ;;  %v2401_v60 = vsel %vm2390_vm11, %v13294_v45, %v2375_v55 }
 0x2b7   :  { %4402 = vrot.lane.b32.xlu1 %v13669_v42, %s16704_s21  ;;  %5677 = vmatpush1.bf16.msra.mxu0 %v1453_v46 }
 0x2b8   :  { %v13722_v26 = vpop.permute.xlu0 %2376 }
 0x2b9   :  { %v1619_v54 = vpop.permute.xlu1 %1618  ;;  %v2402_v59 = vsel %vm2390_vm11, %v2375_v55, %v13722_v26 }
 0x2ba   :  { %4404 = vrot.lane.b32.xlu0 %v11794_v9, %s16704_s21  ;;  %5600 = vmatprep.subr.bf16.mxu1 %v2402_v59  ;;  %v1643_v14 = vsel %vm16710_vm8, %v13627_v52, %v1619_v54  ;;  %v13757_v52 = vld [vmem:[%s16588_s0 + $0x44] ss:$80 sps:$4 sm:$0xff]  }
 0x2bb   :  { %862 = vrot.lane.b32.xlu1 %v13649_v5, %s16691_s24  ;;  %5601 = vmatpush1.bf16.msra.mxu1 %v2401_v60 }
 0x2bc   :  { %v13731_v51 = vpop.permute.xlu0 %1620 }
 0x2bd   :  { %v2565_v63 = vpop.permute.xlu1 %2564  ;;  %v1644_v6 = vsel %vm16709_vm7, %v1619_v54, %v13731_v51  ;;  %vm16711_vm7 = vcmask 752640  }
 0x2be   :  { %864 = vrot.lane.b32.xlu0 %v13662_v1, %s16691_s24  ;;  %5678 = vmatprep.subr.bf16.mxu0 %v1644_v6  ;;  %v2591_v40 = vsel %vm2580_vm12, %v13314_v62, %v2565_v63  ;;  %vm16712_vm8 = vmmov %vm16711_vm7 }
 0x2bf   :  { %4591 = vrot.lane.b32.xlu1 %v13669_v42, %s16691_s24  ;;  %5679 = vmatpush1.bf16.msra.mxu0 %v1643_v14  ;;  %v5111_v14 = vld [vmem:[%s16590_s2] sm:$0xff] }
 0x2c0   :  { %v13741_v45 = vpop.permute.xlu0 %2566 }
 0x2c1   :  { %v1809_v16 = vpop.permute.xlu1 %1808  ;;  %v2592_v61 = vsel %vm2580_vm12, %v2565_v63, %v13741_v45 }
 0x2c2   :  { %4593 = vrot.lane.b32.xlu0 %v11794_v9, %s16691_s24  ;;  %5602 = vmatprep.subr.bf16.mxu1 %v2592_v61  ;;  %v1833_v12 = vsel %vm16712_vm8, %v13651_v3, %v1809_v16 }
 0x2c3   :  { %1052 = vrot.lane.b32.xlu1 %v13649_v5, %s16681_s29  ;;  %5603 = vmatpush1.bf16.msra.mxu1 %v2591_v40  ;;  %v5112_v40 = vld [vmem:[%s16590_s2 + $0x8] sm:$0xff]  ;;  %s11933_s2 = smov 121  }
 0x2c4   :  { %v13761_v25 = vpop.permute.xlu0 %1810 }
 0x2c5   :  { %v2755_v9 = vpop.permute.xlu1 %2754  ;;  %v1834_v62 = vsel %vm16711_vm7, %v1809_v16, %v13761_v25  ;;  %vm16713_vm7 = vcmask 490496  }
 0x2c6   :  { %1054 = vrot.lane.b32.xlu0 %v13662_v1, %s16681_s29  ;;  %5680 = vmatprep.subr.bf16.mxu0 %v1834_v62  ;;  %vm16714_vm8 = vmmov %vm16713_vm7 }
 0x2c7   :  { %296 = vrot.lane.b32.xlu1 %v13757_v52, %s16702_s28  ;;  %5681 = vmatpush1.bf16.msra.mxu0 %v1833_v12  ;;  %v2781_v43 = vsel %vm16714_vm8, %v13334_v20, %v2755_v9  ;;  %v11798_v20 = vld [vmem:[%s16588_s0 + $0x48] ss:$80 sps:$4 sm:$0xff]  }
 0x2c8   :  { %v13782_v13 = vpop.permute.xlu0 %2756 }
 0x2c9   :  { %v1999_v33 = vpop.permute.xlu1 %1998  ;;  %v2782_v3 = vsel %vm16713_vm7, %v2755_v9, %v13782_v13  ;;  %vm16716_vm7 = vcmask 261120  }
 0x2ca   :  { %298 = vrot.lane.b32.xlu0 %v11797_v7, %s16702_s28  ;;  %5604 = vmatprep.subr.bf16.mxu1 %v2782_v3  ;;  %v2023_v54 = vsel %vm2010_vm9, %v13684_v0, %v1999_v33  ;;  %vm16717_vm8 = vmmov %vm16716_vm7  ;;  %v11799_v7 = vld [vmem:[%s16588_s0 + $0x48] ss:$80 sps:$4 sm:$0xff]  }
 0x2cb   :  { %1242 = vrot.lane.b32.xlu1 %v13649_v5, %s16715_s11  ;;  %5605 = vmatpush1.bf16.msra.mxu1 %v2781_v43 }
 0x2cc   :  { %v13793_v55 = vpop.permute.xlu0 %2000 }
 0x2cd   :  { %v2945_v50 = vpop.permute.xlu1 %2944  ;;  %v2024_v46 = vsel %vm2010_vm9, %v1999_v33, %v13793_v55 }
 0x2ce   :  { %1244 = vrot.lane.b32.xlu0 %v13662_v1, %s16715_s11  ;;  %5682 = vmatprep.subr.bf16.mxu0 %v2024_v46  ;;  %v2971_v0 = vsel %vm16717_vm8, %v13357_v53, %v2945_v50  ;;  %vm16719_vm8 = vcmask 244736  }
 0x2cf   :  { %486 = vrot.lane.b32.xlu1 %v13757_v52, %s16703_s25  ;;  %5683 = vmatpush1.bf16.msra.mxu0 %v2023_v54 }
 0x2d0   :  { %v13806_v59 = vpop.permute.xlu0 %2946 }
 0x2d1   :  { %v2189_v60 = vpop.permute.xlu1 %2188  ;;  %v2972_v63 = vsel %vm16716_vm7, %v2945_v50, %v13806_v59  ;;  %vm16718_vm7 = vcmask 130048  }
 0x2d2   :  { %488 = vrot.lane.b32.xlu0 %v11798_v20, %s16703_s25  ;;  %5606 = vmatprep.subr.bf16.mxu1 %v2972_v63  ;;  %v2213_v53 = vsel %vm2200_vm10, %v13703_v8, %v2189_v60 }
 0x2d3   :  { %1432 = vrot.lane.b32.xlu1 %v13649_v5, %s16688_s26  ;;  %5607 = vmatpush1.bf16.msra.mxu1 %v2971_v0 }
 0x2d4   :  { %v13815_v6 = vpop.permute.xlu0 %2190 }
 0x2d5   :  { %v3135_v16 = vpop.permute.xlu1 %3134  ;;  %v2214_v61 = vsel %vm2200_vm10, %v2189_v60, %v13815_v6 }
 0x2d6   :  { %1434 = vrot.lane.b32.xlu0 %v13662_v1, %s16688_s26  ;;  %5684 = vmatprep.subr.bf16.mxu0 %v2214_v61  ;;  %v3161_v8 = vsel %vm3150_vm15, %v13370_v17, %v3135_v16 }
 0x2d7   :  { %5115 = vperm.xlu1 %11724, %v5111_v14   ;;  %5685 = vmatpush1.bf16.msra.mxu0 %v2213_v53 }
 0x2d8   :  { %v13829_v9 = vpop.permute.xlu0 %3136  ;;  %5609 = vmatmul.mubr.bf16.vlgmr.msra.gmra.mrb[8].mxu1 %v13276_v35 }
 0x2d9   :  { %v2379_v62 = vpop.permute.xlu1 %2378  ;;  %v3162_v12 = vsel %vm3150_vm15, %v3135_v16, %v13829_v9  ;;  %11367 = vmatprep.mubr.msk.bf16.mxu1 %vm16718_vm7, %v13284_v27  ;;  %vm16720_vm7 = vmmov %vm16719_vm8 }
 0x2da   :  { %5120 = vperm.xlu0 %11725, %v5112_v40   ;;  %5619 = vmatprep.subr.bf16.mxu1 %v3162_v12  ;;  %v2403_v50 = vsel %vm2390_vm11, %v13722_v26, %v2379_v62  ;;  %v11800_v26 = vld [vmem:[%s16588_s0 + $0x48] ss:$80 sps:$4 sm:$0xff]  }
 0x2db   :  { %676 = vrot.lane.b32.xlu1 %v13757_v52, %s16704_s21  ;;  %5620 = vmatpush1.bf16.msra.mxu1 %v3161_v8 }
 0x2dc   :  { %v13843_v33 = vpop.permute.xlu0 %2380 }
 0x2dd   :  { %v3325_v3 = vpop.permute.xlu1 %3324  ;;  %v2404_v43 = vsel %vm2390_vm11, %v2379_v62, %v13843_v33 }
 0x2de   :  { %5686 = vmatprep.subr.bf16.mxu0 %v2404_v43  ;;  %1622 = vrot.lane.b32.xlu0 %v13649_v5, %s16690_s18  ;;  %v3351_v20 = vsel %vm16720_vm7, %v13393_v56, %v3325_v3 }
 0x2df   :  { %678 = vrot.lane.b32.xlu1 %v11799_v7, %s16704_s21  ;;  %5687 = vmatpush1.bf16.msra.mxu0 %v2403_v50  ;;  %v11805_v7 = vld [vmem:[%s16588_s0 + $0x30] ss:$80 sps:$4 sm:$0xff]   ;;  %v11802_v50 = vld [vmem:[%s16588_s0 + $0x48] ss:$80 sps:$4 sm:$0xff]  }
 0x2e0   :  { %v13852_v17 = vpop.permute.xlu0 %3326 }
 0x2e1   :  { %v2569_v46 = vpop.permute.xlu1 %2568  ;;  %v3352_v54 = vsel %vm16719_vm8, %v3325_v3, %v13852_v17  ;;  %vm16721_vm8 = vcmask 490496  }
 0x2e2   :  { %5621 = vmatprep.subr.bf16.mxu1 %v3352_v54  ;;  %866 = vrot.lane.b32.xlu0 %v13757_v52, %s16691_s24  ;;  %v2593_v56 = vsel %vm2580_vm12, %v13741_v45, %v2569_v46  ;;  %v11801_v45 = vld [vmem:[%s16588_s0 + $0x48] ss:$80 sps:$4 sm:$0xff]   ;;  %vm16722_vm7 = vmmov %vm16721_vm8  ;;  %v11803_v54 = vld [vmem:[%s16588_s0 + $0x2c] ss:$80 sps:$4 sm:$0xff]  }
 0x2e3   :  { %1624 = vrot.lane.b32.xlu1 %v13662_v1, %s16690_s18  ;;  %5622 = vmatpush1.bf16.msra.mxu1 %v3351_v20 }
 0x2e4   :  { %v13865_v60 = vpop.permute.xlu0 %2570 }
 0x2e5   :  { %v3515_v63 = vpop.permute.xlu1 %3514  ;;  %v2594_v0 = vsel %vm2580_vm12, %v2569_v46, %v13865_v60 }
 0x2e6   :  { %5688 = vmatprep.subr.bf16.mxu0 %v2594_v0  ;;  %1812 = vrot.lane.b32.xlu0 %v13649_v5, %s16694_s30  ;;  %v3541_v53 = vsel %vm3530_vm14, %v13413_v4, %v3515_v63 }
 0x2e7   :  { %868 = vrot.lane.b32.xlu1 %v11800_v26, %s16691_s24  ;;  %5689 = vmatpush1.bf16.msra.mxu0 %v2593_v56 }
 0x2e8   :  { %v13874_v14 = vpop.permute.xlu0 %3516 }
 0x2e9   :  { %v2759_v16 = vpop.permute.xlu1 %2758  ;;  %v3542_v61 = vsel %vm3530_vm14, %v3515_v63, %v13874_v14 }
 0x2ea   :  { %5623 = vmatprep.subr.bf16.mxu1 %v3542_v61  ;;  %1056 = vrot.lane.b32.xlu0 %v13757_v52, %s16681_s29  ;;  %v2783_v4 = vsel %vm16722_vm7, %v13782_v13, %v2759_v16 }
 0x2eb   :  { %1814 = vrot.lane.b32.xlu1 %v13662_v1, %s16694_s30  ;;  %5624 = vmatpush1.bf16.msra.mxu1 %v3541_v53 }
 0x2ec   :  { %v13887_v40 = vpop.permute.xlu0 %2760 }
 0x2ed   :  { %v3705_v62 = vpop.permute.xlu1 %3704  ;;  %v2784_v12 = vsel %vm16721_vm8, %v2759_v16, %v13887_v40  ;;  %vm16723_vm8 = vcmask 261120  }
 0x2ee   :  { %5690 = vmatprep.subr.bf16.mxu0 %v2784_v12  ;;  %2002 = vrot.lane.b32.xlu0 %v13649_v5, %s16664_s13  ;;  %v3731_v13 = vsel %vm3720_vm13, %v13433_v31, %v3705_v62  ;;  %vm16724_vm7 = vmmov %vm16723_vm8 }
 0x2ef   :  { %1058 = vrot.lane.b32.xlu1 %v11801_v45, %s16681_s29  ;;  %5691 = vmatpush1.bf16.msra.mxu0 %v2783_v4 }
 0x2f0   :  { %v13896_v8 = vpop.permute.xlu0 %3706 }
 0x2f1   :  { %v2949_v3 = vpop.permute.xlu1 %2948  ;;  %v3732_v43 = vsel %vm3720_vm13, %v3705_v62, %v13896_v8 }
 0x2f2   :  { %5625 = vmatprep.subr.bf16.mxu1 %v3732_v43  ;;  %1246 = vrot.lane.b32.xlu0 %v13757_v52, %s16715_s11  ;;  %v2973_v26 = vsel %vm16724_vm7, %v13806_v59, %v2949_v3  ;;  %v11806_v59 = vld [vmem:[%s16588_s0 + $0x48] ss:$80 sps:$4 sm:$0xff]   ;;  %vm16726_vm7 = vcmask 244736  }
 0x2f3   :  { %2004 = vrot.lane.b32.xlu1 %v13662_v1, %s16664_s13  ;;  %5626 = vmatpush1.bf16.msra.mxu1 %v3731_v13 }
 0x2f4   :  { %v13912_v46 = vpop.permute.xlu0 %2950  ;;  %5627 = vmatprep.subr.bf16.mxu1 %v11805_v7 }
 0x2f5   :  { %v3139_v20 = vpop.permute.xlu1 %3138  ;;  %v2974_v31 = vsel %vm16723_vm8, %v2949_v3, %v13912_v46  ;;  %vm16725_vm8 = vcmask 130048  }
 0x2f6   :  { %5692 = vmatprep.subr.bf16.mxu0 %v2974_v31  ;;  %2192 = vrot.lane.b32.xlu0 %v13649_v5, %s16667_s15  ;;  %v3163_v16 = vsel %vm3150_vm15, %v13829_v9, %v3139_v20 }
 0x2f7   :  { %1248 = vrot.lane.b32.xlu1 %v11802_v50, %s16715_s11  ;;  %5693 = vmatpush1.bf16.msra.mxu0 %v2973_v26 }
 0x2f8   :  { %v13924_v63 = vpop.permute.xlu0 %3140  ;;  %5628 = vmatpush1.bf16.msra.mxu1 %v11803_v54 }
 0x2f9   :  { %v4021_v0 = vpop.permute.xlu1 %4020  ;;  %v3164_v56 = vsel %vm3150_vm15, %v3139_v20, %v13924_v63 }
 0x2fa   :  { %5705 = vmatprep.subr.bf16.mxu0 %v3164_v56  ;;  %5695 = vmatmul.mubr.bf16.vlgmr.msra.gmra.mrb[12].mxu0 %v13276_v35  ;;  %v4046_v53 = vsel %vm300_vm0, %v13483_v29, %v4021_v0  ;;  %v11807_v29 = vld [vmem:[%s16588_s0 + $0x48] ss:$80 sps:$4 sm:$0xff]  }
 0x2fb   :  { %2194 = vrot.lane.b32.xlu1 %v13662_v1, %s16667_s15  ;;  %5706 = vmatpush1.bf16.msra.mxu0 %v3163_v16 }
 0x2fc   :  { %1436 = vrot.lane.b32.xlu0 %v13757_v52, %s16688_s26  ;;  %v13938_v61 = vpop.permute.xlu0 %4022  ;;  %11368 = vmatprep.mubr.msk.bf16.mxu0 %vm16725_vm8, %v13284_v27  ;;  %vm16727_vm8 = vmmov %vm16726_vm7 }
 0x2fd   :  { %v3329_v35 = vpop.permute.xlu1 %3328  ;;  %v4047_v9 = vsel %vm300_vm0, %v4021_v0, %v13938_v61 }
 0x2fe   :  { %5629 = vmatprep.subr.bf16.mxu1 %v4047_v9  ;;  %v3353_v12 = vsel %vm16727_vm8, %v13852_v17, %v3329_v35  ;;  %v11812_v9 = vld [vmem:[%s16588_s0 + $0x3c] ss:$80 sps:$4 sm:$0xff]  }
 0x2ff   :  { %1438 = vrot.lane.b32.xlu1 %v11806_v59, %s16688_s26  ;;  %5630 = vmatpush1.bf16.msra.mxu1 %v4046_v53  ;;  %s11925_s26 = smov 120  }
 0x300   :  { %2382 = vrot.lane.b32.xlu0 %v13649_v5, %s16670_s27  ;;  %v13949_v45 = vpop.permute.xlu0 %3330 }
 0x301   :  { %v4210_v62 = vpop.permute.xlu1 %4209  ;;  %v3354_v27 = vsel %vm16726_vm7, %v3329_v35, %v13949_v45  ;;  %vm16728_vm7 = vcmask 760832  }
 0x302   :  { %5707 = vmatprep.subr.bf16.mxu0 %v3354_v27  ;;  %v4235_v17 = vsel %vm490_vm1, %v13508_v57, %v4210_v62  ;;  %v11808_v57 = vld [vmem:[%s16588_s0 + $0x48] ss:$80 sps:$4 sm:$0xff]   ;;  %vm16729_vm8 = vmmov %vm16728_vm7 }
 0x303   :  { %2384 = vrot.lane.b32.xlu1 %v13662_v1, %s16670_s27  ;;  %5708 = vmatpush1.bf16.msra.mxu0 %v3353_v12  ;;  %v11810_v27 = vld [vmem:[%s16588_s0 + $0x38] ss:$80 sps:$4 sm:$0xff]  }
 0x304   :  { %1626 = vrot.lane.b32.xlu0 %v13757_v52, %s16690_s18  ;;  %v13962_v4 = vpop.permute.xlu0 %4211 }
 0x305   :  { %v3519_v7 = vpop.permute.xlu1 %3518  ;;  %v4236_v3 = vsel %vm490_vm1, %v4210_v62, %v13962_v4 }
 0x306   :  { %5631 = vmatprep.subr.bf16.mxu1 %v4236_v3  ;;  %v3543_v54 = vsel %vm3530_vm14, %v13874_v14, %v3519_v7 }
 0x307   :  { %1628 = vrot.lane.b32.xlu1 %v11807_v29, %s16690_s18  ;;  %5632 = vmatpush1.bf16.msra.mxu1 %v4235_v17  ;;  %v11813_v29 = vld [vmem:[%s16588_s0 + $0x48] ss:$80 sps:$4 sm:$0xff]   ;;  %v14042_v17 = vld [vmem:[%s16589_s1 + $0x4] ss:$16 sps:$4 sm:$0xff]   ;;  %s11927_s18 = smov 56  }
 0x308   :  { %2572 = vrot.lane.b32.xlu0 %v13649_v5, %s16651_s17  ;;  %v13971_v43 = vpop.permute.xlu0 %3520 }
 0x309   :  { %v4399_v13 = vpop.permute.xlu1 %4398  ;;  %v3544_v50 = vsel %vm3530_vm14, %v3519_v7, %v13971_v43 }
 0x30a   :  { %5709 = vmatprep.subr.bf16.mxu0 %v3544_v50  ;;  %v4424_v14 = vsel %vm680_vm2, %v13528_v44, %v4399_v13  ;;  %v11809_v44 = vld [vmem:[%s16588_s0 + $0x48] ss:$80 sps:$4 sm:$0xff]  }
 0x30b   :  { %2574 = vrot.lane.b32.xlu1 %v13662_v1, %s16651_s17  ;;  %5710 = vmatpush1.bf16.msra.mxu0 %v3543_v54 }
 0x30c   :  { %1816 = vrot.lane.b32.xlu0 %v13757_v52, %s16694_s30  ;;  %v13984_v20 = vpop.permute.xlu0 %4400 }
 0x30d   :  { %v3709_v31 = vpop.permute.xlu1 %3708  ;;  %v4425_v26 = vsel %vm680_vm2, %v4399_v13, %v13984_v20 }
 0x30e   :  { %5633 = vmatprep.subr.bf16.mxu1 %v4425_v26  ;;  %v3733_v59 = vsel %vm3720_vm13, %v13896_v8, %v3709_v31 }
 0x30f   :  { %1818 = vrot.lane.b32.xlu1 %v11808_v57, %s16694_s30  ;;  %5634 = vmatpush1.bf16.msra.mxu1 %v4424_v14 }
 0x310   :  { %2762 = vrot.lane.b32.xlu0 %v13649_v5, %s16652_s20  ;;  %v13993_v0 = vpop.permute.xlu0 %3710 }
 0x311   :  { %v4588_v56 = vpop.permute.xlu1 %4587  ;;  %v3734_v16 = vsel %vm3720_vm13, %v3709_v31, %v13993_v0 }
 0x312   :  { %5711 = vmatprep.subr.bf16.mxu0 %v3734_v16  ;;  %v4613_v62 = vsel %vm870_vm3, %v13548_v15, %v4588_v56 }
 0x313   :  { %2764 = vrot.lane.b32.xlu1 %v13662_v1, %s16652_s20  ;;  %5712 = vmatpush1.bf16.msra.mxu0 %v3733_v59 }
 0x314   :  { %2006 = vrot.lane.b32.xlu0 %v13757_v52, %s16664_s13  ;;  %v14006_v35 = vpop.permute.xlu0 %4589  ;;  %5713 = vmatprep.subr.bf16.mxu0 %v13669_v42 }
 0x315   :  { %v293_v8 = vpop.permute.xlu1 %292  ;;  %v4614_v53 = vsel %vm870_vm3, %v4588_v56, %v14006_v35 }
 0x316   :  { %5635 = vmatprep.subr.bf16.mxu1 %v4614_v53  ;;  %v315_v50 = vsel %vm300_vm0, %v13574_v23, %v293_v8  ;;  %v11814_v23 = vld [vmem:[%s16588_s0 + $0x48] ss:$80 sps:$4 sm:$0xff]  }
 0x317   :  { %2008 = vrot.lane.b32.xlu1 %v11809_v44, %s16664_s13  ;;  %5636 = vmatpush1.bf16.msra.mxu1 %v4613_v62 }
 0x318   :  { %2952 = vrot.lane.b32.xlu0 %v13649_v5, %s16653_s16  ;;  %v14022_v42 = vpop.permute.xlu0 %294  ;;  %5748 = vmatprep.subr.bf16.mxu1 %v11812_v9 }
 0x319   :  { %v4025_v12 = vpop.permute.xlu1 %4024  ;;  %5714 = vmatpush1.bf16.msra.mxu0 %v13584_v21  ;;  %v316_v15 = vsel %vm300_vm0, %v293_v8, %v14022_v42 }
 0x31a   :  { %5652 = vmatmul.mubr.bf16.vlgmr.msra.gmra.mrb[8].mxu1 %v13472_v28  ;;  %v4048_v13 = vsel %vm300_vm0, %v13938_v61, %v4025_v12 }
 0x31b   :  { %2954 = vrot.lane.b32.xlu1 %v13662_v1, %s16653_s16  ;;  %5749 = vmatpush1.bf16.msra.mxu1 %v11810_v27 }
 0x31c   :  { %2196 = vrot.lane.b32.xlu0 %v13757_v52, %s16667_s15  ;;  %v14035_v7 = vpop.permute.xlu0 %4026  ;;  %5750 = vmatprep.subr.bf16.mxu1 %v316_v15 }
 0x31d   :  { %v483_v21 = vpop.permute.xlu1 %482  ;;  %v4049_v3 = vsel %vm300_vm0, %v4025_v12, %v14035_v7  ;;  %5780 = vmatprep.mubr.bf16.mxu1 %v14042_v17 }
 0x31e   :  { %5715 = vmatprep.subr.bf16.mxu0 %v4049_v3  ;;  %v505_v61 = vsel %vm490_vm1, %v13599_v22, %v483_v21 }
 0x31f   :  { %2198 = vrot.lane.b32.xlu1 %v11813_v29, %s16667_s15  ;;  %5716 = vmatpush1.bf16.msra.mxu0 %v4048_v13 }
 0x320   :  { %5751 = vmatpush1.bf16.msra.mxu1 %v315_v50  ;;  %3142 = vrot.lane.b32.xlu0 %v13649_v5, %s16654_s22  ;;  %v14052_v54 = vpop.permute.xlu0 %484 }
 0x321   :  { %v4214_v57 = vpop.permute.xlu1 %4213  ;;  %v506_v31 = vsel %vm490_vm1, %v483_v21, %v14052_v54 }
 0x322   :  { %5752 = vmatprep.subr.bf16.mxu1 %v506_v31  ;;  %v4237_v16 = vsel %vm490_vm1, %v13962_v4, %v4214_v57  ;;  %v11815_v4 = vld [vmem:[%s16588_s0 + $0x48] ss:$80 sps:$4 sm:$0xff]  }
 0x323   :  { %3144 = vrot.lane.b32.xlu1 %v13662_v1, %s16654_s22 }
 0x324   :  { %5753 = vmatpush1.bf16.msra.mxu1 %v505_v61  ;;  %2386 = vrot.lane.b32.xlu0 %v13757_v52, %s16670_s27  ;;  %v14065_v26 = vpop.permute.xlu0 %4215 }
 0x325   :  { %v673_v14 = vpop.permute.xlu1 %672  ;;  %v4238_v56 = vsel %vm490_vm1, %v4214_v57, %v14065_v26 }
 0x326   :  { %5717 = vmatprep.subr.bf16.mxu0 %v4238_v56  ;;  %v695_v9 = vsel %vm680_vm2, %v13618_v48, %v673_v14 }
 0x327   :  { %2388 = vrot.lane.b32.xlu1 %v11814_v23, %s16670_s27  ;;  %5718 = vmatpush1.bf16.msra.mxu0 %v4237_v16 }
 0x328   :  { %3332 = vrot.lane.b32.xlu0 %v13649_v5, %s16655_s23  ;;  %v14074_v22 = vpop.permute.xlu0 %674 }
 0x329   :  { %v4403_v59 = vpop.permute.xlu1 %4402  ;;  %v696_v44 = vsel %vm680_vm2, %v673_v14, %v14074_v22 }
 0x32a   :  { %5754 = vmatprep.subr.bf16.mxu1 %v696_v44  ;;  %v4426_v48 = vsel %vm680_vm2, %v13984_v20, %v4403_v59  ;;  %v11816_v20 = vld [vmem:[%s16588_s0 + $0x48] ss:$80 sps:$4 sm:$0xff]  }
 0x32b   :  { %3334 = vrot.lane.b32.xlu1 %v13662_v1, %s16655_s23  ;;  %5755 = vmatpush1.bf16.msra.mxu1 %v695_v9  ;;  %v11818_v44 = vld [vmem:[%s16588_s0 + $0x48] ss:$80 sps:$4 sm:$0xff]  }
 0x32c   :  { %2576 = vrot.lane.b32.xlu0 %v13757_v52, %s16651_s17  ;;  %v14087_v8 = vpop.permute.xlu0 %4404 }
 0x32d   :  { %v863_v53 = vpop.permute.xlu1 %862  ;;  %v4427_v62 = vsel %vm680_vm2, %v4403_v59, %v14087_v8 }
 0x32e   :  { %5719 = vmatprep.subr.bf16.mxu0 %v4427_v62  ;;  %v885_v29 = vsel %vm870_vm3, %v13637_v58, %v863_v53 }
 0x32f   :  { %2578 = vrot.lane.b32.xlu1 %v11815_v4, %s16651_s17  ;;  %5720 = vmatpush1.bf16.msra.mxu0 %v4426_v48  ;;  %s16789_s17 = sld [smem:[#allocation10_spill]] }
 0x330   :  { %3522 = vrot.lane.b32.xlu0 %v13649_v5, %s16656_s19  ;;  %v14096_v27 = vpop.permute.xlu0 %864 }
 0x331   :  { %v4592_v12 = vpop.permute.xlu1 %4591  ;;  %v886_v15 = vsel %vm870_vm3, %v863_v53, %v14096_v27  ;;  %v14163_v53 = vld [vmem:[%s16588_s0 + $0x44] ss:$80 sps:$4 sm:$0xff]  }
 0x332   :  { %5756 = vmatprep.subr.bf16.mxu1 %v886_v15  ;;  %v4615_v58 = vsel %vm870_vm3, %v14006_v35, %v4592_v12 }
 0x333   :  { %3524 = vrot.lane.b32.xlu1 %v13662_v1, %s16656_s19  ;;  %5757 = vmatpush1.bf16.msra.mxu1 %v885_v29 }
 0x334   :  { %2766 = vrot.lane.b32.xlu0 %v13757_v52, %s16652_s20  ;;  %v14109_v21 = vpop.permute.xlu0 %4593 }
 0x335   :  { %v1053_v3 = vpop.permute.xlu1 %1052  ;;  %v4616_v13 = vsel %vm870_vm3, %v4592_v12, %v14109_v21  ;;  %v14113_v50 = vpop.f32.mrb[4].mxu1 }
 0x336   :  { %5721 = vmatprep.subr.bf16.mxu0 %v4616_v13  ;;  %v5483_v57 = vpop.f32.mrb[5].mxu1  ;;  %v1075_v35 = vsel %vm1060_vm4, %v13671_v37, %v1053_v3 }
 0x337   :  { %2768 = vrot.lane.b32.xlu1 %v11816_v20, %s16652_s20  ;;  %5722 = vmatpush1.bf16.msra.mxu0 %v4615_v58  ;;  %v14118_v31 = vpop.f32.mrb[6].mxu1 }
 0x338   :  { %3712 = vrot.lane.b32.xlu0 %v13649_v5, %s16674_s14  ;;  %v14122_v61 = vpop.permute.xlu0 %1054  ;;  %5834 = vmatprep.subr.bf16.mxu0 %v13757_v52  ;;  %v14125_v23 = vpop.f32.mrb[7].mxu1  ;;  %v11817_v5 = vld [vmem:[%s16588_s0 + $0x48] ss:$80 sps:$4 sm:$0xff]  }
 0x339   :  { %v297_v14 = vpop.permute.xlu1 %296  ;;  %v1076_v56 = vsel %vm1060_vm4, %v1053_v3, %v14122_v61  ;;  %v11823_v3 = vld [vmem:[%s16588_s0 + $0x48] ss:$80 sps:$4 sm:$0xff]  }
 0x33a   :  { %5738 = vmatmul.mubr.bf16.vlgmr.msra.gmra.mrb[12].mxu0 %v13472_v28  ;;  %5758 = vmatprep.subr.bf16.mxu1 %v1076_v56  ;;  %v317_v37 = vsel %vm300_vm0, %v14022_v42, %v297_v14 }
 0x33b   :  { %3714 = vrot.lane.b32.xlu1 %v13662_v1, %s16674_s14  ;;  %5759 = vmatpush1.bf16.msra.mxu1 %v1075_v35 }
 0x33c   :  { %5835 = vmatpush1.bf16.msra.mxu0 %v13662_v1  ;;  %2956 = vrot.lane.b32.xlu0 %v13757_v52, %s16653_s16  ;;  %v299_v16 = vpop.permute.xlu0 %298 }
 0x33d   :  { %v1243_v59 = vpop.permute.xlu1 %1242  ;;  %v318_v28 = vsel %vm300_vm0, %v297_v14, %v299_v16  ;;  %5866 = vmatprep.mubr.bf16.mxu0 %v14042_v17  ;;  %v11819_v17 = vld [vmem:[%s16588_s0 + $0x40] ss:$80 sps:$4 sm:$0xff]  }
 0x33e   :  { %5836 = vmatprep.subr.bf16.mxu0 %v318_v28  ;;  %v1265_v42 = vsel %vm1250_vm5, %v13693_v36, %v1243_v59  ;;  %v11822_v36 = vld [vmem:[%s16588_s0 + $0x48] ss:$80 sps:$4 sm:$0xff]  }
 0x33f   :  { %2958 = vrot.lane.b32.xlu1 %v11817_v5, %s16653_s16  ;;  %v11824_v5 = vld [vmem:[%s16588_s0 + $0x48] ss:$80 sps:$4 sm:$0xff]   ;;  %s16780_s16 = sld [smem:[#allocation8_spill]] }
 0x340   :  { %5837 = vmatpush1.bf16.msra.mxu0 %v317_v37  ;;  %3146 = vrot.lane.b32.xlu0 %v13757_v52, %s16654_s22  ;;  %v14150_v1 = vpop.permute.xlu0 %1244 }
 0x341   :  { %v487_v9 = vpop.permute.xlu1 %486  ;;  %v1266_v4 = vsel %vm1250_vm5, %v1243_v59, %v14150_v1 }
 0x342   :  { %5760 = vmatprep.subr.bf16.mxu1 %v1266_v4  ;;  %v507_v12 = vsel %vm490_vm1, %v14052_v54, %v487_v9 }
 0x343   :  { %3148 = vrot.lane.b32.xlu1 %v11818_v44, %s16654_s22  ;;  %5761 = vmatpush1.bf16.msra.mxu1 %v1265_v42 }
 0x344   :  { %4028 = vrot.lane.b32.xlu0 %v11819_v17, %s16702_s28  ;;  %v489_v62 = vpop.permute.xlu0 %488 }
 0x345   :  { %v508_v48 = vsel %vm490_vm1, %v487_v9, %v489_v62  ;;  %v1433_v15 = vpop.permute.xlu1 %1432 }
 0x346   :  { %5838 = vmatprep.subr.bf16.mxu0 %v508_v48  ;;  %v1455_v54 = vsel %vm1440_vm6, %v13712_v34, %v1433_v15 }
 0x347   :  { %4030 = vrot.lane.b32.xlu1 %v14163_v53, %s16702_s28  ;;  %5839 = vmatpush1.bf16.msra.mxu0 %v507_v12 }
 0x348   :  { %3336 = vrot.lane.b32.xlu0 %v13757_v52, %s16655_s23  ;;  %v14176_v29 = vpop.permute.xlu0 %1434 }
 0x349   :  { %v1456_v20 = vsel %vm1440_vm6, %v1433_v15, %v14176_v29 }
 0x34a   :  { %5762 = vmatprep.subr.bf16.mxu1 %v1456_v20 }
 0x34b   :  { %3338 = vrot.lane.b32.xlu1 %v11822_v36, %s16655_s23  ;;  %5763 = vmatpush1.bf16.msra.mxu1 %v1455_v54 }
 0x34c   :  { %4217 = vrot.lane.b32.xlu0 %v11819_v17, %s16703_s25 }
 0x34f   :  { %4219 = vrot.lane.b32.xlu1 %v14163_v53, %s16703_s25 }
 0x350   :  { %3526 = vrot.lane.b32.xlu0 %v13757_v52, %s16656_s19 }
 0x353   :  { %3528 = vrot.lane.b32.xlu1 %v11823_v3, %s16656_s19 }
 0x354   :  { %4406 = vrot.lane.b32.xlu0 %v11819_v17, %s16704_s21 }
 0x355   :  { %v5567_v34 = vpop.f32.mrb[8].mxu0 }
 0x356   :  { %v14193_v13 = vpop.permute.xlu1 %5115  ;;  %v5569_v58 = vpop.f32.mrb[9].mxu0 }
 0x357   :  { %v11578_v14 = vadd.f32 %v5483_v57, %v14193_v13  ;;  %4408 = vrot.lane.b32.xlu1 %v14163_v53, %s16704_s21  ;;  %v11582_v56 = vadd.f32 %v5569_v58, %v14193_v13  ;;  %v5571_v35 = vpop.f32.mrb[10].mxu0  ;;  %v11566_v16 = vadd.f32 %v13475_v24, %v14193_v13  ;;  %v14205_v59 = vadd.f32 %v5567_v34, %v14193_v13 }
 0x358   :  { %3716 = vrot.lane.b32.xlu0 %v13757_v52, %s16674_s14  ;;  %v5573_v57 = vpop.f32.mrb[11].mxu0  ;;  %v11569_v28 = vadd.f32 %v13745_v18, %v14193_v13  ;;  %v11570_v37 = vadd.f32 %v13750_v38, %v14193_v13  ;;  %v11573_v24 = vadd.f32 %v13767_v11, %v14193_v13  ;;  %v11565_v42 = vadd.f32 %v13465_v47, %v14193_v13 }
 0x359   :  { %v5927_v44 = vmax.f32 %v11578_v14, 0.0  ;;  %v5929_v9 = vmax.f32 %v11582_v56, 0.0  ;;  %v14213_v4 = vpop.permute.xlu0 %5120  ;;  %v5921_v12 = vmax.f32 %v11566_v16, 0.0 }
 0x35a   :  { %v677_v62 = vpop.permute.xlu1 %676  ;;  %v11580_v52 = vadd.f32 %v14125_v23, %v14213_v4  ;;  %v11584_v48 = vadd.f32 %v5573_v57, %v14213_v4  ;;  %v11568_v18 = vadd.f32 %v13486_v30, %v14213_v4  ;;  %v11571_v38 = vadd.f32 %v13759_v39, %v14213_v4 }
 0x35b   :  { %3718 = vrot.lane.b32.xlu1 %v11824_v5, %s16674_s14  ;;  %v697_v11 = vsel %vm680_vm2, %v14074_v22, %v677_v62  ;;  %v5922_v15 = vmax.f32 %v11569_v28, 0.0  ;;  %v11572_v47 = vadd.f32 %v13763_v2, %v14213_v4  ;;  %v5923_v3 = vmax.f32 %v11570_v37, 0.0 }
 0x35c   :  { %v5945_v36 = vmax.f32 %v11580_v52, 0.0  ;;  %v5947_v23 = vmax.f32 %v11584_v48, 0.0  ;;  %4595 = vrot.lane.b32.xlu0 %v11819_v17, %s16691_s24  ;;  %v5939_v20 = vmax.f32 %v11568_v18, 0.0  ;;  %v5940_v54 = vmax.f32 %v11571_v38, 0.0 }
 0x35d   :  { %v1623_v30 = vpop.permute.xlu0 %1622  ;;  %v5941_v34 = vmax.f32 %v11572_v47, 0.0  ;;  %v11575_v39 = vadd.f32 %v13780_v41, %v14213_v4  ;;  %v11567_v22 = vadd.f32 %v13481_v49, %v14213_v4  ;;  %v5924_v41 = vmax.f32 %v11573_v24, 0.0 }
 0x35e   :  { %v14236_v58 = vpack.c.bf16 %v5945_v36, %v5927_v44  ;;  %v14238_v14 = vpack.c.bf16 %v5947_v23, %v5929_v9  ;;  %v679_v2 = vpop.permute.xlu1 %678  ;;  %v14240_v56 = vpack.c.bf16 %v5939_v20, %v5921_v12  ;;  %v14242_v5 = vpack.c.bf16 %v5940_v54, %v5922_v15 }
 0x35f   :  { %4597 = vrot.lane.b32.xlu1 %v14163_v53, %s16691_s24  ;;  %v698_v17 = vsel %vm680_vm2, %v677_v62, %v679_v2  ;;  %v14247_v16 = vpack.c.bf16 %v5941_v34, %v5923_v3  ;;  %v5942_v57 = vmax.f32 %v11575_v39, 0.0  ;;  %v5920_v49 = vmax.f32 %v11565_v42, 0.0 }
 0x360   :  { %5840 = vmatprep.subr.bf16.mxu0 %v698_v17  ;;  %6047 = vrot.lane.b32.xlu0 %v14240_v56, %s16702_s28  ;;  %v5938_v28 = vmax.f32 %v11567_v22, 0.0  ;;  %v11574_v37 = vadd.f32 %v13776_v32, %v14193_v13  ;;  %v11576_v44 = vadd.f32 %v13784_v19, %v14213_v4  ;;  %v11577_v24 = vadd.f32 %v14113_v50, %v14193_v13  ;;  %v11827_v22 = vld [vmem:[%s16588_s0 + $0x4c] ss:$80 sps:$4 sm:$0xff]  }
 0x361   :  { %5841 = vmatpush1.bf16.msra.mxu0 %v697_v11  ;;  %v867_v9 = vpop.permute.xlu0 %866  ;;  %v14255_v52 = vpack.c.bf16 %v5942_v57, %v5924_v41  ;;  %v11579_v62 = vadd.f32 %v14118_v31, %v14213_v4  ;;  %v11583_v48 = vadd.f32 %v5571_v35, %v14213_v4  ;;  %v5928_v42 = vmax.f32 %v14205_v59, 0.0 }
 0x362   :  { %v14263_v18 = vpop.permute.xlu1 %1624  ;;  %v14265_v32 = vpack.c.bf16 %v5938_v28, %v5920_v49  ;;  %v5925_v38 = vmax.f32 %v11574_v37, 0.0  ;;  %v5943_v19 = vmax.f32 %v11576_v44, 0.0  ;;  %v5926_v50 = vmax.f32 %v11577_v24, 0.0  ;;  %v11829_v44 = vld [vmem:[%s16588_s0 + $0x4c] ss:$80 sps:$4 sm:$0xff]  }
 0x363   :  { %6049 = vrot.lane.b32.xlu1 %v14242_v5, %s16702_s28  ;;  %v1646_v11 = vsel %vm16728_vm7, %v1623_v30, %v14263_v18  ;;  %v5944_v12 = vmax.f32 %v11579_v62, 0.0  ;;  %v5946_v15 = vmax.f32 %v11583_v48, 0.0  ;;  %v1645_v31 = vsel %vm16729_vm8, %v13731_v51, %v1623_v30  ;;  %v14287_v51 = vld [vmem:[%s16588_s0 + $0x48] ss:$80 sps:$4 sm:$0xff]   ;;  %v11826_v30 = vld [vmem:[%s16588_s0 + $0x4c] ss:$80 sps:$4 sm:$0xff]  }
 0x364   :  { %5764 = vmatprep.subr.bf16.mxu1 %v1646_v11  ;;  %6051 = vrot.lane.b32.xlu0 %v14247_v16, %s16702_s28  ;;  %v14275_v35 = vpack.c.bf16 %v5943_v19, %v5925_v38  ;;  %v887_v54 = vsel %vm870_vm3, %v14096_v27, %v867_v9  ;;  %vm16730_vm7 = vcmask 752640  }
 0x365   :  { %5765 = vmatpush1.bf16.msra.mxu1 %v1645_v31  ;;  %v1813_v59 = vpop.permute.xlu0 %1812  ;;  %v14277_v47 = vpack.c.bf16 %v5944_v12, %v5926_v50  ;;  %v14279_v36 = vpack.c.bf16 %v5946_v15, %v5928_v42  ;;  %vm16731_vm8 = vmmov %vm16730_vm7 }
 0x366   :  { %v869_v23 = vpop.permute.xlu1 %868  ;;  %v1835_v27 = vsel %vm16731_vm8, %v13761_v25, %v1813_v59  ;;  %v11828_v25 = vld [vmem:[%s16588_s0 + $0x4c] ss:$80 sps:$4 sm:$0xff]  }
 0x367   :  { %6053 = vrot.lane.b32.xlu1 %v14255_v52, %s16702_s28  ;;  %v888_v20 = vsel %vm870_vm3, %v867_v9, %v869_v23 }
 0x368   :  { %5842 = vmatprep.subr.bf16.mxu0 %v888_v20  ;;  %6045 = vrot.lane.b32.xlu0 %v14265_v32, %s16702_s28 }
 0x369   :  { %5843 = vmatpush1.bf16.msra.mxu0 %v887_v54  ;;  %v1057_v3 = vpop.permute.xlu0 %1056 }
 0x36a   :  { %v14296_v34 = vpop.permute.xlu1 %1814  ;;  %v1077_v57 = vsel %vm1060_vm4, %v14122_v61, %v1057_v3 }
 0x36b   :  { %4032 = vrot.lane.b32.xlu1 %v14287_v51, %s16702_s28  ;;  %v1836_v39 = vsel %vm16730_vm7, %v1813_v59, %v14296_v34 }
 0x36c   :  { %5766 = vmatprep.subr.bf16.mxu1 %v1836_v39  ;;  %4034 = vrot.lane.b32.xlu0 %v11826_v30, %s16702_s28 }
 0x36d   :  { %5767 = vmatpush1.bf16.msra.mxu1 %v1835_v27  ;;  %v2003_v2 = vpop.permute.xlu0 %2002 }
 0x36e   :  { %v1059_v17 = vpop.permute.xlu1 %1058  ;;  %v2025_v61 = vsel %vm2010_vm9, %v13793_v55, %v2003_v2 }
 0x36f   :  { %4221 = vrot.lane.b32.xlu1 %v14287_v51, %s16703_s25  ;;  %v1078_v41 = vsel %vm1060_vm4, %v1057_v3, %v1059_v17 }
 0x370   :  { %5844 = vmatprep.subr.bf16.mxu0 %v1078_v41  ;;  %4223 = vrot.lane.b32.xlu0 %v11827_v22, %s16703_s25 }
 0x371   :  { %5845 = vmatpush1.bf16.msra.mxu0 %v1077_v57  ;;  %v1247_v49 = vpop.permute.xlu0 %1246 }
 0x372   :  { %v14317_v28 = vpop.permute.xlu1 %2004  ;;  %v1267_v48 = vsel %vm1250_vm5, %v14150_v1, %v1247_v49 }
 0x373   :  { %4410 = vrot.lane.b32.xlu1 %v14287_v51, %s16704_s21  ;;  %v2026_v37 = vsel %vm2010_vm9, %v2003_v2, %v14317_v28 }
 0x374   :  { %5768 = vmatprep.subr.bf16.mxu1 %v2026_v37  ;;  %4412 = vrot.lane.b32.xlu0 %v11828_v25, %s16704_s21 }
 0x375   :  { %5769 = vmatpush1.bf16.msra.mxu1 %v2025_v61  ;;  %v2193_v9 = vpop.permute.xlu0 %2192 }
 0x376   :  { %v1249_v24 = vpop.permute.xlu1 %1248  ;;  %v2215_v19 = vsel %vm2200_vm10, %v13815_v6, %v2193_v9 }
 0x377   :  { %4599 = vrot.lane.b32.xlu1 %v14287_v51, %s16691_s24  ;;  %v1268_v62 = vsel %vm1250_vm5, %v1247_v49, %v1249_v24  ;;  %vm16732_vm5 = vcmask 760832  }
 0x378   :  { %5846 = vmatprep.subr.bf16.mxu0 %v1268_v62  ;;  %4601 = vrot.lane.b32.xlu0 %v11829_v44, %s16691_s24  ;;  %vm16733_vm7 = vmmov %vm16732_vm5 }
 0x379   :  { %5847 = vmatpush1.bf16.msra.mxu0 %v1267_v48  ;;  %v1437_v55 = vpop.permute.xlu0 %1436 }
 0x37a   :  { %v2195_v42 = vpop.permute.xlu1 %2194  ;;  %v1457_v1 = vsel %vm1440_vm6, %v14176_v29, %v1437_v55 }
 0x37b   :  { %6055 = vrot.lane.b32.xlu1 %v14275_v35, %s16702_s28  ;;  %v2216_v38 = vsel %vm2200_vm10, %v2193_v9, %v2195_v42 }
 0x37c   :  { %5770 = vmatprep.subr.bf16.mxu1 %v2216_v38 }
 0x37d   :  { %5771 = vmatpush1.bf16.msra.mxu1 %v2215_v19  ;;  %v2383_v11 = vpop.permute.xlu0 %2382  ;;  %v11898_v19 = vld [vmem:[%s16589_s1 + $0xc] ss:$16 sps:$4 sm:$0xff]  }
 0x37e   :  { %v1439_v50 = vpop.permute.xlu1 %1438  ;;  %v2405_v23 = vsel %vm2390_vm11, %v13843_v33, %v2383_v11 }
 0x37f   :  { %v1458_v12 = vsel %vm1440_vm6, %v1437_v55, %v1439_v50  ;;  %vm16734_vm6 = vmmov %vm16731_vm8 }
 0x380   :  { %5848 = vmatprep.subr.bf16.mxu0 %v1458_v12  ;;  %vm16735_vm8 = vmmov %vm16734_vm6 }
 0x381   :  { %5849 = vmatpush1.bf16.msra.mxu0 %v1457_v1  ;;  %v1627_v15 = vpop.permute.xlu0 %1626 }
 0x382   :  { %v2385_v31 = vpop.permute.xlu1 %2384  ;;  %v1647_v30 = vsel %vm16733_vm7, %v14263_v18, %v1627_v15 }
 0x383   :  { %v2406_v59 = vsel %vm2390_vm11, %v2383_v11, %v2385_v31 }
 0x384   :  { %5772 = vmatprep.subr.bf16.mxu1 %v2406_v59 }
 0x385   :  { %5773 = vmatpush1.bf16.msra.mxu1 %v2405_v23  ;;  %v2573_v6 = vpop.permute.xlu0 %2572 }
 0x386   :  { %v1629_v20 = vpop.permute.xlu1 %1628  ;;  %v2595_v27 = vsel %vm2580_vm12, %v13865_v60, %v2573_v6 }
 0x387   :  { %v1648_v54 = vsel %vm16732_vm5, %v1627_v15, %v1629_v20  ;;  %vm16736_vm5 = vcmask 490496  }
 0x388   :  { %5850 = vmatprep.subr.bf16.mxu0 %v1648_v54  ;;  %vm16737_vm7 = vmmov %vm16736_vm5 }
 0x389   :  { %5851 = vmatpush1.bf16.msra.mxu0 %v1647_v30  ;;  %v1817_v29 = vpop.permute.xlu0 %1816 }
 0x38a   :  { %v2575_v3 = vpop.permute.xlu1 %2574  ;;  %v1837_v17 = vsel %vm16735_vm8, %v14296_v34, %v1817_v29 }
 0x38b   :  { %v2596_v39 = vsel %vm2580_vm12, %v2573_v6, %v2575_v3 }
 0x38c   :  { %5774 = vmatprep.subr.bf16.mxu1 %v2596_v39 }
 0x38d   :  { %5775 = vmatpush1.bf16.msra.mxu1 %v2595_v27  ;;  %v2763_v33 = vpop.permute.xlu0 %2762 }
 0x38e   :  { %v1819_v22 = vpop.permute.xlu1 %1818  ;;  %v2785_v25 = vsel %vm16737_vm7, %v13887_v40, %v2763_v33 }
 0x38f   :  { %v1838_v2 = vsel %vm16734_vm6, %v1817_v29, %v1819_v22  ;;  %vm16738_vm6 = vcmask 261120  }
 0x390   :  { %5852 = vmatprep.subr.bf16.mxu0 %v1838_v2  ;;  %vm16739_vm8 = vmmov %vm16738_vm6 }
 0x391   :  { %5853 = vmatpush1.bf16.msra.mxu0 %v1837_v17  ;;  %v2007_v18 = vpop.permute.xlu0 %2006 }
 0x392   :  { %v2765_v41 = vpop.permute.xlu1 %2764  ;;  %v2027_v61 = vsel %vm2010_vm9, %v14317_v28, %v2007_v18  ;;  %v11897_v28 = vld [vmem:[%s16589_s1] ss:$16 sps:$4 sm:$0xff]  }
 0x393   :  { %v2786_v57 = vsel %vm16736_vm5, %v2763_v33, %v2765_v41  ;;  %vm16740_vm5 = vcmask 130048  }
 0x394   :  { %5776 = vmatprep.subr.bf16.mxu1 %v2786_v57  ;;  %v11832_v57 = vld [vmem:[%s16588_s0 + $0x40] ss:$80 sps:$4 sm:$0xff]  }
 0x395   :  { %5777 = vmatpush1.bf16.msra.mxu1 %v2785_v25  ;;  %v2953_v60 = vpop.permute.xlu0 %2952 }
 0x396   :  { %v2009_v49 = vpop.permute.xlu1 %2008  ;;  %v2975_v40 = vsel %vm16739_vm8, %v13912_v46, %v2953_v60 }
 0x397   :  { %v2028_v37 = vsel %vm2010_vm9, %v2007_v18, %v2009_v49  ;;  %v11830_v49 = vld [vmem:[%s16588_s0 + $0x3c] ss:$80 sps:$4 sm:$0xff]   ;;  %s16790_s0 = sld [smem:[#allocation11_spill]] }
 0x398   :  { %5854 = vmatprep.subr.bf16.mxu0 %v2028_v37 }
 0x399   :  { %5855 = vmatpush1.bf16.msra.mxu0 %v2027_v61  ;;  %v2197_v34 = vpop.permute.xlu0 %2196 }
 0x39a   :  { %v14361_v44 = vpop.permute.xlu1 %2954  ;;  %v2217_v55 = vsel %vm2200_vm10, %v2195_v42, %v2197_v34 }
 0x39b   :  { %v2976_v9 = vsel %vm16738_vm6, %v2953_v60, %v14361_v44  ;;  %vm16743_vm6 = vcmask 490496  }
 0x39c   :  { %5778 = vmatprep.subr.bf16.mxu1 %v2976_v9  ;;  %vm16744_vm8 = vmmov %vm16743_vm6 }
 0x39d   :  { %5779 = vmatpush1.bf16.msra.mxu1 %v2975_v40  ;;  %v3143_v24 = vpop.permute.xlu0 %3142 }
 0x39e   :  { %v2199_v62 = vpop.permute.xlu1 %2198  ;;  %v3165_v42 = vsel %vm3150_vm15, %v13924_v63, %v3143_v24 }
 0x39f   :  { %v2218_v48 = vsel %vm2200_vm10, %v2197_v34, %v2199_v62  ;;  %vm16741_vm10 = vcmask 244736  }
 0x3a0   :  { %5856 = vmatprep.subr.bf16.mxu0 %v2218_v48  ;;  %5781 = vmatmul.mubr.bf16.vlgmr.msra.gmra.mrb[12].mxu1 %v11897_v28  ;;  %vm16742_vm7 = vmmov %vm16741_vm10 }
 0x3a1   :  { %5857 = vmatpush1.bf16.msra.mxu0 %v2217_v55  ;;  %v2387_v38 = vpop.permute.xlu0 %2386  ;;  %11369 = vmatprep.mubr.msk.bf16.mxu1 %vm16740_vm5, %v11898_v19 }
 0x3a2   :  { %v3145_v46 = vpop.permute.xlu1 %3144  ;;  %v2407_v15 = vsel %vm2390_vm11, %v2385_v31, %v2387_v38 }
 0x3a3   :  { %v3166_v11 = vsel %vm3150_vm15, %v3143_v24, %v3145_v46 }
 0x3a4   :  { %5791 = vmatprep.subr.bf16.mxu1 %v3166_v11 }
 0x3a5   :  { %5792 = vmatpush1.bf16.msra.mxu1 %v3165_v42  ;;  %v3333_v50 = vpop.permute.xlu0 %3332 }
 0x3a6   :  { %v2389_v12 = vpop.permute.xlu1 %2388  ;;  %v3355_v20 = vsel %vm16742_vm7, %v13949_v45, %v3333_v50 }
 0x3a7   :  { %v2408_v1 = vsel %vm2390_vm11, %v2387_v38, %v2389_v12 }
 0x3a8   :  { %5858 = vmatprep.subr.bf16.mxu0 %v2408_v1 }
 0x3a9   :  { %5859 = vmatpush1.bf16.msra.mxu0 %v2407_v15  ;;  %v2577_v59 = vpop.permute.xlu0 %2576 }
 0x3aa   :  { %v3335_v23 = vpop.permute.xlu1 %3334  ;;  %v2597_v29 = vsel %vm2580_vm12, %v2575_v3, %v2577_v59 }
 0x3ab   :  { %v3356_v6 = vsel %vm16741_vm10, %v3333_v50, %v3335_v23  ;;  %vm16747_vm10 = vcmask 130048  }
 0x3ac   :  { %5793 = vmatprep.subr.bf16.mxu1 %v3356_v6 }
 0x3ad   :  { %5794 = vmatpush1.bf16.msra.mxu1 %v3355_v20  ;;  %v3523_v54 = vpop.permute.xlu0 %3522 }
 0x3ae   :  { %v2579_v63 = vpop.permute.xlu1 %2578  ;;  %v3545_v33 = vsel %vm3530_vm14, %v13971_v43, %v3523_v54 }
 0x3af   :  { %v2598_v30 = vsel %vm2580_vm12, %v2577_v59, %v2579_v63  ;;  %vm16745_vm12 = vcmask 261120  }
 0x3b0   :  { %5860 = vmatprep.subr.bf16.mxu0 %v2598_v30  ;;  %vm16746_vm5 = vmmov %vm16745_vm12 }
 0x3b1   :  { %5861 = vmatpush1.bf16.msra.mxu0 %v2597_v29  ;;  %v2767_v39 = vpop.permute.xlu0 %2766 }
 0x3b2   :  { %v3525_v31 = vpop.permute.xlu1 %3524  ;;  %v2787_v17 = vsel %vm16744_vm8, %v2765_v41, %v2767_v39  ;;  %vm7077_vm8 = vcmask 474112  }
 0x3b3   :  { %v3546_v27 = vsel %vm3530_vm14, %v3523_v54, %v3525_v31 }
 0x3b4   :  { %5795 = vmatprep.subr.bf16.mxu1 %v3546_v27 }
 0x3b5   :  { %5796 = vmatpush1.bf16.msra.mxu1 %v3545_v33  ;;  %v3713_v22 = vpop.permute.xlu0 %3712 }
 0x3b6   :  { %v2769_v45 = vpop.permute.xlu1 %2768  ;;  %v3735_v43 = vsel %vm3720_vm13, %v13993_v0, %v3713_v22 }
 0x3b7   :  { %v2788_v2 = vsel %vm16743_vm6, %v2767_v39, %v2769_v45 }
 0x3b8   :  { %5862 = vmatprep.subr.bf16.mxu0 %v2788_v2 }
 0x3b9   :  { %5863 = vmatpush1.bf16.msra.mxu0 %v2787_v17  ;;  %v2957_v18 = vpop.permute.xlu0 %2956  ;;  %v11899_v17 = vld [vmem:[%s16589_s1 + $0x8] ss:$16 sps:$4 sm:$0xff]   ;;  %s11924_s1 = smov 122  }
 0x3ba   :  { %v3715_v3 = vpop.permute.xlu1 %3714  ;;  %v2977_v61 = vsel %vm16746_vm5, %v14361_v44, %v2957_v18  ;;  %vm16750_vm5 = vmmov %vm16747_vm10 }
 0x3bb   :  { %v3736_v25 = vsel %vm3720_vm13, %v3713_v22, %v3715_v3 }
 0x3bc   :  { %5797 = vmatprep.subr.bf16.mxu1 %v3736_v25 }
 0x3bd   :  { %5798 = vmatpush1.bf16.msra.mxu1 %v3735_v43  ;;  %v3147_v60 = vpop.permute.xlu0 %3146 }
 0x3be   :  { %v2959_v41 = vpop.permute.xlu1 %2958  ;;  %5799 = vmatprep.subr.bf16.mxu1 %v11832_v57  ;;  %v3167_v40 = vsel %vm3150_vm15, %v3145_v46, %v3147_v60 }
 0x3bf   :  { %v2978_v37 = vsel %vm16745_vm12, %v2957_v18, %v2959_v41  ;;  %vm7180_vm12 = vcmask 457728  }
 0x3c0   :  { %5864 = vmatprep.subr.bf16.mxu0 %v2978_v37 }
 0x3c1   :  { %5865 = vmatpush1.bf16.msra.mxu0 %v2977_v61  ;;  %v4029_v34 = vpop.permute.xlu0 %4028  ;;  %5800 = vmatpush1.bf16.msra.mxu1 %v11830_v49 }
 0x3c2   :  { %v3149_v9 = vpop.permute.xlu1 %3148  ;;  %v4050_v44 = vsel %vm300_vm0, %v14035_v7, %v4029_v34 }
 0x3c3   :  { %v3168_v0 = vsel %vm3150_vm15, %v3147_v60, %v3149_v9  ;;  %vm16748_vm15 = vmmov %vm16742_vm7 }
 0x3c4   :  { %5877 = vmatprep.subr.bf16.mxu0 %v3168_v0  ;;  %5867 = vmatmul.mubr.bf16.vlgmr.msra.gmra.mrb[16].mxu0 %v11897_v28 }
 0x3c5   :  { %5878 = vmatpush1.bf16.msra.mxu0 %v3167_v40  ;;  %v3337_v24 = vpop.permute.xlu0 %3336  ;;  %11370 = vmatprep.mubr.msk.bf16.mxu0 %vm16747_vm10, %v11898_v19  ;;  %vm16751_vm10 = vmmov %vm16743_vm6 }
 0x3c6   :  { %v14406_v62 = vpop.permute.xlu1 %4030  ;;  %v3357_v46 = vsel %vm16748_vm15, %v3335_v23, %v3337_v24  ;;  %vm16753_vm15 = vmmov %vm16743_vm6 }
 0x3c7   :  { %v4051_v48 = vsel %vm300_vm0, %v4029_v34, %v14406_v62 }
 0x3c8   :  { %5801 = vmatprep.subr.bf16.mxu1 %v4051_v48 }
 0x3c9   :  { %5802 = vmatpush1.bf16.msra.mxu1 %v4050_v44  ;;  %v4218_v55 = vpop.permute.xlu0 %4217 }
 0x3ca   :  { %v3339_v38 = vpop.permute.xlu1 %3338  ;;  %v4239_v50 = vsel %vm490_vm1, %v14065_v26, %v4218_v55 }
 0x3cb   :  { %v3358_v28 = vsel %vm16742_vm7, %v3337_v24, %v3339_v38  ;;  %vm16752_vm7 = vmmov %vm16743_vm6 }
 0x3cc   :  { %5879 = vmatprep.subr.bf16.mxu0 %v3358_v28 }
 0x3cd   :  { %5880 = vmatpush1.bf16.msra.mxu0 %v3357_v46  ;;  %v3527_v11 = vpop.permute.xlu0 %3526 }
 0x3ce   :  { %v14414_v19 = vpop.permute.xlu1 %4219  ;;  %v3547_v15 = vsel %vm3530_vm14, %v3525_v31, %v3527_v11 }
 0x3cf   :  { %v4240_v42 = vsel %vm490_vm1, %v4218_v55, %v14414_v19 }
 0x3d0   :  { %5803 = vmatprep.subr.bf16.mxu1 %v4240_v42 }
 0x3d1   :  { %5804 = vmatpush1.bf16.msra.mxu1 %v4239_v50  ;;  %v4407_v7 = vpop.permute.xlu0 %4406 }
 0x3d2   :  { %v3529_v12 = vpop.permute.xlu1 %3528  ;;  %v4428_v20 = vsel %vm680_vm2, %v14087_v8, %v4407_v7 }
 0x3d3   :  { %v3548_v1 = vsel %vm3530_vm14, %v3527_v11, %v3529_v12  ;;  %vm16749_vm14 = vmmov %vm16743_vm6 }
 0x3d4   :  { %5881 = vmatprep.subr.bf16.mxu0 %v3548_v1 }
 0x3d5   :  { %5882 = vmatpush1.bf16.msra.mxu0 %v3547_v15  ;;  %v3717_v59 = vpop.permute.xlu0 %3716 }
 0x3d6   :  { %v14422_v23 = vpop.permute.xlu1 %4408  ;;  %v3737_v30 = vsel %vm3720_vm13, %v3715_v3, %v3717_v59 }
 0x3d7   :  { %v4429_v6 = vsel %vm680_vm2, %v4407_v7, %v14422_v23 }
 0x3d8   :  { %5805 = vmatprep.subr.bf16.mxu1 %v4429_v6 }
 0x3d9   :  { %5806 = vmatpush1.bf16.msra.mxu1 %v4428_v20  ;;  %v4596_v26 = vpop.permute.xlu0 %4595 }
 0x3da   :  { %v3719_v54 = vpop.permute.xlu1 %3718  ;;  %v4617_v8 = vsel %vm870_vm3, %v14109_v21, %v4596_v26 }
 0x3db   :  { %v3738_v63 = vsel %vm3720_vm13, %v3717_v59, %v3719_v54  ;;  %vm6668_vm13 = vcmask 982016  }
 0x3dc   :  { %5883 = vmatprep.subr.bf16.mxu0 %v3738_v63 }
 0x3dd   :  { %5884 = vmatpush1.bf16.msra.mxu0 %v3737_v30  ;;  %v6048_v29 = vpop.permute.xlu0 %6047 }
 0x3de   :  { %v14430_v39 = vpop.permute.xlu1 %4597  ;;  %5885 = vmatprep.subr.bf16.mxu0 %v14287_v51 }
 0x3df   :  { %v4618_v31 = vsel %vm870_vm3, %v4596_v26, %v14430_v39 }
 0x3e0   :  { %5807 = vmatprep.subr.bf16.mxu1 %v4618_v31 }
 0x3e1   :  { %5808 = vmatpush1.bf16.msra.mxu1 %v4617_v8  ;;  %v6052_v27 = vpop.permute.xlu0 %6051  ;;  %5886 = vmatpush1.bf16.msra.mxu0 %v14163_v53 }
 0x3e2   :  { %v6050_v33 = vpop.permute.xlu1 %6049 }
 0x3e3   :  { %v6082_v22 = vsel %vm300_vm0, %v6048_v29, %v6050_v33  ;;  %v6083_v45 = vsel %vm300_vm0, %v6050_v33, %v6052_v27 }
 0x3e4   :  { %v14441_v2 = vmax.bf16 %v6082_v22, %v14240_v56  ;;  %v14444_v51 = vmax.bf16 %v6083_v45, %v14242_v5  ;;  %5824 = vmatmul.mubr.bf16.vlgmr.msra.gmra.mrb[12].mxu1 %v11899_v17 }
 0x3e5   :  { %v6046_v21 = vpop.permute.xlu0 %6045 }
 0x3e6   :  { %v6054_v18 = vpop.permute.xlu1 %6053  ;;  %6173 = vrot.lane.b32.xlu1 %v14444_v51, %s16681_s29  ;;  %6171 = vrot.lane.b32.xlu0 %v14441_v2, %s16681_s29  ;;  %v6081_v53 = vsel %vm300_vm0, %v6046_v21, %v6048_v29 }
 0x3e7   :  { %v6084_v56 = vsel %vm300_vm0, %v6052_v27, %v6054_v18  ;;  %v14456_v5 = vmax.bf16 %v6081_v53, %v14265_v32 }
 0x3e8   :  { %v14459_v3 = vmax.bf16 %v6084_v56, %v14247_v16 }
 0x3e9   :  { %v4035_v57 = vpop.permute.xlu0 %4034 }
 0x3ea   :  { %v4033_v25 = vpop.permute.xlu1 %4032  ;;  %6175 = vrot.lane.b32.xlu0 %v14459_v3, %s16681_s29  ;;  %6169 = vrot.lane.b32.xlu1 %v14456_v5, %s16681_s29 }
 0x3eb   :  { %v4053_v43 = vsel %vm300_vm0, %v4033_v25, %v4035_v57  ;;  %v4052_v60 = vsel %vm300_vm0, %v14406_v62, %v4033_v25 }
 0x3ec   :  { %5887 = vmatprep.subr.bf16.mxu0 %v4053_v43 }
 0x3ed   :  { %5888 = vmatpush1.bf16.msra.mxu0 %v4052_v60  ;;  %v5653_v32 = vpop.f32.mrb[8].mxu1  ;;  %v4224_v49 = vpop.permute.xlu0 %4223 }
 0x3ee   :  { %v11585_v16 = vadd.f32 %v5653_v32, %v14193_v13  ;;  %v4222_v41 = vpop.permute.xlu1 %4221  ;;  %6057 = vrot.lane.b32.xlu0 %v14277_v47, %s16702_s28  ;;  %6059 = vrot.lane.b32.xlu1 %v14236_v58, %s16702_s28  ;;  %v5655_v37 = vpop.f32.mrb[9].mxu1 }
 0x3ef   :  { %v11586_v61 = vadd.f32 %v5655_v37, %v14193_v13  ;;  %v5657_v34 = vpop.f32.mrb[10].mxu1  ;;  %v4242_v9 = vsel %vm490_vm1, %v4222_v41, %v4224_v49  ;;  %v4241_v0 = vsel %vm490_vm1, %v14414_v19, %v4222_v41 }
 0x3f0   :  { %v11587_v40 = vadd.f32 %v5657_v34, %v14213_v4  ;;  %5889 = vmatprep.subr.bf16.mxu0 %v4242_v9  ;;  %v5659_v24 = vpop.f32.mrb[11].mxu1  ;;  %v5930_v44 = vmax.f32 %v11585_v16, 0.0 }
 0x3f1   :  { %v11588_v62 = vadd.f32 %v5659_v24, %v14213_v4  ;;  %5890 = vmatpush1.bf16.msra.mxu0 %v4241_v0  ;;  %v4413_v48 = vpop.permute.xlu0 %4412  ;;  %v5931_v28 = vmax.f32 %v11586_v61, 0.0 }
 0x3f2   :  { %v5948_v55 = vmax.f32 %v11587_v40, 0.0  ;;  %v4411_v38 = vpop.permute.xlu1 %4410  ;;  %6061 = vrot.lane.b32.xlu0 %v14279_v36, %s16702_s28 }
 0x3f3   :  { %v5949_v46 = vmax.f32 %v11588_v62, 0.0  ;;  %v4431_v11 = vsel %vm680_vm2, %v4411_v38, %v4413_v48  ;;  %v4430_v19 = vsel %vm680_vm2, %v14422_v23, %v4411_v38  ;;  %vm6565_vm2 = vcmask 998400  }
 0x3f4   :  { %v14484_v42 = vpack.c.bf16 %v5948_v55, %v5930_v44  ;;  %5891 = vmatprep.subr.bf16.mxu0 %v4431_v11 }
 0x3f5   :  { %v14486_v50 = vpack.c.bf16 %v5949_v46, %v5931_v28  ;;  %5892 = vmatpush1.bf16.msra.mxu0 %v4430_v19  ;;  %v4602_v7 = vpop.permute.xlu0 %4601 }
 0x3f6   :  { %v4600_v12 = vpop.permute.xlu1 %4599 }
 0x3f7   :  { %v4620_v1 = vsel %vm870_vm3, %v4600_v12, %v4602_v7  ;;  %v4619_v15 = vsel %vm870_vm3, %v14430_v39, %v4600_v12 }
 0x3f8   :  { %5893 = vmatprep.subr.bf16.mxu0 %v4620_v1 }
 0x3f9   :  { %5894 = vmatpush1.bf16.msra.mxu0 %v4619_v15 }
 0x3fa   :  { %v6056_v59 = vpop.permute.xlu1 %6055 }
 0x3fb   :  { %v6085_v6 = vsel %vm300_vm0, %v6054_v18, %v6056_v59 }
 0x3fc   :  { %v14493_v23 = vmax.bf16 %v6085_v6, %v14255_v52  ;;  %5910 = vmatmul.mubr.bf16.vlgmr.msra.gmra.mrb[16].mxu0 %v11899_v17 }
 0x3fe   :  { %6177 = vrot.lane.b32.xlu1 %v14493_v23, %s16681_s29 }
 0x40d   :  { %v5739_v20 = vpop.f32.mrb[12].mxu0 }
 0x40e   :  { %v11589_v26 = vadd.f32 %v5739_v20, %v14193_v13  ;;  %v5741_v54 = vpop.f32.mrb[13].mxu0 }
 0x40f   :  { %v11590_v63 = vadd.f32 %v5741_v54, %v14193_v13  ;;  %v5743_v30 = vpop.f32.mrb[14].mxu0 }
 0x410   :  { %v11591_v29 = vadd.f32 %v5743_v30, %v14213_v4  ;;  %v5745_v39 = vpop.f32.mrb[15].mxu0  ;;  %v5932_v8 = vmax.f32 %v11589_v26, 0.0 }
 0x411   :  { %v11592_v31 = vadd.f32 %v5745_v39, %v14213_v4  ;;  %v5933_v52 = vmax.f32 %v11590_v63, 0.0 }
 0x412   :  { %v5950_v27 = vmax.f32 %v11591_v29, 0.0 }
 0x413   :  { %v5951_v33 = vmax.f32 %v11592_v31, 0.0 }
 0x414   :  { %v14501_v22 = vpack.c.bf16 %v5950_v27, %v5932_v8 }
 0x415   :  { %v14503_v45 = vpack.c.bf16 %v5951_v33, %v5933_v52 }
 0x458   :  { %v6174_v17 = vpop.permute.xlu1 %6173  ;;  %v6172_v21 = vpop.permute.xlu0 %6171 }
 0x459   :  { %v6206_v18 = vsel %vm1060_vm4, %v6172_v21, %v6174_v17 }
 0x45a   :  { %v14507_v53 = vmax.bf16 %v6206_v18, %v14441_v2 }
 0x45c   :  { %v6170_v56 = vpop.permute.xlu1 %6169  ;;  %6333 = vrot.lane.b32.xlu0 %v14507_v53, %s16703_s25  ;;  %8993 = vmatprep.subr.bf16.mxu1 %v14507_v53  ;;  %v6176_v57 = vpop.permute.xlu0 %6175 }
 0x45d   :  { %v6205_v25 = vsel %vm1060_vm4, %v6170_v56, %v6172_v21  ;;  %v6207_v43 = vsel %vm1060_vm4, %v6174_v17, %v6176_v57 }
 0x45e   :  { %v6239_v60 = vmax.bf16 %v6205_v25, %v14456_v5  ;;  %v14516_v32 = vmax.bf16 %v6207_v43, %v14444_v51 }
 0x460   :  { %6331 = vrot.lane.b32.xlu0 %v6239_v60, %s16703_s25  ;;  %8994 = vmatpush1.bf16.msra.mxu1 %v6239_v60  ;;  %v6060_v2 = vpop.permute.xlu1 %6059  ;;  %v6058_v16 = vpop.permute.xlu0 %6057 }
 0x461   :  { %6335 = vrot.lane.b32.xlu1 %v14516_v32, %s16703_s25  ;;  %v6086_v41 = vsel %vm300_vm0, %v6056_v59, %v6058_v16  ;;  %v6087_v61 = vsel %vm300_vm0, %v6058_v16, %v6060_v2 }
 0x462   :  { %v14587_v9 = vmax.bf16 %v6087_v61, %v14277_v47 }
 0x464   :  { %6437 = vrot.lane.b32.xlu0 %v14516_v32, %s16691_s24 }
 0x465   :  { %6435 = vrot.lane.b32.xlu1 %v14507_v53, %s16691_s24 }
 0x468   :  { %6537 = vrot.lane.b32.xlu0 %v14507_v53, %s11924_s1 }
 0x469   :  { %6433 = vrot.lane.b32.xlu1 %v6239_v60, %s16691_s24 }
 0x46c   :  { %6535 = vrot.lane.b32.xlu0 %v6239_v60, %s11924_s1 }
 0x46d   :  { %6539 = vrot.lane.b32.xlu1 %v14516_v32, %s11924_s1 }
 0x470   :  { %v14531_v51 = vpop.permute.xlu1 %6177  ;;  %6642 = vrot.lane.b32.xlu0 %v14516_v32, %s11925_s26 }
 0x471   :  { %v6208_v5 = vsel %vm1060_vm4, %v6176_v57, %v14531_v51  ;;  %6640 = vrot.lane.b32.xlu1 %v14507_v53, %s11925_s26 }
 0x472   :  { %v14540_v49 = vmax.bf16 %v6208_v5, %v14459_v3  ;;  %v14552_v3 = vmax.bf16 %v6086_v41, %v14275_v35  ;;  %v14572_v35 = vpop.permute.xlu0 %6061 }
 0x473   :  { %v6088_v37 = vsel %vm300_vm0, %v6060_v2, %v14572_v35 }
 0x474   :  { %9079 = vmatprep.subr.bf16.mxu0 %v14540_v49  ;;  %6743 = vrot.lane.b32.xlu0 %v14507_v53, %s16664_s13  ;;  %v14584_v34 = vmax.bf16 %v6088_v37, %v14236_v58  ;;  %v14624_v58 = vld [vmem:[%s16591_s3 + $0x4] ss:$16 sps:$4 sm:$0xff]  }
 0x475   :  { %6638 = vrot.lane.b32.xlu1 %v6239_v60, %s11925_s26  ;;  %9080 = vmatpush1.bf16.msra.mxu0 %v14516_v32 }
 0x476   :  { %9025 = vmatprep.mubr.bf16.mxu1 %v14624_v58  ;;  %9111 = vmatprep.mubr.bf16.mxu0 %v14624_v58 }
 0x478   :  { %6741 = vrot.lane.b32.xlu0 %v6239_v60, %s16664_s13 }
 0x479   :  { %6745 = vrot.lane.b32.xlu1 %v14516_v32, %s16664_s13 }
 0x47c   :  { %6179 = vrot.lane.b32.xlu0 %v14552_v3, %s16681_s29 }
 0x47d   :  { %6063 = vrot.lane.b32.xlu1 %v14238_v14, %s16702_s28 }
 0x480   :  { %6847 = vrot.lane.b32.xlu0 %v14516_v32, %s16670_s27 }
 0x481   :  { %6845 = vrot.lane.b32.xlu1 %v14507_v53, %s16670_s27 }
 0x484   :  { %6947 = vrot.lane.b32.xlu0 %v14507_v53, %s16652_s20 }
 0x485   :  { %6843 = vrot.lane.b32.xlu1 %v6239_v60, %s16670_s27 }
 0x488   :  { %6945 = vrot.lane.b32.xlu0 %v6239_v60, %s16652_s20 }
 0x489   :  { %6949 = vrot.lane.b32.xlu1 %v14516_v32, %s16652_s20 }
 0x48c   :  { %7051 = vrot.lane.b32.xlu0 %v14516_v32, %s11926_s7 }
 0x48d   :  { %7049 = vrot.lane.b32.xlu1 %v14507_v53, %s11926_s7 }
 0x490   :  { %7152 = vrot.lane.b32.xlu0 %v14507_v53, %s11927_s18 }
 0x491   :  { %7047 = vrot.lane.b32.xlu1 %v6239_v60, %s11926_s7 }
 0x494   :  { %7150 = vrot.lane.b32.xlu0 %v6239_v60, %s11927_s18 }
 0x495   :  { %7154 = vrot.lane.b32.xlu1 %v14516_v32, %s11927_s18 }
 0x498   :  { %6183 = vrot.lane.b32.xlu0 %v14584_v34, %s16681_s29 }
 0x499   :  { %6181 = vrot.lane.b32.xlu1 %v14587_v9, %s16681_s29 }
 0x49c   :  { %7285 = vrot.lane.b32.xlu0 %v14540_v49, %s16703_s25 }
 0x49d   :  { %7283 = vrot.lane.b32.xlu1 %v14516_v32, %s16703_s25 }
 0x4a0   :  { %7385 = vrot.lane.b32.xlu0 %v14516_v32, %s16691_s24 }
 0x4a1   :  { %7281 = vrot.lane.b32.xlu1 %v14507_v53, %s16703_s25 }
 0x4a4   :  { %7383 = vrot.lane.b32.xlu0 %v14507_v53, %s16691_s24 }
 0x4a5   :  { %7387 = vrot.lane.b32.xlu1 %v14540_v49, %s16691_s24 }
 0x4a8   :  { %7489 = vrot.lane.b32.xlu0 %v14540_v49, %s11924_s1 }
 0x4a9   :  { %7487 = vrot.lane.b32.xlu1 %v14516_v32, %s11924_s1 }
 0x4ac   :  { %7589 = vrot.lane.b32.xlu0 %v14516_v32, %s11925_s26 }
 0x4ad   :  { %7485 = vrot.lane.b32.xlu1 %v14507_v53, %s11924_s1 }
 0x4b0   :  { %7587 = vrot.lane.b32.xlu0 %v14507_v53, %s11925_s26 }
 0x4b1   :  { %7591 = vrot.lane.b32.xlu1 %v14540_v49, %s11925_s26 }
 0x4b4   :  { %7693 = vrot.lane.b32.xlu0 %v14540_v49, %s16664_s13 }
 0x4b5   :  { %7691 = vrot.lane.b32.xlu1 %v14516_v32, %s16664_s13 }
 0x4b7   :  { %v5825_v47 = vpop.f32.mrb[12].mxu1 }
 0x4b8   :  { %v11593_v0 = vadd.f32 %v5825_v47, %v14193_v13  ;;  %v5827_v40 = vpop.f32.mrb[13].mxu1  ;;  %6065 = vrot.lane.b32.xlu0 %v14484_v42, %s16702_s28 }
 0x4b9   :  { %v11594_v24 = vadd.f32 %v5827_v40, %v14193_v13  ;;  %7689 = vrot.lane.b32.xlu1 %v14507_v53, %s16664_s13  ;;  %v5829_v62 = vpop.f32.mrb[14].mxu1 }
 0x4ba   :  { %v11595_v48 = vadd.f32 %v5829_v62, %v14213_v4  ;;  %v5831_v44 = vpop.f32.mrb[15].mxu1  ;;  %v5934_v38 = vmax.f32 %v11593_v0, 0.0 }
 0x4bb   :  { %v11596_v55 = vadd.f32 %v5831_v44, %v14213_v4  ;;  %v5935_v46 = vmax.f32 %v11594_v24, 0.0 }
 0x4bc   :  { %v5952_v28 = vmax.f32 %v11595_v48, 0.0  ;;  %7795 = vrot.lane.b32.xlu0 %v14540_v49, %s16670_s27 }
 0x4bd   :  { %v5953_v11 = vmax.f32 %v11596_v55, 0.0  ;;  %7793 = vrot.lane.b32.xlu1 %v14516_v32, %s16670_s27 }
 0x4be   :  { %v14640_v19 = vpack.c.bf16 %v5952_v28, %v5934_v38 }
 0x4bf   :  { %v14642_v7 = vpack.c.bf16 %v5953_v11, %v5935_v46 }
 0x4c0   :  { %7895 = vrot.lane.b32.xlu0 %v14516_v32, %s16652_s20 }
 0x4c1   :  { %7791 = vrot.lane.b32.xlu1 %v14507_v53, %s16670_s27 }
 0x4c4   :  { %7893 = vrot.lane.b32.xlu0 %v14507_v53, %s16652_s20 }
 0x4c5   :  { %7897 = vrot.lane.b32.xlu1 %v14540_v49, %s16652_s20 }
 0x4c8   :  { %7999 = vrot.lane.b32.xlu0 %v14540_v49, %s11926_s7 }
 0x4c9   :  { %7997 = vrot.lane.b32.xlu1 %v14516_v32, %s11926_s7 }
 0x4cc   :  { %8099 = vrot.lane.b32.xlu0 %v14516_v32, %s11927_s18 }
 0x4cd   :  { %7995 = vrot.lane.b32.xlu1 %v14507_v53, %s11926_s7 }
 0x4ce   :  { %v6334_v12 = vpop.permute.xlu0 %6333 }
 0x4cf   :  { %v5911_v1 = vpop.f32.mrb[16].mxu0 }
 0x4d0   :  { %v11597_v15 = vadd.f32 %v5911_v1, %v14193_v13  ;;  %v5913_v59 = vpop.f32.mrb[17].mxu0  ;;  %8097 = vrot.lane.b32.xlu0 %v14507_v53, %s11927_s18 }
 0x4d1   :  { %v11598_v6 = vadd.f32 %v5913_v59, %v14193_v13  ;;  %8101 = vrot.lane.b32.xlu1 %v14540_v49, %s11927_s18  ;;  %v5915_v20 = vpop.f32.mrb[18].mxu0 }
 0x4d2   :  { %v11599_v26 = vadd.f32 %v5915_v20, %v14213_v4  ;;  %v5917_v54 = vpop.f32.mrb[19].mxu0  ;;  %v6332_v63 = vpop.permute.xlu0 %6331  ;;  %v5936_v31 = vmax.f32 %v11597_v15, 0.0 }
 0x4d3   :  { %v11600_v30 = vadd.f32 %v5917_v54, %v14213_v4  ;;  %v14668_v29 = vpop.permute.xlu1 %6335  ;;  %v6361_v39 = vsel %vm490_vm1, %v6332_v63, %v6334_v12  ;;  %v5937_v27 = vmax.f32 %v11598_v6, 0.0 }
 0x4d4   :  { %v5954_v8 = vmax.f32 %v11599_v26, 0.0  ;;  %6069 = vrot.lane.b32.xlu0 %v14501_v22, %s16702_s28  ;;  %v6362_v13 = vsel %vm490_vm1, %v6334_v12, %v14668_v29 }
 0x4d5   :  { %v5955_v52 = vmax.f32 %v11600_v30, 0.0  ;;  %6067 = vrot.lane.b32.xlu1 %v14486_v50, %s16702_s28  ;;  %8995 = vmatprep.subr.bf16.mxu1 %v6362_v13 }
 0x4d6   :  { %v14677_v33 = vpack.c.bf16 %v5954_v8, %v5936_v31  ;;  %8996 = vmatpush1.bf16.msra.mxu1 %v6361_v39  ;;  %v14679_v4 = vpop.permute.xlu0 %6437 }
 0x4d7   :  { %v14681_v17 = vpack.c.bf16 %v5955_v52, %v5937_v27  ;;  %v6436_v21 = vpop.permute.xlu1 %6435 }
 0x4d8   :  { %8229 = vrot.lane.b32.xlu0 %v14540_v49, %s16703_s25  ;;  %v6464_v18 = vsel %vm870_vm3, %v6436_v21, %v14679_v4 }
 0x4d9   :  { %8997 = vmatprep.subr.bf16.mxu1 %v6464_v18 }
 0x4da   :  { %v6538_v56 = vpop.permute.xlu0 %6537 }
 0x4db   :  { %v6434_v57 = vpop.permute.xlu1 %6433 }
 0x4dc   :  { %v6463_v25 = vsel %vm870_vm3, %v6434_v57, %v6436_v21  ;;  %8227 = vrot.lane.b32.xlu0 %v14516_v32, %s16703_s25 }
 0x4dd   :  { %8998 = vmatpush1.bf16.msra.mxu1 %v6463_v25 }
 0x4de   :  { %v6536_v43 = vpop.permute.xlu0 %6535 }
 0x4df   :  { %v14690_v60 = vpop.permute.xlu1 %6539  ;;  %v6566_v2 = vsel %vm6565_vm2, %v6536_v43, %v6538_v56 }
 0x4e0   :  { %v6567_v5 = vsel %vm6565_vm2, %v6538_v56, %v14690_v60 }
 0x4e1   :  { %8999 = vmatprep.subr.bf16.mxu1 %v6567_v5 }
 0x4e2   :  { %9000 = vmatpush1.bf16.msra.mxu1 %v6566_v2  ;;  %v14695_v16 = vpop.permute.xlu0 %6642 }
 0x4e3   :  { %v6641_v41 = vpop.permute.xlu1 %6640 }
 0x4e4   :  { %v6670_v37 = vsel %vm6668_vm13, %v6641_v41, %v14695_v16 }
 0x4e5   :  { %9001 = vmatprep.subr.bf16.mxu1 %v6670_v37 }
 0x4e6   :  { %v6744_v61 = vpop.permute.xlu0 %6743 }
 0x4e7   :  { %v6639_v47 = vpop.permute.xlu1 %6638 }
 0x4e8   :  { %v6669_v0 = vsel %vm6668_vm13, %v6639_v47, %v6641_v41 }
 0x4e9   :  { %9002 = vmatpush1.bf16.msra.mxu1 %v6669_v0 }
 0x4ea   :  { %v6742_v40 = vpop.permute.xlu0 %6741 }
 0x4eb   :  { %v14700_v24 = vpop.permute.xlu1 %6745  ;;  %v6771_v62 = vsel %vm2010_vm9, %v6742_v40, %v6744_v61 }
 0x4ec   :  { %v6772_v48 = vsel %vm2010_vm9, %v6744_v61, %v14700_v24 }
 0x4ed   :  { %9003 = vmatprep.subr.bf16.mxu1 %v6772_v48 }
 0x4ee   :  { %9004 = vmatpush1.bf16.msra.mxu1 %v6771_v62  ;;  %v6180_v44 = vpop.permute.xlu0 %6179 }
 0x4ef   :  { %v14705_v55 = vpop.permute.xlu1 %6063  ;;  %v6209_v38 = vsel %vm1060_vm4, %v14531_v51, %v6180_v44 }
 0x4f0   :  { %v6089_v28 = vsel %vm300_vm0, %v14572_v35, %v14705_v55  ;;  %v14713_v46 = vmax.bf16 %v6209_v38, %v14493_v23 }
 0x4f1   :  { %v14716_v11 = vmax.bf16 %v6089_v28, %v14279_v36 }
 0x4f2   :  { %8333 = vrot.lane.b32.xlu0 %v14713_v46, %s16691_s24  ;;  %v14720_v12 = vpop.permute.xlu0 %6847 }
 0x4f3   :  { %v6846_v1 = vpop.permute.xlu1 %6845  ;;  %6185 = vrot.lane.b32.xlu1 %v14716_v11, %s16681_s29 }
 0x4f4   :  { %v6874_v51 = vsel %vm2390_vm11, %v6846_v1, %v14720_v12 }
 0x4f5   :  { %9005 = vmatprep.subr.bf16.mxu1 %v6874_v51 }
 0x4f6   :  { %8433 = vrot.lane.b32.xlu0 %v14540_v49, %s11924_s1  ;;  %v6948_v23 = vpop.permute.xlu0 %6947 }
 0x4f7   :  { %v6844_v35 = vpop.permute.xlu1 %6843  ;;  %8231 = vrot.lane.b32.xlu1 %v14713_v46, %s16703_s25 }
 0x4f8   :  { %v6873_v36 = vsel %vm2390_vm11, %v6844_v35, %v6846_v1 }
 0x4f9   :  { %9006 = vmatpush1.bf16.msra.mxu1 %v6873_v36 }
 0x4fa   :  { %8431 = vrot.lane.b32.xlu0 %v14516_v32, %s11924_s1  ;;  %v6946_v15 = vpop.permute.xlu0 %6945 }
 0x4fb   :  { %v14733_v59 = vpop.permute.xlu1 %6949  ;;  %8331 = vrot.lane.b32.xlu1 %v14540_v49, %s16691_s24  ;;  %v6975_v6 = vsel %vm16749_vm14, %v6946_v15, %v6948_v23  ;;  %vm16754_vm14 = vmmov %vm16743_vm6 }
 0x4fc   :  { %v6976_v20 = vsel %vm16743_vm6, %v6948_v23, %v14733_v59 }
 0x4fd   :  { %9007 = vmatprep.subr.bf16.mxu1 %v6976_v20 }
 0x4fe   :  { %9008 = vmatpush1.bf16.msra.mxu1 %v6975_v6  ;;  %8537 = vrot.lane.b32.xlu0 %v14713_v46, %s11925_s26  ;;  %v14742_v26 = vpop.permute.xlu0 %7051 }
 0x4ff   :  { %v7050_v54 = vpop.permute.xlu1 %7049  ;;  %8329 = vrot.lane.b32.xlu1 %v14516_v32, %s16691_s24 }
 0x500   :  { %v7079_v63 = vsel %vm7077_vm8, %v7050_v54, %v14742_v26 }
 0x501   :  { %9009 = vmatprep.subr.bf16.mxu1 %v7079_v63 }
 0x502   :  { %6337 = vrot.lane.b32.xlu0 %v14540_v49, %s16703_s25  ;;  %v7153_v30 = vpop.permute.xlu0 %7152 }
 0x503   :  { %v7048_v39 = vpop.permute.xlu1 %7047  ;;  %8435 = vrot.lane.b32.xlu1 %v14713_v46, %s11924_s1 }
 0x504   :  { %v7078_v31 = vsel %vm7077_vm8, %v7048_v39, %v7050_v54  ;;  %v14842_v39 = vld [vmem:[%s16591_s3 + $0xc] ss:$16 sps:$4 sm:$0xff]  }
 0x505   :  { %9010 = vmatpush1.bf16.msra.mxu1 %v7078_v31 }
 0x506   :  { %v7151_v8 = vpop.permute.xlu0 %7150 }
 0x507   :  { %v14753_v13 = vpop.permute.xlu1 %7154  ;;  %8535 = vrot.lane.b32.xlu1 %v14540_v49, %s11925_s26  ;;  %v7181_v27 = vsel %vm7180_vm12, %v7151_v8, %v7153_v30 }
 0x508   :  { %v7182_v52 = vsel %vm7180_vm12, %v7153_v30, %v14753_v13  ;;  %v14837_v30 = vld [vmem:[%s16591_s3] ss:$16 sps:$4 sm:$0xff]  }
 0x509   :  { %9011 = vmatprep.subr.bf16.mxu1 %v7182_v52 }
 0x50a   :  { %9012 = vmatpush1.bf16.msra.mxu1 %v7181_v27  ;;  %v14760_v21 = vpop.permute.xlu0 %6183 }
 0x50b   :  { %v6182_v18 = vpop.permute.xlu1 %6181  ;;  %8533 = vrot.lane.b32.xlu1 %v14516_v32, %s11925_s26  ;;  %9013 = vmatprep.subr.bf16.mxu1 %v14516_v32 }
 0x50c   :  { %v6210_v56 = vsel %vm1060_vm4, %v6180_v44, %v6182_v18  ;;  %v6211_v25 = vsel %vm1060_vm4, %v6182_v18, %v14760_v21 }
 0x50d   :  { %v14767_v57 = vmax.bf16 %v6210_v56, %v14552_v3  ;;  %v14781_v3 = vmax.bf16 %v6211_v25, %v14587_v9 }
 0x50e   :  { %9014 = vmatpush1.bf16.msra.mxu1 %v14507_v53  ;;  %v14772_v43 = vpop.permute.xlu0 %7285 }
 0x50f   :  { %v7284_v2 = vpop.permute.xlu1 %7283  ;;  %6341 = vrot.lane.b32.xlu0 %v14767_v57, %s16703_s25  ;;  %6339 = vrot.lane.b32.xlu1 %v14713_v46, %s16703_s25 }
 0x510   :  { %v7312_v5 = vsel %vm490_vm1, %v7284_v2, %v14772_v43 }
 0x511   :  { %9015 = vmatprep.subr.bf16.mxu1 %v7312_v5 }
 0x512   :  { %v7386_v41 = vpop.permute.xlu0 %7385 }
 0x513   :  { %v7282_v37 = vpop.permute.xlu1 %7281  ;;  %6439 = vrot.lane.b32.xlu0 %v14540_v49, %s16691_s24  ;;  %6343 = vrot.lane.b32.xlu1 %v14781_v3, %s16703_s25 }
 0x514   :  { %v7311_v53 = vsel %vm490_vm1, %v7282_v37, %v7284_v2 }
 0x515   :  { %9016 = vmatpush1.bf16.msra.mxu1 %v7311_v53 }
 0x516   :  { %v7384_v61 = vpop.permute.xlu0 %7383 }
 0x517   :  { %v14788_v47 = vpop.permute.xlu1 %7387  ;;  %6443 = vrot.lane.b32.xlu0 %v14767_v57, %s16691_s24  ;;  %6441 = vrot.lane.b32.xlu1 %v14713_v46, %s16691_s24  ;;  %v7413_v9 = vsel %vm870_vm3, %v7384_v61, %v7386_v41 }
 0x518   :  { %v7414_v0 = vsel %vm870_vm3, %v7386_v41, %v14788_v47 }
 0x519   :  { %9017 = vmatprep.subr.bf16.mxu1 %v7414_v0 }
 0x51a   :  { %9018 = vmatpush1.bf16.msra.mxu1 %v7413_v9  ;;  %v14797_v40 = vpop.permute.xlu0 %7489 }
 0x51b   :  { %v7488_v62 = vpop.permute.xlu1 %7487  ;;  %6541 = vrot.lane.b32.xlu0 %v14540_v49, %s11924_s1  ;;  %6445 = vrot.lane.b32.xlu1 %v14781_v3, %s16691_s24 }
 0x51c   :  { %v7516_v48 = vsel %vm6565_vm2, %v7488_v62, %v14797_v40 }
 0x51d   :  { %9019 = vmatprep.subr.bf16.mxu1 %v7516_v48 }
 0x51e   :  { %v7590_v44 = vpop.permute.xlu0 %7589 }
 0x51f   :  { %v7486_v38 = vpop.permute.xlu1 %7485  ;;  %6545 = vrot.lane.b32.xlu0 %v14767_v57, %s11924_s1  ;;  %6543 = vrot.lane.b32.xlu1 %v14713_v46, %s11924_s1 }
 0x520   :  { %v7515_v28 = vsel %vm6565_vm2, %v7486_v38, %v7488_v62 }
 0x521   :  { %9020 = vmatpush1.bf16.msra.mxu1 %v7515_v28 }
 0x522   :  { %v7588_v1 = vpop.permute.xlu0 %7587 }
 0x523   :  { %v14810_v51 = vpop.permute.xlu1 %7591  ;;  %6644 = vrot.lane.b32.xlu0 %v14540_v49, %s11925_s26  ;;  %6547 = vrot.lane.b32.xlu1 %v14781_v3, %s11924_s1  ;;  %v7617_v23 = vsel %vm6668_vm13, %v7588_v1, %v7590_v44 }
 0x524   :  { %v7618_v35 = vsel %vm6668_vm13, %v7590_v44, %v14810_v51 }
 0x525   :  { %9021 = vmatprep.subr.bf16.mxu1 %v7618_v35 }
 0x526   :  { %9022 = vmatpush1.bf16.msra.mxu1 %v7617_v23  ;;  %v14819_v36 = vpop.permute.xlu0 %7693 }
 0x527   :  { %v7692_v15 = vpop.permute.xlu1 %7691  ;;  %6648 = vrot.lane.b32.xlu0 %v14767_v57, %s11925_s26  ;;  %6646 = vrot.lane.b32.xlu1 %v14713_v46, %s11925_s26 }
 0x528   :  { %v7720_v6 = vsel %vm2010_vm9, %v7692_v15, %v14819_v36 }
 0x529   :  { %9023 = vmatprep.subr.bf16.mxu1 %v7720_v6 }
 0x52a   :  { %v14827_v20 = vpop.permute.xlu0 %6065 }
 0x52b   :  { %v7690_v54 = vpop.permute.xlu1 %7689  ;;  %6747 = vrot.lane.b32.xlu0 %v14540_v49, %s16664_s13  ;;  %6650 = vrot.lane.b32.xlu1 %v14781_v3, %s11925_s26  ;;  %v6090_v25 = vsel %vm300_vm0, %v14705_v55, %v14827_v20 }
 0x52c   :  { %v7719_v63 = vsel %vm2010_vm9, %v7690_v54, %v7692_v15  ;;  %v14873_v53 = vmax.bf16 %v6090_v25, %v14238_v14 }
 0x52d   :  { %9024 = vmatpush1.bf16.msra.mxu1 %v7719_v63 }
 0x52e   :  { %v14844_v31 = vpop.permute.xlu0 %7795 }
 0x52f   :  { %v7794_v8 = vpop.permute.xlu1 %7793  ;;  %6751 = vrot.lane.b32.xlu0 %v14767_v57, %s16664_s13  ;;  %6749 = vrot.lane.b32.xlu1 %v14713_v46, %s16664_s13 }
 0x530   :  { %v7822_v27 = vsel %vm2390_vm11, %v7794_v8, %v14844_v31  ;;  %9026 = vmatmul.mubr.bf16.vlgmr.msra.gmra.mrb[16].mxu1 %v14837_v30 }
 0x531   :  { %9036 = vmatprep.subr.bf16.mxu1 %v7822_v27  ;;  %11375 = vmatprep.mubr.msk.bf16.mxu1 %vm16750_vm5, %v14842_v39  ;;  %vm16755_vm5 = vmmov %vm16743_vm6 }
 0x532   :  { %v7896_v52 = vpop.permute.xlu0 %7895 }
 0x533   :  { %v7792_v18 = vpop.permute.xlu1 %7791  ;;  %6071 = vrot.lane.b32.xlu0 %v14503_v45, %s16702_s28  ;;  %6753 = vrot.lane.b32.xlu1 %v14781_v3, %s16664_s13 }
 0x534   :  { %v7821_v56 = vsel %vm2390_vm11, %v7792_v18, %v7794_v8 }
 0x535   :  { %9037 = vmatpush1.bf16.msra.mxu1 %v7821_v56 }
 0x536   :  { %v7894_v2 = vpop.permute.xlu0 %7893 }
 0x537   :  { %v14863_v5 = vpop.permute.xlu1 %7897  ;;  %6851 = vrot.lane.b32.xlu0 %v14713_v46, %s16670_s27  ;;  %6849 = vrot.lane.b32.xlu1 %v14540_v49, %s16670_s27  ;;  %v7923_v41 = vsel %vm16751_vm10, %v7894_v2, %v7896_v52  ;;  %vm16756_vm10 = vcmask 130048  }
 0x538   :  { %v7924_v37 = vsel %vm16752_vm7, %v7896_v52, %v14863_v5  ;;  %vm16757_vm7 = vmmov %vm16756_vm10 }
 0x539   :  { %9038 = vmatprep.subr.bf16.mxu1 %v7924_v37 }
 0x53a   :  { %9039 = vmatpush1.bf16.msra.mxu1 %v7923_v41  ;;  %v14875_v55 = vpop.permute.xlu0 %7999 }
 0x53b   :  { %v7998_v61 = vpop.permute.xlu1 %7997  ;;  %6853 = vrot.lane.b32.xlu0 %v14767_v57, %s16670_s27  ;;  %6187 = vrot.lane.b32.xlu1 %v14873_v53, %s16681_s29 }
 0x53c   :  { %v8026_v9 = vsel %vm7077_vm8, %v7998_v61, %v14875_v55 }
 0x53d   :  { %9040 = vmatprep.subr.bf16.mxu1 %v8026_v9 }
 0x53e   :  { %v8100_v0 = vpop.permute.xlu0 %8099 }
 0x53f   :  { %v7996_v62 = vpop.permute.xlu1 %7995  ;;  %6951 = vrot.lane.b32.xlu0 %v14540_v49, %s16652_s20  ;;  %6855 = vrot.lane.b32.xlu1 %v14781_v3, %s16670_s27 }
 0x540   :  { %v8025_v14 = vsel %vm7077_vm8, %v7996_v62, %v7998_v61 }
 0x541   :  { %9041 = vmatpush1.bf16.msra.mxu1 %v8025_v14 }
 0x542   :  { %v8098_v48 = vpop.permute.xlu0 %8097 }
 0x543   :  { %v14888_v44 = vpop.permute.xlu1 %8101  ;;  %6955 = vrot.lane.b32.xlu0 %v14767_v57, %s16652_s20  ;;  %6953 = vrot.lane.b32.xlu1 %v14713_v46, %s16652_s20  ;;  %v8127_v38 = vsel %vm7180_vm12, %v8098_v48, %v8100_v0 }
 0x544   :  { %v8128_v28 = vsel %vm7180_vm12, %v8100_v0, %v14888_v44 }
 0x545   :  { %9042 = vmatprep.subr.bf16.mxu1 %v8128_v28 }
 0x546   :  { %9043 = vmatpush1.bf16.msra.mxu1 %v8127_v38 }
 0x547   :  { %7053 = vrot.lane.b32.xlu0 %v14540_v49, %s11926_s7  ;;  %6957 = vrot.lane.b32.xlu1 %v14781_v3, %s16652_s20  ;;  %v6068_v1 = vpop.permute.xlu1 %6067 }
 0x548   :  { %9044 = vmatprep.subr.bf16.mxu1 %v14540_v49  ;;  %v6091_v23 = vsel %vm300_vm0, %v14827_v20, %v6068_v1 }
 0x549   :  { %v14924_v35 = vmax.bf16 %v6091_v23, %v14484_v42 }
 0x54a   :  { %9045 = vmatpush1.bf16.msra.mxu1 %v14516_v32  ;;  %v14915_v32 = vpop.permute.xlu0 %6069 }
 0x54b   :  { %7057 = vrot.lane.b32.xlu0 %v14767_v57, %s11926_s7  ;;  %7055 = vrot.lane.b32.xlu1 %v14713_v46, %s11926_s7  ;;  %v6092_v15 = vsel %vm300_vm0, %v6068_v1, %v14915_v32  ;;  %v14996_v1 = vld [vmem:[%s16591_s3 + $0x8] ss:$16 sps:$4 sm:$0xff]  }
 0x54c   :  { %v14933_v20 = vmax.bf16 %v6092_v15, %v14486_v50 }
 0x54e   :  { %v8230_v6 = vpop.permute.xlu0 %8229 }
 0x54f   :  { %7156 = vrot.lane.b32.xlu0 %v14540_v49, %s11927_s18  ;;  %7059 = vrot.lane.b32.xlu1 %v14781_v3, %s11926_s7 }
 0x552   :  { %v8228_v42 = vpop.permute.xlu0 %8227 }
 0x553   :  { %7160 = vrot.lane.b32.xlu0 %v14767_v57, %s11927_s18  ;;  %7158 = vrot.lane.b32.xlu1 %v14713_v46, %s11927_s18  ;;  %v8257_v18 = vsel %vm490_vm1, %v8228_v42, %v8230_v6 }
 0x557   :  { %7287 = vrot.lane.b32.xlu0 %v14713_v46, %s16703_s25  ;;  %7162 = vrot.lane.b32.xlu1 %v14781_v3, %s11927_s18 }
 0x55b   :  { %6189 = vrot.lane.b32.xlu0 %v14924_v35, %s16681_s29  ;;  %7289 = vrot.lane.b32.xlu1 %v14767_v57, %s16703_s25 }
 0x55f   :  { %7291 = vrot.lane.b32.xlu0 %v14781_v3, %s16703_s25  ;;  %6191 = vrot.lane.b32.xlu1 %v14933_v20, %s16681_s29 }
 0x563   :  { %7389 = vrot.lane.b32.xlu0 %v14713_v46, %s16691_s24 }
 0x564   :  { %v14943_v63 = vpop.permute.xlu0 %8333 }
 0x565   :  { %v14941_v54 = vpop.permute.xlu1 %6185 }
 0x566   :  { %v6212_v8 = vsel %vm1060_vm4, %v14760_v21, %v14941_v54 }
 0x567   :  { %v14949_v50 = vmax.bf16 %v6212_v8, %v14584_v34  ;;  %7393 = vrot.lane.b32.xlu0 %v14781_v3, %s16691_s24 }
 0x568   :  { %v8434_v56 = vpop.permute.xlu0 %8433 }
 0x569   :  { %v14953_v27 = vpop.permute.xlu1 %8231  ;;  %7293 = vrot.lane.b32.xlu1 %v14949_v50, %s16703_s25 }
 0x56a   :  { %v8258_v52 = vsel %vm490_vm1, %v8230_v6, %v14953_v27 }
 0x56b   :  { %7491 = vrot.lane.b32.xlu0 %v14713_v46, %s11924_s1  ;;  %9046 = vmatprep.subr.bf16.mxu1 %v8258_v52 }
 0x56c   :  { %9047 = vmatpush1.bf16.msra.mxu1 %v8257_v18  ;;  %v8432_v25 = vpop.permute.xlu0 %8431 }
 0x56d   :  { %v8332_v34 = vpop.permute.xlu1 %8331  ;;  %7391 = vrot.lane.b32.xlu1 %v14767_v57, %s16691_s24  ;;  %v8461_v9 = vsel %vm6565_vm2, %v8432_v25, %v8434_v56 }
 0x56e   :  { %v8360_v21 = vsel %vm870_vm3, %v8332_v34, %v14943_v63 }
 0x56f   :  { %7495 = vrot.lane.b32.xlu0 %v14781_v3, %s11924_s1  ;;  %9048 = vmatprep.subr.bf16.mxu1 %v8360_v21 }
 0x570   :  { %v14980_v0 = vpop.permute.xlu0 %8537 }
 0x571   :  { %v8330_v2 = vpop.permute.xlu1 %8329  ;;  %7395 = vrot.lane.b32.xlu1 %v14949_v50, %s16691_s24 }
 0x572   :  { %v8359_v41 = vsel %vm870_vm3, %v8330_v2, %v8332_v34 }
 0x573   :  { %7593 = vrot.lane.b32.xlu0 %v14713_v46, %s11925_s26  ;;  %9049 = vmatpush1.bf16.msra.mxu1 %v8359_v41 }
 0x574   :  { %v6338_v48 = vpop.permute.xlu0 %6337 }
 0x575   :  { %v14973_v37 = vpop.permute.xlu1 %8435  ;;  %7493 = vrot.lane.b32.xlu1 %v14767_v57, %s11924_s1  ;;  %v6363_v42 = vsel %vm490_vm1, %v14668_v29, %v6338_v48 }
 0x576   :  { %v8462_v61 = vsel %vm6565_vm2, %v8434_v56, %v14973_v37 }
 0x577   :  { %7597 = vrot.lane.b32.xlu0 %v14781_v3, %s11925_s26  ;;  %9050 = vmatprep.subr.bf16.mxu1 %v8462_v61 }
 0x578   :  { %9051 = vmatpush1.bf16.msra.mxu1 %v8461_v9 }
 0x579   :  { %v8536_v62 = vpop.permute.xlu1 %8535  ;;  %7497 = vrot.lane.b32.xlu1 %v14949_v50, %s11924_s1 }
 0x57a   :  { %v8564_v14 = vsel %vm6668_vm13, %v8536_v62, %v14980_v0 }
 0x57b   :  { %7695 = vrot.lane.b32.xlu0 %v14713_v46, %s16664_s13  ;;  %9052 = vmatprep.subr.bf16.mxu1 %v8564_v14 }
 0x57d   :  { %v8534_v38 = vpop.permute.xlu1 %8533  ;;  %7595 = vrot.lane.b32.xlu1 %v14767_v57, %s11925_s26 }
 0x57e   :  { %v8563_v28 = vsel %vm6668_vm13, %v8534_v38, %v8536_v62 }
 0x57f   :  { %7699 = vrot.lane.b32.xlu0 %v14781_v3, %s16664_s13  ;;  %9053 = vmatpush1.bf16.msra.mxu1 %v8563_v28 }
 0x580   :  { %9165 = vmatprep.subr.bf16.mxu1 %v14767_v57 }
 0x581   :  { %v6340_v23 = vpop.permute.xlu1 %6339  ;;  %7599 = vrot.lane.b32.xlu1 %v14949_v50, %s11925_s26  ;;  %v6342_v15 = vpop.permute.xlu0 %6341 }
 0x582   :  { %9069 = vmatmul.mubr.bf16.vlgmr.msra.gmra.mrb[16].mxu1 %v14996_v1  ;;  %v6364_v6 = vsel %vm490_vm1, %v6338_v48, %v6340_v23  ;;  %v6365_v29 = vsel %vm490_vm1, %v6340_v23, %v6342_v15 }
 0x583   :  { %6073 = vrot.lane.b32.xlu0 %v14640_v19, %s16702_s28  ;;  %9081 = vmatprep.subr.bf16.mxu0 %v6364_v6 }
 0x584   :  { %9166 = vmatpush1.bf16.msra.mxu1 %v14713_v46  ;;  %9082 = vmatpush1.bf16.msra.mxu0 %v6363_v42 }
 0x585   :  { %v15010_v8 = vpop.permute.xlu1 %6343  ;;  %7697 = vrot.lane.b32.xlu1 %v14767_v57, %s16664_s13  ;;  %v6440_v52 = vpop.permute.xlu0 %6439  ;;  %9197 = vmatprep.mubr.bf16.mxu1 %v14624_v58 }
 0x586   :  { %v6366_v18 = vsel %vm490_vm1, %v6342_v15, %v15010_v8  ;;  %v6465_v58 = vsel %vm870_vm3, %v14679_v4, %v6440_v52 }
 0x587   :  { %7799 = vrot.lane.b32.xlu0 %v14767_v57, %s16670_s27  ;;  %9167 = vmatprep.subr.bf16.mxu1 %v6366_v18 }
 0x588   :  { %9168 = vmatpush1.bf16.msra.mxu1 %v6365_v29 }
 0x589   :  { %v6442_v56 = vpop.permute.xlu1 %6441  ;;  %7701 = vrot.lane.b32.xlu1 %v14949_v50, %s16664_s13  ;;  %v6444_v34 = vpop.permute.xlu0 %6443 }
 0x58a   :  { %v6466_v21 = vsel %vm870_vm3, %v6440_v52, %v6442_v56  ;;  %v6467_v61 = vsel %vm870_vm3, %v6442_v56, %v6444_v34 }
 0x58b   :  { %7803 = vrot.lane.b32.xlu0 %v14949_v50, %s16670_s27  ;;  %9083 = vmatprep.subr.bf16.mxu0 %v6466_v21 }
 0x58c   :  { %9084 = vmatpush1.bf16.msra.mxu0 %v6465_v58 }
 0x58d   :  { %v15027_v25 = vpop.permute.xlu1 %6445  ;;  %7797 = vrot.lane.b32.xlu1 %v14713_v46, %s16670_s27  ;;  %v6542_v2 = vpop.permute.xlu0 %6541 }
 0x58e   :  { %v6468_v41 = vsel %vm870_vm3, %v6444_v34, %v15027_v25  ;;  %v6568_v14 = vsel %vm6565_vm2, %v14690_v60, %v6542_v2 }
 0x58f   :  { %7901 = vrot.lane.b32.xlu0 %v14767_v57, %s16652_s20  ;;  %9169 = vmatprep.subr.bf16.mxu1 %v6468_v41 }
 0x590   :  { %9170 = vmatpush1.bf16.msra.mxu1 %v6467_v61 }
 0x591   :  { %v6544_v9 = vpop.permute.xlu1 %6543  ;;  %7801 = vrot.lane.b32.xlu1 %v14781_v3, %s16670_s27  ;;  %v6546_v4 = vpop.permute.xlu0 %6545 }
 0x592   :  { %v6569_v62 = vsel %vm6565_vm2, %v6542_v2, %v6544_v9  ;;  %v6570_v23 = vsel %vm6565_vm2, %v6544_v9, %v6546_v4 }
 0x593   :  { %7905 = vrot.lane.b32.xlu0 %v14949_v50, %s16652_s20  ;;  %9085 = vmatprep.subr.bf16.mxu0 %v6569_v62 }
 0x594   :  { %9086 = vmatpush1.bf16.msra.mxu0 %v6568_v14 }
 0x595   :  { %v15043_v48 = vpop.permute.xlu1 %6547  ;;  %7899 = vrot.lane.b32.xlu1 %v14713_v46, %s16652_s20  ;;  %v6645_v38 = vpop.permute.xlu0 %6644 }
 0x596   :  { %v6571_v28 = vsel %vm6565_vm2, %v6546_v4, %v15043_v48  ;;  %v6671_v42 = vsel %vm6668_vm13, %v14695_v16, %v6645_v38 }
 0x597   :  { %8003 = vrot.lane.b32.xlu0 %v14767_v57, %s11926_s7  ;;  %9171 = vmatprep.subr.bf16.mxu1 %v6571_v28 }
 0x598   :  { %9172 = vmatpush1.bf16.msra.mxu1 %v6570_v23 }
 0x599   :  { %v6647_v15 = vpop.permute.xlu1 %6646  ;;  %7903 = vrot.lane.b32.xlu1 %v14781_v3, %s16652_s20  ;;  %v6649_v60 = vpop.permute.xlu0 %6648 }
 0x59a   :  { %v6672_v6 = vsel %vm6668_vm13, %v6645_v38, %v6647_v15  ;;  %v6673_v56 = vsel %vm6668_vm13, %v6647_v15, %v6649_v60 }
 0x59b   :  { %8007 = vrot.lane.b32.xlu0 %v14949_v50, %s11926_s7  ;;  %9087 = vmatprep.subr.bf16.mxu0 %v6672_v6 }
 0x59c   :  { %9088 = vmatpush1.bf16.msra.mxu0 %v6671_v42 }
 0x59d   :  { %v15059_v52 = vpop.permute.xlu1 %6650  ;;  %8001 = vrot.lane.b32.xlu1 %v14713_v46, %s11926_s7  ;;  %v6748_v18 = vpop.permute.xlu0 %6747 }
 0x59e   :  { %v6674_v29 = vsel %vm6668_vm13, %v6649_v60, %v15059_v52  ;;  %v6773_v58 = vsel %vm2010_vm9, %v14700_v24, %v6748_v18 }
 0x59f   :  { %8105 = vrot.lane.b32.xlu0 %v14767_v57, %s11927_s18  ;;  %9173 = vmatprep.subr.bf16.mxu1 %v6674_v29 }
 0x5a0   :  { %9174 = vmatpush1.bf16.msra.mxu1 %v6673_v56 }
 0x5a1   :  { %v6750_v34 = vpop.permute.xlu1 %6749  ;;  %8005 = vrot.lane.b32.xlu1 %v14781_v3, %s11926_s7  ;;  %v6752_v16 = vpop.permute.xlu0 %6751 }
 0x5a2   :  { %v6774_v21 = vsel %vm2010_vm9, %v6748_v18, %v6750_v34  ;;  %v6775_v9 = vsel %vm2010_vm9, %v6750_v34, %v6752_v16 }
 0x5a3   :  { %8109 = vrot.lane.b32.xlu0 %v14949_v50, %s11927_s18  ;;  %9089 = vmatprep.subr.bf16.mxu0 %v6774_v21 }
 0x5a4   :  { %9090 = vmatpush1.bf16.msra.mxu0 %v6773_v58 }
 0x5a5   :  { %v15075_v2 = vpop.permute.xlu1 %6753  ;;  %8103 = vrot.lane.b32.xlu1 %v14713_v46, %s11927_s18  ;;  %v15079_v41 = vpop.permute.xlu0 %6071 }
 0x5a6   :  { %v6776_v61 = vsel %vm2010_vm9, %v6752_v16, %v15075_v2  ;;  %v6093_v23 = vsel %vm300_vm0, %v14915_v32, %v15079_v41 }
 0x5a7   :  { %6077 = vrot.lane.b32.xlu0 %v14677_v33, %s16702_s28  ;;  %9175 = vmatprep.subr.bf16.mxu1 %v6776_v61  ;;  %v15109_v6 = vmax.bf16 %v6093_v23, %v14501_v22 }
 0x5a8   :  { %9176 = vmatpush1.bf16.msra.mxu1 %v6775_v9 }
 0x5a9   :  { %v6850_v4 = vpop.permute.xlu1 %6849  ;;  %8107 = vrot.lane.b32.xlu1 %v14781_v3, %s11927_s18  ;;  %v6852_v24 = vpop.permute.xlu0 %6851 }
 0x5aa   :  { %v6876_v62 = vsel %vm2390_vm11, %v6850_v4, %v6852_v24  ;;  %v6875_v14 = vsel %vm2390_vm11, %v14720_v12, %v6850_v4 }
 0x5ab   :  { %8235 = vrot.lane.b32.xlu0 %v14781_v3, %s16703_s25  ;;  %9091 = vmatprep.subr.bf16.mxu0 %v6876_v62 }
 0x5ac   :  { %9092 = vmatpush1.bf16.msra.mxu0 %v6875_v14 }
 0x5ad   :  { %v15093_v38 = vpop.permute.xlu1 %6187  ;;  %6075 = vrot.lane.b32.xlu1 %v14642_v7, %s16702_s28  ;;  %v6854_v28 = vpop.permute.xlu0 %6853 }
 0x5ae   :  { %v6877_v42 = vsel %vm2390_vm11, %v6852_v24, %v6854_v28  ;;  %v6213_v32 = vsel %vm1060_vm4, %v14941_v54, %v15093_v38 }
 0x5af   :  { %8237 = vrot.lane.b32.xlu0 %v14949_v50, %s16703_s25  ;;  %v15121_v22 = vmax.bf16 %v6213_v32, %v14716_v11 }
 0x5b1   :  { %v15102_v15 = vpop.permute.xlu1 %6855  ;;  %8233 = vrot.lane.b32.xlu1 %v14767_v57, %s16703_s25  ;;  %v6952_v12 = vpop.permute.xlu0 %6951 }
 0x5b2   :  { %v6878_v60 = vsel %vm2390_vm11, %v6854_v28, %v15102_v15  ;;  %v6977_v34 = vsel %vm16754_vm14, %v14733_v59, %v6952_v12  ;;  %vm16759_vm14 = vmmov %vm16755_vm5 }
 0x5b3   :  { %8335 = vrot.lane.b32.xlu0 %v14767_v57, %s16691_s24  ;;  %9177 = vmatprep.subr.bf16.mxu1 %v6878_v60 }
 0x5b4   :  { %9178 = vmatpush1.bf16.msra.mxu1 %v6877_v42 }
 0x5b5   :  { %v6954_v18 = vpop.permute.xlu1 %6953  ;;  %6193 = vrot.lane.b32.xlu1 %v15109_v6, %s16681_s29  ;;  %v6956_v29 = vpop.permute.xlu0 %6955 }
 0x5b6   :  { %v6978_v56 = vsel %vm16753_vm15, %v6952_v12, %v6954_v18  ;;  %v6979_v11 = vsel %vm16755_vm5, %v6954_v18, %v6956_v29  ;;  %vm16758_vm15 = vmmov %vm16755_vm5 }
 0x5b7   :  { %8339 = vrot.lane.b32.xlu0 %v14949_v50, %s16691_s24  ;;  %9093 = vmatprep.subr.bf16.mxu0 %v6978_v56 }
 0x5b8   :  { %9094 = vmatpush1.bf16.msra.mxu0 %v6977_v34 }
 0x5b9   :  { %v15127_v54 = vpop.permute.xlu1 %6957  ;;  %8239 = vrot.lane.b32.xlu1 %v15121_v22, %s16703_s25  ;;  %v7054_v16 = vpop.permute.xlu0 %7053 }
 0x5ba   :  { %v6980_v21 = vsel %vm16743_vm6, %v6956_v29, %v15127_v54  ;;  %v7080_v9 = vsel %vm7077_vm8, %v14742_v26, %v7054_v16  ;;  %vm16760_vm6 = vmmov %vm16755_vm5 }
 0x5bb   :  { %8437 = vrot.lane.b32.xlu0 %v14767_v57, %s11924_s1  ;;  %9179 = vmatprep.subr.bf16.mxu1 %v6980_v21 }
 0x5bc   :  { %9180 = vmatpush1.bf16.msra.mxu1 %v6979_v11 }
 0x5bd   :  { %v7056_v58 = vpop.permute.xlu1 %7055  ;;  %8337 = vrot.lane.b32.xlu1 %v14781_v3, %s16691_s24  ;;  %v7058_v59 = vpop.permute.xlu0 %7057 }
 0x5be   :  { %v7081_v61 = vsel %vm7077_vm8, %v7054_v16, %v7056_v58  ;;  %v7082_v14 = vsel %vm7077_vm8, %v7056_v58, %v7058_v59 }
 0x5bf   :  { %8441 = vrot.lane.b32.xlu0 %v14949_v50, %s11924_s1  ;;  %9095 = vmatprep.subr.bf16.mxu0 %v7081_v61 }
 0x5c0   :  { %9096 = vmatpush1.bf16.msra.mxu0 %v7080_v9 }
 0x5c1   :  { %v15143_v4 = vpop.permute.xlu1 %7059  ;;  %8341 = vrot.lane.b32.xlu1 %v15121_v22, %s16691_s24  ;;  %v7157_v24 = vpop.permute.xlu0 %7156 }
 0x5c2   :  { %v7083_v62 = vsel %vm7077_vm8, %v7058_v59, %v15143_v4  ;;  %v7183_v12 = vsel %vm7180_vm12, %v14753_v13, %v7157_v24 }
 0x5c3   :  { %8539 = vrot.lane.b32.xlu0 %v14767_v57, %s11925_s26  ;;  %9181 = vmatprep.subr.bf16.mxu1 %v7083_v62 }
 0x5c4   :  { %9182 = vmatpush1.bf16.msra.mxu1 %v7082_v14 }
 0x5c5   :  { %v7159_v28 = vpop.permute.xlu1 %7158  ;;  %8439 = vrot.lane.b32.xlu1 %v14781_v3, %s11924_s1  ;;  %v7161_v26 = vpop.permute.xlu0 %7160 }
 0x5c6   :  { %v7184_v23 = vsel %vm7180_vm12, %v7157_v24, %v7159_v28  ;;  %v7185_v18 = vsel %vm7180_vm12, %v7159_v28, %v7161_v26 }
 0x5c7   :  { %8543 = vrot.lane.b32.xlu0 %v14949_v50, %s11925_s26  ;;  %9097 = vmatprep.subr.bf16.mxu0 %v7184_v23 }
 0x5c8   :  { %9098 = vmatpush1.bf16.msra.mxu0 %v7183_v12 }
 0x5c9   :  { %v15159_v60 = vpop.permute.xlu1 %7162  ;;  %8443 = vrot.lane.b32.xlu1 %v15121_v22, %s11924_s1  ;;  %9099 = vmatprep.subr.bf16.mxu0 %v14713_v46  ;;  %v7288_v42 = vpop.permute.xlu0 %7287 }
 0x5ca   :  { %v7186_v32 = vsel %vm7180_vm12, %v7161_v26, %v15159_v60 }
 0x5cb   :  { %6345 = vrot.lane.b32.xlu0 %v14949_v50, %s16703_s25  ;;  %9183 = vmatprep.subr.bf16.mxu1 %v7186_v32 }
 0x5cc   :  { %9100 = vmatpush1.bf16.msra.mxu0 %v14540_v49  ;;  %9184 = vmatpush1.bf16.msra.mxu1 %v7185_v18  ;;  %v7313_v49 = vsel %vm490_vm1, %v14772_v43, %v7288_v42 }
 0x5cd   :  { %v7290_v13 = vpop.permute.xlu1 %7289  ;;  %8541 = vrot.lane.b32.xlu1 %v14781_v3, %s11925_s26  ;;  %9185 = vmatprep.subr.bf16.mxu1 %v14781_v3  ;;  %v6190_v29 = vpop.permute.xlu0 %6189 }
 0x5ce   :  { %v6214_v56 = vsel %vm1060_vm4, %v15093_v38, %v6190_v29  ;;  %v7314_v34 = vsel %vm490_vm1, %v7288_v42, %v7290_v13 }
 0x5cf   :  { %v15177_v16 = vmax.bf16 %v6214_v56, %v14873_v53  ;;  %9101 = vmatprep.subr.bf16.mxu0 %v7314_v34 }
 0x5d0   :  { %9102 = vmatpush1.bf16.msra.mxu0 %v7313_v49  ;;  %9186 = vmatpush1.bf16.msra.mxu1 %v14767_v57 }
 0x5d1   :  { %v15182_v21 = vpop.permute.xlu1 %6191  ;;  %8545 = vrot.lane.b32.xlu1 %v15121_v22, %s11925_s26  ;;  %6349 = vrot.lane.b32.xlu0 %v15177_v16, %s16703_s25  ;;  %v7292_v38 = vpop.permute.xlu0 %7291 }
 0x5d2   :  { %v6215_v53 = vsel %vm1060_vm4, %v6190_v29, %v15182_v21  ;;  %v7315_v9 = vsel %vm490_vm1, %v7290_v13, %v7292_v38 }
 0x5d3   :  { %v15195_v11 = vmax.bf16 %v6215_v53, %v14924_v35 }
 0x5d5   :  { %6347 = vrot.lane.b32.xlu1 %v15121_v22, %s16703_s25  ;;  %6447 = vrot.lane.b32.xlu0 %v14949_v50, %s16691_s24  ;;  %v7390_v43 = vpop.permute.xlu0 %7389 }
 0x5d6   :  { %v7415_v28 = vsel %vm870_vm3, %v14788_v47, %v7390_v43 }
 0x5d9   :  { %6351 = vrot.lane.b32.xlu1 %v15195_v11, %s16703_s25  ;;  %6451 = vrot.lane.b32.xlu0 %v15177_v16, %s16691_s24  ;;  %v7394_v58 = vpop.permute.xlu0 %7393 }
 0x5db   :  { %v15201_v59 = vpop.permute.xlu1 %7293 }
 0x5dc   :  { %v7316_v61 = vsel %vm490_vm1, %v7292_v38, %v15201_v59 }
 0x5dd   :  { %6449 = vrot.lane.b32.xlu1 %v15121_v22, %s16691_s24  ;;  %6549 = vrot.lane.b32.xlu0 %v14949_v50, %s11924_s1  ;;  %v7492_v35 = vpop.permute.xlu0 %7491 }
 0x5de   :  { %9187 = vmatprep.subr.bf16.mxu1 %v7316_v61  ;;  %v7517_v13 = vsel %vm6565_vm2, %v14797_v40, %v7492_v35 }
 0x5df   :  { %9188 = vmatpush1.bf16.msra.mxu1 %v7315_v9  ;;  %v7392_v24 = vpop.permute.xlu1 %7391 }
 0x5e0   :  { %v7416_v62 = vsel %vm870_vm3, %v7390_v43, %v7392_v24  ;;  %v7417_v42 = vsel %vm870_vm3, %v7392_v24, %v7394_v58 }
 0x5e1   :  { %6453 = vrot.lane.b32.xlu1 %v15195_v11, %s16691_s24  ;;  %6553 = vrot.lane.b32.xlu0 %v15177_v16, %s11924_s1  ;;  %v7496_v14 = vpop.permute.xlu0 %7495 }
 0x5e2   :  { %9103 = vmatprep.subr.bf16.mxu0 %v7416_v62 }
 0x5e3   :  { %9104 = vmatpush1.bf16.msra.mxu0 %v7415_v28  ;;  %v15217_v26 = vpop.permute.xlu1 %7395 }
 0x5e4   :  { %v7418_v23 = vsel %vm870_vm3, %v7394_v58, %v15217_v26 }
 0x5e5   :  { %6551 = vrot.lane.b32.xlu1 %v15121_v22, %s11924_s1  ;;  %6652 = vrot.lane.b32.xlu0 %v14949_v50, %s11925_s26  ;;  %v7594_v12 = vpop.permute.xlu0 %7593 }
 0x5e6   :  { %9189 = vmatprep.subr.bf16.mxu1 %v7418_v23  ;;  %v7619_v43 = vsel %vm6668_vm13, %v14810_v51, %v7594_v12 }
 0x5e7   :  { %9190 = vmatpush1.bf16.msra.mxu1 %v7417_v42  ;;  %v7494_v32 = vpop.permute.xlu1 %7493 }
 0x5e8   :  { %v7518_v47 = vsel %vm6565_vm2, %v7492_v35, %v7494_v32  ;;  %v7519_v49 = vsel %vm6565_vm2, %v7494_v32, %v7496_v14 }
 0x5e9   :  { %6555 = vrot.lane.b32.xlu1 %v15195_v11, %s11924_s1  ;;  %6656 = vrot.lane.b32.xlu0 %v15177_v16, %s11925_s26  ;;  %v7598_v18 = vpop.permute.xlu0 %7597 }
 0x5ea   :  { %9105 = vmatprep.subr.bf16.mxu0 %v7518_v47 }
 0x5eb   :  { %9106 = vmatpush1.bf16.msra.mxu0 %v7517_v13  ;;  %v15233_v29 = vpop.permute.xlu1 %7497 }
 0x5ec   :  { %v7520_v56 = vsel %vm6565_vm2, %v7496_v14, %v15233_v29 }
 0x5ed   :  { %6654 = vrot.lane.b32.xlu1 %v15121_v22, %s11925_s26  ;;  %6755 = vrot.lane.b32.xlu0 %v14949_v50, %s16664_s13  ;;  %v7696_v34 = vpop.permute.xlu0 %7695 }
 0x5ee   :  { %9191 = vmatprep.subr.bf16.mxu1 %v7520_v56  ;;  %v7721_v14 = vsel %vm2010_vm9, %v14819_v36, %v7696_v34 }
 0x5ef   :  { %9192 = vmatpush1.bf16.msra.mxu1 %v7519_v49  ;;  %v7596_v38 = vpop.permute.xlu1 %7595 }
 0x5f0   :  { %v7620_v40 = vsel %vm6668_vm13, %v7594_v12, %v7596_v38  ;;  %v7621_v9 = vsel %vm6668_vm13, %v7596_v38, %v7598_v18 }
 0x5f1   :  { %6658 = vrot.lane.b32.xlu1 %v15195_v11, %s11925_s26  ;;  %6759 = vrot.lane.b32.xlu0 %v15177_v16, %s16664_s13  ;;  %v7700_v53 = vpop.permute.xlu0 %7699 }
 0x5f2   :  { %9107 = vmatprep.subr.bf16.mxu0 %v7620_v40 }
 0x5f3   :  { %9108 = vmatpush1.bf16.msra.mxu0 %v7619_v43  ;;  %v15249_v58 = vpop.permute.xlu1 %7599 }
 0x5f4   :  { %v7622_v61 = vsel %vm6668_vm13, %v7598_v18, %v15249_v58 }
 0x5f5   :  { %6757 = vrot.lane.b32.xlu1 %v15121_v22, %s16664_s13  ;;  %6079 = vrot.lane.b32.xlu0 %v14681_v17, %s16702_s28  ;;  %v15257_v35 = vpop.permute.xlu0 %6073 }
 0x5f6   :  { %9193 = vmatprep.subr.bf16.mxu1 %v7622_v61  ;;  %v6094_v23 = vsel %vm300_vm0, %v15079_v41, %v15257_v35 }
 0x5f7   :  { %9194 = vmatpush1.bf16.msra.mxu1 %v7621_v9  ;;  %v7698_v24 = vpop.permute.xlu1 %7697  ;;  %v15283_v32 = vmax.bf16 %v6094_v23, %v14503_v45 }
 0x5f8   :  { %v7722_v51 = vsel %vm2010_vm9, %v7696_v34, %v7698_v24  ;;  %v7723_v36 = vsel %vm2010_vm9, %v7698_v24, %v7700_v53 }
 0x5f9   :  { %6761 = vrot.lane.b32.xlu1 %v15195_v11, %s16664_s13  ;;  %6859 = vrot.lane.b32.xlu0 %v15121_v22, %s16670_s27  ;;  %v7800_v62 = vpop.permute.xlu0 %7799 }
 0x5fa   :  { %9109 = vmatprep.subr.bf16.mxu0 %v7722_v51 }
 0x5fb   :  { %9110 = vmatpush1.bf16.msra.mxu0 %v7721_v14  ;;  %v15267_v28 = vpop.permute.xlu1 %7701 }
 0x5fc   :  { %v7724_v12 = vsel %vm2010_vm9, %v7700_v53, %v15267_v28 }
 0x5fd   :  { %6857 = vrot.lane.b32.xlu1 %v14949_v50, %s16670_s27  ;;  %6861 = vrot.lane.b32.xlu0 %v15177_v16, %s16670_s27  ;;  %v15278_v42 = vpop.permute.xlu0 %7803 }
 0x5fe   :  { %9195 = vmatprep.subr.bf16.mxu1 %v7724_v12  ;;  %9112 = vmatmul.mubr.bf16.vlgmr.msra.gmra.mrb[20].mxu0 %v14837_v30 }
 0x5ff   :  { %9196 = vmatpush1.bf16.msra.mxu1 %v7723_v36  ;;  %v7798_v41 = vpop.permute.xlu1 %7797  ;;  %11376 = vmatprep.mubr.msk.bf16.mxu0 %vm16756_vm10, %v14842_v39 }
 0x600   :  { %v7824_v47 = vsel %vm2390_vm11, %v7798_v41, %v7800_v62  ;;  %v7823_v18 = vsel %vm2390_vm11, %v14844_v31, %v7798_v41 }
 0x601   :  { %6959 = vrot.lane.b32.xlu0 %v14949_v50, %s16652_s20  ;;  %6195 = vrot.lane.b32.xlu1 %v15283_v32, %s16681_s29  ;;  %v7902_v13 = vpop.permute.xlu0 %7901 }
 0x602   :  { %9122 = vmatprep.subr.bf16.mxu0 %v7824_v47  ;;  %9198 = vmatmul.mubr.bf16.vlgmr.msra.gmra.mrb[20].mxu1 %v14837_v30 }
 0x603   :  { %9123 = vmatpush1.bf16.msra.mxu0 %v7823_v18  ;;  %v7802_v45 = vpop.permute.xlu1 %7801  ;;  %11377 = vmatprep.mubr.msk.bf16.mxu1 %vm16757_vm7, %v14842_v39 }
 0x604   :  { %v7826_v56 = vsel %vm2390_vm11, %v7802_v45, %v15278_v42  ;;  %v7825_v31 = vsel %vm2390_vm11, %v7800_v62, %v7802_v45 }
 0x605   :  { %6963 = vrot.lane.b32.xlu0 %v15177_v16, %s16652_s20  ;;  %6863 = vrot.lane.b32.xlu1 %v15195_v11, %s16670_s27  ;;  %v15304_v34 = vpop.permute.xlu0 %7905 }
 0x606   :  { %9208 = vmatprep.subr.bf16.mxu1 %v7826_v56 }
 0x607   :  { %9209 = vmatpush1.bf16.msra.mxu1 %v7825_v31  ;;  %v7900_v30 = vpop.permute.xlu1 %7899 }
 0x608   :  { %v7926_v49 = vsel %vm16758_vm15, %v7900_v30, %v7902_v13  ;;  %v7925_v39 = vsel %vm16759_vm14, %v14863_v5, %v7900_v30  ;;  %vm16765_vm14 = vcmask 130048  }
 0x609   :  { %7061 = vrot.lane.b32.xlu0 %v14949_v50, %s11926_s7  ;;  %6961 = vrot.lane.b32.xlu1 %v15121_v22, %s16652_s20  ;;  %v8004_v38 = vpop.permute.xlu0 %8003 }
 0x60a   :  { %9124 = vmatprep.subr.bf16.mxu0 %v7926_v49 }
 0x60b   :  { %9125 = vmatpush1.bf16.msra.mxu0 %v7925_v39  ;;  %v7904_v40 = vpop.permute.xlu1 %7903 }
 0x60c   :  { %v7928_v53 = vsel %vm16760_vm6, %v7904_v40, %v15304_v34  ;;  %v7927_v43 = vsel %vm16755_vm5, %v7902_v13, %v7904_v40  ;;  %vm16766_vm6 = vmmov %vm16765_vm14 }
 0x60d   :  { %7065 = vrot.lane.b32.xlu0 %v15177_v16, %s11926_s7  ;;  %6965 = vrot.lane.b32.xlu1 %v15195_v11, %s16652_s20  ;;  %v15320_v5 = vpop.permute.xlu0 %8007 }
 0x60e   :  { %9210 = vmatprep.subr.bf16.mxu1 %v7928_v53 }
 0x60f   :  { %9211 = vmatpush1.bf16.msra.mxu1 %v7927_v43  ;;  %v8002_v61 = vpop.permute.xlu1 %8001 }
 0x610   :  { %v8028_v9 = vsel %vm7077_vm8, %v8002_v61, %v8004_v38  ;;  %v8027_v24 = vsel %vm7077_vm8, %v14875_v55, %v8002_v61 }
 0x611   :  { %7164 = vrot.lane.b32.xlu0 %v14949_v50, %s11927_s18  ;;  %7063 = vrot.lane.b32.xlu1 %v15121_v22, %s11926_s7  ;;  %v8106_v51 = vpop.permute.xlu0 %8105 }
 0x612   :  { %9126 = vmatprep.subr.bf16.mxu0 %v8028_v9 }
 0x613   :  { %9127 = vmatpush1.bf16.msra.mxu0 %v8027_v24  ;;  %v8006_v62 = vpop.permute.xlu1 %8005 }
 0x614   :  { %v8030_v14 = vsel %vm7077_vm8, %v8006_v62, %v15320_v5  ;;  %v8029_v23 = vsel %vm7077_vm8, %v8004_v38, %v8006_v62 }
 0x615   :  { %7168 = vrot.lane.b32.xlu0 %v15177_v16, %s11927_s18  ;;  %7067 = vrot.lane.b32.xlu1 %v15195_v11, %s11926_s7  ;;  %v15336_v55 = vpop.permute.xlu0 %8109 }
 0x616   :  { %9212 = vmatprep.subr.bf16.mxu1 %v8030_v14 }
 0x617   :  { %9213 = vmatpush1.bf16.msra.mxu1 %v8029_v23  ;;  %v8104_v12 = vpop.permute.xlu1 %8103 }
 0x618   :  { %v8130_v36 = vsel %vm7180_vm12, %v8104_v12, %v8106_v51  ;;  %v8129_v41 = vsel %vm7180_vm12, %v14888_v44, %v8104_v12 }
 0x619   :  { %7295 = vrot.lane.b32.xlu0 %v15121_v22, %s16703_s25  ;;  %7166 = vrot.lane.b32.xlu1 %v15121_v22, %s11927_s18  ;;  %v15345_v47 = vpop.permute.xlu0 %6077 }
 0x61a   :  { %9128 = vmatprep.subr.bf16.mxu0 %v8130_v36 }
 0x61b   :  { %9129 = vmatpush1.bf16.msra.mxu0 %v8129_v41  ;;  %v8108_v18 = vpop.permute.xlu1 %8107 }
 0x61c   :  { %9130 = vmatprep.subr.bf16.mxu0 %v14767_v57  ;;  %v8132_v13 = vsel %vm7180_vm12, %v8108_v18, %v15336_v55  ;;  %v8131_v45 = vsel %vm7180_vm12, %v8106_v51, %v8108_v18 }
 0x61d   :  { %7170 = vrot.lane.b32.xlu1 %v15195_v11, %s11927_s18  ;;  %9214 = vmatprep.subr.bf16.mxu1 %v8132_v13  ;;  %v8236_v44 = vpop.permute.xlu0 %8235 }
 0x61e   :  { %9215 = vmatpush1.bf16.msra.mxu1 %v8131_v45 }
 0x61f   :  { %9131 = vmatpush1.bf16.msra.mxu0 %v14713_v46  ;;  %v6076_v56 = vpop.permute.xlu1 %6075  ;;  %9216 = vmatprep.subr.bf16.mxu1 %v14949_v50 }
 0x620   :  { %v6095_v31 = vsel %vm300_vm0, %v15257_v35, %v6076_v56  ;;  %v6096_v57 = vsel %vm300_vm0, %v6076_v56, %v15345_v47 }
 0x621   :  { %v15360_v30 = vmax.bf16 %v6095_v31, %v14640_v19  ;;  %7297 = vrot.lane.b32.xlu1 %v15177_v16, %s16703_s25  ;;  %v8238_v49 = vpop.permute.xlu0 %8237  ;;  %v15366_v46 = vmax.bf16 %v6096_v57, %v14642_v7 }
 0x622   :  { %9217 = vmatpush1.bf16.msra.mxu1 %v14781_v3  ;;  %v8261_v24 = vsel %vm490_vm1, %v8236_v44, %v8238_v49 }
 0x623   :  { %v8234_v39 = vpop.permute.xlu1 %8233  ;;  %6197 = vrot.lane.b32.xlu0 %v15360_v30, %s16681_s29 }
 0x624   :  { %v8260_v35 = vsel %vm490_vm1, %v8234_v39, %v8236_v44  ;;  %v8259_v38 = vsel %vm490_vm1, %v14953_v27, %v8234_v39 }
 0x625   :  { %6199 = vrot.lane.b32.xlu1 %v15366_v46, %s16681_s29  ;;  %9132 = vmatprep.subr.bf16.mxu0 %v8260_v35  ;;  %v8336_v19 = vpop.permute.xlu0 %8335 }
 0x626   :  { %9133 = vmatpush1.bf16.msra.mxu0 %v8259_v38  ;;  %v8361_v62 = vsel %vm870_vm3, %v14943_v63, %v8336_v19 }
 0x627   :  { %v15375_v40 = vpop.permute.xlu1 %6193  ;;  %7299 = vrot.lane.b32.xlu0 %v15195_v11, %s16703_s25 }
 0x628   :  { %v6216_v7 = vsel %vm1060_vm4, %v15182_v21, %v15375_v40 }
 0x629   :  { %v15383_v53 = vmax.bf16 %v6216_v7, %v14933_v20  ;;  %v8340_v43 = vpop.permute.xlu0 %8339 }
 0x62b   :  { %v15385_v27 = vpop.permute.xlu1 %8239  ;;  %7397 = vrot.lane.b32.xlu0 %v15121_v22, %s16691_s24  ;;  %7301 = vrot.lane.b32.xlu1 %v15383_v53, %s16703_s25 }
 0x62c   :  { %v8262_v61 = vsel %vm490_vm1, %v8238_v49, %v15385_v27 }
 0x62d   :  { %9218 = vmatprep.subr.bf16.mxu1 %v8262_v61  ;;  %v8438_v9 = vpop.permute.xlu0 %8437  ;;  %v15454_v61 = vld [vmem:[%s16591_s3 + $0x4] ss:$16 sps:$4 sm:$0xff]  }
 0x62e   :  { %9219 = vmatpush1.bf16.msra.mxu1 %v8261_v24  ;;  %v8463_v13 = vsel %vm6565_vm2, %v14973_v37, %v8438_v9 }
 0x62f   :  { %v8338_v21 = vpop.permute.xlu1 %8337  ;;  %7401 = vrot.lane.b32.xlu0 %v15195_v11, %s16691_s24  ;;  %7399 = vrot.lane.b32.xlu1 %v15177_v16, %s16691_s24 }
 0x630   :  { %v8362_v20 = vsel %vm870_vm3, %v8336_v19, %v8338_v21  ;;  %v8363_v36 = vsel %vm870_vm3, %v8338_v21, %v8340_v43 }
 0x631   :  { %9134 = vmatprep.subr.bf16.mxu0 %v8362_v20  ;;  %v8442_v51 = vpop.permute.xlu0 %8441 }
 0x632   :  { %9135 = vmatpush1.bf16.msra.mxu0 %v8361_v62 }
 0x633   :  { %v15401_v14 = vpop.permute.xlu1 %8341  ;;  %7499 = vrot.lane.b32.xlu0 %v15121_v22, %s11924_s1  ;;  %7403 = vrot.lane.b32.xlu1 %v15383_v53, %s16691_s24 }
 0x634   :  { %v8364_v23 = vsel %vm870_vm3, %v8340_v43, %v15401_v14 }
 0x635   :  { %9220 = vmatprep.subr.bf16.mxu1 %v8364_v23  ;;  %v8540_v12 = vpop.permute.xlu0 %8539 }
 0x636   :  { %9221 = vmatpush1.bf16.msra.mxu1 %v8363_v36  ;;  %v8565_v49 = vsel %vm6668_vm13, %v14980_v0, %v8540_v12 }
 0x637   :  { %v8440_v41 = vpop.permute.xlu1 %8439  ;;  %7503 = vrot.lane.b32.xlu0 %v15195_v11, %s11924_s1  ;;  %7501 = vrot.lane.b32.xlu1 %v15177_v16, %s11924_s1 }
 0x638   :  { %v8464_v63 = vsel %vm6565_vm2, %v8438_v9, %v8440_v41  ;;  %v8465_v56 = vsel %vm6565_vm2, %v8440_v41, %v8442_v51 }
 0x639   :  { %9136 = vmatprep.subr.bf16.mxu0 %v8464_v63  ;;  %v8544_v18 = vpop.permute.xlu0 %8543 }
 0x63a   :  { %9137 = vmatpush1.bf16.msra.mxu0 %v8463_v13 }
 0x63b   :  { %v15417_v45 = vpop.permute.xlu1 %8443  ;;  %7601 = vrot.lane.b32.xlu0 %v15121_v22, %s11925_s26  ;;  %7505 = vrot.lane.b32.xlu1 %v15383_v53, %s11924_s1 }
 0x63c   :  { %v8466_v44 = vsel %vm6565_vm2, %v8442_v51, %v15417_v45 }
 0x63d   :  { %9222 = vmatprep.subr.bf16.mxu1 %v8466_v44  ;;  %v6346_v31 = vpop.permute.xlu0 %6345 }
 0x63e   :  { %9223 = vmatpush1.bf16.msra.mxu1 %v8465_v56 }
 0x63f   :  { %v8542_v57 = vpop.permute.xlu1 %8541  ;;  %7605 = vrot.lane.b32.xlu0 %v15195_v11, %s11925_s26  ;;  %7603 = vrot.lane.b32.xlu1 %v15177_v16, %s11925_s26 }
 0x640   :  { %v8566_v37 = vsel %vm6668_vm13, %v8540_v12, %v8542_v57  ;;  %v8567_v0 = vsel %vm6668_vm13, %v8542_v57, %v8544_v18 }
 0x641   :  { %9138 = vmatprep.subr.bf16.mxu0 %v8566_v37 }
 0x642   :  { %9139 = vmatpush1.bf16.msra.mxu0 %v8565_v49 }
 0x643   :  { %v15433_v39 = vpop.permute.xlu1 %8545  ;;  %7703 = vrot.lane.b32.xlu0 %v15121_v22, %s16664_s13  ;;  %7607 = vrot.lane.b32.xlu1 %v15383_v53, %s11925_s26  ;;  %v6350_v35 = vpop.permute.xlu0 %6349 }
 0x644   :  { %9251 = vmatprep.subr.bf16.mxu0 %v14949_v50  ;;  %v8568_v38 = vsel %vm6668_vm13, %v8544_v18, %v15433_v39 }
 0x645   :  { %9224 = vmatprep.subr.bf16.mxu1 %v8568_v38  ;;  %9155 = vmatmul.mubr.bf16.vlgmr.msra.gmra.mrb[20].mxu0 %v14996_v1 }
 0x646   :  { %9225 = vmatpush1.bf16.msra.mxu1 %v8567_v0  ;;  %9252 = vmatpush1.bf16.msra.mxu0 %v14781_v3  ;;  %v6367_v3 = vsel %vm490_vm1, %v15010_v8, %v6346_v31 }
 0x647   :  { %v6348_v19 = vpop.permute.xlu1 %6347  ;;  %7707 = vrot.lane.b32.xlu0 %v15195_v11, %s16664_s13  ;;  %7705 = vrot.lane.b32.xlu1 %v15177_v16, %s16664_s13  ;;  %v6448_v7 = vpop.permute.xlu0 %6447 }
 0x648   :  { %9337 = vmatprep.subr.bf16.mxu1 %v15177_v16  ;;  %v6368_v43 = vsel %vm490_vm1, %v6346_v31, %v6348_v19  ;;  %9283 = vmatprep.mubr.bf16.mxu0 %v15454_v61  ;;  %v6469_v62 = vsel %vm870_vm3, %v15027_v25, %v6448_v7 }
 0x649   :  { %9253 = vmatprep.subr.bf16.mxu0 %v6368_v43  ;;  %9241 = vmatmul.mubr.bf16.vlgmr.msra.gmra.mrb[20].mxu1 %v14996_v1  ;;  %v6369_v1 = vsel %vm490_vm1, %v6348_v19, %v6350_v35 }
 0x64a   :  { %9254 = vmatpush1.bf16.msra.mxu0 %v6367_v3  ;;  %9338 = vmatpush1.bf16.msra.mxu1 %v15121_v22 }
 0x64b   :  { %v15461_v9 = vpop.permute.xlu1 %6351  ;;  %7805 = vrot.lane.b32.xlu0 %v15121_v22, %s16670_s27  ;;  %7709 = vrot.lane.b32.xlu1 %v15383_v53, %s16664_s13  ;;  %v6452_v24 = vpop.permute.xlu0 %6451 }
 0x64c   :  { %v6370_v21 = vsel %vm490_vm1, %v6350_v35, %v15461_v9  ;;  %9369 = vmatprep.mubr.bf16.mxu1 %v15454_v61 }
 0x64d   :  { %9339 = vmatprep.subr.bf16.mxu1 %v6370_v21 }
 0x64e   :  { %9340 = vmatpush1.bf16.msra.mxu1 %v6369_v1 }
 0x64f   :  { %v6450_v8 = vpop.permute.xlu1 %6449  ;;  %7809 = vrot.lane.b32.xlu0 %v15195_v11, %s16670_s27  ;;  %7807 = vrot.lane.b32.xlu1 %v15177_v16, %s16670_s27  ;;  %v6550_v20 = vpop.permute.xlu0 %6549 }
 0x650   :  { %v6470_v51 = vsel %vm870_vm3, %v6448_v7, %v6450_v8  ;;  %v6471_v41 = vsel %vm870_vm3, %v6450_v8, %v6452_v24  ;;  %v6572_v13 = vsel %vm6565_vm2, %v15043_v48, %v6550_v20 }
 0x651   :  { %9255 = vmatprep.subr.bf16.mxu0 %v6470_v51 }
 0x652   :  { %9256 = vmatpush1.bf16.msra.mxu0 %v6469_v62 }
 0x653   :  { %v15478_v23 = vpop.permute.xlu1 %6453  ;;  %7907 = vrot.lane.b32.xlu0 %v15121_v22, %s16652_s20  ;;  %7811 = vrot.lane.b32.xlu1 %v15383_v53, %s16670_s27  ;;  %v6554_v12 = vpop.permute.xlu0 %6553 }
 0x654   :  { %v6472_v36 = vsel %vm870_vm3, %v6452_v24, %v15478_v23 }
 0x655   :  { %9341 = vmatprep.subr.bf16.mxu1 %v6472_v36 }
 0x656   :  { %9342 = vmatpush1.bf16.msra.mxu1 %v6471_v41 }
 0x657   :  { %v6552_v63 = vpop.permute.xlu1 %6551  ;;  %7911 = vrot.lane.b32.xlu0 %v15195_v11, %s16652_s20  ;;  %7909 = vrot.lane.b32.xlu1 %v15177_v16, %s16652_s20  ;;  %v6653_v25 = vpop.permute.xlu0 %6652 }
 0x658   :  { %v6573_v18 = vsel %vm6565_vm2, %v6550_v20, %v6552_v63  ;;  %v6574_v57 = vsel %vm6565_vm2, %v6552_v63, %v6554_v12  ;;  %v6675_v35 = vsel %vm6668_vm13, %v15059_v52, %v6653_v25 }
 0x659   :  { %9257 = vmatprep.subr.bf16.mxu0 %v6573_v18 }
 0x65a   :  { %9258 = vmatpush1.bf16.msra.mxu0 %v6572_v13 }
 0x65b   :  { %v15494_v44 = vpop.permute.xlu1 %6555  ;;  %8009 = vrot.lane.b32.xlu0 %v15121_v22, %s11926_s7  ;;  %7913 = vrot.lane.b32.xlu1 %v15383_v53, %s16652_s20  ;;  %v6657_v56 = vpop.permute.xlu0 %6656 }
 0x65c   :  { %v6575_v31 = vsel %vm6565_vm2, %v6554_v12, %v15494_v44 }
 0x65d   :  { %9343 = vmatprep.subr.bf16.mxu1 %v6575_v31 }
 0x65e   :  { %9344 = vmatpush1.bf16.msra.mxu1 %v6574_v57 }
 0x65f   :  { %v6655_v37 = vpop.permute.xlu1 %6654  ;;  %8013 = vrot.lane.b32.xlu0 %v15195_v11, %s11926_s7  ;;  %8011 = vrot.lane.b32.xlu1 %v15177_v16, %s11926_s7  ;;  %v6756_v48 = vpop.permute.xlu0 %6755 }
 0x660   :  { %v6676_v49 = vsel %vm6668_vm13, %v6653_v25, %v6655_v37  ;;  %v6677_v7 = vsel %vm6668_vm13, %v6655_v37, %v6657_v56  ;;  %v6777_v24 = vsel %vm2010_vm9, %v15075_v2, %v6756_v48 }
 0x661   :  { %9259 = vmatprep.subr.bf16.mxu0 %v6676_v49 }
 0x662   :  { %9260 = vmatpush1.bf16.msra.mxu0 %v6675_v35 }
 0x663   :  { %v15510_v38 = vpop.permute.xlu1 %6658  ;;  %8111 = vrot.lane.b32.xlu0 %v15121_v22, %s11927_s18  ;;  %8015 = vrot.lane.b32.xlu1 %v15383_v53, %s11926_s7  ;;  %v6760_v0 = vpop.permute.xlu0 %6759 }
 0x664   :  { %v6678_v19 = vsel %vm6668_vm13, %v6657_v56, %v15510_v38 }
 0x665   :  { %9345 = vmatprep.subr.bf16.mxu1 %v6678_v19 }
 0x666   :  { %9346 = vmatpush1.bf16.msra.mxu1 %v6677_v7 }
 0x667   :  { %v6758_v43 = vpop.permute.xlu1 %6757  ;;  %8115 = vrot.lane.b32.xlu0 %v15195_v11, %s11927_s18  ;;  %8113 = vrot.lane.b32.xlu1 %v15177_v16, %s11927_s18  ;;  %v15523_v52 = vpop.permute.xlu0 %6079 }
 0x668   :  { %v6778_v3 = vsel %vm2010_vm9, %v6756_v48, %v6758_v43  ;;  %v6097_v21 = vsel %vm300_vm0, %v15345_v47, %v15523_v52  ;;  %v6779_v2 = vsel %vm2010_vm9, %v6758_v43, %v6760_v0  ;;  %vm16761_vm0 = vmmov %vm16755_vm5 }
 0x669   :  { %9261 = vmatprep.subr.bf16.mxu0 %v6778_v3  ;;  %v15540_v51 = vmax.bf16 %v6097_v21, %v14677_v33  ;;  %vm16762_vm10 = vmmov %vm16761_vm0 }
 0x66a   :  { %9262 = vmatpush1.bf16.msra.mxu0 %v6777_v24  ;;  %vm16763_vm7 = vmmov %vm16761_vm0 }
 0x66b   :  { %v15531_v1 = vpop.permute.xlu1 %6761  ;;  %8241 = vrot.lane.b32.xlu0 %v15177_v16, %s16703_s25  ;;  %8117 = vrot.lane.b32.xlu1 %v15383_v53, %s11927_s18  ;;  %v6860_v8 = vpop.permute.xlu0 %6859  ;;  %vm16764_vm15 = vmmov %vm16761_vm0 }
 0x66c   :  { %v6780_v20 = vsel %vm2010_vm9, %v6760_v0, %v15531_v1  ;;  %vm16767_vm5 = vmmov %vm16761_vm0 }
 0x66d   :  { %9347 = vmatprep.subr.bf16.mxu1 %v6780_v20 }
 0x66e   :  { %9348 = vmatpush1.bf16.msra.mxu1 %v6779_v2 }
 0x66f   :  { %v6858_v47 = vpop.permute.xlu1 %6857  ;;  %8243 = vrot.lane.b32.xlu1 %v15195_v11, %s16703_s25  ;;  %6201 = vrot.lane.b32.xlu0 %v15540_v51, %s16681_s29  ;;  %v6862_v62 = vpop.permute.xlu0 %6861 }
 0x670   :  { %v6880_v12 = vsel %vm2390_vm11, %v6858_v47, %v6860_v8  ;;  %v6879_v36 = vsel %vm2390_vm11, %v15102_v15, %v6858_v47  ;;  %v6881_v56 = vsel %vm2390_vm11, %v6860_v8, %v6862_v62 }
 0x671   :  { %9263 = vmatprep.subr.bf16.mxu0 %v6880_v12 }
 0x672   :  { %9264 = vmatpush1.bf16.msra.mxu0 %v6879_v36 }
 0x673   :  { %v15550_v33 = vpop.permute.xlu1 %6195  ;;  %8245 = vrot.lane.b32.xlu1 %v15383_v53, %s16703_s25  ;;  %v6960_v41 = vpop.permute.xlu0 %6959 }
 0x674   :  { %v6217_v63 = vsel %vm1060_vm4, %v15375_v40, %v15550_v33  ;;  %v6981_v57 = vsel %vm16762_vm10, %v15127_v54, %v6960_v41  ;;  %vm16768_vm10 = vmmov %vm16761_vm0 }
 0x675   :  { %v15558_v25 = vmax.bf16 %v6217_v63, %v15109_v6 }
 0x677   :  { %v15560_v18 = vpop.permute.xlu1 %6863  ;;  %8343 = vrot.lane.b32.xlu1 %v15177_v16, %s16691_s24  ;;  %8247 = vrot.lane.b32.xlu0 %v15558_v25, %s16703_s25  ;;  %v6964_v15 = vpop.permute.xlu0 %6963 }
 0x678   :  { %v6882_v13 = vsel %vm2390_vm11, %v6862_v62, %v15560_v18 }
 0x679   :  { %9349 = vmatprep.subr.bf16.mxu1 %v6882_v13 }
 0x67a   :  { %9350 = vmatpush1.bf16.msra.mxu1 %v6881_v56 }
 0x67b   :  { %v6962_v40 = vpop.permute.xlu1 %6961  ;;  %8347 = vrot.lane.b32.xlu1 %v15383_v53, %s16691_s24  ;;  %8345 = vrot.lane.b32.xlu0 %v15195_v11, %s16691_s24  ;;  %v7062_v6 = vpop.permute.xlu0 %7061 }
 0x67c   :  { %v6982_v31 = vsel %vm16761_vm0, %v6960_v41, %v6962_v40  ;;  %v6983_v35 = vsel %vm16764_vm15, %v6962_v40, %v6964_v15  ;;  %v7084_v7 = vsel %vm7077_vm8, %v15143_v4, %v7062_v6  ;;  %vm16771_vm15 = vmmov %vm16761_vm0 }
 0x67d   :  { %9265 = vmatprep.subr.bf16.mxu0 %v6982_v31 }
 0x67e   :  { %9266 = vmatpush1.bf16.msra.mxu0 %v6981_v57 }
 0x67f   :  { %v15576_v37 = vpop.permute.xlu1 %6965  ;;  %8445 = vrot.lane.b32.xlu1 %v15177_v16, %s11924_s1  ;;  %8349 = vrot.lane.b32.xlu0 %v15558_v25, %s16691_s24  ;;  %v7066_v48 = vpop.permute.xlu0 %7065 }
 0x680   :  { %v6984_v49 = vsel %vm16763_vm7, %v6964_v15, %v15576_v37  ;;  %vm16769_vm7 = vmmov %vm16761_vm0 }
 0x681   :  { %9351 = vmatprep.subr.bf16.mxu1 %v6984_v49 }
 0x682   :  { %9352 = vmatpush1.bf16.msra.mxu1 %v6983_v35 }
 0x683   :  { %v7064_v0 = vpop.permute.xlu1 %7063  ;;  %8449 = vrot.lane.b32.xlu1 %v15383_v53, %s11924_s1  ;;  %8447 = vrot.lane.b32.xlu0 %v15195_v11, %s11924_s1  ;;  %v7165_v19 = vpop.permute.xlu0 %7164 }
 0x684   :  { %v7085_v54 = vsel %vm7077_vm8, %v7062_v6, %v7064_v0  ;;  %v7086_v24 = vsel %vm7077_vm8, %v7064_v0, %v7066_v48  ;;  %v7187_v20 = vsel %vm7180_vm12, %v15159_v60, %v7165_v19 }
 0x685   :  { %9267 = vmatprep.subr.bf16.mxu0 %v7085_v54 }
 0x686   :  { %9268 = vmatpush1.bf16.msra.mxu0 %v7084_v7 }
 0x687   :  { %v15592_v43 = vpop.permute.xlu1 %7067  ;;  %8547 = vrot.lane.b32.xlu1 %v15177_v16, %s11925_s26  ;;  %8451 = vrot.lane.b32.xlu0 %v15558_v25, %s11924_s1  ;;  %v7169_v21 = vpop.permute.xlu0 %7168 }
 0x688   :  { %v7087_v3 = vsel %vm7077_vm8, %v7066_v48, %v15592_v43 }
 0x689   :  { %9353 = vmatprep.subr.bf16.mxu1 %v7087_v3 }
 0x68a   :  { %9354 = vmatpush1.bf16.msra.mxu1 %v7086_v24 }
 0x68b   :  { %v7167_v8 = vpop.permute.xlu1 %7166  ;;  %8551 = vrot.lane.b32.xlu1 %v15383_v53, %s11925_s26  ;;  %8549 = vrot.lane.b32.xlu0 %v15195_v11, %s11925_s26  ;;  %v7296_v62 = vpop.permute.xlu0 %7295 }
 0x68c   :  { %v7188_v4 = vsel %vm7180_vm12, %v7165_v19, %v7167_v8  ;;  %v7189_v12 = vsel %vm7180_vm12, %v7167_v8, %v7169_v21  ;;  %v7317_v63 = vsel %vm490_vm1, %v15201_v59, %v7296_v62 }
 0x68d   :  { %9269 = vmatprep.subr.bf16.mxu0 %v7188_v4 }
 0x68e   :  { %9270 = vmatpush1.bf16.msra.mxu0 %v7187_v20 }
 0x68f   :  { %v15608_v2 = vpop.permute.xlu1 %7170  ;;  %6353 = vrot.lane.b32.xlu1 %v15383_v53, %s16703_s25  ;;  %8553 = vrot.lane.b32.xlu0 %v15558_v25, %s11925_s26 }
 0x690   :  { %9271 = vmatprep.subr.bf16.mxu0 %v15121_v22  ;;  %v7190_v47 = vsel %vm7180_vm12, %v7169_v21, %v15608_v2 }
 0x691   :  { %9355 = vmatprep.subr.bf16.mxu1 %v7190_v47 }
 0x692   :  { %9272 = vmatpush1.bf16.msra.mxu0 %v14949_v50  ;;  %9356 = vmatpush1.bf16.msra.mxu1 %v7189_v12 }
 0x693   :  { %v7298_v60 = vpop.permute.xlu1 %7297  ;;  %6355 = vrot.lane.b32.xlu0 %v15558_v25, %s16703_s25  ;;  %9357 = vmatprep.subr.bf16.mxu1 %v15195_v11 }
 0x694   :  { %v7318_v36 = vsel %vm490_vm1, %v7296_v62, %v7298_v60 }
 0x695   :  { %9273 = vmatprep.subr.bf16.mxu0 %v7318_v36  ;;  %v6198_v41 = vpop.permute.xlu0 %6197 }
 0x696   :  { %v6218_v15 = vsel %vm1060_vm4, %v15550_v33, %v6198_v41  ;;  %9274 = vmatpush1.bf16.msra.mxu0 %v7317_v63  ;;  %9358 = vmatpush1.bf16.msra.mxu1 %v15177_v16 }
 0x697   :  { %v15629_v50 = vmax.bf16 %v6218_v15, %v15283_v32  ;;  %v15631_v13 = vpop.permute.xlu1 %6199 }
 0x698   :  { %v6219_v56 = vsel %vm1060_vm4, %v6198_v41, %v15631_v13 }
 0x699   :  { %v15636_v40 = vmax.bf16 %v6219_v56, %v15360_v30  ;;  %6357 = vrot.lane.b32.xlu1 %v15629_v50, %s16703_s25  ;;  %v7300_v59 = vpop.permute.xlu0 %7299 }
 0x69a   :  { %v7319_v30 = vsel %vm490_vm1, %v7298_v60, %v7300_v59 }
 0x69b   :  { %6359 = vrot.lane.b32.xlu0 %v15636_v40, %s16703_s25 }
 0x69d   :  { %v15642_v33 = vpop.permute.xlu1 %7301  ;;  %6455 = vrot.lane.b32.xlu1 %v15383_v53, %s16691_s24  ;;  %v7398_v32 = vpop.permute.xlu0 %7397 }
 0x69e   :  { %v7320_v6 = vsel %vm490_vm1, %v7300_v59, %v15642_v33  ;;  %v7419_v49 = vsel %vm870_vm3, %v15217_v26, %v7398_v32 }
 0x69f   :  { %6457 = vrot.lane.b32.xlu0 %v15558_v25, %s16691_s24  ;;  %9359 = vmatprep.subr.bf16.mxu1 %v7320_v6 }
 0x6a0   :  { %9360 = vmatpush1.bf16.msra.mxu1 %v7319_v30 }
 0x6a1   :  { %v7400_v31 = vpop.permute.xlu1 %7399  ;;  %6459 = vrot.lane.b32.xlu1 %v15629_v50, %s16691_s24  ;;  %v7402_v57 = vpop.permute.xlu0 %7401 }
 0x6a2   :  { %v7420_v48 = vsel %vm870_vm3, %v7398_v32, %v7400_v31  ;;  %v7421_v19 = vsel %vm870_vm3, %v7400_v31, %v7402_v57  ;;  %v6150_v31 = vmax.bf16 %v15523_v52, %v14681_v17  ;;  %v15727_v17 = vld [vmem:[%s16591_s3 + $0xc] ss:$16 sps:$4 sm:$0xff]  }
 0x6a3   :  { %6461 = vrot.lane.b32.xlu0 %v15636_v40, %s16691_s24  ;;  %9275 = vmatprep.subr.bf16.mxu0 %v7420_v48 }
 0x6a4   :  { %9276 = vmatpush1.bf16.msra.mxu0 %v7419_v49 }
 0x6a5   :  { %v15658_v35 = vpop.permute.xlu1 %7403  ;;  %6557 = vrot.lane.b32.xlu1 %v15383_v53, %s11924_s1  ;;  %v7500_v0 = vpop.permute.xlu0 %7499 }
 0x6a6   :  { %v7422_v54 = vsel %vm870_vm3, %v7402_v57, %v15658_v35  ;;  %v7521_v24 = vsel %vm6565_vm2, %v15233_v29, %v7500_v0 }
 0x6a7   :  { %6559 = vrot.lane.b32.xlu0 %v15558_v25, %s11924_s1  ;;  %9361 = vmatprep.subr.bf16.mxu1 %v7422_v54 }
 0x6a8   :  { %9362 = vmatpush1.bf16.msra.mxu1 %v7421_v19 }
 0x6a9   :  { %v7502_v7 = vpop.permute.xlu1 %7501  ;;  %6561 = vrot.lane.b32.xlu1 %v15629_v50, %s11924_s1  ;;  %v7504_v26 = vpop.permute.xlu0 %7503 }
 0x6aa   :  { %v7522_v3 = vsel %vm6565_vm2, %v7500_v0, %v7502_v7  ;;  %v7523_v20 = vsel %vm6565_vm2, %v7502_v7, %v7504_v26 }
 0x6ab   :  { %6563 = vrot.lane.b32.xlu0 %v15636_v40, %s11924_s1  ;;  %9277 = vmatprep.subr.bf16.mxu0 %v7522_v3 }
 0x6ac   :  { %9278 = vmatpush1.bf16.msra.mxu0 %v7521_v24 }
 0x6ad   :  { %v15674_v21 = vpop.permute.xlu1 %7505  ;;  %6660 = vrot.lane.b32.xlu1 %v15383_v53, %s11925_s26  ;;  %v7602_v8 = vpop.permute.xlu0 %7601 }
 0x6ae   :  { %v7524_v4 = vsel %vm6565_vm2, %v7504_v26, %v15674_v21  ;;  %v7623_v12 = vsel %vm6668_vm13, %v15249_v58, %v7602_v8 }
 0x6af   :  { %6662 = vrot.lane.b32.xlu0 %v15558_v25, %s11925_s26  ;;  %9363 = vmatprep.subr.bf16.mxu1 %v7524_v4 }
 0x6b0   :  { %9364 = vmatpush1.bf16.msra.mxu1 %v7523_v20 }
 0x6b1   :  { %v7604_v47 = vpop.permute.xlu1 %7603  ;;  %6664 = vrot.lane.b32.xlu1 %v15629_v50, %s11925_s26  ;;  %v7606_v29 = vpop.permute.xlu0 %7605 }
 0x6b2   :  { %v7624_v62 = vsel %vm6668_vm13, %v7602_v8, %v7604_v47  ;;  %v7625_v63 = vsel %vm6668_vm13, %v7604_v47, %v7606_v29 }
 0x6b3   :  { %6666 = vrot.lane.b32.xlu0 %v15636_v40, %s11925_s26  ;;  %9279 = vmatprep.subr.bf16.mxu0 %v7624_v62  ;;  %v15764_v62 = vpop.f32.mrb[16].mxu1 }
 0x6b4   :  { %9280 = vmatpush1.bf16.msra.mxu0 %v7623_v12 }
 0x6b5   :  { %v15690_v60 = vpop.permute.xlu1 %7607  ;;  %6763 = vrot.lane.b32.xlu1 %v15383_v53, %s16664_s13  ;;  %v7704_v36 = vpop.permute.xlu0 %7703 }
 0x6b6   :  { %v7626_v41 = vsel %vm6668_vm13, %v7606_v29, %v15690_v60  ;;  %v7725_v59 = vsel %vm2010_vm9, %v15267_v28, %v7704_v36  ;;  %v15720_v28 = vld [vmem:[%s16591_s3] ss:$16 sps:$4 sm:$0xff]  }
 0x6b7   :  { %6765 = vrot.lane.b32.xlu0 %v15558_v25, %s16664_s13  ;;  %9365 = vmatprep.subr.bf16.mxu1 %v7626_v41 }
 0x6b8   :  { %9366 = vmatpush1.bf16.msra.mxu1 %v7625_v63 }
 0x6b9   :  { %v7706_v15 = vpop.permute.xlu1 %7705  ;;  %6767 = vrot.lane.b32.xlu1 %v15629_v50, %s16664_s13  ;;  %v7708_v58 = vpop.permute.xlu0 %7707 }
 0x6ba   :  { %v7726_v56 = vsel %vm2010_vm9, %v7704_v36, %v7706_v15  ;;  %v7727_v57 = vsel %vm2010_vm9, %v7706_v15, %v7708_v58 }
 0x6bb   :  { %6769 = vrot.lane.b32.xlu0 %v15636_v40, %s16664_s13  ;;  %9281 = vmatprep.subr.bf16.mxu0 %v7726_v56 }
 0x6bc   :  { %9282 = vmatpush1.bf16.msra.mxu0 %v7725_v59 }
 0x6bd   :  { %v15706_v32 = vpop.permute.xlu1 %7709  ;;  %6865 = vrot.lane.b32.xlu1 %v15383_v53, %s16670_s27  ;;  %v7806_v6 = vpop.permute.xlu0 %7805 }
 0x6be   :  { %v7728_v30 = vsel %vm2010_vm9, %v7708_v58, %v15706_v32  ;;  %v7827_v0 = vsel %vm2390_vm11, %v15278_v42, %v7806_v6 }
 0x6bf   :  { %6867 = vrot.lane.b32.xlu0 %v15558_v25, %s16670_s27  ;;  %9367 = vmatprep.subr.bf16.mxu1 %v7728_v30 }
 0x6c0   :  { %9368 = vmatpush1.bf16.msra.mxu1 %v7727_v57  ;;  %9284 = vmatmul.mubr.bf16.vlgmr.msra.gmra.mrb[24].mxu0 %v15720_v28 }
 0x6c1   :  { %v7808_v48 = vpop.permute.xlu1 %7807  ;;  %6203 = vrot.lane.b32.xlu1 %v6150_v31, %s16681_s29  ;;  %v7810_v49 = vpop.permute.xlu0 %7809  ;;  %11378 = vmatprep.mubr.msk.bf16.mxu0 %vm16765_vm14, %v15727_v17  ;;  %vm16772_vm14 = vmmov %vm16761_vm0 }
 0x6c2   :  { %v7828_v52 = vsel %vm2390_vm11, %v7806_v6, %v7808_v48  ;;  %v7829_v42 = vsel %vm2390_vm11, %v7808_v48, %v7810_v49 }
 0x6c3   :  { %6869 = vrot.lane.b32.xlu0 %v15629_v50, %s16670_s27  ;;  %9294 = vmatprep.subr.bf16.mxu0 %v7828_v52 }
 0x6c4   :  { %9295 = vmatpush1.bf16.msra.mxu0 %v7827_v0  ;;  %9370 = vmatmul.mubr.bf16.vlgmr.msra.gmra.mrb[24].mxu1 %v15720_v28 }
 0x6c5   :  { %v15737_v54 = vpop.permute.xlu1 %7811  ;;  %6871 = vrot.lane.b32.xlu1 %v15636_v40, %s16670_s27  ;;  %v7908_v19 = vpop.permute.xlu0 %7907  ;;  %11379 = vmatprep.mubr.msk.bf16.mxu1 %vm16766_vm6, %v15727_v17  ;;  %vm16773_vm6 = vmmov %vm16761_vm0 }
 0x6c6   :  { %v7830_v7 = vsel %vm2390_vm11, %v7810_v49, %v15737_v54  ;;  %v7929_v8 = vsel %vm16761_vm0, %v15304_v34, %v7908_v19  ;;  %v15766_v34 = vpop.f32.mrb[17].mxu1 }
 0x6c7   :  { %6967 = vrot.lane.b32.xlu0 %v15383_v53, %s16652_s20  ;;  %9380 = vmatprep.subr.bf16.mxu1 %v7830_v7  ;;  %v15771_v63 = vpop.f32.mrb[18].mxu1 }
 0x6c8   :  { %9381 = vmatpush1.bf16.msra.mxu1 %v7829_v42  ;;  %v15777_v58 = vpop.f32.mrb[19].mxu1 }
 0x6c9   :  { %v7910_v26 = vpop.permute.xlu1 %7909  ;;  %6969 = vrot.lane.b32.xlu1 %v15558_v25, %s16652_s20  ;;  %v7912_v3 = vpop.permute.xlu0 %7911 }
 0x6ca   :  { %v7930_v24 = vsel %vm16767_vm5, %v7908_v19, %v7910_v26  ;;  %v7931_v29 = vsel %vm16769_vm7, %v7910_v26, %v7912_v3  ;;  %vm16774_vm5 = vcmask 130048  }
 0x6cb   :  { %6971 = vrot.lane.b32.xlu0 %v15629_v50, %s16652_s20  ;;  %9296 = vmatprep.subr.bf16.mxu0 %v7930_v24 }
 0x6cc   :  { %9297 = vmatpush1.bf16.msra.mxu0 %v7929_v8 }
 0x6cd   :  { %v15755_v4 = vpop.permute.xlu1 %7913  ;;  %6973 = vrot.lane.b32.xlu1 %v15636_v40, %s16652_s20  ;;  %v8010_v20 = vpop.permute.xlu0 %8009 }
 0x6ce   :  { %v7932_v47 = vsel %vm16768_vm10, %v7912_v3, %v15755_v4  ;;  %v8031_v15 = vsel %vm7077_vm8, %v15320_v5, %v8010_v20 }
 0x6cf   :  { %7069 = vrot.lane.b32.xlu0 %v15383_v53, %s11926_s7  ;;  %9382 = vmatprep.subr.bf16.mxu1 %v7932_v47 }
 0x6d0   :  { %9383 = vmatpush1.bf16.msra.mxu1 %v7931_v29 }
 0x6d1   :  { %v8012_v12 = vpop.permute.xlu1 %8011  ;;  %7071 = vrot.lane.b32.xlu1 %v15558_v25, %s11926_s7  ;;  %v8014_v36 = vpop.permute.xlu0 %8013 }
 0x6d2   :  { %v8032_v41 = vsel %vm7077_vm8, %v8010_v20, %v8012_v12  ;;  %v8033_v30 = vsel %vm7077_vm8, %v8012_v12, %v8014_v36 }
 0x6d3   :  { %7073 = vrot.lane.b32.xlu0 %v15629_v50, %s11926_s7  ;;  %9298 = vmatprep.subr.bf16.mxu0 %v8032_v41 }
 0x6d4   :  { %9299 = vmatpush1.bf16.msra.mxu0 %v8031_v15 }
 0x6d5   :  { %v15779_v56 = vpop.permute.xlu1 %8015  ;;  %7075 = vrot.lane.b32.xlu1 %v15636_v40, %s11926_s7  ;;  %v8112_v59 = vpop.permute.xlu0 %8111 }
 0x6d6   :  { %v8034_v6 = vsel %vm7077_vm8, %v8014_v36, %v15779_v56  ;;  %v8133_v48 = vsel %vm7180_vm12, %v15336_v55, %v8112_v59 }
 0x6d7   :  { %7172 = vrot.lane.b32.xlu0 %v15383_v53, %s11927_s18  ;;  %9384 = vmatprep.subr.bf16.mxu1 %v8034_v6 }
 0x6d8   :  { %9385 = vmatpush1.bf16.msra.mxu1 %v8033_v30 }
 0x6d9   :  { %v8114_v5 = vpop.permute.xlu1 %8113  ;;  %7174 = vrot.lane.b32.xlu1 %v15558_v25, %s11927_s18  ;;  %v8116_v31 = vpop.permute.xlu0 %8115 }
 0x6da   :  { %v8134_v57 = vsel %vm7180_vm12, %v8112_v59, %v8114_v5  ;;  %v8135_v19 = vsel %vm7180_vm12, %v8114_v5, %v8116_v31 }
 0x6db   :  { %7176 = vrot.lane.b32.xlu0 %v15629_v50, %s11927_s18  ;;  %9300 = vmatprep.subr.bf16.mxu0 %v8134_v57 }
 0x6dc   :  { %9301 = vmatpush1.bf16.msra.mxu0 %v8133_v48 }
 0x6dd   :  { %v15795_v49 = vpop.permute.xlu1 %8117  ;;  %7178 = vrot.lane.b32.xlu1 %v15636_v40, %s11927_s18  ;;  %9302 = vmatprep.subr.bf16.mxu0 %v15177_v16  ;;  %v8242_v52 = vpop.permute.xlu0 %8241 }
 0x6de   :  { %v8136_v0 = vsel %vm7180_vm12, %v8116_v31, %v15795_v49 }
 0x6df   :  { %7303 = vrot.lane.b32.xlu0 %v15558_v25, %s16703_s25  ;;  %9386 = vmatprep.subr.bf16.mxu1 %v8136_v0 }
 0x6e0   :  { %9303 = vmatpush1.bf16.msra.mxu0 %v15121_v22  ;;  %9387 = vmatpush1.bf16.msra.mxu1 %v8135_v19  ;;  %v8263_v22 = vsel %vm490_vm1, %v15385_v27, %v8242_v52 }
 0x6e1   :  { %v8244_v55 = vpop.permute.xlu1 %8243  ;;  %7305 = vrot.lane.b32.xlu1 %v15629_v50, %s16703_s25  ;;  %9388 = vmatprep.subr.bf16.mxu1 %v15383_v53  ;;  %v15809_v16 = vpop.permute.xlu0 %6201 }
 0x6e2   :  { %v6220_v7 = vsel %vm1060_vm4, %v15631_v13, %v15809_v16  ;;  %v8264_v42 = vsel %vm490_vm1, %v8242_v52, %v8244_v55 }
 0x6e3   :  { %v15816_v26 = vmax.bf16 %v6220_v7, %v15366_v46  ;;  %7307 = vrot.lane.b32.xlu0 %v15636_v40, %s16703_s25  ;;  %9304 = vmatprep.subr.bf16.mxu0 %v8264_v42  ;;  %v15887_v42 = vld [vmem:[%s16591_s3 + $0x8] ss:$16 sps:$4 sm:$0xff]  }
 0x6e4   :  { %9305 = vmatpush1.bf16.msra.mxu0 %v8263_v22  ;;  %9389 = vmatpush1.bf16.msra.mxu1 %v15195_v11 }
 0x6e5   :  { %v8246_v3 = vpop.permute.xlu1 %8245  ;;  %7309 = vrot.lane.b32.xlu1 %v15816_v26, %s16703_s25 }
 0x6e6   :  { %v8265_v27 = vsel %vm490_vm1, %v8244_v55, %v8246_v3 }
 0x6e7   :  { %7405 = vrot.lane.b32.xlu0 %v15558_v25, %s16691_s24 }
 0x6e9   :  { %v8344_v13 = vpop.permute.xlu1 %8343  ;;  %7407 = vrot.lane.b32.xlu1 %v15629_v50, %s16691_s24  ;;  %v15829_v46 = vpop.permute.xlu0 %8247 }
 0x6ea   :  { %v8266_v24 = vsel %vm490_vm1, %v8246_v3, %v15829_v46  ;;  %v8365_v29 = vsel %vm870_vm3, %v15401_v14, %v8344_v13 }
 0x6eb   :  { %7409 = vrot.lane.b32.xlu0 %v15636_v40, %s16691_s24  ;;  %9390 = vmatprep.subr.bf16.mxu1 %v8266_v24 }
 0x6ec   :  { %9391 = vmatpush1.bf16.msra.mxu1 %v8265_v27 }
 0x6ed   :  { %v8348_v8 = vpop.permute.xlu1 %8347  ;;  %7411 = vrot.lane.b32.xlu1 %v15816_v26, %s16691_s24  ;;  %v8346_v20 = vpop.permute.xlu0 %8345 }
 0x6ee   :  { %v8366_v47 = vsel %vm870_vm3, %v8344_v13, %v8346_v20  ;;  %v8367_v15 = vsel %vm870_vm3, %v8346_v20, %v8348_v8 }
 0x6ef   :  { %7507 = vrot.lane.b32.xlu0 %v15558_v25, %s11924_s1  ;;  %9306 = vmatprep.subr.bf16.mxu0 %v8366_v47 }
 0x6f0   :  { %9307 = vmatpush1.bf16.msra.mxu0 %v8365_v29 }
 0x6f1   :  { %v8446_v12 = vpop.permute.xlu1 %8445  ;;  %7509 = vrot.lane.b32.xlu1 %v15629_v50, %s11924_s1  ;;  %v15845_v36 = vpop.permute.xlu0 %8349 }
 0x6f2   :  { %v8368_v41 = vsel %vm870_vm3, %v8348_v8, %v15845_v36  ;;  %v8467_v30 = vsel %vm6565_vm2, %v15417_v45, %v8446_v12 }
 0x6f3   :  { %7511 = vrot.lane.b32.xlu0 %v15636_v40, %s11924_s1  ;;  %9392 = vmatprep.subr.bf16.mxu1 %v8368_v41 }
 0x6f4   :  { %9393 = vmatpush1.bf16.msra.mxu1 %v8367_v15 }
 0x6f5   :  { %v8450_v59 = vpop.permute.xlu1 %8449  ;;  %7513 = vrot.lane.b32.xlu1 %v15816_v26, %s11924_s1  ;;  %v8448_v14 = vpop.permute.xlu0 %8447 }
 0x6f6   :  { %v8468_v6 = vsel %vm6565_vm2, %v8446_v12, %v8448_v14  ;;  %v8469_v48 = vsel %vm6565_vm2, %v8448_v14, %v8450_v59 }
 0x6f7   :  { %7609 = vrot.lane.b32.xlu0 %v15558_v25, %s11925_s26  ;;  %9308 = vmatprep.subr.bf16.mxu0 %v8468_v6 }
 0x6f8   :  { %9309 = vmatpush1.bf16.msra.mxu0 %v8467_v30 }
 0x6f9   :  { %v8548_v5 = vpop.permute.xlu1 %8547  ;;  %7611 = vrot.lane.b32.xlu1 %v15629_v50, %s11925_s26  ;;  %v15861_v31 = vpop.permute.xlu0 %8451 }
 0x6fa   :  { %v8470_v57 = vsel %vm6565_vm2, %v8450_v59, %v15861_v31  ;;  %v8569_v19 = vsel %vm6668_vm13, %v15433_v39, %v8548_v5 }
 0x6fb   :  { %7613 = vrot.lane.b32.xlu0 %v15636_v40, %s11925_s26  ;;  %9394 = vmatprep.subr.bf16.mxu1 %v8470_v57 }
 0x6fc   :  { %9395 = vmatpush1.bf16.msra.mxu1 %v8469_v48 }
 0x6fd   :  { %7615 = vrot.lane.b32.xlu1 %v15816_v26, %s11925_s26  ;;  %v8550_v45 = vpop.permute.xlu0 %8549  ;;  %v8552_v52 = vpop.permute.xlu1 %8551 }
 0x6fe   :  { %v8570_v0 = vsel %vm6668_vm13, %v8548_v5, %v8550_v45  ;;  %v8571_v22 = vsel %vm6668_vm13, %v8550_v45, %v8552_v52 }
 0x6ff   :  { %7711 = vrot.lane.b32.xlu0 %v15558_v25, %s16664_s13  ;;  %9310 = vmatprep.subr.bf16.mxu0 %v8570_v0 }
 0x700   :  { %9311 = vmatpush1.bf16.msra.mxu0 %v8569_v19 }
 0x701   :  { %7713 = vrot.lane.b32.xlu1 %v15629_v50, %s16664_s13  ;;  %9423 = vmatprep.subr.bf16.mxu0 %v15383_v53  ;;  %v15878_v55 = vpop.permute.xlu0 %8553  ;;  %v6354_v39 = vpop.permute.xlu1 %6353 }
 0x702   :  { %v8572_v7 = vsel %vm6668_vm13, %v8552_v52, %v15878_v55  ;;  %v6371_v24 = vsel %vm490_vm1, %v15461_v9, %v6354_v39 }
 0x703   :  { %7715 = vrot.lane.b32.xlu0 %v15636_v40, %s16664_s13  ;;  %9327 = vmatmul.mubr.bf16.vlgmr.msra.gmra.mrb[24].mxu0 %v15887_v42 }
 0x704   :  { %9396 = vmatprep.subr.bf16.mxu1 %v8572_v7  ;;  %9424 = vmatpush1.bf16.msra.mxu0 %v15195_v11 }
 0x705   :  { %9397 = vmatpush1.bf16.msra.mxu1 %v8571_v22  ;;  %7717 = vrot.lane.b32.xlu1 %v15816_v26, %s16664_s13  ;;  %v6356_v3 = vpop.permute.xlu0 %6355 }
 0x706   :  { %9509 = vmatprep.subr.bf16.mxu1 %v15629_v50  ;;  %v6372_v13 = vsel %vm490_vm1, %v6354_v39, %v6356_v3  ;;  %9455 = vmatprep.mubr.bf16.mxu0 %v15454_v61 }
 0x707   :  { %7813 = vrot.lane.b32.xlu0 %v15558_v25, %s16670_s27  ;;  %9425 = vmatprep.subr.bf16.mxu0 %v6372_v13 }
 0x708   :  { %9413 = vmatmul.mubr.bf16.vlgmr.msra.gmra.mrb[24].mxu1 %v15887_v42  ;;  %9426 = vmatpush1.bf16.msra.mxu0 %v6371_v24 }
 0x709   :  { %9510 = vmatpush1.bf16.msra.mxu1 %v15558_v25  ;;  %7815 = vrot.lane.b32.xlu1 %v15629_v50, %s16670_s27 }
 0x70a   :  { %9541 = vmatprep.mubr.bf16.mxu1 %v15454_v61 }
 0x70b   :  { %v6358_v11 = vpop.permute.xlu1 %6357  ;;  %7817 = vrot.lane.b32.xlu0 %v15636_v40, %s16670_s27 }
 0x70c   :  { %v6373_v20 = vsel %vm490_vm1, %v6356_v3, %v6358_v11 }
 0x70d   :  { %7819 = vrot.lane.b32.xlu1 %v15816_v26, %s16670_s27  ;;  %v6360_v27 = vpop.permute.xlu0 %6359 }
 0x70e   :  { %v6374_v9 = vsel %vm490_vm1, %v6358_v11, %v6360_v27 }
 0x70f   :  { %v6456_v8 = vpop.permute.xlu1 %6455  ;;  %7915 = vrot.lane.b32.xlu0 %v15558_v25, %s16652_s20  ;;  %9511 = vmatprep.subr.bf16.mxu1 %v6374_v9 }
 0x710   :  { %9512 = vmatpush1.bf16.msra.mxu1 %v6373_v20  ;;  %v6473_v12 = vsel %vm870_vm3, %v15478_v23, %v6456_v8 }
 0x711   :  { %7917 = vrot.lane.b32.xlu1 %v15629_v50, %s16652_s20  ;;  %v6458_v61 = vpop.permute.xlu0 %6457 }
 0x712   :  { %v6474_v47 = vsel %vm870_vm3, %v6456_v8, %v6458_v61 }
 0x713   :  { %v6460_v29 = vpop.permute.xlu1 %6459  ;;  %7919 = vrot.lane.b32.xlu0 %v15636_v40, %s16652_s20  ;;  %9427 = vmatprep.subr.bf16.mxu0 %v6474_v47 }
 0x714   :  { %9428 = vmatpush1.bf16.msra.mxu0 %v6473_v12  ;;  %v6475_v14 = vsel %vm870_vm3, %v6458_v61, %v6460_v29 }
 0x715   :  { %7921 = vrot.lane.b32.xlu1 %v15816_v26, %s16652_s20  ;;  %v6462_v41 = vpop.permute.xlu0 %6461 }
 0x716   :  { %v6476_v15 = vsel %vm870_vm3, %v6460_v29, %v6462_v41 }
 0x717   :  { %v6558_v59 = vpop.permute.xlu1 %6557  ;;  %8017 = vrot.lane.b32.xlu0 %v15558_v25, %s11926_s7  ;;  %9513 = vmatprep.subr.bf16.mxu1 %v6476_v15 }
 0x718   :  { %9514 = vmatpush1.bf16.msra.mxu1 %v6475_v14  ;;  %v6576_v5 = vsel %vm6565_vm2, %v15494_v44, %v6558_v59  ;;  %v15949_v22 = vpop.f32.mrb[20].mxu0 }
 0x719   :  { %8019 = vrot.lane.b32.xlu1 %v15629_v50, %s11926_s7  ;;  %v6560_v6 = vpop.permute.xlu0 %6559  ;;  %v15952_v13 = vpop.f32.mrb[21].mxu0 }
 0x71a   :  { %v6577_v23 = vsel %vm6565_vm2, %v6558_v59, %v6560_v6  ;;  %v15959_v27 = vpop.f32.mrb[22].mxu0 }
 0x71b   :  { %v6562_v30 = vpop.permute.xlu1 %6561  ;;  %8021 = vrot.lane.b32.xlu0 %v15636_v40, %s11926_s7  ;;  %9429 = vmatprep.subr.bf16.mxu0 %v6577_v23  ;;  %v15962_v8 = vpop.f32.mrb[23].mxu0 }
 0x71c   :  { %9430 = vmatpush1.bf16.msra.mxu0 %v6576_v5  ;;  %v6578_v52 = vsel %vm6565_vm2, %v6560_v6, %v6562_v30  ;;  %v15977_v6 = vpop.f32.mrb[20].mxu1 }
 0x71d   :  { %8023 = vrot.lane.b32.xlu1 %v15816_v26, %s11926_s7  ;;  %v6564_v57 = vpop.permute.xlu0 %6563  ;;  %s11931_s7 = smov 113  }
 0x71e   :  { %v6579_v48 = vsel %vm6565_vm2, %v6562_v30, %v6564_v57  ;;  %v15981_v30 = vpop.f32.mrb[21].mxu1 }
 0x71f   :  { %v6661_v45 = vpop.permute.xlu1 %6660  ;;  %8119 = vrot.lane.b32.xlu0 %v15558_v25, %s11927_s18  ;;  %9515 = vmatprep.subr.bf16.mxu1 %v6579_v48  ;;  %v15984_v48 = vpop.f32.mrb[22].mxu1 }
 0x720   :  { %9516 = vmatpush1.bf16.msra.mxu1 %v6578_v52  ;;  %v6679_v7 = vsel %vm6668_vm13, %v15510_v38, %v6661_v45 }
 0x721   :  { %8121 = vrot.lane.b32.xlu1 %v15629_v50, %s11927_s18  ;;  %v6663_v0 = vpop.permute.xlu0 %6662 }
 0x722   :  { %v6680_v44 = vsel %vm6668_vm13, %v6661_v45, %v6663_v0  ;;  %v15986_v45 = vpop.f32.mrb[23].mxu1 }
 0x723   :  { %v6665_v19 = vpop.permute.xlu1 %6664  ;;  %8123 = vrot.lane.b32.xlu0 %v15636_v40, %s11927_s18  ;;  %9431 = vmatprep.subr.bf16.mxu0 %v6680_v44 }
 0x724   :  { %9432 = vmatpush1.bf16.msra.mxu0 %v6679_v7  ;;  %v6681_v11 = vsel %vm6668_vm13, %v6663_v0, %v6665_v19 }
 0x725   :  { %8125 = vrot.lane.b32.xlu1 %v15816_v26, %s11927_s18  ;;  %v6667_v39 = vpop.permute.xlu0 %6666  ;;  %s11932_s18 = smov 112  }
 0x726   :  { %v6682_v3 = vsel %vm6668_vm13, %v6665_v19, %v6667_v39 }
 0x727   :  { %v6764_v24 = vpop.permute.xlu1 %6763  ;;  %8249 = vrot.lane.b32.xlu0 %v15629_v50, %s16703_s25  ;;  %9517 = vmatprep.subr.bf16.mxu1 %v6682_v3 }
 0x728   :  { %9518 = vmatpush1.bf16.msra.mxu1 %v6681_v11  ;;  %v6781_v61 = vsel %vm2010_vm9, %v15531_v1, %v6764_v24 }
 0x729   :  { %8251 = vrot.lane.b32.xlu1 %v15636_v40, %s16703_s25  ;;  %v6766_v38 = vpop.permute.xlu0 %6765 }
 0x72a   :  { %v6782_v9 = vsel %vm2010_vm9, %v6764_v24, %v6766_v38 }
 0x72b   :  { %v6768_v20 = vpop.permute.xlu1 %6767  ;;  %8253 = vrot.lane.b32.xlu0 %v15816_v26, %s16703_s25  ;;  %9433 = vmatprep.subr.bf16.mxu0 %v6782_v9  ;;  %v8959_v9 = vld [vmem:[%s16592_s4] sm:$0xff] }
 0x72c   :  { %9434 = vmatpush1.bf16.msra.mxu0 %v6781_v61  ;;  %v6783_v41 = vsel %vm2010_vm9, %v6766_v38, %v6768_v20 }
 0x72d   :  { %v6770_v47 = vpop.permute.xlu0 %6769 }
 0x72e   :  { %v6784_v29 = vsel %vm2010_vm9, %v6768_v20, %v6770_v47 }
 0x72f   :  { %v6866_v12 = vpop.permute.xlu1 %6865  ;;  %8351 = vrot.lane.b32.xlu0 %v15629_v50, %s16691_s24  ;;  %9519 = vmatprep.subr.bf16.mxu1 %v6784_v29 }
 0x730   :  { %9520 = vmatpush1.bf16.msra.mxu1 %v6783_v41  ;;  %v6883_v1 = vsel %vm2390_vm11, %v15560_v18, %v6866_v12 }
 0x731   :  { %v6868_v15 = vpop.permute.xlu0 %6867 }
 0x732   :  { %v6884_v59 = vsel %vm2390_vm11, %v6866_v12, %v6868_v15 }
 0x733   :  { %v6204_v14 = vpop.permute.xlu1 %6203  ;;  %8355 = vrot.lane.b32.xlu0 %v15816_v26, %s16691_s24  ;;  %9435 = vmatprep.subr.bf16.mxu0 %v6884_v59 }
 0x734   :  { %v6221_v23 = vsel %vm1060_vm4, %v15809_v16, %v6204_v14  ;;  %9436 = vmatpush1.bf16.msra.mxu0 %v6883_v1  ;;  %vm16770_vm4 = vmmov %vm16761_vm0 }
 0x735   :  { %v6255_v5 = vmax.bf16 %v6221_v23, %v15540_v51  ;;  %v6870_v57 = vpop.permute.xlu0 %6869  ;;  %vm16775_vm0 = vmmov %vm16774_vm5 }
 0x736   :  { %v6885_v0 = vsel %vm2390_vm11, %v6868_v15, %v6870_v57  ;;  %vm16776_vm10 = vmmov %vm16770_vm4 }
 0x737   :  { %v6872_v52 = vpop.permute.xlu1 %6871  ;;  %8453 = vrot.lane.b32.xlu0 %v15629_v50, %s11924_s1  ;;  %8255 = vrot.lane.b32.xlu1 %v6255_v5, %s16703_s25  ;;  %vm16777_vm7 = vmmov %vm16770_vm4 }
 0x738   :  { %v6886_v18 = vsel %vm2390_vm11, %v6870_v57, %v6872_v52  ;;  %v8960_v57 = vld [vmem:[%s16592_s4 + $0x8] sm:$0xff]  ;;  %s11928_s4 = smov 116  }
 0x739   :  { %9521 = vmatprep.subr.bf16.mxu1 %v6886_v18  ;;  %v6968_v16 = vpop.permute.xlu0 %6967 }
 0x73a   :  { %9522 = vmatpush1.bf16.msra.mxu1 %v6885_v0  ;;  %v6985_v7 = vsel %vm16771_vm15, %v15576_v37, %v6968_v16  ;;  %vm16778_vm15 = vmmov %vm16770_vm4 }
 0x73b   :  { %v6970_v44 = vpop.permute.xlu1 %6969  ;;  %8457 = vrot.lane.b32.xlu0 %v15816_v26, %s11924_s1  ;;  %8353 = vrot.lane.b32.xlu1 %v15636_v40, %s16691_s24 }
 0x73c   :  { %v6986_v51 = vsel %vm16770_vm4, %v6968_v16, %v6970_v44 }
 0x73d   :  { %9437 = vmatprep.subr.bf16.mxu0 %v6986_v51  ;;  %v6972_v19 = vpop.permute.xlu0 %6971 }
 0x73e   :  { %9438 = vmatpush1.bf16.msra.mxu0 %v6985_v7  ;;  %v6987_v11 = vsel %vm16773_vm6, %v6970_v44, %v6972_v19  ;;  %vm16787_vm6 = vmmov %vm16775_vm0 }
 0x73f   :  { %v6974_v39 = vpop.permute.xlu1 %6973  ;;  %8357 = vrot.lane.b32.xlu1 %v6255_v5, %s16691_s24  ;;  %8555 = vrot.lane.b32.xlu0 %v15629_v50, %s11925_s26 }
 0x740   :  { %v6988_v3 = vsel %vm16772_vm14, %v6972_v19, %v6974_v39  ;;  %vm16786_vm14 = vmmov %vm16775_vm0 }
 0x741   :  { %9523 = vmatprep.subr.bf16.mxu1 %v6988_v3  ;;  %v7070_v24 = vpop.permute.xlu0 %7069 }
 0x742   :  { %9524 = vmatpush1.bf16.msra.mxu1 %v6987_v11  ;;  %v7088_v61 = vsel %vm7077_vm8, %v15592_v43, %v7070_v24 }
 0x743   :  { %v7072_v38 = vpop.permute.xlu1 %7071  ;;  %8455 = vrot.lane.b32.xlu1 %v15636_v40, %s11924_s1  ;;  %8559 = vrot.lane.b32.xlu0 %v15816_v26, %s11925_s26 }
 0x744   :  { %v7089_v37 = vsel %vm7077_vm8, %v7070_v24, %v7072_v38 }
 0x745   :  { %9439 = vmatprep.subr.bf16.mxu0 %v7089_v37  ;;  %v7074_v20 = vpop.permute.xlu0 %7073 }
 0x746   :  { %9440 = vmatpush1.bf16.msra.mxu0 %v7088_v61  ;;  %v7090_v41 = vsel %vm7077_vm8, %v7072_v38, %v7074_v20 }
 0x747   :  { %v7076_v47 = vpop.permute.xlu1 %7075  ;;  %8459 = vrot.lane.b32.xlu1 %v6255_v5, %s11924_s1  ;;  %8963 = vperm.xlu0 %11725, %v8959_v9  }
 0x748   :  { %v7091_v29 = vsel %vm7077_vm8, %v7074_v20, %v7076_v47 }
 0x749   :  { %9525 = vmatprep.subr.bf16.mxu1 %v7091_v29  ;;  %v7173_v12 = vpop.permute.xlu0 %7172 }
 0x74a   :  { %9526 = vmatpush1.bf16.msra.mxu1 %v7090_v41  ;;  %v7191_v14 = vsel %vm7180_vm12, %v15608_v2, %v7173_v12 }
 0x74b   :  { %v7175_v15 = vpop.permute.xlu1 %7174  ;;  %8557 = vrot.lane.b32.xlu1 %v15636_v40, %s11925_s26 }
 0x74c   :  { %v7192_v59 = vsel %vm7180_vm12, %v7173_v12, %v7175_v15 }
 0x74d   :  { %9441 = vmatprep.subr.bf16.mxu0 %v7192_v59  ;;  %v7177_v43 = vpop.permute.xlu0 %7176 }
 0x74e   :  { %9442 = vmatpush1.bf16.msra.mxu0 %v7191_v14  ;;  %v7193_v18 = vsel %vm7180_vm12, %v7175_v15, %v7177_v43 }
 0x74f   :  { %v7179_v1 = vpop.permute.xlu1 %7178  ;;  %8561 = vrot.lane.b32.xlu1 %v6255_v5, %s11925_s26  ;;  %9443 = vmatprep.subr.bf16.mxu0 %v15558_v25 }
 0x750   :  { %v7194_v23 = vsel %vm7180_vm12, %v7177_v43, %v7179_v1 }
 0x751   :  { %9527 = vmatprep.subr.bf16.mxu1 %v7194_v23  ;;  %v7304_v52 = vpop.permute.xlu0 %7303 }
 0x752   :  { %9444 = vmatpush1.bf16.msra.mxu0 %v15383_v53  ;;  %9528 = vmatpush1.bf16.msra.mxu1 %v7193_v18  ;;  %v7321_v0 = vsel %vm490_vm1, %v15642_v33, %v7304_v52 }
 0x753   :  { %v7306_v2 = vpop.permute.xlu1 %7305  ;;  %8968 = vperm.xlu1 %11724, %v8960_v57   ;;  %9529 = vmatprep.subr.bf16.mxu1 %v15636_v40 }
 0x754   :  { %v7322_v5 = vsel %vm490_vm1, %v7304_v52, %v7306_v2 }
 0x755   :  { %9445 = vmatprep.subr.bf16.mxu0 %v7322_v5  ;;  %v7308_v16 = vpop.permute.xlu0 %7307 }
 0x756   :  { %9446 = vmatpush1.bf16.msra.mxu0 %v7321_v0  ;;  %9530 = vmatpush1.bf16.msra.mxu1 %v15629_v50  ;;  %v7323_v19 = vsel %vm490_vm1, %v7306_v2, %v7308_v16 }
 0x757   :  { %v7310_v44 = vpop.permute.xlu1 %7309 }
 0x758   :  { %v7324_v51 = vsel %vm490_vm1, %v7308_v16, %v7310_v44 }
 0x759   :  { %9531 = vmatprep.subr.bf16.mxu1 %v7324_v51  ;;  %v7406_v53 = vpop.permute.xlu0 %7405 }
 0x75a   :  { %9532 = vmatpush1.bf16.msra.mxu1 %v7323_v19  ;;  %v7423_v24 = vsel %vm870_vm3, %v15658_v35, %v7406_v53 }
 0x75b   :  { %v7408_v7 = vpop.permute.xlu1 %7407 }
 0x75c   :  { %v7424_v39 = vsel %vm870_vm3, %v7406_v53, %v7408_v7 }
 0x75d   :  { %9447 = vmatprep.subr.bf16.mxu0 %v7424_v39  ;;  %v7410_v3 = vpop.permute.xlu0 %7409 }
 0x75e   :  { %9448 = vmatpush1.bf16.msra.mxu0 %v7423_v24  ;;  %v7425_v37 = vsel %vm870_vm3, %v7408_v7, %v7410_v3 }
 0x75f   :  { %v7412_v33 = vpop.permute.xlu1 %7411 }
 0x760   :  { %v7426_v11 = vsel %vm870_vm3, %v7410_v3, %v7412_v33 }
 0x761   :  { %9533 = vmatprep.subr.bf16.mxu1 %v7426_v11  ;;  %v7508_v38 = vpop.permute.xlu0 %7507 }
 0x762   :  { %9534 = vmatpush1.bf16.msra.mxu1 %v7425_v37  ;;  %v7525_v47 = vsel %vm6565_vm2, %v15674_v21, %v7508_v38 }
 0x763   :  { %v7510_v9 = vpop.permute.xlu1 %7509 }
 0x764   :  { %v7526_v20 = vsel %vm6565_vm2, %v7508_v38, %v7510_v9 }
 0x765   :  { %9449 = vmatprep.subr.bf16.mxu0 %v7526_v20  ;;  %v7512_v61 = vpop.permute.xlu0 %7511 }
 0x766   :  { %9450 = vmatpush1.bf16.msra.mxu0 %v7525_v47  ;;  %v7527_v41 = vsel %vm6565_vm2, %v7510_v9, %v7512_v61 }
 0x767   :  { %v7514_v29 = vpop.permute.xlu1 %7513 }
 0x768   :  { %v7528_v35 = vsel %vm6565_vm2, %v7512_v61, %v7514_v29 }
 0x769   :  { %9535 = vmatprep.subr.bf16.mxu1 %v7528_v35  ;;  %v7610_v12 = vpop.permute.xlu0 %7609 }
 0x76a   :  { %9536 = vmatpush1.bf16.msra.mxu1 %v7527_v41  ;;  %v7627_v14 = vsel %vm6668_vm13, %v15690_v60, %v7610_v12 }
 0x76b   :  { %v7612_v15 = vpop.permute.xlu1 %7611 }
 0x76c   :  { %v7628_v59 = vsel %vm6668_vm13, %v7610_v12, %v7612_v15 }
 0x76d   :  { %9451 = vmatprep.subr.bf16.mxu0 %v7628_v59  ;;  %v7614_v43 = vpop.permute.xlu0 %7613 }
 0x76e   :  { %9452 = vmatpush1.bf16.msra.mxu0 %v7627_v14  ;;  %v7629_v57 = vsel %vm6668_vm13, %v7612_v15, %v7614_v43 }
 0x76f   :  { %v7616_v1 = vpop.permute.xlu1 %7615 }
 0x770   :  { %v7630_v21 = vsel %vm6668_vm13, %v7614_v43, %v7616_v1 }
 0x771   :  { %9537 = vmatprep.subr.bf16.mxu1 %v7630_v21  ;;  %v7712_v23 = vpop.permute.xlu0 %7711 }
 0x772   :  { %9538 = vmatpush1.bf16.msra.mxu1 %v7629_v57  ;;  %v7729_v5 = vsel %vm2010_vm9, %v15706_v32, %v7712_v23 }
 0x773   :  { %v7714_v52 = vpop.permute.xlu1 %7713 }
 0x774   :  { %v7730_v18 = vsel %vm2010_vm9, %v7712_v23, %v7714_v52 }
 0x775   :  { %9453 = vmatprep.subr.bf16.mxu0 %v7730_v18  ;;  %v7716_v2 = vpop.permute.xlu0 %7715 }
 0x776   :  { %9454 = vmatpush1.bf16.msra.mxu0 %v7729_v5  ;;  %v7731_v44 = vsel %vm2010_vm9, %v7714_v52, %v7716_v2 }
 0x777   :  { %v7718_v16 = vpop.permute.xlu1 %7717 }
 0x778   :  { %v7732_v60 = vsel %vm2010_vm9, %v7716_v2, %v7718_v16 }
 0x779   :  { %9539 = vmatprep.subr.bf16.mxu1 %v7732_v60  ;;  %v7814_v0 = vpop.permute.xlu0 %7813  ;;  %9456 = vmatmul.mubr.bf16.vlgmr.msra.gmra.mrb[28].mxu0 %v15720_v28 }
 0x77a   :  { %9540 = vmatpush1.bf16.msra.mxu1 %v7731_v44  ;;  %11380 = vmatprep.mubr.msk.bf16.mxu0 %vm16774_vm5, %v15727_v17  ;;  %v7831_v32 = vsel %vm2390_vm11, %v15737_v54, %v7814_v0  ;;  %vm10708_vm5 = vcmask 1043456  }
 0x77b   :  { %v7816_v51 = vpop.permute.xlu1 %7815 }
 0x77c   :  { %v7832_v53 = vsel %vm2390_vm11, %v7814_v0, %v7816_v51 }
 0x77d   :  { %9466 = vmatprep.subr.bf16.mxu0 %v7832_v53  ;;  %v7818_v19 = vpop.permute.xlu0 %7817  ;;  %9542 = vmatmul.mubr.bf16.vlgmr.msra.gmra.mrb[28].mxu1 %v15720_v28 }
 0x77e   :  { %9467 = vmatpush1.bf16.msra.mxu0 %v7831_v32  ;;  %11381 = vmatprep.mubr.msk.bf16.mxu1 %vm16775_vm0, %v15727_v17  ;;  %v7833_v24 = vsel %vm2390_vm11, %v7816_v51, %v7818_v19 }
 0x77f   :  { %v7820_v7 = vpop.permute.xlu1 %7819 }
 0x780   :  { %v7834_v39 = vsel %vm2390_vm11, %v7818_v19, %v7820_v7  ;;  %vm16782_vm11 = vmmov %vm16775_vm0 }
 0x781   :  { %9552 = vmatprep.subr.bf16.mxu1 %v7834_v39  ;;  %v7916_v3 = vpop.permute.xlu0 %7915 }
 0x782   :  { %9553 = vmatpush1.bf16.msra.mxu1 %v7833_v24  ;;  %v7933_v28 = vsel %vm16777_vm7, %v15755_v4, %v7916_v3  ;;  %vm10877_vm7 = vcmask 15360  }
 0x783   :  { %v7918_v33 = vpop.permute.xlu1 %7917 }
 0x784   :  { %v7934_v11 = vsel %vm16776_vm10, %v7916_v3, %v7918_v33  ;;  %vm10828_vm10 = vcmask 687104  }
 0x785   :  { %9468 = vmatprep.subr.bf16.mxu0 %v7934_v11  ;;  %v7920_v38 = vpop.permute.xlu0 %7919 }
 0x786   :  { %9469 = vmatpush1.bf16.msra.mxu0 %v7933_v28  ;;  %v7935_v9 = vsel %vm16778_vm15, %v7918_v33, %v7920_v38 }
 0x787   :  { %v7922_v54 = vpop.permute.xlu1 %7921 }
 0x788   :  { %v7936_v17 = vsel %vm16770_vm4, %v7920_v38, %v7922_v54  ;;  %vm10879_vm4 = vcmask 9216  }
 0x789   :  { %9554 = vmatprep.subr.bf16.mxu1 %v7936_v17  ;;  %v8018_v37 = vpop.permute.xlu0 %8017 }
 0x78a   :  { %9555 = vmatpush1.bf16.msra.mxu1 %v7935_v9  ;;  %v8035_v29 = vsel %vm7077_vm8, %v15779_v56, %v8018_v37 }
 0x78b   :  { %v8020_v20 = vpop.permute.xlu1 %8019 }
 0x78c   :  { %v8036_v61 = vsel %vm7077_vm8, %v8018_v37, %v8020_v20 }
 0x78d   :  { %9470 = vmatprep.subr.bf16.mxu0 %v8036_v61  ;;  %v8022_v47 = vpop.permute.xlu0 %8021 }
 0x78e   :  { %9471 = vmatpush1.bf16.msra.mxu0 %v8035_v29  ;;  %v8037_v41 = vsel %vm7077_vm8, %v8020_v20, %v8022_v47 }
 0x78f   :  { %v8024_v35 = vpop.permute.xlu1 %8023 }
 0x790   :  { %v8038_v4 = vsel %vm7077_vm8, %v8022_v47, %v8024_v35  ;;  %vm16784_vm8 = vmmov %vm16775_vm0 }
 0x791   :  { %9556 = vmatprep.subr.bf16.mxu1 %v8038_v4  ;;  %v8120_v12 = vpop.permute.xlu0 %8119 }
 0x792   :  { %9557 = vmatpush1.bf16.msra.mxu1 %v8037_v41  ;;  %v8137_v14 = vsel %vm7180_vm12, %v15795_v49, %v8120_v12 }
 0x793   :  { %v8122_v15 = vpop.permute.xlu1 %8121 }
 0x794   :  { %v8138_v59 = vsel %vm7180_vm12, %v8120_v12, %v8122_v15 }
 0x795   :  { %9472 = vmatprep.subr.bf16.mxu0 %v8138_v59  ;;  %v8124_v43 = vpop.permute.xlu0 %8123 }
 0x796   :  { %9473 = vmatpush1.bf16.msra.mxu0 %v8137_v14  ;;  %v8139_v23 = vsel %vm7180_vm12, %v8122_v15, %v8124_v43 }
 0x797   :  { %v8126_v1 = vpop.permute.xlu1 %8125  ;;  %9474 = vmatprep.subr.bf16.mxu0 %v15629_v50 }
 0x798   :  { %v8140_v56 = vsel %vm7180_vm12, %v8124_v43, %v8126_v1  ;;  %vm16785_vm12 = vmmov %vm16775_vm0 }
 0x799   :  { %9558 = vmatprep.subr.bf16.mxu1 %v8140_v56  ;;  %v8250_v21 = vpop.permute.xlu0 %8249 }
 0x79a   :  { %9475 = vmatpush1.bf16.msra.mxu0 %v15558_v25  ;;  %9559 = vmatpush1.bf16.msra.mxu1 %v8139_v23  ;;  %v8267_v18 = vsel %vm490_vm1, %v15829_v46, %v8250_v21 }
 0x79b   :  { %v8252_v57 = vpop.permute.xlu1 %8251  ;;  %9560 = vmatprep.subr.bf16.mxu1 %v15816_v26 }
 0x79c   :  { %v8268_v52 = vsel %vm490_vm1, %v8250_v21, %v8252_v57 }
 0x79d   :  { %9476 = vmatprep.subr.bf16.mxu0 %v8268_v52  ;;  %v8254_v49 = vpop.permute.xlu0 %8253 }
 0x79e   :  { %9477 = vmatpush1.bf16.msra.mxu0 %v8267_v18  ;;  %9561 = vmatpush1.bf16.msra.mxu1 %v15636_v40  ;;  %v8269_v25 = vsel %vm490_vm1, %v8252_v57, %v8254_v49 }
 0x7a1   :  { %v8352_v50 = vpop.permute.xlu0 %8351 }
 0x7a2   :  { %v8369_v46 = vsel %vm870_vm3, %v15845_v36, %v8352_v50 }
 0x7a5   :  { %v8356_v2 = vpop.permute.xlu0 %8355 }
 0x7a9   :  { %v8256_v5 = vpop.permute.xlu1 %8255  ;;  %v8454_v0 = vpop.permute.xlu0 %8453 }
 0x7aa   :  { %v8270_v16 = vsel %vm490_vm1, %v8254_v49, %v8256_v5  ;;  %v8471_v7 = vsel %vm6565_vm2, %v15861_v31, %v8454_v0 }
 0x7ab   :  { %9562 = vmatprep.subr.bf16.mxu1 %v8270_v16 }
 0x7ac   :  { %9563 = vmatpush1.bf16.msra.mxu1 %v8269_v25 }
 0x7ad   :  { %v8354_v26 = vpop.permute.xlu1 %8353  ;;  %v8458_v53 = vpop.permute.xlu0 %8457 }
 0x7ae   :  { %v8370_v60 = vsel %vm870_vm3, %v8352_v50, %v8354_v26  ;;  %v8371_v51 = vsel %vm870_vm3, %v8354_v26, %v8356_v2 }
 0x7af   :  { %9478 = vmatprep.subr.bf16.mxu0 %v8370_v60 }
 0x7b0   :  { %9479 = vmatpush1.bf16.msra.mxu0 %v8369_v46 }
 0x7b1   :  { %v8358_v44 = vpop.permute.xlu1 %8357  ;;  %v8556_v3 = vpop.permute.xlu0 %8555 }
 0x7b2   :  { %v8372_v40 = vsel %vm870_vm3, %v8356_v2, %v8358_v44  ;;  %v8573_v38 = vsel %vm6668_vm13, %v15878_v55, %v8556_v3  ;;  %vm9873_vm3 = vcmask 7168  }
 0x7b3   :  { %9564 = vmatprep.subr.bf16.mxu1 %v8372_v40 }
 0x7b4   :  { %9565 = vmatpush1.bf16.msra.mxu1 %v8371_v51 }
 0x7b5   :  { %v8456_v19 = vpop.permute.xlu1 %8455  ;;  %v8560_v28 = vpop.permute.xlu0 %8559 }
 0x7b6   :  { %v8472_v32 = vsel %vm6565_vm2, %v8454_v0, %v8456_v19  ;;  %v8473_v24 = vsel %vm6565_vm2, %v8456_v19, %v8458_v53 }
 0x7b7   :  { %9480 = vmatprep.subr.bf16.mxu0 %v8472_v32 }
 0x7b8   :  { %9481 = vmatpush1.bf16.msra.mxu0 %v8471_v7 }
 0x7b9   :  { %v8460_v39 = vpop.permute.xlu1 %8459 }
 0x7ba   :  { %v8474_v36 = vsel %vm6565_vm2, %v8458_v53, %v8460_v39  ;;  %vm16783_vm2 = vmmov %vm16775_vm0 }
 0x7bb   :  { %9566 = vmatprep.subr.bf16.mxu1 %v8474_v36 }
 0x7bc   :  { %9567 = vmatpush1.bf16.msra.mxu1 %v8473_v24 }
 0x7bd   :  { %v8558_v33 = vpop.permute.xlu1 %8557 }
 0x7be   :  { %v8574_v11 = vsel %vm6668_vm13, %v8556_v3, %v8558_v33  ;;  %v8575_v17 = vsel %vm6668_vm13, %v8558_v33, %v8560_v28 }
 0x7bf   :  { %9482 = vmatprep.subr.bf16.mxu0 %v8574_v11 }
 0x7c0   :  { %9483 = vmatpush1.bf16.msra.mxu0 %v8573_v38 }
 0x7c1   :  { %v8562_v54 = vpop.permute.xlu1 %8561 }
 0x7c2   :  { %v8576_v31 = vsel %vm6668_vm13, %v8560_v28, %v8562_v54 }
 0x7c3   :  { %9499 = vmatmul.mubr.bf16.vlgmr.msra.gmra.mrb[28].mxu0 %v15887_v42  ;;  %9568 = vmatprep.subr.bf16.mxu1 %v8576_v31 }
 0x7c4   :  { %9569 = vmatpush1.bf16.msra.mxu1 %v8575_v17 }
 0x7c5   :  { %10465 = vmatprep.subr.bf16.mxu1 %v11923_v10 }
 0x7c6   :  { %v16111_v37 = vpop.permute.xlu0 %8963 }
 0x7c7   :  { %9585 = vmatmul.mubr.bf16.vlgmr.msra.gmra.mrb[28].mxu1 %v15887_v42  ;;  %v11605_v55 = vadd.f32 %v15949_v22, %v16111_v37  ;;  %v11602_v9 = vadd.f32 %v15766_v34, %v16111_v37  ;;  %v11606_v20 = vadd.f32 %v15952_v13, %v16111_v37  ;;  %v11609_v61 = vadd.f32 %v15977_v6, %v16111_v37 }
 0x7c8   :  { %v11610_v42 = vadd.f32 %v15981_v30, %v16111_v37  ;;  %v11601_v4 = vadd.f32 %v15764_v62, %v16111_v37 }
 0x7c9   :  { %v9597_v29 = vmax.f32 %v11605_v55, 0.0  ;;  %v9596_v35 = vmax.f32 %v11602_v9, 0.0  ;;  %v9598_v12 = vmax.f32 %v11606_v20, 0.0  ;;  %v9599_v41 = vmax.f32 %v11609_v61, 0.0 }
 0x7ca   :  { %v9595_v56 = vmax.f32 %v11601_v4, 0.0 }
 0x7d2   :  { %v16121_v47 = vpop.permute.xlu1 %8968 }
 0x7d3   :  { %v11607_v22 = vadd.f32 %v15959_v27, %v16121_v47  ;;  %v11604_v34 = vadd.f32 %v15777_v58, %v16121_v47  ;;  %v11608_v13 = vadd.f32 %v15962_v8, %v16121_v47  ;;  %v11611_v6 = vadd.f32 %v15984_v48, %v16121_v47 }
 0x7d4   :  { %v11612_v30 = vadd.f32 %v15986_v45, %v16121_v47  ;;  %v11603_v62 = vadd.f32 %v15771_v63, %v16121_v47  ;;  %v9600_v58 = vmax.f32 %v11610_v42, 0.0 }
 0x7d5   :  { %v9611_v15 = vmax.f32 %v11607_v22, 0.0  ;;  %v9610_v59 = vmax.f32 %v11604_v34, 0.0  ;;  %v9612_v27 = vmax.f32 %v11608_v13, 0.0  ;;  %v9613_v43 = vmax.f32 %v11611_v6, 0.0 }
 0x7d6   :  { %v9328_v14 = vpop.f32.mrb[24].mxu0  ;;  %v9614_v1 = vmax.f32 %v11612_v30, 0.0  ;;  %v9609_v8 = vmax.f32 %v11603_v62, 0.0 }
 0x7d7   :  { %v11613_v21 = vadd.f32 %v9328_v14, %v16111_v37  ;;  %v9330_v48 = vpop.f32.mrb[25].mxu0  ;;  %v16140_v23 = vpack.c.bf16 %v9611_v15, %v9597_v29  ;;  %v16142_v57 = vpack.c.bf16 %v9610_v59, %v9596_v35  ;;  %v16144_v45 = vpack.c.bf16 %v9612_v27, %v9598_v12 }
 0x7d8   :  { %v9332_v52 = vpop.f32.mrb[26].mxu0  ;;  %v16146_v63 = vpack.c.bf16 %v9613_v43, %v9599_v41  ;;  %v16148_v49 = vpack.c.bf16 %v9614_v1, %v9600_v58  ;;  %v16150_v18 = vpack.c.bf16 %v9609_v8, %v9595_v56 }
 0x7d9   :  { %v11614_v50 = vadd.f32 %v9332_v52, %v16121_v47  ;;  %9696 = vrot.lane.b32.xlu1 %v16140_v23, %s16703_s25  ;;  %9694 = vrot.lane.b32.xlu0 %v16142_v57, %s16703_s25  ;;  %v9334_v2 = vpop.f32.mrb[27].mxu0  ;;  %v9601_v5 = vmax.f32 %v11613_v21, 0.0 }
 0x7db   :  { %v9615_v16 = vmax.f32 %v11614_v50, 0.0  ;;  %v9414_v25 = vpop.f32.mrb[24].mxu1 }
 0x7dc   :  { %v11615_v26 = vadd.f32 %v9414_v25, %v16111_v37  ;;  %v9416_v60 = vpop.f32.mrb[25].mxu1 }
 0x7dd   :  { %v9629_v0 = vpack.c.bf16 %v9615_v16, %v9601_v5  ;;  %v11616_v46 = vadd.f32 %v9416_v60, %v16111_v37  ;;  %v9418_v44 = vpop.f32.mrb[26].mxu1  ;;  %9698 = vrot.lane.b32.xlu0 %v16144_v45, %s16703_s25 }
 0x7de   :  { %v11617_v40 = vadd.f32 %v9418_v44, %v16121_v47  ;;  %v9420_v51 = vpop.f32.mrb[27].mxu1  ;;  %v9603_v19 = vmax.f32 %v11615_v26, 0.0 }
 0x7df   :  { %v11618_v53 = vadd.f32 %v9420_v51, %v16121_v47  ;;  %v9604_v7 = vmax.f32 %v11616_v46, 0.0 }
 0x7e0   :  { %v9617_v32 = vmax.f32 %v11617_v40, 0.0 }
 0x7e1   :  { %v9618_v39 = vmax.f32 %v11618_v53, 0.0 }
 0x7e2   :  { %v9631_v36 = vpack.c.bf16 %v9617_v32, %v9603_v19 }
 0x7e3   :  { %v9632_v3 = vpack.c.bf16 %v9618_v39, %v9604_v7 }
 0x7e5   :  { %9710 = vrot.lane.b32.xlu1 %v9632_v3, %s16703_s25 }
 0x896   :  { %v9500_v24 = vpop.f32.mrb[28].mxu0 }
 0x897   :  { %v11619_v33 = vadd.f32 %v9500_v24, %v16111_v37  ;;  %v9502_v11 = vpop.f32.mrb[29].mxu0 }
 0x898   :  { %v11620_v38 = vadd.f32 %v9502_v11, %v16111_v37  ;;  %v9504_v28 = vpop.f32.mrb[30].mxu0 }
 0x899   :  { %v11621_v54 = vadd.f32 %v9504_v28, %v16121_v47  ;;  %v9506_v31 = vpop.f32.mrb[31].mxu0  ;;  %v9605_v9 = vmax.f32 %v11619_v33, 0.0 }
 0x89a   :  { %v11622_v17 = vadd.f32 %v9506_v31, %v16121_v47  ;;  %v9586_v55 = vpop.f32.mrb[28].mxu1  ;;  %v9606_v35 = vmax.f32 %v11620_v38, 0.0 }
 0x89b   :  { %v9619_v20 = vmax.f32 %v11621_v54, 0.0  ;;  %v11623_v61 = vadd.f32 %v9586_v55, %v16111_v37  ;;  %v9588_v29 = vpop.f32.mrb[29].mxu1 }
 0x89c   :  { %v9620_v42 = vmax.f32 %v11622_v17, 0.0  ;;  %v11624_v4 = vadd.f32 %v9588_v29, %v16111_v37  ;;  %v9590_v22 = vpop.f32.mrb[30].mxu1  ;;  %v9695_v37 = vpop.permute.xlu0 %9694 }
 0x89d   :  { %v9633_v34 = vpack.c.bf16 %v9619_v20, %v9605_v9  ;;  %v11625_v13 = vadd.f32 %v9590_v22, %v16121_v47  ;;  %v9592_v6 = vpop.f32.mrb[31].mxu1  ;;  %v9607_v30 = vmax.f32 %v11623_v61, 0.0 }
 0x89e   :  { %v9634_v12 = vpack.c.bf16 %v9620_v42, %v9606_v35  ;;  %v11626_v41 = vadd.f32 %v9592_v6, %v16121_v47  ;;  %v9608_v15 = vmax.f32 %v11624_v4, 0.0  ;;  %v9697_v47 = vpop.permute.xlu1 %9696 }
 0x89f   :  { %v9621_v62 = vmax.f32 %v11625_v13, 0.0  ;;  %9712 = vrot.lane.b32.xlu0 %v9633_v34, %s16703_s25  ;;  %v9721_v14 = vsel %vm490_vm1, %v9695_v37, %v9697_v47 }
 0x8a0   :  { %v9622_v59 = vmax.f32 %v11626_v41, 0.0  ;;  %9714 = vrot.lane.b32.xlu1 %v9634_v12, %s16703_s25  ;;  %v9699_v58 = vpop.permute.xlu0 %9698  ;;  %v9747_v1 = vmax.bf16 %v9721_v14, %v16142_v57 }
 0x8a1   :  { %v9635_v27 = vpack.c.bf16 %v9621_v62, %v9607_v30  ;;  %v9722_v56 = vsel %vm490_vm1, %v9697_v47, %v9699_v58 }
 0x8a2   :  { %v9636_v43 = vpack.c.bf16 %v9622_v59, %v9608_v15  ;;  %v16189_v8 = vmax.bf16 %v9722_v56, %v16140_v23  ;;  %v9711_v21 = vpop.permute.xlu1 %9710  ;;  %v11841_v56 = vld [vmem:[%s16593_s5 + $0x4] ss:$16 sps:$4 sm:$0xff]  }
 0x8a3   :  { %9708 = vrot.lane.b32.xlu0 %v9631_v36, %s16703_s25  ;;  %10401 = vmatprep.mubr.bf16.mxu0 %v11841_v56 }
 0x8a4   :  { %9700 = vrot.lane.b32.xlu1 %v16146_v63, %s16703_s25 }
 0x8a7   :  { %9702 = vrot.lane.b32.xlu0 %v16148_v49, %s16703_s25 }
 0x8a8   :  { %9716 = vrot.lane.b32.xlu1 %v9635_v27, %s16703_s25 }
 0x8ab   :  { %9718 = vrot.lane.b32.xlu0 %v9636_v43, %s16703_s25 }
 0x8ac   :  { %9692 = vrot.lane.b32.xlu1 %v16150_v18, %s16703_s25 }
 0x8af   :  { %9704 = vrot.lane.b32.xlu0 %v9629_v0, %s16703_s25  ;;  %s11929_s25 = smov 117  }
 0x8b0   :  { %9790 = vrot.lane.b32.xlu1 %v9747_v1, %s16664_s13 }
 0x8b3   :  { %9792 = vrot.lane.b32.xlu0 %v16189_v8, %s16664_s13 }
 0x911   :  { %v9713_v48 = vpop.permute.xlu0 %9712 }
 0x912   :  { %v9729_v52 = vsel %vm490_vm1, %v9711_v21, %v9713_v48  ;;  %v9715_v50 = vpop.permute.xlu1 %9714 }
 0x913   :  { %v9755_v2 = vmax.bf16 %v9729_v52, %v9632_v3  ;;  %v9730_v57 = vsel %vm490_vm1, %v9713_v48, %v9715_v50  ;;  %v10110_v48 = vld [vmem:[%s16594_s6 + $0x8] sm:$0xff]  ;;  %v10111_v52 = vld [vmem:[%s16594_s6 + $0x10] sm:$0xff] }
 0x914   :  { %v16195_v5 = vmax.bf16 %v9730_v57, %v9633_v34  ;;  %v10114_v57 = vld [vmem:[%s16594_s6 + $0x28] sm:$0xff] }
 0x915   :  { %v9709_v16 = vpop.permute.xlu0 %9708  ;;  %9806 = vrot.lane.b32.xlu1 %v9755_v2, %s16664_s13 }
 0x916   :  { %v9728_v25 = vsel %vm490_vm1, %v9709_v16, %v9711_v21  ;;  %v9701_v23 = vpop.permute.xlu1 %9700  ;;  %9808 = vrot.lane.b32.xlu0 %v16195_v5, %s16664_s13  ;;  %v10109_v21 = vld [vmem:[%s16594_s6] sm:$0xff]  ;;  %v10116_v16 = vld [vmem:[%s16594_s6 + $0x38] sm:$0xff] }
 0x917   :  { %v9754_v26 = vmax.bf16 %v9728_v25, %v9631_v36  ;;  %v9723_v60 = vsel %vm490_vm1, %v9699_v58, %v9701_v23  ;;  %v10117_v25 = vld [vmem:[%s16594_s6 + $0x40] sm:$0xff] }
 0x918   :  { %v9749_v0 = vmax.bf16 %v9723_v60, %v16144_v45  ;;  %v10120_v60 = vld [vmem:[%s16594_s6 + $0x58] sm:$0xff] }
 0x919   :  { %v9703_v46 = vpop.permute.xlu0 %9702  ;;  %9804 = vrot.lane.b32.xlu1 %v9754_v26, %s16664_s13 }
 0x91a   :  { %v9724_v44 = vsel %vm490_vm1, %v9701_v23, %v9703_v46  ;;  %v9717_v40 = vpop.permute.xlu1 %9716  ;;  %9794 = vrot.lane.b32.xlu0 %v9749_v0, %s16664_s13  ;;  %v10118_v23 = vld [vmem:[%s16594_s6 + $0x48] sm:$0xff] }
 0x91b   :  { %v16207_v51 = vmax.bf16 %v9724_v44, %v16146_v63  ;;  %v9731_v53 = vsel %vm490_vm1, %v9715_v50, %v9717_v40  ;;  %v10112_v50 = vld [vmem:[%s16594_s6 + $0x18] sm:$0xff] }
 0x91c   :  { %v16210_v19 = vmax.bf16 %v9731_v53, %v9634_v12  ;;  %v10123_v53 = vld [vmem:[%s16594_s6 + $0x70] sm:$0xff] }
 0x91d   :  { %v9719_v32 = vpop.permute.xlu0 %9718  ;;  %9796 = vrot.lane.b32.xlu1 %v16207_v51, %s16664_s13 }
 0x91e   :  { %v9732_v45 = vsel %vm490_vm1, %v9717_v40, %v9719_v32  ;;  %9810 = vrot.lane.b32.xlu0 %v16210_v19, %s16664_s13  ;;  %v9693_v7 = vpop.permute.xlu1 %9692  ;;  %v9773_v33 = vmax.bf16 %v9719_v32, %v9636_v43 }
 0x91f   :  { %v16217_v39 = vmax.bf16 %v9732_v45, %v9635_v27  ;;  %v9720_v36 = vsel %vm490_vm1, %v9693_v7, %v9695_v37  ;;  %v10596_v7 = vld [vmem:[%s16595_s8 + $0x8] sm:$0xff] }
 0x920   :  { %v9746_v63 = vmax.bf16 %v9720_v36, %v16150_v18 }
 0x921   :  { %v9705_v3 = vpop.permute.xlu0 %9704  ;;  %9812 = vrot.lane.b32.xlu1 %v16217_v39, %s16664_s13 }
 0x922   :  { %v9725_v24 = vsel %vm490_vm1, %v9703_v46, %v9705_v3  ;;  %9788 = vrot.lane.b32.xlu0 %v9746_v63, %s16664_s13  ;;  %v9791_v38 = vpop.permute.xlu1 %9790  ;;  %vm16779_vm1 = vmmov %vm16775_vm0  ;;  %v10122_v46 = vld [vmem:[%s16594_s6 + $0x68] sm:$0xff]  ;;  %v10598_v3 = vld [vmem:[%s16595_s8 + $0x18] sm:$0xff] }
 0x923   :  { %v9751_v11 = vmax.bf16 %v9725_v24, %v16148_v49  ;;  %v10599_v24 = vld [vmem:[%s16595_s8 + $0x20] sm:$0xff] }
 0x925   :  { %v9793_v28 = vpop.permute.xlu0 %9792  ;;  %9814 = vrot.lane.b32.xlu1 %v9773_v33, %s16664_s13 }
 0x926   :  { %v9817_v54 = vsel %vm2010_vm9, %v9791_v38, %v9793_v28  ;;  %9798 = vrot.lane.b32.xlu0 %v9751_v11, %s16664_s13  ;;  %s11930_s13 = smov 1  }
 0x927   :  { %v16229_v18 = vmax.bf16 %v9817_v54, %v9747_v1  ;;  %v10601_v54 = vld [vmem:[%s16595_s8 + $0x30] sm:$0xff] }
 0x929   :  { %9937 = vrot.lane.b32.xlu1 %v16229_v18, %s11928_s4 }
 0x987   :  { %v9807_v31 = vpop.permute.xlu1 %9806 }
 0x988   :  { %v9809_v17 = vpop.permute.xlu0 %9808 }
 0x989   :  { %v9825_v55 = vsel %vm2010_vm9, %v9807_v31, %v9809_v17 }
 0x98a   :  { %v16234_v9 = vmax.bf16 %v9825_v55, %v9755_v2  ;;  %v10113_v2 = vld [vmem:[%s16594_s6 + $0x20] sm:$0xff] }
 0x98b   :  { %v9805_v49 = vpop.permute.xlu1 %9804 }
 0x98c   :  { %v9824_v20 = vsel %vm2010_vm9, %v9805_v49, %v9807_v31  ;;  %v9795_v61 = vpop.permute.xlu0 %9794  ;;  %9939 = vrot.lane.b32.xlu0 %v16234_v9, %s11929_s25  ;;  %v10603_v49 = vld [vmem:[%s16595_s8 + $0x40] sm:$0xff] }
 0x98d   :  { %v9850_v29 = vmax.bf16 %v9824_v20, %v9754_v26  ;;  %v9818_v12 = vsel %vm2010_vm9, %v9793_v28, %v9795_v61  ;;  %v10119_v26 = vld [vmem:[%s16594_s6 + $0x50] sm:$0xff]  ;;  %v10600_v28 = vld [vmem:[%s16595_s8 + $0x28] sm:$0xff] }
 0x98e   :  { %v16263_v41 = vmax.bf16 %v9818_v12, %v16189_v8  ;;  %v11844_v8 = vld [vmem:[%s16593_s5 + $0xc] ss:$16 sps:$4 sm:$0xff]  }
 0x98f   :  { %9871 = vrot.lane.b32.xlu1 %v9850_v29, %s11930_s13  ;;  %v9797_v35 = vpop.permute.xlu1 %9796  ;;  %11414 = vmatprep.mubr.msk.bf16.mxu1 %vm16779_vm1, %v11844_v8 }
 0x990   :  { %v9819_v42 = vsel %vm2010_vm9, %v9795_v61, %v9797_v35  ;;  %v9811_v4 = vpop.permute.xlu0 %9810 }
 0x991   :  { %v16241_v22 = vmax.bf16 %v9819_v42, %v9749_v0  ;;  %v9826_v62 = vsel %vm2010_vm9, %v9809_v17, %v9811_v4  ;;  %v10121_v0 = vld [vmem:[%s16594_s6 + $0x60] sm:$0xff] }
 0x992   :  { %v9852_v59 = vmax.bf16 %v9826_v62, %v16195_v5  ;;  %v10115_v5 = vld [vmem:[%s16594_s6 + $0x30] sm:$0xff] }
 0x993   :  { %9947 = vrot.lane.b32.xlu1 %v16234_v9, %s11931_s7  ;;  %10005 = vrot.lane.b32.xlu0 %v16241_v22, %s16691_s24  ;;  %v9813_v43 = vpop.permute.xlu1 %9812 }
 0x994   :  { %v9789_v34 = vpop.permute.xlu0 %9788  ;;  %v9827_v37 = vsel %vm2010_vm9, %v9811_v4, %v9813_v43 }
 0x995   :  { %v9816_v13 = vsel %vm2010_vm9, %v9789_v34, %v9791_v38  ;;  %v9853_v47 = vmax.bf16 %v9827_v37, %v16210_v19  ;;  %v10595_v19 = vld [vmem:[%s16595_s8] sm:$0xff] }
 0x996   :  { %v16251_v6 = vmax.bf16 %v9816_v13, %v9746_v63  ;;  %v10811_v34 = vld [vmem:[%s16780_s16] sm:$0xff]  ;;  %v10812_v13 = vld [vmem:[%s16780_s16 + $0x8] sm:$0x3] }
 0x997   :  { %9881 = vrot.lane.b32.xlu1 %v9850_v29, %s16704_s21  ;;  %9945 = vrot.lane.b32.xlu0 %v16229_v18, %s11932_s18  ;;  %v9815_v14 = vpop.permute.xlu1 %9814 }
 0x998   :  { %v9799_v30 = vpop.permute.xlu0 %9798  ;;  %v9828_v58 = vsel %vm2010_vm9, %v9813_v43, %v9815_v14 }
 0x999   :  { %v9820_v15 = vsel %vm2010_vm9, %v9797_v35, %v9799_v30  ;;  %v9854_v1 = vmax.bf16 %v9828_v58, %v16217_v39  ;;  %v10597_v39 = vld [vmem:[%s16595_s8 + $0x10] sm:$0xff]  ;;  %vm16781_vm9 = vmmov %vm16775_vm0  ;;  %vm11935_vm0 = vmmov 0  }
 0x99a   :  { %v16286_v27 = vmax.bf16 %v9820_v15, %v16207_v51  ;;  %v10605_v35 = vld [vmem:[%s16595_s8 + $0x50] sm:$0xf] }
 0x99b   :  { %9887 = vrot.lane.b32.xlu1 %v16251_v6, %s11925_s26  ;;  %9879 = vrot.lane.b32.xlu0 %v16251_v6, %s16691_s24  ;;  %v9938_v44 = vpop.permute.xlu1 %9937 }
 0x99f   :  { %10021 = vrot.lane.b32.xlu1 %v16241_v22, %s11928_s4  ;;  %10013 = vrot.lane.b32.xlu0 %v16241_v22, %s11925_s26 }
 0x9a3   :  { %9963 = vrot.lane.b32.xlu1 %v16263_v41, %s16691_s24  ;;  %9889 = vrot.lane.b32.xlu0 %v9850_v29, %s11933_s2 }
 0x9a7   :  { %9895 = vrot.lane.b32.xlu1 %v16251_v6, %s11928_s4  ;;  %9897 = vrot.lane.b32.xlu0 %v9850_v29, %s11929_s25 }
 0x9ab   :  { %10029 = vrot.lane.b32.xlu1 %v16241_v22, %s11932_s18  ;;  %9905 = vrot.lane.b32.xlu0 %v9850_v29, %s11931_s7  ;;  %v10604_v29 = vld [vmem:[%s16595_s8 + $0x48] sm:$0xff] }
 0x9af   :  { %9971 = vrot.lane.b32.xlu1 %v16263_v41, %s11925_s26  ;;  %9979 = vrot.lane.b32.xlu0 %v16263_v41, %s11928_s4 }
 0x9b3   :  { %9903 = vrot.lane.b32.xlu1 %v16251_v6, %s11932_s18  ;;  %9914 = vrot.lane.b32.xlu0 %v16234_v9, %s11930_s13 }
 0x9b7   :  { %10047 = vrot.lane.b32.xlu1 %v16286_v27, %s16691_s24  ;;  %9956 = vrot.lane.b32.xlu0 %v9852_v59, %s11930_s13 }
 0x9bb   :  { %9987 = vrot.lane.b32.xlu1 %v16263_v41, %s11932_s18  ;;  %9965 = vrot.lane.b32.xlu0 %v9852_v59, %s16704_s21 }
 0x9bf   :  { %9981 = vrot.lane.b32.xlu1 %v9852_v59, %s11929_s25  ;;  %9973 = vrot.lane.b32.xlu0 %v9852_v59, %s11933_s2 }
 0x9c3   :  { %9989 = vrot.lane.b32.xlu0 %v9852_v59, %s11931_s7  ;;  %10007 = vrot.lane.b32.xlu1 %v9853_v47, %s16704_s21 }
 0x9c7   :  { %9923 = vrot.lane.b32.xlu0 %v16234_v9, %s16704_s21  ;;  %10015 = vrot.lane.b32.xlu1 %v9853_v47, %s11933_s2 }
 0x9cb   :  { %10023 = vrot.lane.b32.xlu0 %v9853_v47, %s11929_s25  ;;  %9921 = vrot.lane.b32.xlu1 %v16229_v18, %s16691_s24  ;;  %s16788_s24 = sld [smem:[#allocation9_spill]] }
 0x9cf   :  { %10031 = vrot.lane.b32.xlu0 %v9853_v47, %s11931_s7  ;;  %10055 = vrot.lane.b32.xlu1 %v16286_v27, %s11925_s26 }
 0x9d3   :  { %10049 = vrot.lane.b32.xlu0 %v9854_v1, %s16704_s21  ;;  %10040 = vrot.lane.b32.xlu1 %v9854_v1, %s11930_s13 }
 0x9d7   :  { %10057 = vrot.lane.b32.xlu0 %v9854_v1, %s11933_s2  ;;  %9998 = vrot.lane.b32.xlu1 %v9853_v47, %s11930_s13 }
 0x9db   :  { %9929 = vrot.lane.b32.xlu0 %v16229_v18, %s11925_s26  ;;  %9931 = vrot.lane.b32.xlu1 %v16234_v9, %s11933_s2  ;;  %v10602_v9 = vld [vmem:[%s16595_s8 + $0x38] sm:$0xff] }
 0x9df   :  { %10063 = vrot.lane.b32.xlu0 %v16286_v27, %s11928_s4  ;;  %10065 = vrot.lane.b32.xlu1 %v9854_v1, %s11929_s25 }
 0x9e3   :  { %10071 = vrot.lane.b32.xlu0 %v16286_v27, %s11932_s18  ;;  %10073 = vrot.lane.b32.xlu1 %v9854_v1, %s11931_s7 }
 0x9e7   :  { %10126 = vperm.xlu0 %11725, %v10109_v21   ;;  %10131 = vperm.xlu1 %11724, %v10110_v48  }
 0x9eb   :  { %10136 = vperm.xlu0 %11725, %v10111_v52   ;;  %10141 = vperm.xlu1 %11724, %v10112_v50  }
 0x9ef   :  { %10146 = vperm.xlu0 %11725, %v10113_v2   ;;  %10151 = vperm.xlu1 %11724, %v10114_v57  }
 0x9f3   :  { %10156 = vperm.xlu0 %11725, %v10115_v5   ;;  %10161 = vperm.xlu1 %11724, %v10116_v16  }
 0x9f7   :  { %10166 = vperm.xlu0 %11725, %v10117_v25   ;;  %10171 = vperm.xlu1 %11724, %v10118_v23  }
 0x9fb   :  { %10176 = vperm.xlu0 %11725, %v10119_v26   ;;  %10181 = vperm.xlu1 %11724, %v10120_v60  }
 0x9fe   :  { %v9940_v40 = vpop.permute.xlu0 %9939 }
 0x9ff   :  { %10186 = vperm.xlu0 %11725, %v10121_v0   ;;  %10191 = vperm.xlu1 %11724, %v10122_v46   ;;  %v9943_v51 = vsel %vm9873_vm3, %v9938_v44, %v9940_v40 }
 0xa00   :  { %11436 = vmatprep.subr.bf16.mxu0 %v9943_v51 }
 0xa01   :  { %v9872_v32 = vpop.permute.xlu1 %9871 }
 0xa02   :  { %v9876_v45 = vsel %vm9873_vm3, %v16251_v6, %v9872_v32 }
 0xa03   :  { %10196 = vperm.xlu0 %11725, %v10123_v53   ;;  %10608 = vperm.xlu1 %11724, %v10595_v19  }
 0xa04   :  { %11437 = vmatpush3.bf16.msra.mxu0 %v9876_v45 }
 0xa05   :  { %v16389_v36 = vpop.permute.xlu0 %10005  ;;  %v9948_v63 = vpop.permute.xlu1 %9947 }
 0xa07   :  { %10613 = vperm.xlu0 %11725, %v10596_v7   ;;  %10618 = vperm.xlu1 %11724, %v10597_v39  }
 0xa09   :  { %v9946_v33 = vpop.permute.xlu0 %9945  ;;  %v9882_v11 = vpop.permute.xlu1 %9881 }
 0xa0a   :  { %v9951_v38 = vsel %vm9873_vm3, %v9946_v33, %v9948_v63 }
 0xa0b   :  { %10623 = vperm.xlu0 %11725, %v10598_v3   ;;  %10628 = vperm.xlu1 %11724, %v10599_v24  }
 0xa0c   :  { %11438 = vmatprep.subr.bf16.mxu0 %v9951_v38 }
 0xa0d   :  { %v9880_v31 = vpop.permute.xlu0 %9879  ;;  %v9888_v17 = vpop.permute.xlu1 %9887 }
 0xa0e   :  { %v9885_v55 = vsel %vm9873_vm3, %v9880_v31, %v9882_v11 }
 0xa0f   :  { %10633 = vperm.xlu0 %11725, %v10600_v28   ;;  %10638 = vperm.xlu1 %11724, %v10601_v54   ;;  %v11839_v28 = vld [vmem:[%s16593_s5] ss:$16 sps:$4 sm:$0xff]  }
 0xa10   :  { %11439 = vmatpush3.bf16.msra.mxu0 %v9885_v55 }
 0xa11   :  { %v10014_v20 = vpop.permute.xlu0 %10013  ;;  %v10022_v61 = vpop.permute.xlu1 %10021 }
 0xa13   :  { %10643 = vperm.xlu0 %11725, %v10602_v9   ;;  %10648 = vperm.xlu1 %11724, %v10603_v49  }
 0xa15   :  { %v9890_v42 = vpop.permute.xlu0 %9889  ;;  %v9964_v4 = vpop.permute.xlu1 %9963 }
 0xa16   :  { %v9893_v1 = vsel %vm9873_vm3, %v9888_v17, %v9890_v42  ;;  %v11853_v42 = vld [vmem:[%s16593_s5 + $0x28] ss:$16 sps:$4 sm:$0xff]  }
 0xa17   :  { %10653 = vperm.xlu0 %11725, %v10604_v29   ;;  %10658 = vperm.xlu1 %11724, %v10605_v35   ;;  %v11848_v29 = vld [vmem:[%s16593_s5 + $0x44] ss:$16 sps:$4 sm:$0xff]   ;;  %v11852_v35 = vld [vmem:[%s16593_s5 + $0x40] ss:$16 sps:$4 sm:$0xff]  }
 0xa19   :  { %v9898_v6 = vpop.permute.xlu0 %9897  ;;  %v9896_v12 = vpop.permute.xlu1 %9895 }
 0xa1a   :  { %v9901_v48 = vsel %vm9873_vm3, %v9896_v12, %v9898_v6  ;;  %v11859_v6 = vld [vmem:[%s16593_s5 + $0x48] ss:$16 sps:$4 sm:$0xff]   ;;  %v11860_v12 = vld [vmem:[%s16593_s5 + $0x84] ss:$16 sps:$4 sm:$0xff]  }
 0xa1b   :  { %10815 = vperm.xlu0 %11725, %v10811_v34   ;;  %10820 = vperm.xlu1 %11724, %v10812_v13   ;;  %v11856_v34 = vld [vmem:[%s16593_s5 + $0x4c] ss:$16 sps:$4 sm:$0xff]   ;;  %v11858_v13 = vld [vmem:[%s16593_s5 + $0x60] ss:$16 sps:$4 sm:$0xff]  }
 0xa1d   :  { %v9906_v30 = vpop.permute.xlu0 %9905  ;;  %v10030_v62 = vpop.permute.xlu1 %10029 }
 0xa21   :  { %v9980_v15 = vpop.permute.xlu0 %9979  ;;  %v9972_v59 = vpop.permute.xlu1 %9971 }
 0xa25   :  { %v9915_v43 = vpop.permute.xlu0 %9914  ;;  %v9904_v37 = vpop.permute.xlu1 %9903 }
 0xa26   :  { %v9909_v57 = vsel %vm9873_vm3, %v9904_v37, %v9906_v30  ;;  %v9918_v23 = vsel %vm9873_vm3, %v16229_v18, %v9915_v43  ;;  %v11862_v30 = vld [vmem:[%s16593_s5 + $0x6c] ss:$16 sps:$4 sm:$0xff]   ;;  %v11870_v37 = vld [vmem:[%s16593_s5 + $0xa0] ss:$16 sps:$4 sm:$0xff]  }
 0xa27   :  { %v11868_v43 = vld [vmem:[%s16593_s5 + $0x8c] ss:$16 sps:$4 sm:$0xff]  }
 0xa29   :  { %v9957_v47 = vpop.permute.xlu0 %9956  ;;  %v10048_v14 = vpop.permute.xlu1 %10047 }
 0xa2a   :  { %v9960_v58 = vsel %vm9873_vm3, %v16263_v41, %v9957_v47  ;;  %v11871_v47 = vld [vmem:[%s16593_s5 + $0x88] ss:$16 sps:$4 sm:$0xff]  }
 0xa2b   :  { %11440 = vmatprep.subr.bf16.mxu0 %v9960_v58  ;;  %v11874_v58 = vld [vmem:[%s16593_s5 + $0xac] ss:$16 sps:$4 sm:$0xff]  }
 0xa2c   :  { %11441 = vmatpush3.bf16.msra.mxu0 %v9893_v1  ;;  %v10107_v1 = vld [vmem:[%s16593_s5 + $0xe0] sm:$0xff] }
 0xa2d   :  { %v9966_v56 = vpop.permute.xlu0 %9965  ;;  %v9988_v8 = vpop.permute.xlu1 %9987 }
 0xa2e   :  { %v9969_v21 = vsel %vm9873_vm3, %v9964_v4, %v9966_v56  ;;  %v11854_v4 = vld [vmem:[%s16593_s5 + $0x64] ss:$16 sps:$4 sm:$0xff]   ;;  %v11876_v56 = vld [vmem:[%s16593_s5 + $0xc0] ss:$16 sps:$4 sm:$0xff]  }
 0xa2f   :  { %11442 = vmatprep.subr.bf16.mxu0 %v9969_v21  ;;  %v11411_v21 = vcombine.high %v10107_v1, %v10107_v1 }
 0xa30   :  { %11443 = vmatpush3.bf16.msra.mxu0 %v9901_v48  ;;  %v11879_v48 = vld [vmem:[%s16593_s5 + $0xcc] ss:$16 sps:$4 sm:$0xff]  }
 0xa31   :  { %v9974_v52 = vpop.permute.xlu0 %9973  ;;  %v9982_v50 = vpop.permute.xlu1 %9981 }
 0xa32   :  { %v9977_v2 = vsel %vm9873_vm3, %v9972_v59, %v9974_v52  ;;  %v9985_v41 = vsel %vm9873_vm3, %v9980_v15, %v9982_v50  ;;  %v11865_v15 = vld [vmem:[%s16593_s5 + $0x68] ss:$16 sps:$4 sm:$0xff]   ;;  %v11866_v59 = vld [vmem:[%s16593_s5 + $0xa4] ss:$16 sps:$4 sm:$0xff]   ;;  %v11410_v50 = vcombine.low %v10107_v1, %v10107_v1 }
 0xa33   :  { %11444 = vmatprep.subr.bf16.mxu0 %v9977_v2  ;;  %v10108_v52 = vld [vmem:[%s16593_s5 + $0xe8] sm:$0xff] }
 0xa34   :  { %11445 = vmatpush3.bf16.msra.mxu0 %v9909_v57  ;;  %v11882_v2 = vld [vmem:[%s16593_s5 + $0xc8] ss:$16 sps:$4 sm:$0xff]   ;;  %v11413_v57 = vcombine.high %v10108_v52, %v10108_v52 }
 0xa35   :  { %v9990_v5 = vpop.permute.xlu0 %9989  ;;  %11446 = vmatprep.subr.bf16.mxu0 %v9985_v41  ;;  %v10008_v16 = vpop.permute.xlu1 %10007  ;;  %v11412_v41 = vcombine.low %v10108_v52, %v10108_v52 }
 0xa36   :  { %v10011_v25 = vsel %vm9873_vm3, %v16389_v36, %v10008_v16  ;;  %v9993_v26 = vsel %vm9873_vm3, %v9988_v8, %v9990_v5  ;;  %v11877_v8 = vld [vmem:[%s16593_s5 + $0xa8] ss:$16 sps:$4 sm:$0xff]   ;;  %v11885_v5 = vld [vmem:[%s16788_s24] sm:$0xff]  }
 0xa37   :  { %10466 = vmatpush1.bf16.msra.mxu1 %v10011_v25 }
 0xa38   :  { %11447 = vmatpush3.bf16.msra.mxu0 %v9918_v23  ;;  %10467 = vmatprep.subr.bf16.mxu1 %v11923_v10 }
 0xa39   :  { %v9924_v60 = vpop.permute.xlu0 %9923  ;;  %11448 = vmatprep.subr.bf16.mxu0 %v9993_v26  ;;  %v10016_v0 = vpop.permute.xlu1 %10015 }
 0xa3a   :  { %v10019_v46 = vsel %vm9873_vm3, %v10014_v20, %v10016_v0  ;;  %v11846_v20 = vld [vmem:[%s16593_s5 + $0x20] ss:$16 sps:$4 sm:$0xff]  }
 0xa3b   :  { %10468 = vmatpush1.bf16.msra.mxu1 %v10019_v46 }
 0xa3c   :  { %10469 = vmatprep.subr.bf16.mxu1 %v11923_v10 }
 0xa3d   :  { %v10024_v44 = vpop.permute.xlu0 %10023  ;;  %v9922_v40 = vpop.permute.xlu1 %9921 }
 0xa3e   :  { %v10027_v51 = vsel %vm9873_vm3, %v10022_v61, %v10024_v44  ;;  %v9927_v18 = vsel %vm9873_vm3, %v9922_v40, %v9924_v60  ;;  %v11847_v61 = vld [vmem:[%s16593_s5 + $0x8] ss:$16 sps:$4 sm:$0xff]  }
 0xa3f   :  { %11449 = vmatpush3.bf16.msra.mxu0 %v9927_v18  ;;  %10470 = vmatpush1.bf16.msra.mxu1 %v10027_v51 }
 0xa40   :  { %10471 = vmatprep.subr.bf16.mxu1 %v11923_v10 }
 0xa41   :  { %v10032_v53 = vpop.permute.xlu0 %10031  ;;  %v10056_v19 = vpop.permute.xlu1 %10055 }
 0xa42   :  { %v10035_v32 = vsel %vm9873_vm3, %v10030_v62, %v10032_v53  ;;  %v11864_v62 = vld [vmem:[%s16593_s5 + $0x80] ss:$16 sps:$4 sm:$0xff]  }
 0xa43   :  { %10472 = vmatpush1.bf16.msra.mxu1 %v10035_v32 }
 0xa44   :  { %10473 = vmatprep.subr.bf16.mxu1 %v11923_v10 }
 0xa45   :  { %v10050_v45 = vpop.permute.xlu0 %10049  ;;  %v10041_v7 = vpop.permute.xlu1 %10040 }
 0xa46   :  { %v10044_v39 = vsel %vm9873_vm3, %v16286_v27, %v10041_v7  ;;  %v10053_v3 = vsel %vm9873_vm3, %v10048_v14, %v10050_v45  ;;  %v11872_v14 = vld [vmem:[%s16593_s5 + $0xc4] ss:$16 sps:$4 sm:$0xff]  }
 0xa47   :  { %10474 = vmatpush1.bf16.msra.mxu1 %v10044_v39 }
 0xa48   :  { %10475 = vmatprep.subr.bf16.mxu1 %v11923_v10 }
 0xa49   :  { %v10058_v36 = vpop.permute.xlu0 %10057  ;;  %v9999_v63 = vpop.permute.xlu1 %9998 }
 0xa4a   :  { %v10002_v24 = vsel %vm9873_vm3, %v16241_v22, %v9999_v63  ;;  %v10061_v38 = vsel %vm9873_vm3, %v10056_v19, %v10058_v36  ;;  %v11842_v22 = vld [vmem:[%s16593_s5 + $0x24] ss:$16 sps:$4 sm:$0xff]  }
 0xa4b   :  { %11450 = vmatprep.subr.bf16.mxu0 %v10002_v24  ;;  %10476 = vmatpush1.bf16.msra.mxu1 %v10053_v3 }
 0xa4c   :  { %10477 = vmatprep.subr.bf16.mxu1 %v11923_v10 }
 0xa4d   :  { %v9930_v33 = vpop.permute.xlu0 %9929  ;;  %v9932_v11 = vpop.permute.xlu1 %9931 }
 0xa4e   :  { %v9935_v27 = vsel %vm9873_vm3, %v9930_v33, %v9932_v11 }
 0xa4f   :  { %11451 = vmatpush3.bf16.msra.mxu0 %v9935_v27  ;;  %10478 = vmatpush1.bf16.msra.mxu1 %v10061_v38 }
 0xa50   :  { %10479 = vmatprep.subr.bf16.mxu1 %v11923_v10 }
 0xa51   :  { %v10064_v54 = vpop.permute.xlu0 %10063  ;;  %v10066_v31 = vpop.permute.xlu1 %10065 }
 0xa52   :  { %v10069_v17 = vsel %vm9873_vm3, %v10064_v54, %v10066_v31  ;;  %10402 = vmatmul.mubr.bf16.vlgmr.msra.gmra.mrb[32].mxu0 %v11839_v28 }
 0xa53   :  { %10480 = vmatpush1.bf16.msra.mxu1 %v10069_v17  ;;  %10409 = vmatprep.mubr.bf16.mxu0 %v11842_v22 }
 0xa54   :  { %10481 = vmatprep.subr.bf16.mxu1 %v11923_v10  ;;  %v11850_v10 = vld [vmem:[%s16593_s5 + $0x2c] ss:$16 sps:$4 sm:$0xff]  }
 0xa55   :  { %v10072_v55 = vpop.permute.xlu0 %10071  ;;  %v10074_v9 = vpop.permute.xlu1 %10073 }
 0xa56   :  { %v10077_v49 = vsel %vm9873_vm3, %v10072_v55, %v10074_v9 }
 0xa57   :  { %10482 = vmatpush1.bf16.msra.mxu1 %v10077_v49 }
 0xa5a   :  { %10410 = vmatmul.mubr.bf16.gmra.mrb[36].mxu0 %v11846_v20  ;;  %10498 = vmatmul.mubr.bf16.vlgmr.msra.gmra.mrb[32].mxu1 %v11847_v61 }
 0xa5b   :  { %10417 = vmatprep.mubr.bf16.mxu0 %v11848_v29  ;;  %11415 = vmatprep.mubr.msk.bf16.mxu1 %vm16781_vm9, %v11850_v10 }
 0xa62   :  { %10418 = vmatmul.mubr.bf16.gmra.mrb[40].mxu0 %v11852_v35  ;;  %10506 = vmatmul.mubr.bf16.gmra.mrb[36].mxu1 %v11853_v42 }
 0xa63   :  { %10425 = vmatprep.mubr.bf16.mxu0 %v11854_v4  ;;  %11416 = vmatprep.mubr.msk.bf16.mxu1 %vm16782_vm11, %v11856_v34 }
 0xa66   :  { %v10127_v46 = vpop.permute.xlu0 %10126  ;;  %v10132_v44 = vpop.permute.xlu1 %10131 }
 0xa6a   :  { %10426 = vmatmul.mubr.bf16.gmra.mrb[44].mxu0 %v11858_v13  ;;  %10514 = vmatmul.mubr.bf16.gmra.mrb[40].mxu1 %v11859_v6  ;;  %v10137_v27 = vpop.permute.xlu0 %10136  ;;  %v10142_v28 = vpop.permute.xlu1 %10141 }
 0xa6b   :  { %10433 = vmatprep.mubr.bf16.mxu0 %v11860_v12  ;;  %11417 = vmatprep.mubr.msk.bf16.mxu1 %vm16783_vm2, %v11862_v30 }
 0xa6e   :  { %v10147_v12 = vpop.permute.xlu0 %10146  ;;  %v10152_v30 = vpop.permute.xlu1 %10151 }
 0xa72   :  { %10434 = vmatmul.mubr.bf16.gmra.mrb[48].mxu0 %v11864_v62  ;;  %10522 = vmatmul.mubr.bf16.gmra.mrb[44].mxu1 %v11865_v15 }
 0xa73   :  { %10441 = vmatprep.mubr.bf16.mxu0 %v11866_v59  ;;  %11418 = vmatprep.mubr.msk.bf16.mxu1 %vm16784_vm8, %v11868_v43 }
 0xa7a   :  { %10442 = vmatmul.mubr.bf16.gmra.mrb[52].mxu0 %v11870_v37  ;;  %10530 = vmatmul.mubr.bf16.gmra.mrb[48].mxu1 %v11871_v47 }
 0xa7b   :  { %10449 = vmatprep.mubr.bf16.mxu0 %v11872_v14  ;;  %11419 = vmatprep.mubr.msk.bf16.mxu1 %vm16785_vm12, %v11874_v58 }
 0xa82   :  { %10450 = vmatmul.mubr.bf16.gmra.mrb[56].mxu0 %v11876_v56  ;;  %10538 = vmatmul.mubr.bf16.gmra.mrb[52].mxu1 %v11877_v8 }
 0xa83   :  { %10457 = vmatprep.mubr.bf16.mxu0 %v11411_v21  ;;  %11420 = vmatprep.mubr.msk.bf16.mxu1 %vm16786_vm14, %v11879_v48 }
 0xa8a   :  { %10458 = vmatmul.mubr.bf16.gmra.mrb[60].mxu0 %v11410_v50  ;;  %10546 = vmatmul.mubr.bf16.gmra.mrb[56].mxu1 %v11882_v2 }
 0xa8b   :  { %11421 = vmatprep.mubr.msk.bf16.mxu1 %vm16787_vm6, %v11413_v57  ;;  %11537 = vmatprep.mubr.msk.bf16.mxu0 %vm6668_vm13, %v11885_v5  ;;  %v10162_v5 = vpop.permute.xlu1 %10161 }
 0xa92   :  { %10554 = vmatmul.mubr.bf16.gmra.mrb[60].mxu1 %v11412_v41  ;;  %v10157_v41 = vpop.permute.xlu0 %10156 }
 0xb25   :  { %v11452_v16 = vpop.f32.mrb[32].mxu0 }
 0xb26   :  { %v11453_v25 = vpop.f32.mrb[33].mxu0 }
 0xb27   :  { %v11454_v23 = vadd.f32 %v11453_v25, %v11452_v16  ;;  %v11455_v26 = vpop.f32.mrb[34].mxu0 }
 0xb28   :  { %v11456_v60 = vpop.f32.mrb[35].mxu0 }
 0xb29   :  { %v11457_v0 = vadd.f32 %v11456_v60, %v11455_v26  ;;  %v10404_v40 = vadd.f32 %v11454_v23, %v10127_v46 }
 0xb2b   :  { %v10407_v45 = vadd.f32 %v11457_v0, %v10132_v44 }
 0xb2d   :  { %v11458_v51 = vpop.f32.mrb[36].mxu0  ;;  %v10499_v18 = vpop.f32.mrb[32].mxu1 }
 0xb2e   :  { %v10500_v53 = vadd.f32 %v10499_v18, %v10404_v40  ;;  %v11459_v19 = vpop.f32.mrb[37].mxu0  ;;  %v10501_v32 = vpop.f32.mrb[33].mxu1 }
 0xb2f   :  { %v11460_v7 = vadd.f32 %v11459_v19, %v11458_v51  ;;  %v11461_v39 = vpop.f32.mrb[38].mxu0  ;;  %v10502_v36 = vpop.f32.mrb[34].mxu1 }
 0xb30   :  { %v10503_v63 = vadd.f32 %v10502_v36, %v10407_v45  ;;  %v11462_v3 = vpop.f32.mrb[39].mxu0  ;;  %v10504_v24 = vpop.f32.mrb[35].mxu1  ;;  %v10561_v11 = vmax.f32 %v10500_v53, 0.0 }
 0xb31   :  { %v11463_v33 = vadd.f32 %v11462_v3, %v11461_v39  ;;  %v10412_v54 = vadd.f32 %v11460_v7, %v10137_v27  ;;  %v10167_v36 = vpop.permute.xlu0 %10166 }
 0xb32   :  { %v10562_v38 = vmax.f32 %v10503_v63, 0.0  ;;  %v10172_v63 = vpop.permute.xlu1 %10171 }
 0xb33   :  { %v10415_v20 = vadd.f32 %v11463_v33, %v10142_v28 }
 0xb34   :  { %v10587_v22 = vpack.c.bf16 %v10562_v38, %v10561_v11 }
 0xb35   :  { %v11464_v31 = vpop.f32.mrb[40].mxu0  ;;  %v10507_v17 = vpop.f32.mrb[36].mxu1 }
 0xb36   :  { %v10508_v55 = vadd.f32 %v10507_v17, %v10412_v54  ;;  %v11465_v9 = vpop.f32.mrb[41].mxu0  ;;  %v10509_v49 = vpop.f32.mrb[37].mxu1  ;;  %11521 = vmatprep.subr.bf16.mxu0 %v10587_v22 }
 0xb37   :  { %v11466_v61 = vadd.f32 %v11465_v9, %v11464_v31  ;;  %v11467_v29 = vpop.f32.mrb[42].mxu0  ;;  %v10510_v10 = vpop.f32.mrb[38].mxu1  ;;  %11522 = vmatpush3.bf16.msra.mxu0 %v10587_v22 }
 0xb38   :  { %v10511_v35 = vadd.f32 %v10510_v10, %v10415_v20  ;;  %v11468_v42 = vpop.f32.mrb[43].mxu0  ;;  %v10512_v4 = vpop.f32.mrb[39].mxu1  ;;  %v10563_v13 = vmax.f32 %v10508_v55, 0.0 }
 0xb39   :  { %v11469_v34 = vadd.f32 %v11468_v42, %v11467_v29  ;;  %v10420_v15 = vadd.f32 %v11466_v61, %v10147_v12  ;;  %v10177_v10 = vpop.permute.xlu0 %10176 }
 0xb3a   :  { %v10564_v6 = vmax.f32 %v10511_v35, 0.0  ;;  %v10182_v35 = vpop.permute.xlu1 %10181 }
 0xb3b   :  { %v10423_v58 = vadd.f32 %v11469_v34, %v10152_v30 }
 0xb3c   :  { %v10588_v62 = vpack.c.bf16 %v10564_v6, %v10563_v13 }
 0xb3d   :  { %v11470_v59 = vpop.f32.mrb[44].mxu0  ;;  %v10515_v43 = vpop.f32.mrb[40].mxu1 }
 0xb3e   :  { %v10516_v37 = vadd.f32 %v10515_v43, %v10420_v15  ;;  %v11471_v47 = vpop.f32.mrb[45].mxu0  ;;  %v10517_v14 = vpop.f32.mrb[41].mxu1  ;;  %11523 = vmatprep.subr.bf16.mxu0 %v10588_v62 }
 0xb3f   :  { %v11472_v1 = vadd.f32 %v11471_v47, %v11470_v59  ;;  %v11473_v56 = vpop.f32.mrb[46].mxu0  ;;  %v10518_v8 = vpop.f32.mrb[42].mxu1  ;;  %11524 = vmatpush3.bf16.msra.mxu0 %v10588_v62 }
 0xb40   :  { %v10519_v21 = vadd.f32 %v10518_v8, %v10423_v58  ;;  %v11474_v48 = vpop.f32.mrb[47].mxu0  ;;  %v10520_v52 = vpop.f32.mrb[43].mxu1  ;;  %v10565_v2 = vmax.f32 %v10516_v37, 0.0 }
 0xb41   :  { %v11475_v50 = vadd.f32 %v11474_v48, %v11473_v56  ;;  %v10428_v25 = vadd.f32 %v11472_v1, %v10157_v41  ;;  %v10187_v8 = vpop.permute.xlu0 %10186 }
 0xb42   :  { %v10566_v57 = vmax.f32 %v10519_v21, 0.0  ;;  %v10192_v21 = vpop.permute.xlu1 %10191 }
 0xb43   :  { %v10431_v44 = vadd.f32 %v11475_v50, %v10162_v5 }
 0xb44   :  { %v10589_v16 = vpack.c.bf16 %v10566_v57, %v10565_v2 }
 0xb45   :  { %v11476_v23 = vpop.f32.mrb[48].mxu0  ;;  %v10523_v26 = vpop.f32.mrb[44].mxu1 }
 0xb46   :  { %v10524_v60 = vadd.f32 %v10523_v26, %v10428_v25  ;;  %v11477_v0 = vpop.f32.mrb[49].mxu0  ;;  %v10525_v46 = vpop.f32.mrb[45].mxu1  ;;  %11525 = vmatprep.subr.bf16.mxu0 %v10589_v16 }
 0xb47   :  { %v11478_v40 = vadd.f32 %v11477_v0, %v11476_v23  ;;  %v11479_v51 = vpop.f32.mrb[50].mxu0  ;;  %v10526_v18 = vpop.f32.mrb[46].mxu1  ;;  %11526 = vmatpush3.bf16.msra.mxu0 %v10589_v16 }
 0xb48   :  { %v10527_v53 = vadd.f32 %v10526_v18, %v10431_v44  ;;  %v11480_v19 = vpop.f32.mrb[51].mxu0  ;;  %v10528_v32 = vpop.f32.mrb[47].mxu1  ;;  %v10567_v7 = vmax.f32 %v10524_v60, 0.0 }
 0xb49   :  { %v11481_v45 = vadd.f32 %v11480_v19, %v11479_v51  ;;  %v10436_v24 = vadd.f32 %v11478_v40, %v10167_v36  ;;  %v10197_v51 = vpop.permute.xlu0 %10196 }
 0xb4a   :  { %v10568_v39 = vmax.f32 %v10527_v53, 0.0 }
 0xb4b   :  { %v10439_v22 = vadd.f32 %v11481_v45, %v10172_v63 }
 0xb4c   :  { %v10590_v3 = vpack.c.bf16 %v10568_v39, %v10567_v7 }
 0xb4d   :  { %v11482_v33 = vpop.f32.mrb[52].mxu0  ;;  %v10531_v11 = vpop.f32.mrb[48].mxu1 }
 0xb4e   :  { %v10532_v38 = vadd.f32 %v10531_v11, %v10436_v24  ;;  %v11483_v27 = vpop.f32.mrb[53].mxu0  ;;  %v10533_v28 = vpop.f32.mrb[49].mxu1  ;;  %11527 = vmatprep.subr.bf16.mxu0 %v10590_v3  ;;  %v11886_v24 = vld [vmem:[%s16788_s24 + $0x8] sm:$0xff]   ;;  %v11888_v11 = vld [vmem:[%s16788_s24 + $0x18] sm:$0xff]  }
 0xb4f   :  { %v11484_v54 = vadd.f32 %v11483_v27, %v11482_v33  ;;  %v11485_v31 = vpop.f32.mrb[54].mxu0  ;;  %v10534_v17 = vpop.f32.mrb[50].mxu1  ;;  %11528 = vmatpush3.bf16.msra.mxu0 %v10590_v3  ;;  %v11887_v33 = vld [vmem:[%s16788_s24 + $0x10] sm:$0xff]   ;;  %v11890_v27 = vld [vmem:[%s16788_s24 + $0x28] ss:$0 sps:$4 sm:$0x33]  }
 0xb50   :  { %v10535_v55 = vadd.f32 %v10534_v17, %v10439_v22  ;;  %v11486_v9 = vpop.f32.mrb[55].mxu0  ;;  %v10536_v49 = vpop.f32.mrb[51].mxu1  ;;  %v10569_v61 = vmax.f32 %v10532_v38, 0.0  ;;  %v11889_v38 = vld [vmem:[%s16788_s24 + $0x20] sm:$0xff]   ;;  %v11934_v28 = vmov 0.0  }
 0xb51   :  { %v11487_v20 = vadd.f32 %v11486_v9, %v11485_v31  ;;  %v10444_v4 = vadd.f32 %v11484_v54, %v10177_v10  ;;  %11549 = vmatprep.subr.bf16.mxu1 %v11934_v28  ;;  %11561 = vmatprep.mubr.msk.bf16.mxu1 %vm11935_vm0, %v11934_v28  ;;  %v10609_v22 = vpop.permute.xlu1 %10608  ;;  %v10614_v54 = vpop.permute.xlu0 %10613 }
 0xb52   :  { %v10570_v29 = vmax.f32 %v10535_v55, 0.0 }
 0xb53   :  { %v10447_v62 = vadd.f32 %v11487_v20, %v10182_v35 }
 0xb54   :  { %v10591_v42 = vpack.c.bf16 %v10570_v29, %v10569_v61 }
 0xb55   :  { %v11488_v34 = vpop.f32.mrb[56].mxu0  ;;  %v10539_v13 = vpop.f32.mrb[52].mxu1 }
 0xb56   :  { %v10540_v6 = vadd.f32 %v10539_v13, %v10444_v4  ;;  %v11489_v12 = vpop.f32.mrb[57].mxu0  ;;  %v10541_v30 = vpop.f32.mrb[53].mxu1  ;;  %11529 = vmatprep.subr.bf16.mxu0 %v10591_v42 }
 0xb57   :  { %v11490_v15 = vadd.f32 %v11489_v12, %v11488_v34  ;;  %v11491_v59 = vpop.f32.mrb[58].mxu0  ;;  %v10542_v43 = vpop.f32.mrb[54].mxu1  ;;  %11530 = vmatpush3.bf16.msra.mxu0 %v10591_v42 }
 0xb58   :  { %v10543_v37 = vadd.f32 %v10542_v43, %v10447_v62  ;;  %v11492_v47 = vpop.f32.mrb[59].mxu0  ;;  %v10544_v14 = vpop.f32.mrb[55].mxu1  ;;  %v10571_v1 = vmax.f32 %v10540_v6, 0.0 }
 0xb59   :  { %v11493_v58 = vadd.f32 %v11492_v47, %v11491_v59  ;;  %v10452_v52 = vadd.f32 %v11490_v15, %v10187_v8  ;;  %v10619_v31 = vpop.permute.xlu1 %10618  ;;  %v10624_v17 = vpop.permute.xlu0 %10623 }
 0xb5a   :  { %v10572_v56 = vmax.f32 %v10543_v37, 0.0 }
 0xb5b   :  { %v10455_v16 = vadd.f32 %v11493_v58, %v10192_v21 }
 0xb5c   :  { %v10592_v48 = vpack.c.bf16 %v10572_v56, %v10571_v1 }
 0xb5d   :  { %v11494_v50 = vpop.f32.mrb[60].mxu0  ;;  %v10547_v2 = vpop.f32.mrb[56].mxu1 }
 0xb5e   :  { %v10548_v57 = vadd.f32 %v10547_v2, %v10452_v52  ;;  %v11495_v41 = vpop.f32.mrb[61].mxu0  ;;  %v10549_v5 = vpop.f32.mrb[57].mxu1  ;;  %11531 = vmatprep.subr.bf16.mxu0 %v10592_v48 }
 0xb5f   :  { %v11496_v25 = vadd.f32 %v11495_v41, %v11494_v50  ;;  %v11497_v23 = vpop.f32.mrb[62].mxu0  ;;  %v10550_v26 = vpop.f32.mrb[58].mxu1  ;;  %11532 = vmatpush3.bf16.msra.mxu0 %v10592_v48 }
 0xb60   :  { %v10551_v60 = vadd.f32 %v10550_v26, %v10455_v16  ;;  %v11498_v0 = vpop.f32.mrb[63].mxu0  ;;  %v10552_v46 = vpop.f32.mrb[59].mxu1  ;;  %v10573_v44 = vmax.f32 %v10548_v57, 0.0 }
 0xb61   :  { %v10460_v53 = vadd.f32 %v11496_v25, %v10197_v51  ;;  %v10629_v55 = vpop.permute.xlu1 %10628  ;;  %v10634_v10 = vpop.permute.xlu0 %10633 }
 0xb62   :  { %v10574_v40 = vmax.f32 %v10551_v60, 0.0 }
 0xb64   :  { %v10593_v18 = vpack.c.bf16 %v10574_v40, %v10573_v44 }
 0xb65   :  { %v10555_v19 = vpop.f32.mrb[60].mxu1  ;;  %v10639_v4 = vpop.permute.xlu1 %10638 }
 0xb66   :  { %v10556_v32 = vadd.f32 %v10555_v19, %v10460_v53  ;;  %v10557_v45 = vpop.f32.mrb[61].mxu1  ;;  %11533 = vmatprep.subr.bf16.mxu0 %v10593_v18  ;;  %v10644_v43 = vpop.permute.xlu0 %10643 }
 0xb67   :  { %v10558_v7 = vpop.f32.mrb[62].mxu1  ;;  %11534 = vmatpush3.bf16.msra.mxu0 %v10593_v18  ;;  %v11891_v45 = vld [vmem:[%s16789_s17] sm:$0x1f]  }
 0xb68   :  { %v10575_v39 = vmax.f32 %v10556_v32, 0.0  ;;  %v10559_v36 = vpop.f32.mrb[63].mxu1 }
 0xb69   :  { %v10649_v14 = vpop.permute.xlu1 %10648 }
 0xb6a   :  { %v10594_v63 = vpack.c.bf16 %v10575_v39, %v10575_v39  ;;  %v10654_v0 = vpop.permute.xlu0 %10653 }
 0xb6c   :  { %11691 = vmatprep.subr.msk.bf16.mxu0 %vm10708_vm5, %v10594_v63  ;;  %v10710_v3 = vsel %vm10708_vm5, %v10594_v63, 0 }
 0xb6d   :  { %11536 = vmatpush3.bf16.msra.mxu0 %v10710_v3  ;;  %v10659_v41 = vpop.permute.xlu1 %10658 }
 0xb6e   :  { %v10816_v7 = vpop.permute.xlu0 %10815 }
 0xb70   :  { %11538 = vmatmul.mubr.msk.bf16.vlgmr.msra.gmra.mrb[64].mxu0 %vm6668_vm13, %v11886_v24 }
 0xb71   :  { %11541 = vmatprep.mubr.msk.bf16.mxu0 %vm6668_vm13, %v11887_v33  ;;  %v10821_v3 = vpop.permute.xlu1 %10820 }
 0xb78   :  { %11542 = vmatmul.mubr.msk.bf16.gmra.mrb[68].mxu0 %vm6668_vm13, %v11888_v11 }
 0xb79   :  { %11545 = vmatprep.mubr.msk.bf16.mxu0 %vm6668_vm13, %v11889_v38 }
 0xb80   :  { %11546 = vmatmul.mubr.msk.bf16.gmra.mrb[72].mxu0 %vm6668_vm13, %v11890_v27  ;;  %vm10832_vm13 = vcmask 1041408  }
 0xc43   :  { %v11539_v9 = vpop.f32.mrb[64].mxu0 }
 0xc44   :  { %v10755_v49 = vadd.f32 %v11539_v9, %v10619_v31  ;;  %v10746_v20 = vpop.f32.mrb[65].mxu0 }
 0xc45   :  { %v10747_v61 = vadd.f32 %v10746_v20, %v10609_v22  ;;  %v11540_v29 = vpop.f32.mrb[66].mxu0 }
 0xc46   :  { %v10758_v35 = vadd.f32 %v11540_v29, %v10624_v17  ;;  %v10749_v42 = vpop.f32.mrb[67].mxu0  ;;  %v10794_v13 = vmax.f32 %v10755_v49, 0.0 }
 0xc47   :  { %v10750_v34 = vadd.f32 %v10749_v42, %v10614_v54  ;;  %v10792_v12 = vmax.f32 %v10747_v61, 0.0 }
 0xc48   :  { %v10795_v6 = vmax.f32 %v10758_v35, 0.0 }
 0xc49   :  { %v10793_v30 = vmax.f32 %v10750_v34, 0.0 }
 0xc4a   :  { %v10806_v62 = vpack.c.bf16 %v10795_v6, %v10794_v13 }
 0xc4b   :  { %v10805_v15 = vpack.c.bf16 %v10793_v30, %v10792_v12  ;;  %v11543_v59 = vpop.f32.mrb[68].mxu0 }
 0xc4c   :  { %v10771_v37 = vadd.f32 %v11543_v59, %v10639_v4  ;;  %v10762_v47 = vpop.f32.mrb[69].mxu0 }
 0xc4d   :  { %v10763_v58 = vadd.f32 %v10762_v47, %v10629_v55  ;;  %v11544_v1 = vpop.f32.mrb[70].mxu0  ;;  %11550 = vmatpush3.bf16.msra.mxu1 %v10805_v15 }
 0xc4e   :  { %v10774_v56 = vadd.f32 %v11544_v1, %v10644_v43  ;;  %v10765_v8 = vpop.f32.mrb[71].mxu0  ;;  %11551 = vmatprep.subr.bf16.mxu1 %v11934_v28  ;;  %v10798_v48 = vmax.f32 %v10771_v37, 0.0 }
 0xc4f   :  { %v10766_v21 = vadd.f32 %v10765_v8, %v10634_v10  ;;  %v10796_v50 = vmax.f32 %v10763_v58, 0.0 }
 0xc50   :  { %v10799_v52 = vmax.f32 %v10774_v56, 0.0 }
 0xc51   :  { %v10797_v2 = vmax.f32 %v10766_v21, 0.0  ;;  %11552 = vmatpush3.bf16.msra.mxu1 %v10806_v62 }
 0xc52   :  { %v10808_v57 = vpack.c.bf16 %v10799_v52, %v10798_v48  ;;  %11553 = vmatprep.subr.bf16.mxu1 %v11934_v28 }
 0xc53   :  { %v10807_v5 = vpack.c.bf16 %v10797_v2, %v10796_v50  ;;  %v11547_v16 = vpop.f32.mrb[72].mxu0 }
 0xc54   :  { %v10787_v25 = vadd.f32 %v11547_v16, %v10659_v41  ;;  %v10778_v23 = vpop.f32.mrb[73].mxu0 }
 0xc55   :  { %v10779_v26 = vadd.f32 %v10778_v23, %v10649_v14  ;;  %v11548_v60 = vpop.f32.mrb[74].mxu0  ;;  %11554 = vmatpush3.bf16.msra.mxu1 %v10807_v5 }
 0xc56   :  { %v10781_v46 = vpop.f32.mrb[75].mxu0  ;;  %11555 = vmatprep.subr.bf16.mxu1 %v11934_v28  ;;  %v10802_v40 = vmax.f32 %v10787_v25, 0.0 }
 0xc57   :  { %v10782_v44 = vadd.f32 %v10781_v46, %v10654_v0  ;;  %v10800_v51 = vmax.f32 %v10779_v26, 0.0 }
 0xc58   :  { %v10810_v19 = vpack.c.bf16 %v10802_v40, %v10802_v40 }
 0xc59   :  { %v10801_v18 = vmax.f32 %v10782_v44, 0.0  ;;  %11556 = vmatpush3.bf16.msra.mxu1 %v10808_v57 }
 0xc5a   :  { %11557 = vmatprep.subr.bf16.mxu1 %v11934_v28  ;;  %v10834_v32 = vsel %vm10832_vm13, %v10810_v19, 0 }
 0xc5b   :  { %v10809_v53 = vpack.c.bf16 %v10801_v18, %v10800_v51 }
 0xc5d   :  { %11558 = vmatpush3.bf16.msra.mxu1 %v10809_v53 }
 0xc5e   :  { %11559 = vmatprep.subr.bf16.mxu1 %v11934_v28 }
 0xc61   :  { %11560 = vmatpush3.bf16.msra.mxu1 %v10834_v32 }
 0xc64   :  { %11562 = vmatmul.mubr.msk.bf16.vlgmr.msra.gmra.mrb[64].mxu1 %vm10828_vm10, %v11891_v45 }
 0xd37   :  { %v10870_v39 = vpop.f32.mrb[64].mxu1 }
 0xd38   :  { %v10871_v36 = vadd.f32 %v10870_v39, %v10816_v7  ;;  %v11563_v63 = vpop.f32.mrb[65].mxu1 }
 0xd39   :  { %v10873_v24 = vpop.f32.mrb[66].mxu1 }
 0xd3a   :  { %10878 = vst.msk [vmem:[%s16790_s0] sm:$0xff] %vm10877_vm7, %v10871_v36  ;;  %v10874_v33 = vadd.f32 %v10873_v24, %v10821_v3  ;;  %v11564_v11 = vpop.f32.mrb[67].mxu1 }
 0xd3c   :  { %10880 = vst.msk [vmem:[%s16790_s0 + $0x8] sm:$0x3] %vm10879_vm4, %v10874_v33 }

</bundles_post_ra>
